<compile_context>
chip_gen: v7x
topology: tpu7x:2x2x1
jax: 0.10.0
libtpu: 0.0.40
codegen_flags: <defaults>
</compile_context>

<pallas_src>
import jax
import jax.numpy as jnp
from jax.experimental import pallas as pl
from jax.experimental.pallas import tpu as pltpu

_BN_EPS = 1e-5
_LANE = 128
_SUBLANE = 8
# Safe on every generation: < 64 MiB physical (v7x) and < 128 MiB (v5e/v6e),
# above the 16/32 MiB scoped defaults.
_VMEM_LIMIT = 48 * 1024 * 1024


def _round_up(a, b):
    return (a + b - 1) // b * b


def _row_tile(n, max_tile=256):
    """Pick a row tile (multiple of 8, or full extent) and the padded row count."""
    t = min(max_tile, _round_up(n, _SUBLANE))
    return t, _round_up(n, t)


def _cparams(dims):
    return pltpu.CompilerParams(dimension_semantics=dims,
                                vmem_limit_bytes=_VMEM_LIMIT)


# --------------------------------------------------------------------------
# Kernel 1: feature encoder  (Linear -> folded-BN -> ReLU -> Linear -> folded-BN -> ReLU)
# Row-tiled over nodes; weights passed as full-extent blocks (bf16 on the MXU).
# --------------------------------------------------------------------------
def feature_encoder_kernel(x_ref, w1_ref, b1_ref, s1_ref, t1_ref,
                           w2_ref, b2_ref, s2_ref, t2_ref, out_ref):
    x = x_ref[...].astype(jnp.bfloat16)
    h = jnp.dot(x, w1_ref[...], preferred_element_type=jnp.float32) + b1_ref[...]
    h = jnp.maximum(h * s1_ref[...] + t1_ref[...], 0.0)
    h = jnp.dot(h.astype(jnp.bfloat16), w2_ref[...],
                preferred_element_type=jnp.float32) + b2_ref[...]
    out_ref[...] = jnp.maximum(h * s2_ref[...] + t2_ref[...], 0.0)


def feature_encoder(x_pad, fe, tn):
    Np, Dp = x_pad.shape
    Hp = fe["w1"].shape[1]
    row = lambda i: (i, 0)
    full = lambda i: (0, 0)
    return pl.pallas_call(
        feature_encoder_kernel,
        grid=(Np // tn,),
        in_specs=[pl.BlockSpec((tn, Dp), row),
                  pl.BlockSpec((Dp, Hp), full),
                  pl.BlockSpec((1, Hp), full),
                  pl.BlockSpec((1, Hp), full),
                  pl.BlockSpec((1, Hp), full),
                  pl.BlockSpec((Hp, Hp), full),
                  pl.BlockSpec((1, Hp), full),
                  pl.BlockSpec((1, Hp), full),
                  pl.BlockSpec((1, Hp), full)],
        out_specs=pl.BlockSpec((tn, Hp), row),
        out_shape=jax.ShapeDtypeStruct((Np, Hp), jnp.float32),
        compiler_params=_cparams(("parallel",)),
    )(x_pad, fe["w1"], fe["b1"], fe["s1"], fe["t1"],
      fe["w2"], fe["b2"], fe["s2"], fe["t2"])


# --------------------------------------------------------------------------
# Kernel 2: per-node LSTM input projection  x_proj = h @ W_ih^T + (b_ih + b_hh)
# Hoisted out of the recurrence; FLOPs scale with N instead of P*L.
# --------------------------------------------------------------------------
def gate_projection_kernel(h_ref, wih_ref, b_ref, out_ref):
    out_ref[...] = (jnp.dot(h_ref[...].astype(jnp.bfloat16), wih_ref[...],
                            preferred_element_type=jnp.float32) + b_ref[...])


def gate_projection(h, lstm, tn):
    Np, Hp = h.shape
    G4 = lstm["wih"].shape[1]          # 4 * Hp
    return pl.pallas_call(
        gate_projection_kernel,
        grid=(Np // tn,),
        in_specs=[pl.BlockSpec((tn, Hp), lambda i: (i, 0)),
                  pl.BlockSpec((Hp, G4), lambda i: (0, 0)),
                  pl.BlockSpec((1, G4), lambda i: (0, 0))],
        out_specs=pl.BlockSpec((tn, G4), lambda i: (i, 0)),
        out_shape=jax.ShapeDtypeStruct((Np, G4), jnp.float32),
        compiler_params=_cparams(("parallel",)),
    )(h, lstm["wih"], lstm["b"])


# --------------------------------------------------------------------------
# Kernel 3 (fused PathConv): LSTM recurrence (only h @ W_hh inside the loop)
#   -> one-hot scatter_add into an f32 VMEM accumulator
#   -> residual + folded-BN + ReLU at the last P tile.
# grid = (N_tiles "parallel", P_tiles "arbitrary"/reduction).  h_final never
# leaves VMEM; the one-hot tile is [tn, tp] only.
# PyTorch gate order i, f, g, o is preserved (each gate padded to Hp columns).
# --------------------------------------------------------------------------
def make_path_conv_kernel(L, Hp):
    def kernel(xg_ref, whh_ref, idx_ref, xres_ref, sc_ref, sh_ref,
               out_ref, acc_ref):
        ni = pl.program_id(0)
        pi = pl.program_id(1)

        @pl.when(pi == 0)
        def _():
            acc_ref[...] = jnp.zeros_like(acc_ref)

        tp = xg_ref.shape[0]
        whh = whh_ref[...]                     # bf16 [Hp, 4Hp], stays resident

        def step(t, carry):
            h, c = carry
            gates = xg_ref[:, t, :] + jnp.dot(
                h.astype(jnp.bfloat16), whh, preferred_element_type=jnp.float32)
            i_g = jax.nn.sigmoid(gates[:, 0 * Hp:1 * Hp])
            f_g = jax.nn.sigmoid(gates[:, 1 * Hp:2 * Hp])
            g_g = jnp.tanh(gates[:, 2 * Hp:3 * Hp])
            o_g = jax.nn.sigmoid(gates[:, 3 * Hp:4 * Hp])
            c = f_g * c + i_g * g_g
            h = o_g * jnp.tanh(c)
            return h, c

        carry = (jnp.zeros((tp, Hp), jnp.float32),
                 jnp.zeros((tp, Hp), jnp.float32))
        if L <= 4:                              # short paths: static unroll
            for t in range(L):
                carry = step(t, carry)
        else:                                   # long paths: bounded live ranges
            carry = jax.lax.fori_loop(0, L, step, carry, unroll=True)
        h_fin = carry[0]                        # [tp, Hp], final hidden state

        # scatter_add of this P tile into this N tile via a small one-hot matmul
        tn = out_ref.shape[0]
        node_ids = jax.lax.broadcasted_iota(jnp.int32, (tn, tp), 0) + ni * tn
        onehot = (node_ids == idx_ref[...]).astype(jnp.bfloat16)      # [tn, tp]
        acc_ref[...] += jnp.dot(onehot, h_fin.astype(jnp.bfloat16),
                                preferred_element_type=jnp.float32)

        @pl.when(pi == pl.num_programs(1) - 1)
        def _():
            y = acc_ref[...] + xres_ref[...]            # residual
            y = y * sc_ref[...] + sh_ref[...]           # folded BatchNorm (eval)
            out_ref[...] = jnp.maximum(y, 0.0)          # ReLU
    return kernel


def path_conv(xg, last_idx, h_res, lstm, bn, tn, tp):
    Pp, L, G4 = xg.shape
    Np, Hp = h_res.shape
    kernel = make_path_conv_kernel(L, Hp)
    return pl.pallas_call(
        kernel,
        grid=(Np // tn, Pp // tp),
        in_specs=[pl.BlockSpec((tp, L, G4), lambda ni, pi: (pi, 0, 0)),
                  pl.BlockSpec((Hp, G4), lambda ni, pi: (0, 0)),
                  pl.BlockSpec((1, tp), lambda ni, pi: (0, pi)),
                  pl.BlockSpec((tn, Hp), lambda ni, pi: (ni, 0)),
                  pl.BlockSpec((1, Hp), lambda ni, pi: (0, 0)),
                  pl.BlockSpec((1, Hp), lambda ni, pi: (0, 0))],
        out_specs=pl.BlockSpec((tn, Hp), lambda ni, pi: (ni, 0)),
        out_shape=jax.ShapeDtypeStruct((Np, Hp), jnp.float32),
        scratch_shapes=[pltpu.VMEM((tn, Hp), jnp.float32)],
        input_output_aliases={3: 0},            # residual h reuses the output buffer
        compiler_params=_cparams(("parallel", "arbitrary")),
    )(xg, lstm["whh"], last_idx, h_res, bn["s"], bn["t"])


# --------------------------------------------------------------------------
# Kernel 4: global_add_pool, tiled (graphs "parallel", nodes "arbitrary"/reduction).
# The output block is resident across the node axis and used as the accumulator.
# --------------------------------------------------------------------------
def global_add_pool_kernel(h_ref, batch_ref, out_ref):
    gi = pl.program_id(0)
    ni = pl.program_id(1)

    @pl.when(ni == 0)
    def _():
        out_ref[...] = jnp.zeros_like(out_ref)

    tg = out_ref.shape[0]
    tn = h_ref.shape[0]
    gids = jax.lax.broadcasted_iota(jnp.int32, (tg, tn), 0) + gi * tg
    onehot = (gids == batch_ref[...]).astype(jnp.bfloat16)            # [tg, tn]
    out_ref[...] += jnp.dot(onehot, h_ref[...].astype(jnp.bfloat16),
                            preferred_element_type=jnp.float32)


def global_add_pool(h, batch_row, Gp, tg, tn):
    Np, Hp = h.shape
    return pl.pallas_call(
        global_add_pool_kernel,
        grid=(Gp // tg, Np // tn),
        in_specs=[pl.BlockSpec((tn, Hp), lambda gi, ni: (ni, 0)),
                  pl.BlockSpec((1, tn), lambda gi, ni: (0, ni))],
        out_specs=pl.BlockSpec((tg, Hp), lambda gi, ni: (gi, 0)),
        out_shape=jax.ShapeDtypeStruct((Gp, Hp), jnp.float32),
        compiler_params=_cparams(("parallel", "arbitrary")),
    )(h, batch_row)


# --------------------------------------------------------------------------
# Full PathNN forward (eval mode)
# --------------------------------------------------------------------------
def pathnn_forward(prep, x, paths_by_len, batch, num_graphs, hidden_dim, cutoff):
    fe = prep["fe"]
    Dp = fe["w1"].shape[0]
    Hp = fe["w2"].shape[0]
    N = x.shape[0]

    tn, Np = _row_tile(N, 256)
    tg, Gp = _row_tile(num_graphs, 256)

    # Host-side layout plumbing (done once, outside the kernels): lane-pad the
    # feature axis and row-pad nodes; padded rows are masked in pooling (batch=-1).
    x_pad = jnp.zeros((Np, Dp), jnp.float32).at[:N, :x.shape[1]].set(x)
    batch_row = jnp.full((1, Np), -1, jnp.int32).at[0, :N].set(batch.astype(jnp.int32))

    h = feature_encoder(x_pad, fe, tn)

    for i in range(cutoff - 1):
        L = i + 2
        paths = paths_by_len[L].astype(jnp.int32)              # [P, L]
        P = paths.shape[0]
        tp, Pp = _row_tile(P, 512)
        paths_pad = jnp.zeros((Pp, L), jnp.int32).at[:P].set(paths)
        # padded paths scatter nowhere (index -1 never matches a node id)
        last_idx = jnp.full((1, Pp), -1, jnp.int32).at[0, :P].set(paths[:, -1])

        # per-node input projection (hoisted out of the recurrence), then gather
        x_proj = gate_projection(h, prep["lstm"], tn)          # [Np, 4Hp]
        xg = x_proj[paths_pad]                                 # [Pp, L, 4Hp] (XLA gather)
        # TODO(synk): for very large path sets, gather rows in-kernel via scalar
        # prefetch / Element BlockSpec instead of the XLA-side gather.
        h = path_conv(xg, last_idx, h, prep["lstm"], prep["conv_bn"][i], tn, tp)

    pooled = global_add_pool(h, batch_row, Gp, tg, tn)
    return pooled[:num_graphs, :hidden_dim]


# --------------------------------------------------------------------------
# Parameters: logical (PyTorch-shaped) init + one-time host-side preparation
# (lane padding to Hp, per-gate padding, BN folding, bf16 weight cast).
# --------------------------------------------------------------------------
def init_params(key, input_dim, hidden_dim, cutoff):
    H = hidden_dim
    ks = jax.random.split(key, 5)

    def bn_identity():
        return {"g": jnp.ones((H,), jnp.float32),
                "b": jnp.zeros((H,), jnp.float32),
                "m": jnp.zeros((H,), jnp.float32),
                "v": jnp.ones((H,), jnp.float32)}

    return {
        "fe": {"w1": 0.1 * jax.random.normal(ks[0], (input_dim, H), jnp.float32),
               "b1": jnp.zeros((H,), jnp.float32), "bn1": bn_identity(),
               "w2": 0.1 * jax.random.normal(ks[1], (H, H), jnp.float32),
               "b2": jnp.zeros((H,), jnp.float32), "bn2": bn_identity()},
        # Shared LSTM (encode_distances=False -> input_size == H), pre-transposed,
        # gate order [i|f|g|o]; b = b_ih + b_hh.
        "lstm": {"wih": 0.1 * jax.random.normal(ks[2], (H, 4 * H), jnp.float32),
                 "whh": 0.1 * jax.random.normal(ks[3], (H, 4 * H), jnp.float32),
                 "b": 0.01 * jax.random.normal(ks[4], (4 * H,), jnp.float32)},
        "conv_bn": [bn_identity() for _ in range(cutoff - 1)],
    }


def prepare_params(params, input_dim, hidden_dim):
    H = hidden_dim
    Hp = _round_up(H, _LANE)
    Dp = _round_up(input_dim, _LANE)

    def pad2(w, r, c):
        return jnp.zeros((r, c), jnp.float32).at[:w.shape[0], :w.shape[1]].set(w)

    def pad_row(v, c):
        return jnp.zeros((1, c), jnp.float32).at[0, :v.shape[0]].set(v)

    def pad_gate_cols(w, rows):
        out = jnp.zeros((rows, 4 * Hp), jnp.float32)
        for k in range(4):                      # pad each gate block separately
            out = out.at[:w.shape[0], k * Hp:k * Hp + H].set(w[:, k * H:(k + 1) * H])
        return out

    def pad_gate_bias(b):
        out = jnp.zeros((1, 4 * Hp), jnp.float32)
        for k in range(4):
            out = out.at[0, k * Hp:k * Hp + H].set(b[k * H:(k + 1) * H])
        return out

    def fold_bn(bn):                            # eval-mode BN -> scale/shift
        s = bn["g"] * jax.lax.rsqrt(bn["v"] + _BN_EPS)
        t = bn["b"] - bn["m"] * s
        return pad_row(s, Hp), pad_row(t, Hp)   # padded lanes get scale=shift=0

    fe = params["fe"]
    s1, t1 = fold_bn(fe["bn1"])
    s2, t2 = fold_bn(fe["bn2"])
    fe_p = {"w1": pad2(fe["w1"], Dp, Hp).astype(jnp.bfloat16),
            "b1": pad_row(fe["b1"], Hp), "s1": s1, "t1": t1,
            "w2": pad2(fe["w2"], Hp, Hp).astype(jnp.bfloat16),
            "b2": pad_row(fe["b2"], Hp), "s2": s2, "t2": t2}

    lstm = params["lstm"]
    lstm_p = {"wih": pad_gate_cols(lstm["wih"], Hp).astype(jnp.bfloat16),
              "whh": pad_gate_cols(lstm["whh"], Hp).astype(jnp.bfloat16),
              "b": pad_gate_bias(lstm["b"])}

    conv_p = []
    for bn in params["conv_bn"]:
        s, t = fold_bn(bn)
        conv_p.append({"s": s, "t": t})

    return {"fe": fe_p, "lstm": lstm_p, "conv_bn": conv_p}


# TODO(synk): readout()/predict() (linear1/linear2) are not part of forward() and are
# intentionally omitted; encode_distances=True (distance embedding concat) not implemented.

if __name__ == "__main__":
    key = jax.random.PRNGKey(0)
    N, INPUT_DIM, H, CUTOFF, NUM_GRAPHS, P = 16, 8, 32, 3, 2, 24

    k_x, k_p2, k_p3, k_params = jax.random.split(key, 4)
    x = jax.random.normal(k_x, (N, INPUT_DIM), jnp.float32)
    batch = jnp.concatenate([jnp.zeros(N // 2, jnp.int32),
                             jnp.ones(N - N // 2, jnp.int32)])
    paths_by_len = {
        2: jax.random.randint(k_p2, (P, 2), 0, N, dtype=jnp.int32),  # data.path_2
        3: jax.random.randint(k_p3, (P, 3), 0, N, dtype=jnp.int32),  # data.path_3
    }

    logical_params = init_params(k_params, INPUT_DIM, H, CUTOFF)
    prep = prepare_params(logical_params, INPUT_DIM, H)

    fwd = jax.jit(pathnn_forward,
                  static_argnames=("num_graphs", "hidden_dim", "cutoff"))
    out = fwd(prep, x, paths_by_len, batch,
              num_graphs=NUM_GRAPHS, hidden_dim=H, cutoff=CUTOFF)
    out = jax.block_until_ready(out)
    assert out.shape == (NUM_GRAPHS, H)
    print("KERNEL_OK")
</pallas_src>

<mosaic_0001>
module attributes {stable_mosaic.version = 11 : i64} {
  func.func @gate_projection_kernel(%arg0: i32, %arg1: memref<16x128xf32, #tpu.memory_space<vmem>>, %arg2: memref<128x512xbf16, #tpu.memory_space<vmem>>, %arg3: memref<1x512xf32, #tpu.memory_space<vmem>>, %arg4: memref<16x512xf32, #tpu.memory_space<vmem>>) attributes {dimension_semantics = [#tpu.dimension_semantics<parallel>], iteration_bounds = array<i64: 1>, scalar_prefetch = 0 : i64, scratch_operands = 0 : i64, tpu.core_type = #tpu.core_type<tc>, window_params = [{transform_indices = @transform_0, window_bounds = array<i64: 16, 128>}, {pipeline_mode = #tpu.pipeline_mode<synchronous>, transform_indices = @transform_1, window_bounds = array<i64: 128, 512>}, {pipeline_mode = #tpu.pipeline_mode<synchronous>, transform_indices = @transform_2, window_bounds = array<i64: 1, 512>}, {transform_indices = @transform_3, window_bounds = array<i64: 16, 512>}]} {
    %c0 = arith.constant 0 : index
    %c0_0 = arith.constant 0 : index
    %0 = vector.load %arg1[%c0, %c0_0] : memref<16x128xf32, #tpu.memory_space<vmem>>, vector<16x128xf32>
    %1 = arith.truncf %0 : vector<16x128xf32> to vector<16x128xbf16>
    %c0_1 = arith.constant 0 : index
    %c0_2 = arith.constant 0 : index
    %2 = vector.load %arg2[%c0_1, %c0_2] : memref<128x512xbf16, #tpu.memory_space<vmem>>, vector<128x512xbf16>
    %cst = arith.constant dense<0.000000e+00> : vector<16x512xf32>
    %3 = tpu.matmul %1, %2, %cst {dimension_numbers = #tpu.dot_dimension_numbers<[1], [0], [0], [1], [0, 0, 1, 1], [], []>} : vector<16x128xbf16>, vector<128x512xbf16>, vector<16x512xf32> -> vector<16x512xf32>
    %c0_3 = arith.constant 0 : index
    %c0_4 = arith.constant 0 : index
    %4 = vector.load %arg3[%c0_3, %c0_4] : memref<1x512xf32, #tpu.memory_space<vmem>>, vector<1x512xf32>
    %5 = vector.broadcast %4 : vector<1x512xf32> to vector<16x512xf32>
    %6 = arith.addf %3, %5 : vector<16x512xf32>
    %c0_5 = arith.constant 0 : index
    %c0_6 = arith.constant 0 : index
    %7 = vector.load %arg4[%c0_5, %c0_6] : memref<16x512xf32, #tpu.memory_space<vmem>>, vector<16x512xf32>
    tpu.vector_store %arg4[%c0_5, %c0_6], %6 {strides = array<i32>} : memref<16x512xf32, #tpu.memory_space<vmem>>, vector<16x512xf32>,
    return
  }
  func.func @transform_0(%arg0: i32) -> (i32, i32) {
    %c0_i32 = arith.constant 0 : i32
    %c0_i32_0 = arith.constant 0 : i32
    return %arg0, %c0_i32 : i32, i32
  }
  func.func @transform_1(%arg0: i32) -> (i32, i32) {
    %c0_i32 = arith.constant 0 : i32
    %c0_i32_0 = arith.constant 0 : i32
    %c0_i32_1 = arith.constant 0 : i32
    return %c0_i32, %c0_i32_0 : i32, i32
  }
  func.func @transform_2(%arg0: i32) -> (i32, i32) {
    %c0_i32 = arith.constant 0 : i32
    %c0_i32_0 = arith.constant 0 : i32
    %c0_i32_1 = arith.constant 0 : i32
    return %c0_i32, %c0_i32_0 : i32, i32
  }
  func.func @transform_3(%arg0: i32) -> (i32, i32) {
    %c0_i32 = arith.constant 0 : i32
    %c0_i32_0 = arith.constant 0 : i32
    return %arg0, %c0_i32 : i32, i32
  }
}

module attributes {stable_mosaic.version = 11 : i64} {
  func.func @feature_encoder_kernel(%arg0: i32, %arg1: memref<16x128xf32, #tpu.memory_space<vmem>>, %arg2: memref<128x128xbf16, #tpu.memory_space<vmem>>, %arg3: memref<1x128xf32, #tpu.memory_space<vmem>>, %arg4: memref<1x128xf32, #tpu.memory_space<vmem>>, %arg5: memref<1x128xf32, #tpu.memory_space<vmem>>, %arg6: memref<128x128xbf16, #tpu.memory_space<vmem>>, %arg7: memref<1x128xf32, #tpu.memory_space<vmem>>, %arg8: memref<1x128xf32, #tpu.memory_space<vmem>>, %arg9: memref<1x128xf32, #tpu.memory_space<vmem>>, %arg10: memref<16x128xf32, #tpu.memory_space<vmem>>) attributes {dimension_semantics = [#tpu.dimension_semantics<parallel>], iteration_bounds = array<i64: 1>, scalar_prefetch = 0 : i64, scratch_operands = 0 : i64, tpu.core_type = #tpu.core_type<tc>, window_params = [{transform_indices = @transform_0, window_bounds = array<i64: 16, 128>}, {pipeline_mode = #tpu.pipeline_mode<synchronous>, transform_indices = @transform_1, window_bounds = array<i64: 128, 128>}, {pipeline_mode = #tpu.pipeline_mode<synchronous>, transform_indices = @transform_2, window_bounds = array<i64: 1, 128>}, {pipeline_mode = #tpu.pipeline_mode<synchronous>, transform_indices = @transform_3, window_bounds = array<i64: 1, 128>}, {pipeline_mode = #tpu.pipeline_mode<synchronous>, transform_indices = @transform_4, window_bounds = array<i64: 1, 128>}, {pipeline_mode = #tpu.pipeline_mode<synchronous>, transform_indices = @transform_5, window_bounds = array<i64: 128, 128>}, {pipeline_mode = #tpu.pipeline_mode<synchronous>, transform_indices = @transform_6, window_bounds = array<i64: 1, 128>}, {pipeline_mode = #tpu.pipeline_mode<synchronous>, transform_indices = @transform_7, window_bounds = array<i64: 1, 128>}, {pipeline_mode = #tpu.pipeline_mode<synchronous>, transform_indices = @transform_8, window_bounds = array<i64: 1, 128>}, {transform_indices = @transform_9, window_bounds = array<i64: 16, 128>}]} {
    %c0 = arith.constant 0 : index
    %c0_0 = arith.constant 0 : index
    %0 = vector.load %arg1[%c0, %c0_0] : memref<16x128xf32, #tpu.memory_space<vmem>>, vector<16x128xf32>
    %1 = arith.truncf %0 : vector<16x128xf32> to vector<16x128xbf16>
    %c0_1 = arith.constant 0 : index
    %c0_2 = arith.constant 0 : index
    %2 = vector.load %arg2[%c0_1, %c0_2] : memref<128x128xbf16, #tpu.memory_space<vmem>>, vector<128x128xbf16>
    %cst = arith.constant dense<0.000000e+00> : vector<16x128xf32>
    %3 = tpu.matmul %1, %2, %cst {dimension_numbers = #tpu.dot_dimension_numbers<[1], [0], [0], [1], [0, 0, 1, 1], [], []>} : vector<16x128xbf16>, vector<128x128xbf16>, vector<16x128xf32> -> vector<16x128xf32>
    %c0_3 = arith.constant 0 : index
    %c0_4 = arith.constant 0 : index
    %4 = vector.load %arg3[%c0_3, %c0_4] : memref<1x128xf32, #tpu.memory_space<vmem>>, vector<1x128xf32>
    %5 = vector.broadcast %4 : vector<1x128xf32> to vector<16x128xf32>
    %6 = arith.addf %3, %5 : vector<16x128xf32>
    %c0_5 = arith.constant 0 : index
    %c0_6 = arith.constant 0 : index
    %7 = vector.load %arg4[%c0_5, %c0_6] : memref<1x128xf32, #tpu.memory_space<vmem>>, vector<1x128xf32>
    %8 = vector.broadcast %7 : vector<1x128xf32> to vector<16x128xf32>
    %9 = arith.mulf %6, %8 : vector<16x128xf32>
    %c0_7 = arith.constant 0 : index
    %c0_8 = arith.constant 0 : index
    %10 = vector.load %arg5[%c0_7, %c0_8] : memref<1x128xf32, #tpu.memory_space<vmem>>, vector<1x128xf32>
    %11 = vector.broadcast %10 : vector<1x128xf32> to vector<16x128xf32>
    %12 = arith.addf %9, %11 : vector<16x128xf32>
    %cst_9 = arith.constant 0.000000e+00 : f32
    %13 = vector.broadcast %cst_9 : f32 to vector<16x128xf32>
    %14 = arith.maximumf %12, %13 : vector<16x128xf32>
    %15 = arith.truncf %14 : vector<16x128xf32> to vector<16x128xbf16>
    %c0_10 = arith.constant 0 : index
    %c0_11 = arith.constant 0 : index
    %16 = vector.load %arg6[%c0_10, %c0_11] : memref<128x128xbf16, #tpu.memory_space<vmem>>, vector<128x128xbf16>
    %cst_12 = arith.constant dense<0.000000e+00> : vector<16x128xf32>
    %17 = tpu.matmul %15, %16, %cst_12 {dimension_numbers = #tpu.dot_dimension_numbers<[1], [0], [0], [1], [0, 0, 1, 1], [], []>} : vector<16x128xbf16>, vector<128x128xbf16>, vector<16x128xf32> -> vector<16x128xf32>
    %c0_13 = arith.constant 0 : index
    %c0_14 = arith.constant 0 : index
    %18 = vector.load %arg7[%c0_13, %c0_14] : memref<1x128xf32, #tpu.memory_space<vmem>>, vector<1x128xf32>
    %19 = vector.broadcast %18 : vector<1x128xf32> to vector<16x128xf32>
    %20 = arith.addf %17, %19 : vector<16x128xf32>
    %c0_15 = arith.constant 0 : index
    %c0_16 = arith.constant 0 : index
    %21 = vector.load %arg8[%c0_15, %c0_16] : memref<1x128xf32, #tpu.memory_space<vmem>>, vector<1x128xf32>
    %22 = vector.broadcast %21 : vector<1x128xf32> to vector<16x128xf32>
    %23 = arith.mulf %20, %22 : vector<16x128xf32>
    %c0_17 = arith.constant 0 : index
    %c0_18 = arith.constant 0 : index
    %24 = vector.load %arg9[%c0_17, %c0_18] : memref<1x128xf32, #tpu.memory_space<vmem>>, vector<1x128xf32>
    %25 = vector.broadcast %24 : vector<1x128xf32> to vector<16x128xf32>
    %26 = arith.addf %23, %25 : vector<16x128xf32>
    %cst_19 = arith.constant 0.000000e+00 : f32
    %27 = vector.broadcast %cst_19 : f32 to vector<16x128xf32>
    %28 = arith.maximumf %26, %27 : vector<16x128xf32>
    %c0_20 = arith.constant 0 : index
    %c0_21 = arith.constant 0 : index
    %29 = vector.load %arg10[%c0_20, %c0_21] : memref<16x128xf32, #tpu.memory_space<vmem>>, vector<16x128xf32>
    tpu.vector_store %arg10[%c0_20, %c0_21], %28 {strides = array<i32>} : memref<16x128xf32, #tpu.memory_space<vmem>>, vector<16x128xf32>,
    return
  }
  func.func @transform_0(%arg0: i32) -> (i32, i32) {
    %c0_i32 = arith.constant 0 : i32
    %c0_i32_0 = arith.constant 0 : i32
    return %arg0, %c0_i32 : i32, i32
  }
  func.func @transform_1(%arg0: i32) -> (i32, i32) {
    %c0_i32 = arith.constant 0 : i32
    %c0_i32_0 = arith.constant 0 : i32
    %c0_i32_1 = arith.constant 0 : i32
    return %c0_i32, %c0_i32_0 : i32, i32
  }
  func.func @transform_2(%arg0: i32) -> (i32, i32) {
    %c0_i32 = arith.constant 0 : i32
    %c0_i32_0 = arith.constant 0 : i32
    %c0_i32_1 = arith.constant 0 : i32
    return %c0_i32, %c0_i32_0 : i32, i32
  }
  func.func @transform_3(%arg0: i32) -> (i32, i32) {
    %c0_i32 = arith.constant 0 : i32
    %c0_i32_0 = arith.constant 0 : i32
    %c0_i32_1 = arith.constant 0 : i32
    return %c0_i32, %c0_i32_0 : i32, i32
  }
  func.func @transform_4(%arg0: i32) -> (i32, i32) {
    %c0_i32 = arith.constant 0 : i32
    %c0_i32_0 = arith.constant 0 : i32
    %c0_i32_1 = arith.constant 0 : i32
    return %c0_i32, %c0_i32_0 : i32, i32
  }
  func.func @transform_5(%arg0: i32) -> (i32, i32) {
    %c0_i32 = arith.constant 0 : i32
    %c0_i32_0 = arith.constant 0 : i32
    %c0_i32_1 = arith.constant 0 : i32
    return %c0_i32, %c0_i32_0 : i32, i32
  }
  func.func @transform_6(%arg0: i32) -> (i32, i32) {
    %c0_i32 = arith.constant 0 : i32
    %c0_i32_0 = arith.constant 0 : i32
    %c0_i32_1 = arith.constant 0 : i32
    return %c0_i32, %c0_i32_0 : i32, i32
  }
  func.func @transform_7(%arg0: i32) -> (i32, i32) {
    %c0_i32 = arith.constant 0 : i32
    %c0_i32_0 = arith.constant 0 : i32
    %c0_i32_1 = arith.constant 0 : i32
    return %c0_i32, %c0_i32_0 : i32, i32
  }
  func.func @transform_8(%arg0: i32) -> (i32, i32) {
    %c0_i32 = arith.constant 0 : i32
    %c0_i32_0 = arith.constant 0 : i32
    %c0_i32_1 = arith.constant 0 : i32
    return %c0_i32, %c0_i32_0 : i32, i32
  }
  func.func @transform_9(%arg0: i32) -> (i32, i32) {
    %c0_i32 = arith.constant 0 : i32
    %c0_i32_0 = arith.constant 0 : i32
    return %arg0, %c0_i32 : i32, i32
  }
}

module attributes {stable_mosaic.version = 11 : i64} {
  func.func @kernel(%arg0: i32, %arg1: i32, %arg2: memref<24x2x512xf32, #tpu.memory_space<vmem>>, %arg3: memref<128x512xbf16, #tpu.memory_space<vmem>>, %arg4: memref<1x24xi32, #tpu.memory_space<vmem>>, %arg5: memref<16x128xf32, #tpu.memory_space<vmem>>, %arg6: memref<1x128xf32, #tpu.memory_space<vmem>>, %arg7: memref<1x128xf32, #tpu.memory_space<vmem>>, %arg8: memref<16x128xf32, #tpu.memory_space<vmem>>, %arg9: memref<16x128xf32, #tpu.memory_space<vmem>>) attributes {dimension_semantics = [#tpu.dimension_semantics<parallel>, #tpu.dimension_semantics<arbitrary>], iteration_bounds = array<i64: 1, 1>, scalar_prefetch = 0 : i64, scratch_operands = 1 : i64, tpu.core_type = #tpu.core_type<tc>, window_params = [{transform_indices = @transform_0, window_bounds = array<i64: 24, 2, 512>}, {pipeline_mode = #tpu.pipeline_mode<synchronous>, transform_indices = @transform_1, window_bounds = array<i64: 128, 512>}, {transform_indices = @transform_2, window_bounds = array<i64: 1, 24>}, {transform_indices = @transform_3, window_bounds = array<i64: 16, 128>}, {pipeline_mode = #tpu.pipeline_mode<synchronous>, transform_indices = @transform_4, window_bounds = array<i64: 1, 128>}, {pipeline_mode = #tpu.pipeline_mode<synchronous>, transform_indices = @transform_5, window_bounds = array<i64: 1, 128>}, {transform_indices = @transform_6, window_bounds = array<i64: 16, 128>}]} {
    %c0_i32 = arith.constant 0 : i32
    %0 = arith.cmpi eq, %arg1, %c0_i32 : i32
    %1 = arith.extui %0 : i1 to i32
    %c0_i32_0 = arith.constant 0 : i32
    %2 = arith.cmpi ne, %1, %c0_i32_0 : i32
    scf.if %2 {
      %cst_25 = arith.constant 0.000000e+00 : f32
      %84 = vector.broadcast %cst_25 : f32 to vector<16x128xf32>
      %c0_26 = arith.constant 0 : index
      %c0_27 = arith.constant 0 : index
      %85 = vector.load %arg9[%c0_26, %c0_27] : memref<16x128xf32, #tpu.memory_space<vmem>>, vector<16x128xf32>
      tpu.vector_store %arg9[%c0_26, %c0_27], %84 {strides = array<i32>} : memref<16x128xf32, #tpu.memory_space<vmem>>, vector<16x128xf32>,
    } else {
    }
    %c0 = arith.constant 0 : index
    %c0_1 = arith.constant 0 : index
    %3 = vector.load %arg3[%c0, %c0_1] : memref<128x512xbf16, #tpu.memory_space<vmem>>, vector<128x512xbf16>
    %cst = arith.constant 0.000000e+00 : f32
    %4 = vector.broadcast %cst : f32 to vector<24x128xf32>
    %cst_2 = arith.constant 0.000000e+00 : f32
    %5 = vector.broadcast %cst_2 : f32 to vector<24x128xf32>
    %c0_3 = arith.constant 0 : index
    %c0_4 = arith.constant 0 : index
    %c0_5 = arith.constant 0 : index
    %6 = vector.load %arg2[%c0_3, %c0_4, %c0_5] : memref<24x2x512xf32, #tpu.memory_space<vmem>>, vector<24x1x512xf32>
    %7 = vector.shape_cast %6 : vector<24x1x512xf32> to vector<24x512xf32>
    %8 = arith.truncf %4 : vector<24x128xf32> to vector<24x128xbf16>
    %cst_6 = arith.constant dense<0.000000e+00> : vector<24x512xf32>
    %9 = tpu.matmul %8, %3, %cst_6 {dimension_numbers = #tpu.dot_dimension_numbers<[1], [0], [0], [1], [0, 0, 1, 1], [], []>} : vector<24x128xbf16>, vector<128x512xbf16>, vector<24x512xf32> -> vector<24x512xf32>
    %10 = arith.addf %7, %9 : vector<24x512xf32>
    %11 = vector.extract_strided_slice %10 {offsets = [0, 0], sizes = [24, 128], strides = [1, 1]} : vector<24x512xf32> to vector<24x128xf32>
    %12 = arith.negf %11 : vector<24x128xf32>
    %13 = math.exp %12 : vector<24x128xf32>
    %cst_7 = arith.constant 1.000000e+00 : f32
    %14 = vector.broadcast %cst_7 : f32 to vector<24x128xf32>
    %15 = arith.addf %14, %13 : vector<24x128xf32>
    %16 = arith.divf %14, %15 : vector<24x128xf32>
    %17 = vector.extract_strided_slice %10 {offsets = [0, 128], sizes = [24, 128], strides = [1, 1]} : vector<24x512xf32> to vector<24x128xf32>
    %18 = arith.negf %17 : vector<24x128xf32>
    %19 = math.exp %18 : vector<24x128xf32>
    %cst_8 = arith.constant 1.000000e+00 : f32
    %20 = vector.broadcast %cst_8 : f32 to vector<24x128xf32>
    %21 = arith.addf %20, %19 : vector<24x128xf32>
    %22 = arith.divf %20, %21 : vector<24x128xf32>
    %23 = vector.extract_strided_slice %10 {offsets = [0, 256], sizes = [24, 128], strides = [1, 1]} : vector<24x512xf32> to vector<24x128xf32>
    %24 = math.tanh %23 : vector<24x128xf32>
    %25 = vector.extract_strided_slice %10 {offsets = [0, 384], sizes = [24, 128], strides = [1, 1]} : vector<24x512xf32> to vector<24x128xf32>
    %26 = arith.negf %25 : vector<24x128xf32>
    %27 = math.exp %26 : vector<24x128xf32>
    %cst_9 = arith.constant 1.000000e+00 : f32
    %28 = vector.broadcast %cst_9 : f32 to vector<24x128xf32>
    %29 = arith.addf %28, %27 : vector<24x128xf32>
    %30 = arith.divf %28, %29 : vector<24x128xf32>
    %31 = arith.mulf %22, %5 : vector<24x128xf32>
    %32 = arith.mulf %16, %24 : vector<24x128xf32>
    %33 = arith.addf %31, %32 : vector<24x128xf32>
    %34 = math.tanh %33 : vector<24x128xf32>
    %35 = arith.mulf %30, %34 : vector<24x128xf32>
    %c0_10 = arith.constant 0 : index
    %c1 = arith.constant 1 : index
    %c0_11 = arith.constant 0 : index
    %36 = vector.load %arg2[%c0_10, %c1, %c0_11] : memref<24x2x512xf32, #tpu.memory_space<vmem>>, vector<24x1x512xf32>
    %37 = vector.shape_cast %36 : vector<24x1x512xf32> to vector<24x512xf32>
    %38 = arith.truncf %35 : vector<24x128xf32> to vector<24x128xbf16>
    %cst_12 = arith.constant dense<0.000000e+00> : vector<24x512xf32>
    %39 = tpu.matmul %38, %3, %cst_12 {dimension_numbers = #tpu.dot_dimension_numbers<[1], [0], [0], [1], [0, 0, 1, 1], [], []>} : vector<24x128xbf16>, vector<128x512xbf16>, vector<24x512xf32> -> vector<24x512xf32>
    %40 = arith.addf %37, %39 : vector<24x512xf32>
    %41 = vector.extract_strided_slice %40 {offsets = [0, 0], sizes = [24, 128], strides = [1, 1]} : vector<24x512xf32> to vector<24x128xf32>
    %42 = arith.negf %41 : vector<24x128xf32>
    %43 = math.exp %42 : vector<24x128xf32>
    %cst_13 = arith.constant 1.000000e+00 : f32
    %44 = vector.broadcast %cst_13 : f32 to vector<24x128xf32>
    %45 = arith.addf %44, %43 : vector<24x128xf32>
    %46 = arith.divf %44, %45 : vector<24x128xf32>
    %47 = vector.extract_strided_slice %40 {offsets = [0, 128], sizes = [24, 128], strides = [1, 1]} : vector<24x512xf32> to vector<24x128xf32>
    %48 = arith.negf %47 : vector<24x128xf32>
    %49 = math.exp %48 : vector<24x128xf32>
    %cst_14 = arith.constant 1.000000e+00 : f32
    %50 = vector.broadcast %cst_14 : f32 to vector<24x128xf32>
    %51 = arith.addf %50, %49 : vector<24x128xf32>
    %52 = arith.divf %50, %51 : vector<24x128xf32>
    %53 = vector.extract_strided_slice %40 {offsets = [0, 256], sizes = [24, 128], strides = [1, 1]} : vector<24x512xf32> to vector<24x128xf32>
    %54 = math.tanh %53 : vector<24x128xf32>
    %55 = vector.extract_strided_slice %40 {offsets = [0, 384], sizes = [24, 128], strides = [1, 1]} : vector<24x512xf32> to vector<24x128xf32>
    %56 = arith.negf %55 : vector<24x128xf32>
    %57 = math.exp %56 : vector<24x128xf32>
    %cst_15 = arith.constant 1.000000e+00 : f32
    %58 = vector.broadcast %cst_15 : f32 to vector<24x128xf32>
    %59 = arith.addf %58, %57 : vector<24x128xf32>
    %60 = arith.divf %58, %59 : vector<24x128xf32>
    %61 = arith.mulf %52, %33 : vector<24x128xf32>
    %62 = arith.mulf %46, %54 : vector<24x128xf32>
    %63 = arith.addf %61, %62 : vector<24x128xf32>
    %64 = math.tanh %63 : vector<24x128xf32>
    %65 = arith.mulf %60, %64 : vector<24x128xf32>
    %66 = tpu.iota {dimensions = array<i32: 0>} : vector<16x24xi32>
    %c16_i32 = arith.constant 16 : i32
    %67 = arith.muli %arg0, %c16_i32 : i32
    %68 = vector.broadcast %67 : i32 to vector<16x24xi32>
    %69 = arith.addi %66, %68 : vector<16x24xi32>
    %c0_16 = arith.constant 0 : index
    %c0_17 = arith.constant 0 : index
    %70 = vector.load %arg4[%c0_16, %c0_17] : memref<1x24xi32, #tpu.memory_space<vmem>>, vector<1x24xi32>
    %71 = vector.broadcast %70 : vector<1x24xi32> to vector<16x24xi32>
    %72 = arith.cmpi eq, %69, %71 : vector<16x24xi32>
    %73 = arith.extui %72 : vector<16x24xi1> to vector<16x24xi32>
    %74 = arith.sitofp %73 : vector<16x24xi32> to vector<16x24xf32>
    %75 = arith.truncf %74 : vector<16x24xf32> to vector<16x24xbf16>
    %c0_18 = arith.constant 0 : index
    %c0_19 = arith.constant 0 : index
    %76 = vector.load %arg9[%c0_18, %c0_19] : memref<16x128xf32, #tpu.memory_space<vmem>>, vector<16x128xf32>
    %77 = arith.truncf %65 : vector<24x128xf32> to vector<24x128xbf16>
    %cst_20 = arith.constant dense<0.000000e+00> : vector<16x128xf32>
    %78 = tpu.matmul %75, %77, %cst_20 {dimension_numbers = #tpu.dot_dimension_numbers<[1], [0], [0], [1], [0, 0, 1, 1], [], []>} : vector<16x24xbf16>, vector<24x128xbf16>, vector<16x128xf32> -> vector<16x128xf32>
    %79 = arith.addf %76, %78 : vector<16x128xf32>
    %c0_21 = arith.constant 0 : index
    %c0_22 = arith.constant 0 : index
    %80 = vector.load %arg9[%c0_21, %c0_22] : memref<16x128xf32, #tpu.memory_space<vmem>>, vector<16x128xf32>
    tpu.vector_store %arg9[%c0_21, %c0_22], %79 {strides = array<i32>} : memref<16x128xf32, #tpu.memory_space<vmem>>, vector<16x128xf32>,
    %c0_i32_23 = arith.constant 0 : i32
    %81 = arith.cmpi eq, %arg1, %c0_i32_23 : i32
    %82 = arith.extui %81 : i1 to i32
    %c0_i32_24 = arith.constant 0 : i32
    %83 = arith.cmpi ne, %82, %c0_i32_24 : i32
    scf.if %83 {
      %c0_25 = arith.constant 0 : index
      %c0_26 = arith.constant 0 : index
      %84 = vector.load %arg9[%c0_25, %c0_26] : memref<16x128xf32, #tpu.memory_space<vmem>>, vector<16x128xf32>
      %c0_27 = arith.constant 0 : index
      %c0_28 = arith.constant 0 : index
      %85 = vector.load %arg5[%c0_27, %c0_28] : memref<16x128xf32, #tpu.memory_space<vmem>>, vector<16x128xf32>
      %86 = arith.addf %84, %85 : vector<16x128xf32>
      %c0_29 = arith.constant 0 : index
      %c0_30 = arith.constant 0 : index
      %87 = vector.load %arg6[%c0_29, %c0_30] : memref<1x128xf32, #tpu.memory_space<vmem>>, vector<1x128xf32>
      %88 = vector.broadcast %87 : vector<1x128xf32> to vector<16x128xf32>
      %89 = arith.mulf %86, %88 : vector<16x128xf32>
      %c0_31 = arith.constant 0 : index
      %c0_32 = arith.constant 0 : index
      %90 = vector.load %arg7[%c0_31, %c0_32] : memref<1x128xf32, #tpu.memory_space<vmem>>, vector<1x128xf32>
      %91 = vector.broadcast %90 : vector<1x128xf32> to vector<16x128xf32>
      %92 = arith.addf %89, %91 : vector<16x128xf32>
      %cst_33 = arith.constant 0.000000e+00 : f32
      %93 = vector.broadcast %cst_33 : f32 to vector<16x128xf32>
      %94 = arith.maximumf %92, %93 : vector<16x128xf32>
      %c0_34 = arith.constant 0 : index
      %c0_35 = arith.constant 0 : index
      %95 = vector.load %arg8[%c0_34, %c0_35] : memref<16x128xf32, #tpu.memory_space<vmem>>, vector<16x128xf32>
      tpu.vector_store %arg8[%c0_34, %c0_35], %94 {strides = array<i32>} : memref<16x128xf32, #tpu.memory_space<vmem>>, vector<16x128xf32>,
    } else {
    }
    return
  }
  func.func @transform_0(%arg0: i32, %arg1: i32) -> (i32, i32, i32) {
    %c0_i32 = arith.constant 0 : i32
    %c0_i32_0 = arith.constant 0 : i32
    %c0_i32_1 = arith.constant 0 : i32
    return %arg1, %c0_i32, %c0_i32_0 : i32, i32, i32
  }
  func.func @transform_1(%arg0: i32, %arg1: i32) -> (i32, i32) {
    %c0_i32 = arith.constant 0 : i32
    %c0_i32_0 = arith.constant 0 : i32
    %c0_i32_1 = arith.constant 0 : i32
    return %c0_i32, %c0_i32_0 : i32, i32
  }
  func.func @transform_2(%arg0: i32, %arg1: i32) -> (i32, i32) {
    %c0_i32 = arith.constant 0 : i32
    %c0_i32_0 = arith.constant 0 : i32
    return %c0_i32, %arg1 : i32, i32
  }
  func.func @transform_3(%arg0: i32, %arg1: i32) -> (i32, i32) {
    %c0_i32 = arith.constant 0 : i32
    %c0_i32_0 = arith.constant 0 : i32
    return %arg0, %c0_i32 : i32, i32
  }
  func.func @transform_4(%arg0: i32, %arg1: i32) -> (i32, i32) {
    %c0_i32 = arith.constant 0 : i32
    %c0_i32_0 = arith.constant 0 : i32
    %c0_i32_1 = arith.constant 0 : i32
    return %c0_i32, %c0_i32_0 : i32, i32
  }
  func.func @transform_5(%arg0: i32, %arg1: i32) -> (i32, i32) {
    %c0_i32 = arith.constant 0 : i32
    %c0_i32_0 = arith.constant 0 : i32
    %c0_i32_1 = arith.constant 0 : i32
    return %c0_i32, %c0_i32_0 : i32, i32
  }
  func.func @transform_6(%arg0: i32, %arg1: i32) -> (i32, i32) {
    %c0_i32 = arith.constant 0 : i32
    %c0_i32_0 = arith.constant 0 : i32
    return %arg0, %c0_i32 : i32, i32
  }
}

module attributes {stable_mosaic.version = 11 : i64} {
  func.func @kernel(%arg0: i32, %arg1: i32, %arg2: memref<24x3x512xf32, #tpu.memory_space<vmem>>, %arg3: memref<128x512xbf16, #tpu.memory_space<vmem>>, %arg4: memref<1x24xi32, #tpu.memory_space<vmem>>, %arg5: memref<16x128xf32, #tpu.memory_space<vmem>>, %arg6: memref<1x128xf32, #tpu.memory_space<vmem>>, %arg7: memref<1x128xf32, #tpu.memory_space<vmem>>, %arg8: memref<16x128xf32, #tpu.memory_space<vmem>>, %arg9: memref<16x128xf32, #tpu.memory_space<vmem>>) attributes {dimension_semantics = [#tpu.dimension_semantics<parallel>, #tpu.dimension_semantics<arbitrary>], iteration_bounds = array<i64: 1, 1>, scalar_prefetch = 0 : i64, scratch_operands = 1 : i64, tpu.core_type = #tpu.core_type<tc>, window_params = [{transform_indices = @transform_0, window_bounds = array<i64: 24, 3, 512>}, {pipeline_mode = #tpu.pipeline_mode<synchronous>, transform_indices = @transform_1, window_bounds = array<i64: 128, 512>}, {transform_indices = @transform_2, window_bounds = array<i64: 1, 24>}, {transform_indices = @transform_3, window_bounds = array<i64: 16, 128>}, {pipeline_mode = #tpu.pipeline_mode<synchronous>, transform_indices = @transform_4, window_bounds = array<i64: 1, 128>}, {pipeline_mode = #tpu.pipeline_mode<synchronous>, transform_indices = @transform_5, window_bounds = array<i64: 1, 128>}, {transform_indices = @transform_6, window_bounds = array<i64: 16, 128>}]} {
    %c0_i32 = arith.constant 0 : i32
    %0 = arith.cmpi eq, %arg1, %c0_i32 : i32
    %1 = arith.extui %0 : i1 to i32
    %c0_i32_0 = arith.constant 0 : i32
    %2 = arith.cmpi ne, %1, %c0_i32_0 : i32
    scf.if %2 {
      %cst_31 = arith.constant 0.000000e+00 : f32
      %114 = vector.broadcast %cst_31 : f32 to vector<16x128xf32>
      %c0_32 = arith.constant 0 : index
      %c0_33 = arith.constant 0 : index
      %115 = vector.load %arg9[%c0_32, %c0_33] : memref<16x128xf32, #tpu.memory_space<vmem>>, vector<16x128xf32>
      tpu.vector_store %arg9[%c0_32, %c0_33], %114 {strides = array<i32>} : memref<16x128xf32, #tpu.memory_space<vmem>>, vector<16x128xf32>,
    } else {
    }
    %c0 = arith.constant 0 : index
    %c0_1 = arith.constant 0 : index
    %3 = vector.load %arg3[%c0, %c0_1] : memref<128x512xbf16, #tpu.memory_space<vmem>>, vector<128x512xbf16>
    %cst = arith.constant 0.000000e+00 : f32
    %4 = vector.broadcast %cst : f32 to vector<24x128xf32>
    %cst_2 = arith.constant 0.000000e+00 : f32
    %5 = vector.broadcast %cst_2 : f32 to vector<24x128xf32>
    %c0_3 = arith.constant 0 : index
    %c0_4 = arith.constant 0 : index
    %c0_5 = arith.constant 0 : index
    %6 = vector.load %arg2[%c0_3, %c0_4, %c0_5] : memref<24x3x512xf32, #tpu.memory_space<vmem>>, vector<24x1x512xf32>
    %7 = vector.shape_cast %6 : vector<24x1x512xf32> to vector<24x512xf32>
    %8 = arith.truncf %4 : vector<24x128xf32> to vector<24x128xbf16>
    %cst_6 = arith.constant dense<0.000000e+00> : vector<24x512xf32>
    %9 = tpu.matmul %8, %3, %cst_6 {dimension_numbers = #tpu.dot_dimension_numbers<[1], [0], [0], [1], [0, 0, 1, 1], [], []>} : vector<24x128xbf16>, vector<128x512xbf16>, vector<24x512xf32> -> vector<24x512xf32>
    %10 = arith.addf %7, %9 : vector<24x512xf32>
    %11 = vector.extract_strided_slice %10 {offsets = [0, 0], sizes = [24, 128], strides = [1, 1]} : vector<24x512xf32> to vector<24x128xf32>
    %12 = arith.negf %11 : vector<24x128xf32>
    %13 = math.exp %12 : vector<24x128xf32>
    %cst_7 = arith.constant 1.000000e+00 : f32
    %14 = vector.broadcast %cst_7 : f32 to vector<24x128xf32>
    %15 = arith.addf %14, %13 : vector<24x128xf32>
    %16 = arith.divf %14, %15 : vector<24x128xf32>
    %17 = vector.extract_strided_slice %10 {offsets = [0, 128], sizes = [24, 128], strides = [1, 1]} : vector<24x512xf32> to vector<24x128xf32>
    %18 = arith.negf %17 : vector<24x128xf32>
    %19 = math.exp %18 : vector<24x128xf32>
    %cst_8 = arith.constant 1.000000e+00 : f32
    %20 = vector.broadcast %cst_8 : f32 to vector<24x128xf32>
    %21 = arith.addf %20, %19 : vector<24x128xf32>
    %22 = arith.divf %20, %21 : vector<24x128xf32>
    %23 = vector.extract_strided_slice %10 {offsets = [0, 256], sizes = [24, 128], strides = [1, 1]} : vector<24x512xf32> to vector<24x128xf32>
    %24 = math.tanh %23 : vector<24x128xf32>
    %25 = vector.extract_strided_slice %10 {offsets = [0, 384], sizes = [24, 128], strides = [1, 1]} : vector<24x512xf32> to vector<24x128xf32>
    %26 = arith.negf %25 : vector<24x128xf32>
    %27 = math.exp %26 : vector<24x128xf32>
    %cst_9 = arith.constant 1.000000e+00 : f32
    %28 = vector.broadcast %cst_9 : f32 to vector<24x128xf32>
    %29 = arith.addf %28, %27 : vector<24x128xf32>
    %30 = arith.divf %28, %29 : vector<24x128xf32>
    %31 = arith.mulf %22, %5 : vector<24x128xf32>
    %32 = arith.mulf %16, %24 : vector<24x128xf32>
    %33 = arith.addf %31, %32 : vector<24x128xf32>
    %34 = math.tanh %33 : vector<24x128xf32>
    %35 = arith.mulf %30, %34 : vector<24x128xf32>
    %c0_10 = arith.constant 0 : index
    %c1 = arith.constant 1 : index
    %c0_11 = arith.constant 0 : index
    %36 = vector.load %arg2[%c0_10, %c1, %c0_11] : memref<24x3x512xf32, #tpu.memory_space<vmem>>, vector<24x1x512xf32>
    %37 = vector.shape_cast %36 : vector<24x1x512xf32> to vector<24x512xf32>
    %38 = arith.truncf %35 : vector<24x128xf32> to vector<24x128xbf16>
    %cst_12 = arith.constant dense<0.000000e+00> : vector<24x512xf32>
    %39 = tpu.matmul %38, %3, %cst_12 {dimension_numbers = #tpu.dot_dimension_numbers<[1], [0], [0], [1], [0, 0, 1, 1], [], []>} : vector<24x128xbf16>, vector<128x512xbf16>, vector<24x512xf32> -> vector<24x512xf32>
    %40 = arith.addf %37, %39 : vector<24x512xf32>
    %41 = vector.extract_strided_slice %40 {offsets = [0, 0], sizes = [24, 128], strides = [1, 1]} : vector<24x512xf32> to vector<24x128xf32>
    %42 = arith.negf %41 : vector<24x128xf32>
    %43 = math.exp %42 : vector<24x128xf32>
    %cst_13 = arith.constant 1.000000e+00 : f32
    %44 = vector.broadcast %cst_13 : f32 to vector<24x128xf32>
    %45 = arith.addf %44, %43 : vector<24x128xf32>
    %46 = arith.divf %44, %45 : vector<24x128xf32>
    %47 = vector.extract_strided_slice %40 {offsets = [0, 128], sizes = [24, 128], strides = [1, 1]} : vector<24x512xf32> to vector<24x128xf32>
    %48 = arith.negf %47 : vector<24x128xf32>
    %49 = math.exp %48 : vector<24x128xf32>
    %cst_14 = arith.constant 1.000000e+00 : f32
    %50 = vector.broadcast %cst_14 : f32 to vector<24x128xf32>
    %51 = arith.addf %50, %49 : vector<24x128xf32>
    %52 = arith.divf %50, %51 : vector<24x128xf32>
    %53 = vector.extract_strided_slice %40 {offsets = [0, 256], sizes = [24, 128], strides = [1, 1]} : vector<24x512xf32> to vector<24x128xf32>
    %54 = math.tanh %53 : vector<24x128xf32>
    %55 = vector.extract_strided_slice %40 {offsets = [0, 384], sizes = [24, 128], strides = [1, 1]} : vector<24x512xf32> to vector<24x128xf32>
    %56 = arith.negf %55 : vector<24x128xf32>
    %57 = math.exp %56 : vector<24x128xf32>
    %cst_15 = arith.constant 1.000000e+00 : f32
    %58 = vector.broadcast %cst_15 : f32 to vector<24x128xf32>
    %59 = arith.addf %58, %57 : vector<24x128xf32>
    %60 = arith.divf %58, %59 : vector<24x128xf32>
    %61 = arith.mulf %52, %33 : vector<24x128xf32>
    %62 = arith.mulf %46, %54 : vector<24x128xf32>
    %63 = arith.addf %61, %62 : vector<24x128xf32>
    %64 = math.tanh %63 : vector<24x128xf32>
    %65 = arith.mulf %60, %64 : vector<24x128xf32>
    %c0_16 = arith.constant 0 : index
    %c2 = arith.constant 2 : index
    %c0_17 = arith.constant 0 : index
    %66 = vector.load %arg2[%c0_16, %c2, %c0_17] : memref<24x3x512xf32, #tpu.memory_space<vmem>>, vector<24x1x512xf32>
    %67 = vector.shape_cast %66 : vector<24x1x512xf32> to vector<24x512xf32>
    %68 = arith.truncf %65 : vector<24x128xf32> to vector<24x128xbf16>
    %cst_18 = arith.constant dense<0.000000e+00> : vector<24x512xf32>
    %69 = tpu.matmul %68, %3, %cst_18 {dimension_numbers = #tpu.dot_dimension_numbers<[1], [0], [0], [1], [0, 0, 1, 1], [], []>} : vector<24x128xbf16>, vector<128x512xbf16>, vector<24x512xf32> -> vector<24x512xf32>
    %70 = arith.addf %67, %69 : vector<24x512xf32>
    %71 = vector.extract_strided_slice %70 {offsets = [0, 0], sizes = [24, 128], strides = [1, 1]} : vector<24x512xf32> to vector<24x128xf32>
    %72 = arith.negf %71 : vector<24x128xf32>
    %73 = math.exp %72 : vector<24x128xf32>
    %cst_19 = arith.constant 1.000000e+00 : f32
    %74 = vector.broadcast %cst_19 : f32 to vector<24x128xf32>
    %75 = arith.addf %74, %73 : vector<24x128xf32>
    %76 = arith.divf %74, %75 : vector<24x128xf32>
    %77 = vector.extract_strided_slice %70 {offsets = [0, 128], sizes = [24, 128], strides = [1, 1]} : vector<24x512xf32> to vector<24x128xf32>
    %78 = arith.negf %77 : vector<24x128xf32>
    %79 = math.exp %78 : vector<24x128xf32>
    %cst_20 = arith.constant 1.000000e+00 : f32
    %80 = vector.broadcast %cst_20 : f32 to vector<24x128xf32>
    %81 = arith.addf %80, %79 : vector<24x128xf32>
    %82 = arith.divf %80, %81 : vector<24x128xf32>
    %83 = vector.extract_strided_slice %70 {offsets = [0, 256], sizes = [24, 128], strides = [1, 1]} : vector<24x512xf32> to vector<24x128xf32>
    %84 = math.tanh %83 : vector<24x128xf32>
    %85 = vector.extract_strided_slice %70 {offsets = [0, 384], sizes = [24, 128], strides = [1, 1]} : vector<24x512xf32> to vector<24x128xf32>
    %86 = arith.negf %85 : vector<24x128xf32>
    %87 = math.exp %86 : vector<24x128xf32>
    %cst_21 = arith.constant 1.000000e+00 : f32
    %88 = vector.broadcast %cst_21 : f32 to vector<24x128xf32>
    %89 = arith.addf %88, %87 : vector<24x128xf32>
    %90 = arith.divf %88, %89 : vector<24x128xf32>
    %91 = arith.mulf %82, %63 : vector<24x128xf32>
    %92 = arith.mulf %76, %84 : vector<24x128xf32>
    %93 = arith.addf %91, %92 : vector<24x128xf32>
    %94 = math.tanh %93 : vector<24x128xf32>
    %95 = arith.mulf %90, %94 : vector<24x128xf32>
    %96 = tpu.iota {dimensions = array<i32: 0>} : vector<16x24xi32>
    %c16_i32 = arith.constant 16 : i32
    %97 = arith.muli %arg0, %c16_i32 : i32
    %98 = vector.broadcast %97 : i32 to vector<16x24xi32>
    %99 = arith.addi %96, %98 : vector<16x24xi32>
    %c0_22 = arith.constant 0 : index
    %c0_23 = arith.constant 0 : index
    %100 = vector.load %arg4[%c0_22, %c0_23] : memref<1x24xi32, #tpu.memory_space<vmem>>, vector<1x24xi32>
    %101 = vector.broadcast %100 : vector<1x24xi32> to vector<16x24xi32>
    %102 = arith.cmpi eq, %99, %101 : vector<16x24xi32>
    %103 = arith.extui %102 : vector<16x24xi1> to vector<16x24xi32>
    %104 = arith.sitofp %103 : vector<16x24xi32> to vector<16x24xf32>
    %105 = arith.truncf %104 : vector<16x24xf32> to vector<16x24xbf16>
    %c0_24 = arith.constant 0 : index
    %c0_25 = arith.constant 0 : index
    %106 = vector.load %arg9[%c0_24, %c0_25] : memref<16x128xf32, #tpu.memory_space<vmem>>, vector<16x128xf32>
    %107 = arith.truncf %95 : vector<24x128xf32> to vector<24x128xbf16>
    %cst_26 = arith.constant dense<0.000000e+00> : vector<16x128xf32>
    %108 = tpu.matmul %105, %107, %cst_26 {dimension_numbers = #tpu.dot_dimension_numbers<[1], [0], [0], [1], [0, 0, 1, 1], [], []>} : vector<16x24xbf16>, vector<24x128xbf16>, vector<16x128xf32> -> vector<16x128xf32>
    %109 = arith.addf %106, %108 : vector<16x128xf32>
    %c0_27 = arith.constant 0 : index
    %c0_28 = arith.constant 0 : index
    %110 = vector.load %arg9[%c0_27, %c0_28] : memref<16x128xf32, #tpu.memory_space<vmem>>, vector<16x128xf32>
    tpu.vector_store %arg9[%c0_27, %c0_28], %109 {strides = array<i32>} : memref<16x128xf32, #tpu.memory_space<vmem>>, vector<16x128xf32>,
    %c0_i32_29 = arith.constant 0 : i32
    %111 = arith.cmpi eq, %arg1, %c0_i32_29 : i32
    %112 = arith.extui %111 : i1 to i32
    %c0_i32_30 = arith.constant 0 : i32
    %113 = arith.cmpi ne, %112, %c0_i32_30 : i32
    scf.if %113 {
      %c0_31 = arith.constant 0 : index
      %c0_32 = arith.constant 0 : index
      %114 = vector.load %arg9[%c0_31, %c0_32] : memref<16x128xf32, #tpu.memory_space<vmem>>, vector<16x128xf32>
      %c0_33 = arith.constant 0 : index
      %c0_34 = arith.constant 0 : index
      %115 = vector.load %arg5[%c0_33, %c0_34] : memref<16x128xf32, #tpu.memory_space<vmem>>, vector<16x128xf32>
      %116 = arith.addf %114, %115 : vector<16x128xf32>
      %c0_35 = arith.constant 0 : index
      %c0_36 = arith.constant 0 : index
      %117 = vector.load %arg6[%c0_35, %c0_36] : memref<1x128xf32, #tpu.memory_space<vmem>>, vector<1x128xf32>
      %118 = vector.broadcast %117 : vector<1x128xf32> to vector<16x128xf32>
      %119 = arith.mulf %116, %118 : vector<16x128xf32>
      %c0_37 = arith.constant 0 : index
      %c0_38 = arith.constant 0 : index
      %120 = vector.load %arg7[%c0_37, %c0_38] : memref<1x128xf32, #tpu.memory_space<vmem>>, vector<1x128xf32>
      %121 = vector.broadcast %120 : vector<1x128xf32> to vector<16x128xf32>
      %122 = arith.addf %119, %121 : vector<16x128xf32>
      %cst_39 = arith.constant 0.000000e+00 : f32
      %123 = vector.broadcast %cst_39 : f32 to vector<16x128xf32>
      %124 = arith.maximumf %122, %123 : vector<16x128xf32>
      %c0_40 = arith.constant 0 : index
      %c0_41 = arith.constant 0 : index
      %125 = vector.load %arg8[%c0_40, %c0_41] : memref<16x128xf32, #tpu.memory_space<vmem>>, vector<16x128xf32>
      tpu.vector_store %arg8[%c0_40, %c0_41], %124 {strides = array<i32>} : memref<16x128xf32, #tpu.memory_space<vmem>>, vector<16x128xf32>,
    } else {
    }
    return
  }
  func.func @transform_0(%arg0: i32, %arg1: i32) -> (i32, i32, i32) {
    %c0_i32 = arith.constant 0 : i32
    %c0_i32_0 = arith.constant 0 : i32
    %c0_i32_1 = arith.constant 0 : i32
    return %arg1, %c0_i32, %c0_i32_0 : i32, i32, i32
  }
  func.func @transform_1(%arg0: i32, %arg1: i32) -> (i32, i32) {
    %c0_i32 = arith.constant 0 : i32
    %c0_i32_0 = arith.constant 0 : i32
    %c0_i32_1 = arith.constant 0 : i32
    return %c0_i32, %c0_i32_0 : i32, i32
  }
  func.func @transform_2(%arg0: i32, %arg1: i32) -> (i32, i32) {
    %c0_i32 = arith.constant 0 : i32
    %c0_i32_0 = arith.constant 0 : i32
    return %c0_i32, %arg1 : i32, i32
  }
  func.func @transform_3(%arg0: i32, %arg1: i32) -> (i32, i32) {
    %c0_i32 = arith.constant 0 : i32
    %c0_i32_0 = arith.constant 0 : i32
    return %arg0, %c0_i32 : i32, i32
  }
  func.func @transform_4(%arg0: i32, %arg1: i32) -> (i32, i32) {
    %c0_i32 = arith.constant 0 : i32
    %c0_i32_0 = arith.constant 0 : i32
    %c0_i32_1 = arith.constant 0 : i32
    return %c0_i32, %c0_i32_0 : i32, i32
  }
  func.func @transform_5(%arg0: i32, %arg1: i32) -> (i32, i32) {
    %c0_i32 = arith.constant 0 : i32
    %c0_i32_0 = arith.constant 0 : i32
    %c0_i32_1 = arith.constant 0 : i32
    return %c0_i32, %c0_i32_0 : i32, i32
  }
  func.func @transform_6(%arg0: i32, %arg1: i32) -> (i32, i32) {
    %c0_i32 = arith.constant 0 : i32
    %c0_i32_0 = arith.constant 0 : i32
    return %arg0, %c0_i32 : i32, i32
  }
}

module attributes {stable_mosaic.version = 11 : i64} {
  func.func @global_add_pool_kernel(%arg0: i32, %arg1: i32, %arg2: memref<16x128xf32, #tpu.memory_space<vmem>>, %arg3: memref<1x16xi32, #tpu.memory_space<vmem>>, %arg4: memref<8x128xf32, #tpu.memory_space<vmem>>) attributes {dimension_semantics = [#tpu.dimension_semantics<parallel>, #tpu.dimension_semantics<arbitrary>], iteration_bounds = array<i64: 1, 1>, scalar_prefetch = 0 : i64, scratch_operands = 0 : i64, tpu.core_type = #tpu.core_type<tc>, window_params = [{transform_indices = @transform_0, window_bounds = array<i64: 16, 128>}, {transform_indices = @transform_1, window_bounds = array<i64: 1, 16>}, {transform_indices = @transform_2, window_bounds = array<i64: 8, 128>}]} {
    %c0_i32 = arith.constant 0 : i32
    %0 = arith.cmpi eq, %arg1, %c0_i32 : i32
    %1 = arith.extui %0 : i1 to i32
    %c0_i32_0 = arith.constant 0 : i32
    %2 = arith.cmpi ne, %1, %c0_i32_0 : i32
    scf.if %2 {
      %cst_8 = arith.constant 0.000000e+00 : f32
      %19 = vector.broadcast %cst_8 : f32 to vector<8x128xf32>
      %c0_9 = arith.constant 0 : index
      %c0_10 = arith.constant 0 : index
      %20 = vector.load %arg4[%c0_9, %c0_10] : memref<8x128xf32, #tpu.memory_space<vmem>>, vector<8x128xf32>
      tpu.vector_store %arg4[%c0_9, %c0_10], %19 {strides = array<i32>} : memref<8x128xf32, #tpu.memory_space<vmem>>, vector<8x128xf32>,
    } else {
    }
    %3 = tpu.iota {dimensions = array<i32: 0>} : vector<8x16xi32>
    %c8_i32 = arith.constant 8 : i32
    %4 = arith.muli %arg0, %c8_i32 : i32
    %5 = vector.broadcast %4 : i32 to vector<8x16xi32>
    %6 = arith.addi %3, %5 : vector<8x16xi32>
    %c0 = arith.constant 0 : index
    %c0_1 = arith.constant 0 : index
    %7 = vector.load %arg3[%c0, %c0_1] : memref<1x16xi32, #tpu.memory_space<vmem>>, vector<1x16xi32>
    %8 = vector.broadcast %7 : vector<1x16xi32> to vector<8x16xi32>
    %9 = arith.cmpi eq, %6, %8 : vector<8x16xi32>
    %10 = arith.extui %9 : vector<8x16xi1> to vector<8x16xi32>
    %11 = arith.sitofp %10 : vector<8x16xi32> to vector<8x16xf32>
    %12 = arith.truncf %11 : vector<8x16xf32> to vector<8x16xbf16>
    %c0_2 = arith.constant 0 : index
    %c0_3 = arith.constant 0 : index
    %13 = vector.load %arg4[%c0_2, %c0_3] : memref<8x128xf32, #tpu.memory_space<vmem>>, vector<8x128xf32>
    %c0_4 = arith.constant 0 : index
    %c0_5 = arith.constant 0 : index
    %14 = vector.load %arg2[%c0_4, %c0_5] : memref<16x128xf32, #tpu.memory_space<vmem>>, vector<16x128xf32>
    %15 = arith.truncf %14 : vector<16x128xf32> to vector<16x128xbf16>
    %cst = arith.constant dense<0.000000e+00> : vector<8x128xf32>
    %16 = tpu.matmul %12, %15, %cst {dimension_numbers = #tpu.dot_dimension_numbers<[1], [0], [0], [1], [0, 0, 1, 1], [], []>} : vector<8x16xbf16>, vector<16x128xbf16>, vector<8x128xf32> -> vector<8x128xf32>
    %17 = arith.addf %13, %16 : vector<8x128xf32>
    %c0_6 = arith.constant 0 : index
    %c0_7 = arith.constant 0 : index
    %18 = vector.load %arg4[%c0_6, %c0_7] : memref<8x128xf32, #tpu.memory_space<vmem>>, vector<8x128xf32>
    tpu.vector_store %arg4[%c0_6, %c0_7], %17 {strides = array<i32>} : memref<8x128xf32, #tpu.memory_space<vmem>>, vector<8x128xf32>,
    return
  }
  func.func @transform_0(%arg0: i32, %arg1: i32) -> (i32, i32) {
    %c0_i32 = arith.constant 0 : i32
    %c0_i32_0 = arith.constant 0 : i32
    return %arg1, %c0_i32 : i32, i32
  }
  func.func @transform_1(%arg0: i32, %arg1: i32) -> (i32, i32) {
    %c0_i32 = arith.constant 0 : i32
    %c0_i32_0 = arith.constant 0 : i32
    return %c0_i32, %arg1 : i32, i32
  }
  func.func @transform_2(%arg0: i32, %arg1: i32) -> (i32, i32) {
    %c0_i32 = arith.constant 0 : i32
    %c0_i32_0 = arith.constant 0 : i32
    return %arg0, %c0_i32 : i32, i32
  }
}

</mosaic_0001>

<bundles_post_ra>
// kernel: pathnn_forward.7
= control target key start
LH: loop header
LB: loop body
LE: loop exit
PB: predicated region body
PF: predicated region fallthrough
CT: control target
= control target key end

     0   :  { %v411_v1 = vmov 0   ;;  %v52_v36 = vlaneseq  ;;  %s561_s1 = inlined_call_operand.vmem [shape: bf16[128,512], index: 1, kind: input, shape index: {}]   ;;  %s562_s0 = inlined_call_operand.vmem [shape: f32[16,128], index: 0, kind: input, shape index: {}]   ;;  %s563_s2 = inlined_call_operand.vmem [shape: f32[1,512], index: 2, kind: input, shape index: {}]   ;;  %s564_s3 = inlined_call_operand.vmem [shape: f32[16,512], index: 3, kind: output, shape index: {}]  }
   0x1   :  { %v363_v0 = vld [vmem:[%s561_s1 + $0x4] ss:$16 sps:$4 sm:$0xff]   ;;  %264 = vmatprep.mubr.bf16.mxu0 %v411_v1  ;;  %307 = vmatprep.mubr.bf16.mxu1 %v411_v1  ;;  %v365_v2 = vld [vmem:[%s561_s1 + $0xc] ss:$16 sps:$4 sm:$0xff]   ;;  %v367_v3 = vld [vmem:[%s561_s1] ss:$16 sps:$4 sm:$0xff]  }
   0x2   :  { %232 = vmatprep.subr.bf16.mxu0 %v363_v0  ;;  %v368_v4 = vld [vmem:[%s561_s1 + $0x8] ss:$16 sps:$4 sm:$0xff]   ;;  %275 = vmatprep.subr.bf16.mxu1 %v365_v2  ;;  %v369_v5 = vld [vmem:[%s561_s1 + $0x24] ss:$16 sps:$4 sm:$0xff]   ;;  %v371_v6 = vld [vmem:[%s561_s1 + $0x2c] ss:$16 sps:$4 sm:$0xff]  }
   0x3   :  { %233 = vmatpush1.bf16.msra.mxu0 %v367_v3  ;;  %276 = vmatpush1.bf16.msra.mxu1 %v368_v4  ;;  %v373_v7 = vld [vmem:[%s561_s1 + $0x20] ss:$16 sps:$4 sm:$0xff]   ;;  %v374_v8 = vld [vmem:[%s561_s1 + $0x28] ss:$16 sps:$4 sm:$0xff]   ;;  %v375_v9 = vld [vmem:[%s561_s1 + $0x44] ss:$16 sps:$4 sm:$0xff]  }
   0x4   :  { %234 = vmatprep.subr.bf16.mxu0 %v369_v5  ;;  %277 = vmatprep.subr.bf16.mxu1 %v371_v6  ;;  %v377_v10 = vld [vmem:[%s561_s1 + $0x4c] ss:$16 sps:$4 sm:$0xff]   ;;  %v379_v11 = vld [vmem:[%s561_s1 + $0x40] ss:$16 sps:$4 sm:$0xff]   ;;  %v380_v12 = vld [vmem:[%s561_s1 + $0x48] ss:$16 sps:$4 sm:$0xff]  }
   0x5   :  { %v381_v13 = vld [vmem:[%s561_s1 + $0x64] ss:$16 sps:$4 sm:$0xff]   ;;  %v383_v14 = vld [vmem:[%s561_s1 + $0x6c] ss:$16 sps:$4 sm:$0xff]   ;;  %v385_v15 = vld [vmem:[%s561_s1 + $0x60] ss:$16 sps:$4 sm:$0xff]  }
   0x6   :  { %v386_v16 = vld [vmem:[%s561_s1 + $0x68] ss:$16 sps:$4 sm:$0xff]   ;;  %v387_v17 = vld [vmem:[%s561_s1 + $0x84] ss:$16 sps:$4 sm:$0xff]   ;;  %v389_v18 = vld [vmem:[%s561_s1 + $0x8c] ss:$16 sps:$4 sm:$0xff]  }
   0x7   :  { %235 = vmatpush1.bf16.msra.mxu0 %v373_v7  ;;  %278 = vmatpush1.bf16.msra.mxu1 %v374_v8  ;;  %v391_v19 = vld [vmem:[%s561_s1 + $0x80] ss:$16 sps:$4 sm:$0xff]   ;;  %v392_v20 = vld [vmem:[%s561_s1 + $0x88] ss:$16 sps:$4 sm:$0xff]   ;;  %v393_v21 = vld [vmem:[%s561_s1 + $0xa4] ss:$16 sps:$4 sm:$0xff]  }
   0x8   :  { %236 = vmatprep.subr.bf16.mxu0 %v375_v9  ;;  %279 = vmatprep.subr.bf16.mxu1 %v377_v10  ;;  %v395_v22 = vld [vmem:[%s561_s1 + $0xac] ss:$16 sps:$4 sm:$0xff]   ;;  %v397_v23 = vld [vmem:[%s561_s1 + $0xa0] ss:$16 sps:$4 sm:$0xff]   ;;  %v398_v24 = vld [vmem:[%s561_s1 + $0xa8] ss:$16 sps:$4 sm:$0xff]  }
   0x9   :  { %v399_v25 = vld [vmem:[%s561_s1 + $0xc4] ss:$16 sps:$4 sm:$0xff]   ;;  %v401_v26 = vld [vmem:[%s561_s1 + $0xcc] ss:$16 sps:$4 sm:$0xff]   ;;  %v403_v27 = vld [vmem:[%s561_s1 + $0xc0] ss:$16 sps:$4 sm:$0xff]  }
   0xa   :  { %v404_v28 = vld [vmem:[%s561_s1 + $0xc8] ss:$16 sps:$4 sm:$0xff]   ;;  %v405_v29 = vld [vmem:[%s561_s1 + $0xe4] ss:$16 sps:$4 sm:$0xff]   ;;  %v407_v30 = vld [vmem:[%s561_s1 + $0xec] ss:$16 sps:$4 sm:$0xff]  }
   0xb   :  { %237 = vmatpush1.bf16.msra.mxu0 %v379_v11  ;;  %280 = vmatpush1.bf16.msra.mxu1 %v380_v12  ;;  %v409_v31 = vld [vmem:[%s561_s1 + $0xe0] ss:$16 sps:$4 sm:$0xff]   ;;  %v410_v32 = vld [vmem:[%s561_s1 + $0xe8] ss:$16 sps:$4 sm:$0xff]   ;;  %v53_v37 = vshrl.u32 %v52_v36, 7 }
   0xc   :  { %238 = vmatprep.subr.bf16.mxu0 %v381_v13  ;;  %281 = vmatprep.subr.bf16.mxu1 %v383_v14  ;;  %v15_v33 = vld [vmem:[%s562_s0] sm:$0xff]  ;;  %v16_v34 = vld [vmem:[%s562_s0 + $0x8] sm:$0xff] }
   0xd   :  { %v17_v35 = vpack.c.bf16 %v16_v34, %v15_v33  ;;  %v54_v38 = vsub.s32 0, %v53_v37  ;;  %v62_v39 = vsub.s32 2, %v53_v37  ;;  %v50_v40 = vld [vmem:[%s563_s2] sm:$0xf]  ;;  %v58_v41 = vsub.s32 1, %v53_v37 }
   0xe   :  { %v66_v42 = vsub.s32 3, %v53_v37 }
   0xf   :  { %239 = vmatpush1.bf16.msra.mxu0 %v385_v15  ;;  %282 = vmatpush1.bf16.msra.mxu1 %v386_v16  ;;  %v55_v43 = vrot.slane %v50_v40, %v54_v38  ;;  %v63_v44 = vrot.slane %v50_v40, %v62_v39  ;;  %v59_v45 = vrot.slane %v50_v40, %v58_v41 }
  0x10   :  { %240 = vmatprep.subr.bf16.mxu0 %v387_v17  ;;  %283 = vmatprep.subr.bf16.mxu1 %v389_v18  ;;  %v67_v46 = vrot.slane %v50_v40, %v66_v42 }
  0x13   :  { %241 = vmatpush1.bf16.msra.mxu0 %v391_v19  ;;  %284 = vmatpush1.bf16.msra.mxu1 %v392_v20 }
  0x14   :  { %242 = vmatprep.subr.bf16.mxu0 %v393_v21  ;;  %285 = vmatprep.subr.bf16.mxu1 %v395_v22 }
  0x17   :  { %243 = vmatpush1.bf16.msra.mxu0 %v397_v23  ;;  %286 = vmatpush1.bf16.msra.mxu1 %v398_v24 }
  0x18   :  { %244 = vmatprep.subr.bf16.mxu0 %v399_v25  ;;  %287 = vmatprep.subr.bf16.mxu1 %v401_v26 }
  0x1b   :  { %245 = vmatpush1.bf16.msra.mxu0 %v403_v27  ;;  %288 = vmatpush1.bf16.msra.mxu1 %v404_v28 }
  0x1c   :  { %246 = vmatprep.subr.bf16.mxu0 %v405_v29  ;;  %289 = vmatprep.subr.bf16.mxu1 %v407_v30 }
  0x1f   :  { %247 = vmatpush1.bf16.msra.mxu0 %v409_v31  ;;  %290 = vmatpush1.bf16.msra.mxu1 %v410_v32 }
  0x22   :  { %265 = vmatmul.mubr.bf16.vlgmr.msra.gmra.mrb[0].mxu0 %v17_v35  ;;  %308 = vmatmul.mubr.bf16.vlgmr.msra.gmra.mrb[0].mxu1 %v17_v35 }
  0xf5   :  { %v266_v47 = vpop.f32.mrb[0].mxu0  ;;  %v309_v48 = vpop.f32.mrb[0].mxu1 }
  0xf6   :  { %v267_v49 = vadd.f32 %v266_v47, %v55_v43  ;;  %v310_v50 = vadd.f32 %v309_v48, %v63_v44  ;;  %v268_v51 = vpop.f32.mrb[1].mxu0  ;;  %v311_v52 = vpop.f32.mrb[1].mxu1 }
  0xf7   :  { %v269_v53 = vadd.f32 %v268_v51, %v59_v45  ;;  %v312_v54 = vadd.f32 %v311_v52, %v67_v46  ;;  %v270_v55 = vpop.f32.mrb[2].mxu0  ;;  %v313_v56 = vpop.f32.mrb[2].mxu1 }
  0xf8   :  { %318 = vst [vmem:[%s564_s3] sm:$0xff] %v267_v49  ;;  %320 = vst [vmem:[%s564_s3 + $0x10] sm:$0xff] %v310_v50  ;;  %v271_v57 = vadd.f32 %v270_v55, %v55_v43  ;;  %v314_v58 = vadd.f32 %v313_v56, %v63_v44  ;;  %v272_v59 = vpop.f32.mrb[3].mxu0  ;;  %v315_v60 = vpop.f32.mrb[3].mxu1 }
  0xf9   :  { %319 = vst [vmem:[%s564_s3 + $0x8] sm:$0xff] %v269_v53  ;;  %321 = vst [vmem:[%s564_s3 + $0x18] sm:$0xff] %v312_v54  ;;  %v273_v61 = vadd.f32 %v272_v59, %v59_v45  ;;  %v316_v62 = vadd.f32 %v315_v60, %v67_v46 }
  0xfa   :  { %322 = vst [vmem:[%s564_s3 + $0x20] sm:$0xff] %v271_v57  ;;  %324 = vst [vmem:[%s564_s3 + $0x30] sm:$0xff] %v314_v58 }
  0xfb   :  { %323 = vst [vmem:[%s564_s3 + $0x28] sm:$0xff] %v273_v61  ;;  %325 = vst [vmem:[%s564_s3 + $0x38] sm:$0xff] %v316_v62 }

// kernel: pathnn_forward.6
= control target key start
LH: loop header
LB: loop body
LE: loop exit
PB: predicated region body
PF: predicated region fallthrough
CT: control target
= control target key end

     0   :  { %14 = vsyncpa [#allocation3], 0  ;;  %s597_s0 = inlined_call_operand.vmem [shape: f32[16,128], index: 0, kind: input, shape index: {}]   ;;  %s598_s1 = inlined_call_operand.hbm [shape: bf16[128,128], index: 1, kind: input, shape index: {}]   ;;  %s599_s2 = inlined_call_operand.vmem [shape: f32[1,128], index: 2, kind: input, shape index: {}]   ;;  %s600_s3 = inlined_call_operand.vmem [shape: f32[1,128], index: 3, kind: input, shape index: {}]   ;;  %s601_s4 = inlined_call_operand.vmem [shape: f32[1,128], index: 4, kind: input, shape index: {}]   ;;  %s602_s5 = inlined_call_operand.hbm [shape: bf16[128,128], index: 5, kind: input, shape index: {}]   ;;  %s603_s6 = inlined_call_operand.vmem [shape: f32[1,128], index: 6, kind: input, shape index: {}]   ;;  %s604_s7 = inlined_call_operand.vmem [shape: f32[1,128], index: 7, kind: input, shape index: {}]   ;;  %s605_s8 = inlined_call_operand.vmem [shape: f32[1,128], index: 8, kind: input, shape index: {}]   ;;  %s606_s9 = inlined_call_operand.vmem [shape: f32[16,128], index: 9, kind: output, shape index: {}]  }
   0x1   :  { %15 = vsyncpa [#allocation5], 0  ;;  %s487_s30 = smov [#allocation2]   ;;  %s439_s13 = scalar_lea.hbm %s598_s1, 1024 }
   0x2   :  { %s23_s10 = sshll.u32 %s487_s30, 4  ;;  %p440_p0 = scmp.ne.s32.totalorder %s598_s1, %s439_s13  ;;  %s24_s10 = int_to_ptr.vmem [resolvable:$true] %s23_s10 }
   0x3   :  { %p443_p1 = scmp.lt.u32.totalorder %s439_s13, %s598_s1 }
   0x5   :  { %p445_p2 = pnand %p443_p1, %p440_p0 }
   0x7   :  { %448 = shalt.err (!%p445_p2)
}
   0x8   :  { %s449_s18 = scalar_lea.vmem %s24_s10, 1024  ;;  %p454_p4 = scmp.lt.s32.totalorder %s24_s10, %s24_s10 }
   0x9   :  { %p450_p3 = scmp.ne.s32.totalorder %s24_s10, %s449_s18  ;;  %p455_p5 = scmp.lt.s32.totalorder %s449_s18, %s449_s18 }
   0xb   :  { %p456_p6 = por %p455_p5, %p454_p4 }
   0xd   :  { %p457_p7 = pnand %p456_p6, %p450_p3 }
   0xf   :  { %460 = shalt.err (!%p457_p7)
}
  0x10   :  { %s488_s19 = smov 64   ;;  %s489_s20 = smov 4  }
  0x11   :  { %29 = dma.hbm_to_vmem [thread:$0]  %s598_s1, 1024, %s24_s10, [#allocation3], %s488_s19, %s488_s19, %s489_s20  }
  0x12   :  { %s490_s23 = smov [#allocation4]   ;;  %s461_s27 = scalar_lea.hbm %s602_s5, 1024 }
  0x13   :  { %s41_s24 = sshll.u32 %s490_s23, 4  ;;  %p462_p8 = scmp.ne.s32.totalorder %s602_s5, %s461_s27  ;;  %s42_s24 = int_to_ptr.vmem [resolvable:$true] %s41_s24 }
  0x14   :  { %p465_p9 = scmp.lt.u32.totalorder %s461_s27, %s602_s5 }
  0x16   :  { %p467_p10 = pnand %p465_p9, %p462_p8 }
  0x18   :  { %470 = shalt.err (!%p467_p10)
}
  0x19   :  { %s471_s12 = scalar_lea.vmem %s42_s24, 1024  ;;  %p476_p12 = scmp.lt.s32.totalorder %s42_s24, %s42_s24 }
  0x1a   :  { %p472_p11 = scmp.ne.s32.totalorder %s42_s24, %s471_s12  ;;  %p477_p13 = scmp.lt.s32.totalorder %s471_s12, %s471_s12 }
  0x1c   :  { %p478_p0 = por %p477_p13, %p476_p12 }
  0x1e   :  { %p479_p1 = pnand %p478_p0, %p472_p11 }
  0x20   :  { %482 = shalt.err (!%p479_p1)
}
  0x21   :  { %47 = dma.hbm_to_vmem [thread:$0]  %s602_s5, 1024, %s42_s24, [#allocation5], %s488_s19, %s488_s19, %s489_s20  }
  0x22   :  { %483 = dma.done.wait [#allocation3], 1024  }
  0x23   :  { %484 = vsyncadd [#allocation3], 4294966272 }
  0x24   :  { %485 = dma.done.wait [#allocation5], 1024  }
  0x25   :  { %486 = vsyncadd [#allocation5], 4294966272  ;;  %v491_v0 = vmov 0.0   ;;  %vm492_vm0 = vmmov 0   ;;  %v423_v1 = vld [vmem:[#allocation2] sm:$0xff]   ;;  %v424_v2 = vld [vmem:[#allocation2 + $0x8] sm:$0xff]  }
  0x26   :  { %377 = vmatprep.subr.bf16.mxu0 %v491_v0  ;;  %393 = vmatprep.mubr.msk.bf16.mxu0 %vm492_vm0, %v491_v0  ;;  %v425_v3 = vld [vmem:[#allocation2 + $0x10] sm:$0xff]   ;;  %v431_v4 = vld [vmem:[#allocation4] sm:$0xff]   ;;  %v426_v5 = vld [vmem:[#allocation2 + $0x18] sm:$0xff]  }
  0x27   :  { %397 = vmatprep.subr.bf16.mxu1 %v491_v0  ;;  %413 = vmatprep.mubr.msk.bf16.mxu1 %vm492_vm0, %v491_v0  ;;  %v432_v6 = vld [vmem:[#allocation4 + $0x8] sm:$0xff]   ;;  %v427_v7 = vld [vmem:[#allocation2 + $0x20] sm:$0xff]   ;;  %v433_v8 = vld [vmem:[#allocation4 + $0x10] sm:$0xff]  }
  0x28   :  { %378 = vmatpush3.bf16.msra.mxu0 %v423_v1  ;;  %398 = vmatpush3.bf16.msra.mxu1 %v431_v4  ;;  %v428_v9 = vld [vmem:[#allocation2 + $0x28] sm:$0xff]   ;;  %v434_v10 = vld [vmem:[#allocation4 + $0x18] sm:$0xff]   ;;  %v429_v11 = vld [vmem:[#allocation2 + $0x30] sm:$0xff]  }
  0x29   :  { %379 = vmatprep.subr.bf16.mxu0 %v491_v0  ;;  %399 = vmatprep.subr.bf16.mxu1 %v491_v0  ;;  %v435_v12 = vld [vmem:[#allocation4 + $0x20] sm:$0xff]   ;;  %v430_v13 = vld [vmem:[#allocation2 + $0x38] sm:$0xff]   ;;  %v62_v15 = vld [vmem:[%s597_s0 + $0x8] sm:$0xff] }
  0x2a   :  { %v61_v14 = vld [vmem:[%s597_s0] sm:$0xff]  ;;  %v436_v17 = vld [vmem:[#allocation4 + $0x28] sm:$0xff]   ;;  %v437_v18 = vld [vmem:[#allocation4 + $0x30] sm:$0xff]  }
  0x2b   :  { %v63_v16 = vpack.c.bf16 %v62_v15, %v61_v14  ;;  %v438_v19 = vld [vmem:[#allocation4 + $0x38] sm:$0xff]   ;;  %v337_v20 = vld [vmem:[%s599_s2] ss:$0 sm:$0xff] }
  0x2c   :  { %380 = vmatpush3.bf16.msra.mxu0 %v424_v2  ;;  %400 = vmatpush3.bf16.msra.mxu1 %v432_v6  ;;  %v346_v22 = vld [vmem:[%s600_s3] ss:$0 sm:$0xff] }
  0x2d   :  { %381 = vmatprep.subr.bf16.mxu0 %v491_v0  ;;  %401 = vmatprep.subr.bf16.mxu1 %v491_v0  ;;  %v347_v25 = vld [vmem:[%s601_s4] ss:$0 sm:$0xff] }
  0x2e   :  { %v348_v36 = vld [vmem:[%s603_s6] ss:$0 sm:$0xff] }
  0x2f   :  { %v357_v38 = vld [vmem:[%s604_s7] ss:$0 sm:$0xff] }
  0x30   :  { %382 = vmatpush3.bf16.msra.mxu0 %v425_v3  ;;  %402 = vmatpush3.bf16.msra.mxu1 %v433_v8  ;;  %v358_v41 = vld [vmem:[%s605_s8] ss:$0 sm:$0xff] }
  0x31   :  { %383 = vmatprep.subr.bf16.mxu0 %v491_v0  ;;  %403 = vmatprep.subr.bf16.mxu1 %v491_v0 }
  0x34   :  { %384 = vmatpush3.bf16.msra.mxu0 %v426_v5  ;;  %404 = vmatpush3.bf16.msra.mxu1 %v434_v10 }
  0x35   :  { %385 = vmatprep.subr.bf16.mxu0 %v491_v0  ;;  %405 = vmatprep.subr.bf16.mxu1 %v491_v0 }
  0x38   :  { %386 = vmatpush3.bf16.msra.mxu0 %v427_v7  ;;  %406 = vmatpush3.bf16.msra.mxu1 %v435_v12 }
  0x39   :  { %387 = vmatprep.subr.bf16.mxu0 %v491_v0  ;;  %407 = vmatprep.subr.bf16.mxu1 %v491_v0 }
  0x3c   :  { %388 = vmatpush3.bf16.msra.mxu0 %v428_v9  ;;  %408 = vmatpush3.bf16.msra.mxu1 %v436_v17 }
  0x3d   :  { %389 = vmatprep.subr.bf16.mxu0 %v491_v0  ;;  %409 = vmatprep.subr.bf16.mxu1 %v491_v0 }
  0x40   :  { %390 = vmatpush3.bf16.msra.mxu0 %v429_v11  ;;  %410 = vmatpush3.bf16.msra.mxu1 %v437_v18 }
  0x41   :  { %391 = vmatprep.subr.bf16.mxu0 %v491_v0  ;;  %411 = vmatprep.subr.bf16.mxu1 %v491_v0 }
  0x44   :  { %392 = vmatpush3.bf16.msra.mxu0 %v430_v13  ;;  %412 = vmatpush3.bf16.msra.mxu1 %v438_v19 }
  0x47   :  { %394 = vmatmul.mubr.bf16.vlgmr.msra.gmra.mrb[0].mxu0 %v63_v16 }
 0x11a   :  { %v169_v21 = vpop.f32.mrb[0].mxu0 }
 0x11b   :  { %v170_v23 = vadd.f32 %v337_v20, %v169_v21  ;;  %v395_v24 = vpop.f32.mrb[1].mxu0 }
 0x11c   :  { %v172_v26 = vpop.f32.mrb[2].mxu0 }
 0x11d   :  { %v183_v27 = vmul.f32 %v346_v22, %v170_v23  ;;  %v173_v28 = vadd.f32 %v337_v20, %v172_v26  ;;  %v396_v29 = vpop.f32.mrb[3].mxu0 }
 0x11f   :  { %v192_v30 = vadd.f32 %v347_v25, %v183_v27  ;;  %v184_v31 = vmul.f32 %v346_v22, %v173_v28 }
 0x121   :  { %v193_v32 = vadd.f32 %v347_v25, %v184_v31  ;;  %v194_v33 = vmax.f32 %v192_v30, 0.0 }
 0x123   :  { %v195_v34 = vmax.f32 %v193_v32, 0.0 }
 0x125   :  { %v196_v35 = vpack.c.bf16 %v195_v34, %v194_v33 }
 0x127   :  { %414 = vmatmul.mubr.bf16.vlgmr.msra.gmra.mrb[0].mxu1 %v196_v35 }
 0x1fa   :  { %v302_v37 = vpop.f32.mrb[0].mxu1 }
 0x1fb   :  { %v303_v39 = vadd.f32 %v348_v36, %v302_v37  ;;  %v415_v40 = vpop.f32.mrb[1].mxu1 }
 0x1fc   :  { %v305_v42 = vpop.f32.mrb[2].mxu1 }
 0x1fd   :  { %v316_v43 = vmul.f32 %v357_v38, %v303_v39  ;;  %v306_v44 = vadd.f32 %v348_v36, %v305_v42  ;;  %v416_v45 = vpop.f32.mrb[3].mxu1 }
 0x1ff   :  { %v325_v46 = vadd.f32 %v358_v41, %v316_v43  ;;  %v317_v47 = vmul.f32 %v357_v38, %v306_v44 }
 0x201   :  { %v327_v48 = vmax.f32 %v325_v46, 0.0  ;;  %v326_v49 = vadd.f32 %v358_v41, %v317_v47 }
 0x203   :  { %329 = vst [vmem:[%s606_s9] sm:$0xff] %v327_v48  ;;  %v328_v50 = vmax.f32 %v326_v49, 0.0 }
 0x205   :  { %330 = vst [vmem:[%s606_s9 + $0x8] sm:$0xff] %v328_v50 }
 0x206   :  { %335 = vsyncpa [#allocation3], 1 }
 0x207   :  { %336 = vsyncpa [#allocation5], 1 }

// kernel: pathnn_forward.11
= control target key start
LH: loop header
LB: loop body
LE: loop exit
PB: predicated region body
PF: predicated region fallthrough
CT: control target
= control target key end

     0   :  { %v17_v0 = vlaneseq  ;;  %v98_v2 = vmov 0.0   ;;  %vm99_vm0 = vmmov 0   ;;  %vm35_vm2 = vcmask 130048   ;;  %s127_s1 = inlined_call_operand.vmem [shape: s32[1,16], index: 1, kind: input, shape index: {}]   ;;  %s128_s0 = inlined_call_operand.vmem [shape: f32[16,128], index: 0, kind: input, shape index: {}]   ;;  %s129_s2 = inlined_call_operand.vmem [shape: f32[8,128], index: 2, kind: output, shape index: {}]  }
   0x1   :  { %v85_v1 = vld [vmem:[%s127_s1] ss:$0 sm:$0xff]  ;;  %90 = vmatprep.subr.bf16.mxu0 %v98_v2  ;;  %v33_v4 = vld [vmem:[%s128_s0 + $0x8] sm:$0xff]  ;;  %92 = vmatprep.mubr.msk.bf16.mxu0 %vm99_vm0, %v98_v2 }
   0x2   :  { %v32_v3 = vld [vmem:[%s128_s0] sm:$0xff]  ;;  %v18_v5 = vshrl.u32 %v17_v0, 7 }
   0x3   :  { %v34_v6 = vpack.c.bf16 %v33_v4, %v32_v3 }
   0x4   :  { %vm27_vm1 = vcmp.eq.s32.totalorder %v18_v5, %v85_v1 }
   0x5   :  { %91 = vmatpush3.bf16.msra.mxu0 %v34_v6  ;;  %v86_v7 = vsel %vm27_vm1, 1.0, %v98_v2 }
   0x6   :  { %v30_v8 = vpack.c.bf16 %v86_v7, %v86_v7 }
   0x8   :  { %93 = vmatmul.mubr.msk.bf16.vlgmr.msra.gmra.mrb[0].mxu0 %vm35_vm2, %v30_v8 }
  0xdb   :  { %v73_v9 = vpop.f32.mrb[0].mxu0 }
  0xdc   :  { %v94_v10 = vpop.f32.mrb[1].mxu0  ;;  %80 = vst [vmem:[%s129_s2] sm:$0xff] %v73_v9 }
  0xdd   :  { %v76_v11 = vpop.f32.mrb[2].mxu0 }
  0xde   :  { %v95_v12 = vpop.f32.mrb[3].mxu0 }

// kernel: pathnn_forward.8
= control target key start
LH: loop header
LB: loop body
LE: loop exit
PB: predicated region body
PF: predicated region fallthrough
CT: control target
= control target key end

     0   :  { %v5266_v1 = vmov 0   ;;  %v3949_v33 = vmov 1966171168   ;;  %v390_v35 = vlaneseq  ;;  %vm1500_vm0 = vcmask 1041409   ;;  %s5259_s1 = inlined_call_operand.vmem [shape: bf16[128,512], index: 1, kind: input, shape index: {}]   ;;  %s5260_s0 = inlined_call_operand.vmem [shape: f32[24,2,512], index: 0, kind: input, shape index: {}]   ;;  %s5261_s2 = inlined_call_operand.vmem [shape: s32[1,24], index: 2, kind: input, shape index: {}]   ;;  %s5262_s3 = inlined_call_operand.vmem [shape: f32[16,128], index: 3, kind: input, shape index: {}, may-alias: {3,6}]   ;;  %s5263_s4 = inlined_call_operand.vmem [shape: f32[1,128], index: 4, kind: input, shape index: {}]   ;;  %s5264_s5 = inlined_call_operand.vmem [shape: f32[1,128], index: 5, kind: input, shape index: {}]   ;;  %s5265_s6 = inlined_call_operand.vmem [shape: f32[16,128], index: 6, kind: output, shape index: {}, may-alias: {3,6}]  }
   0x1   :  { %v3990_v0 = vld [vmem:[%s5259_s1 + $0x4] ss:$16 sps:$4 sm:$0xff]   ;;  %301 = vmatprep.mubr.bf16.mxu0 %v5266_v1  ;;  %352 = vmatprep.mubr.bf16.mxu1 %v5266_v1  ;;  %v3997_v2 = vld [vmem:[%s5259_s1 + $0xc] ss:$16 sps:$4 sm:$0xff]   ;;  %v4003_v3 = vld [vmem:[%s5259_s1] ss:$16 sps:$4 sm:$0xff]   ;;  %v388_v34 = vunpack.c.l.s4 %v3949_v33 }
   0x2   :  { %269 = vmatprep.subr.bf16.mxu0 %v3990_v0  ;;  %v4008_v4 = vld [vmem:[%s5259_s1 + $0x8] ss:$16 sps:$4 sm:$0xff]   ;;  %320 = vmatprep.subr.bf16.mxu1 %v3997_v2  ;;  %v4014_v5 = vld [vmem:[%s5259_s1 + $0x24] ss:$16 sps:$4 sm:$0xff]   ;;  %v4021_v6 = vld [vmem:[%s5259_s1 + $0x2c] ss:$16 sps:$4 sm:$0xff]  }
   0x3   :  { %270 = vmatpush1.bf16.msra.mxu0 %v4003_v3  ;;  %321 = vmatpush1.bf16.msra.mxu1 %v4008_v4  ;;  %v4026_v7 = vld [vmem:[%s5259_s1 + $0x20] ss:$16 sps:$4 sm:$0xff]   ;;  %v3143_v8 = vld [vmem:[%s5259_s1 + $0x28] ss:$16 sps:$4 sm:$0xff]   ;;  %v3144_v9 = vld [vmem:[%s5259_s1 + $0x44] ss:$16 sps:$4 sm:$0xff]   ;;  %v389_v36 = vunpack.c.0.s8 %v388_v34 }
   0x4   :  { %271 = vmatprep.subr.bf16.mxu0 %v4014_v5  ;;  %322 = vmatprep.subr.bf16.mxu1 %v4021_v6  ;;  %v3146_v10 = vld [vmem:[%s5259_s1 + $0x4c] ss:$16 sps:$4 sm:$0xff]   ;;  %v4042_v11 = vld [vmem:[%s5259_s1 + $0x40] ss:$16 sps:$4 sm:$0xff]   ;;  %v4047_v12 = vld [vmem:[%s5259_s1 + $0x48] ss:$16 sps:$4 sm:$0xff]  }
   0x5   :  { %v4053_v13 = vld [vmem:[%s5259_s1 + $0x64] ss:$16 sps:$4 sm:$0xff]   ;;  %v3152_v14 = vld [vmem:[%s5259_s1 + $0x6c] ss:$16 sps:$4 sm:$0xff]   ;;  %v3154_v15 = vld [vmem:[%s5259_s1 + $0x60] ss:$16 sps:$4 sm:$0xff]  }
   0x6   :  { %v3155_v16 = vld [vmem:[%s5259_s1 + $0x68] ss:$16 sps:$4 sm:$0xff]   ;;  %v3156_v17 = vld [vmem:[%s5259_s1 + $0x84] ss:$16 sps:$4 sm:$0xff]   ;;  %v3158_v18 = vld [vmem:[%s5259_s1 + $0x8c] ss:$16 sps:$4 sm:$0xff]  }
   0x7   :  { %272 = vmatpush1.bf16.msra.mxu0 %v4026_v7  ;;  %323 = vmatpush1.bf16.msra.mxu1 %v3143_v8  ;;  %v3160_v19 = vld [vmem:[%s5259_s1 + $0x80] ss:$16 sps:$4 sm:$0xff]   ;;  %v3161_v20 = vld [vmem:[%s5259_s1 + $0x88] ss:$16 sps:$4 sm:$0xff]   ;;  %v3162_v21 = vld [vmem:[%s5259_s1 + $0xa4] ss:$16 sps:$4 sm:$0xff]  }
   0x8   :  { %273 = vmatprep.subr.bf16.mxu0 %v3144_v9  ;;  %324 = vmatprep.subr.bf16.mxu1 %v3146_v10  ;;  %v3164_v22 = vld [vmem:[%s5259_s1 + $0xac] ss:$16 sps:$4 sm:$0xff]   ;;  %v3166_v23 = vld [vmem:[%s5259_s1 + $0xa0] ss:$16 sps:$4 sm:$0xff]   ;;  %v3167_v24 = vld [vmem:[%s5259_s1 + $0xa8] ss:$16 sps:$4 sm:$0xff]  }
   0x9   :  { %v3168_v25 = vld [vmem:[%s5259_s1 + $0xc4] ss:$16 sps:$4 sm:$0xff]   ;;  %v3170_v26 = vld [vmem:[%s5259_s1 + $0xcc] ss:$16 sps:$4 sm:$0xff]   ;;  %v3172_v27 = vld [vmem:[%s5259_s1 + $0xc0] ss:$16 sps:$4 sm:$0xff]  }
   0xa   :  { %v3173_v28 = vld [vmem:[%s5259_s1 + $0xc8] ss:$16 sps:$4 sm:$0xff]   ;;  %v3174_v29 = vld [vmem:[%s5259_s1 + $0xe4] ss:$16 sps:$4 sm:$0xff]   ;;  %v3176_v30 = vld [vmem:[%s5259_s1 + $0xec] ss:$16 sps:$4 sm:$0xff]  }
   0xb   :  { %274 = vmatpush1.bf16.msra.mxu0 %v4042_v11  ;;  %325 = vmatpush1.bf16.msra.mxu1 %v4047_v12  ;;  %v3178_v31 = vld [vmem:[%s5259_s1 + $0xe0] ss:$16 sps:$4 sm:$0xff]   ;;  %v3179_v32 = vld [vmem:[%s5259_s1 + $0xe8] ss:$16 sps:$4 sm:$0xff]   ;;  %v4133_v37 = vshrl.u32 %v390_v35, 7  ;;  %vm1503_vm1 = vcmask 1042434  }
   0xc   :  { %275 = vmatprep.subr.bf16.mxu0 %v4053_v13  ;;  %326 = vmatprep.subr.bf16.mxu1 %v3152_v14  ;;  %v62_v59 = vld [vmem:[%s5260_s0] ss:$2 sm:$0xf]  ;;  %v2888_v60 = vld [vmem:[%s5260_s0 + $0x8] ss:$2 sm:$0xf] }
   0xd   :  { %5279 = vst [vmem:[#allocation3_spill] sm:$0xff] %v4133_v37  ;;  %v4136_v40 = vsub.s32 %v389_v36, %v4133_v37  ;;  %vm1506_vm2 = vcmask 1043459   ;;  %vm1509_vm3 = vcmask 1044484   ;;  %vm1512_vm4 = vcmask 1045509  }
   0xe   :  { %vm1515_vm5 = vcmask 1046534   ;;  %vm1518_vm6 = vcmask 1047559   ;;  %vm3951_vm7 = vmmov 0   ;;  %vm2804_vm10 = vcmask 1043456  }
   0xf   :  { %276 = vmatpush1.bf16.msra.mxu0 %v3154_v15  ;;  %327 = vmatpush1.bf16.msra.mxu1 %v3155_v16  ;;  %vm2800_vm11 = vcmask 195584  }
  0x10   :  { %277 = vmatprep.subr.bf16.mxu0 %v3156_v17  ;;  %328 = vmatprep.subr.bf16.mxu1 %v3158_v18 }
  0x13   :  { %278 = vmatpush1.bf16.msra.mxu0 %v3160_v19  ;;  %329 = vmatpush1.bf16.msra.mxu1 %v3161_v20 }
  0x14   :  { %279 = vmatprep.subr.bf16.mxu0 %v3162_v21  ;;  %330 = vmatprep.subr.bf16.mxu1 %v3164_v22 }
  0x17   :  { %280 = vmatpush1.bf16.msra.mxu0 %v3166_v23  ;;  %331 = vmatpush1.bf16.msra.mxu1 %v3167_v24 }
  0x18   :  { %281 = vmatprep.subr.bf16.mxu0 %v3168_v25  ;;  %332 = vmatprep.subr.bf16.mxu1 %v3170_v26 }
  0x1b   :  { %282 = vmatpush1.bf16.msra.mxu0 %v3172_v27  ;;  %333 = vmatpush1.bf16.msra.mxu1 %v3173_v28 }
  0x1c   :  { %283 = vmatprep.subr.bf16.mxu0 %v3174_v29  ;;  %334 = vmatprep.subr.bf16.mxu1 %v3176_v30 }
  0x1f   :  { %284 = vmatpush1.bf16.msra.mxu0 %v3178_v31  ;;  %335 = vmatpush1.bf16.msra.mxu1 %v3179_v32 }
  0x20   :  { %1552 = vmatprep.subr.bf16.mxu0 %v3990_v0  ;;  %1603 = vmatprep.subr.bf16.mxu1 %v3997_v2  ;;  %v2889_v2 = vld [vmem:[%s5260_s0 + $0x10] ss:$2 sm:$0xf] }
  0x22   :  { %302 = vmatmul.mubr.bf16.vlgmr.msra.gmra.mrb[0].mxu0 %v5266_v1  ;;  %353 = vmatmul.mubr.bf16.vlgmr.msra.gmra.mrb[0].mxu1 %v5266_v1 }
  0x23   :  { %311 = vmatprep.mubr.bf16.mxu0 %v5266_v1  ;;  %362 = vmatprep.mubr.bf16.mxu1 %v5266_v1 }
  0x24   :  { %1553 = vmatpush1.bf16.msra.mxu0 %v4003_v3  ;;  %1604 = vmatpush1.bf16.msra.mxu1 %v4008_v4  ;;  %v2890_v3 = vld [vmem:[%s5260_s0 + $0x18] ss:$2 sm:$0xf] }
  0x25   :  { %1554 = vmatprep.subr.bf16.mxu0 %v4014_v5  ;;  %1605 = vmatprep.subr.bf16.mxu1 %v4021_v6 }
  0x28   :  { %1555 = vmatpush1.bf16.msra.mxu0 %v4026_v7  ;;  %1606 = vmatpush1.bf16.msra.mxu1 %v3143_v8  ;;  %v2891_v8 = vld [vmem:[%s5260_s0 + $0x20] ss:$2 sm:$0xf] }
  0x29   :  { %1556 = vmatprep.subr.bf16.mxu0 %v3144_v9  ;;  %1607 = vmatprep.subr.bf16.mxu1 %v3146_v10 }
  0x2a   :  { %312 = vmatmul.mubr.bf16.gmra.mrb[4].mxu0 %v5266_v1  ;;  %363 = vmatmul.mubr.bf16.gmra.mrb[4].mxu1 %v5266_v1 }
  0x2b   :  { %1584 = vmatprep.mubr.bf16.mxu0 %v5266_v1  ;;  %1635 = vmatprep.mubr.bf16.mxu1 %v5266_v1 }
  0x2c   :  { %1557 = vmatpush1.bf16.msra.mxu0 %v4042_v11  ;;  %1608 = vmatpush1.bf16.msra.mxu1 %v4047_v12 }
  0x2d   :  { %1558 = vmatprep.subr.bf16.mxu0 %v4053_v13  ;;  %1609 = vmatprep.subr.bf16.mxu1 %v3152_v14 }
  0x30   :  { %1559 = vmatpush1.bf16.msra.mxu0 %v3154_v15  ;;  %1610 = vmatpush1.bf16.msra.mxu1 %v3155_v16  ;;  %v2892_v15 = vld [vmem:[%s5260_s0 + $0x28] ss:$2 sm:$0xf] }
  0x31   :  { %1560 = vmatprep.subr.bf16.mxu0 %v3156_v17  ;;  %1611 = vmatprep.subr.bf16.mxu1 %v3158_v18 }
  0x34   :  { %1561 = vmatpush1.bf16.msra.mxu0 %v3160_v19  ;;  %1612 = vmatpush1.bf16.msra.mxu1 %v3161_v20 }
  0x35   :  { %1562 = vmatprep.subr.bf16.mxu0 %v3162_v21  ;;  %1613 = vmatprep.subr.bf16.mxu1 %v3164_v22  ;;  %v2893_v22 = vld [vmem:[%s5260_s0 + $0x30] ss:$2 sm:$0xf] }
  0x38   :  { %1563 = vmatpush1.bf16.msra.mxu0 %v3166_v23  ;;  %1614 = vmatpush1.bf16.msra.mxu1 %v3167_v24 }
  0x39   :  { %1564 = vmatprep.subr.bf16.mxu0 %v3168_v25  ;;  %1615 = vmatprep.subr.bf16.mxu1 %v3170_v26 }
  0x3c   :  { %1565 = vmatpush1.bf16.msra.mxu0 %v3172_v27  ;;  %1616 = vmatpush1.bf16.msra.mxu1 %v3173_v28 }
  0x3d   :  { %1566 = vmatprep.subr.bf16.mxu0 %v3174_v29  ;;  %1617 = vmatprep.subr.bf16.mxu1 %v3176_v30  ;;  %v2894_v29 = vld [vmem:[%s5260_s0 + $0x38] ss:$2 sm:$0xf] }
  0x40   :  { %1567 = vmatpush1.bf16.msra.mxu0 %v3178_v31  ;;  %1618 = vmatpush1.bf16.msra.mxu1 %v3179_v32 }
  0xf5   :  { %v303_v38 = vpop.f32.mrb[0].mxu0  ;;  %v354_v39 = vpop.f32.mrb[0].mxu1 }
  0xf6   :  { %v305_v41 = vpop.f32.mrb[1].mxu0  ;;  %v356_v42 = vpop.f32.mrb[1].mxu1 }
  0xf7   :  { %v383_v43 = vcombine.low %v303_v38, %v305_v41  ;;  %v384_v44 = vcombine.high %v303_v38, %v305_v41  ;;  %v385_v45 = vcombine.low %v354_v39, %v356_v42  ;;  %v386_v46 = vcombine.high %v354_v39, %v356_v42  ;;  %v307_v47 = vpop.f32.mrb[2].mxu0  ;;  %v358_v48 = vpop.f32.mrb[2].mxu1 }
  0xf8   :  { %v309_v49 = vpop.f32.mrb[3].mxu0  ;;  %v360_v50 = vpop.f32.mrb[3].mxu1 }
  0xf9   :  { %v393_v51 = vrot.slane %v383_v43, %v4136_v40  ;;  %v400_v52 = vrot.slane %v384_v44, %v4136_v40  ;;  %v407_v53 = vrot.slane %v385_v45, %v4136_v40  ;;  %v414_v54 = vrot.slane %v386_v46, %v4136_v40 }
  0xfa   :  { %v451_v55 = vcombine.low %v307_v47, %v309_v49  ;;  %v452_v56 = vcombine.high %v307_v47, %v309_v49  ;;  %v453_v57 = vcombine.low %v358_v48, %v360_v50  ;;  %v454_v58 = vcombine.high %v358_v48, %v360_v50 }
  0xfb   :  { %v415_v61 = vcombine.low %v393_v51, %v407_v53  ;;  %v416_v62 = vcombine.high %v393_v51, %v407_v53  ;;  %v417_v63 = vcombine.low %v400_v52, %v414_v54  ;;  %v418_v0 = vcombine.high %v400_v52, %v414_v54 }
  0xfc   :  { %v4155_v4 = vrot.slane %v451_v55, %v4136_v40  ;;  %v4158_v5 = vrot.slane %v452_v56, %v4136_v40  ;;  %v4161_v6 = vrot.slane %v453_v57, %v4136_v40  ;;  %v4164_v7 = vrot.slane %v454_v58, %v4136_v40 }
  0xfd   :  { %v425_v9 = vrot.slane %v415_v61, %v4136_v40  ;;  %v432_v10 = vrot.slane %v417_v63, %v4136_v40  ;;  %v439_v11 = vrot.slane %v416_v62, %v4136_v40  ;;  %v446_v12 = vrot.slane %v418_v0, %v4136_v40  ;;  %v4173_v13 = vpop.f32.mrb[4].mxu0  ;;  %v4175_v14 = vpop.f32.mrb[4].mxu1 }
  0xfe   :  { %v483_v16 = vcombine.low %v4155_v4, %v4161_v6  ;;  %v484_v17 = vcombine.high %v4155_v4, %v4161_v6  ;;  %v485_v18 = vcombine.low %v4158_v5, %v4164_v7  ;;  %v486_v19 = vcombine.high %v4158_v5, %v4164_v7  ;;  %v4188_v20 = vpop.f32.mrb[5].mxu0  ;;  %v4190_v21 = vpop.f32.mrb[5].mxu1 }
  0xff   :  { %v447_v23 = vcombine.high %v425_v9, %v425_v9  ;;  %v448_v24 = vcombine.high %v432_v10, %v432_v10  ;;  %v449_v25 = vcombine.high %v439_v11, %v439_v11  ;;  %v450_v26 = vcombine.high %v446_v12, %v446_v12  ;;  %v317_v27 = vpop.f32.mrb[6].mxu0  ;;  %v368_v28 = vpop.f32.mrb[6].mxu1 }
 0x100   :  { %v4198_v30 = vadd.f32 %v425_v9, %v62_v59  ;;  %v4200_v31 = vadd.f32 %v2888_v60, %v439_v11  ;;  %v4202_v32 = vadd.f32 %v2891_v8, %v432_v10  ;;  %v318_v33 = vpop.f32.mrb[7].mxu0  ;;  %v369_v34 = vpop.f32.mrb[7].mxu1  ;;  %v4208_v38 = vadd.f32 %v2892_v15, %v446_v12 }
 0x101   :  { %v4204_v35 = vadd.f32 %v2889_v2, %v447_v23  ;;  %v4206_v36 = vadd.f32 %v2890_v3, %v449_v25  ;;  %v4210_v39 = vadd.f32 %v2893_v22, %v448_v24  ;;  %v4214_v43 = vadd.f32 %v2894_v29, %v450_v26 }
 0x102   :  { %v2943_v41 = vmul.f32 -1.442695, %v4198_v30  ;;  %v2944_v42 = vmul.f32 -1.442695, %v4200_v31  ;;  %v2947_v46 = vmul.f32 -1.442695, %v4202_v32  ;;  %v522_v4 = vcombine.high %v4175_v14, %v4190_v21 }
 0x103   :  { %v2945_v44 = vmul.f32 -1.442695, %v4204_v35  ;;  %v2946_v45 = vmul.f32 -1.442695, %v4206_v36  ;;  %v803_v47 = vrot.slane %v4198_v30, 1  ;;  %v804_v49 = vrot.slane %v4200_v31, 1 }
 0x104   :  { %3180 = vpow2.f32 %v2943_v41  ;;  %v2948_v48 = vmul.f32 -1.442695, %v4208_v38  ;;  %v2949_v50 = vmul.f32 -1.442695, %v4210_v39  ;;  %v805_v51 = vrot.slane %v4204_v35, 1 }
 0x105   :  { %3182 = vpow2.f32 %v2944_v42  ;;  %v2950_v52 = vmul.f32 -1.442695, %v4214_v43  ;;  %v806_v53 = vrot.slane %v4206_v36, 1  ;;  %v807_v54 = vrot.slane %v4202_v32, 1 }
 0x106   :  { %3184 = vpow2.f32 %v2945_v44  ;;  %v2967_v55 = vmul.f32 -1.442695, %v803_v47  ;;  %v2968_v56 = vmul.f32 -1.442695, %v804_v49  ;;  %v2969_v57 = vmul.f32 -1.442695, %v805_v51 }
 0x107   :  { %3186 = vpow2.f32 %v2946_v45  ;;  %v2970_v58 = vmul.f32 -1.442695, %v806_v53  ;;  %v2971_v59 = vmul.f32 -1.442695, %v807_v54  ;;  %v808_v8 = vrot.slane %v4208_v38, 1 }
 0x108   :  { %3188 = vpow2.f32 %v2947_v46  ;;  %v809_v11 = vrot.slane %v4210_v39, 1  ;;  %v810_v22 = vrot.slane %v4214_v43, 1  ;;  %v995_v54 = vrot.slane %v4198_v30, 2 }
 0x109   :  { %3190 = vpow2.f32 %v2948_v48  ;;  %v2972_v27 = vmul.f32 -1.442695, %v808_v8  ;;  %v1067_v8 = vrot.slane %v4198_v30, 3  ;;  %v1070_v30 = vrot.slane %v4206_v36, 3 }
 0x10a   :  { %3192 = vpow2.f32 %v2949_v50  ;;  %v2973_v33 = vmul.f32 -1.442695, %v809_v11  ;;  %v2974_v41 = vmul.f32 -1.442695, %v810_v22  ;;  %v1000_v11 = vrot.slane %v4208_v38, 2 }
 0x10b   :  { %3194 = vpow2.f32 %v2950_v52 }
 0x10c   :  { %3196 = vpow2.f32 %v2967_v55 }
 0x10d   :  { %3198 = vpow2.f32 %v2968_v56  ;;  %v996_v56 = vrot.slane %v4200_v31, 2 }
 0x10e   :  { %v3181_v60 = vpop.eup %3180  ;;  %3200 = vpow2.f32 %v2969_v57 }
 0x10f   :  { %v3183_v61 = vpop.eup %3182  ;;  %v707_v62 = vadd.f32 1.0, %v3181_v60  ;;  %3202 = vpow2.f32 %v2970_v58  ;;  %v997_v58 = vrot.slane %v4204_v35, 2  ;;  %v998_v60 = vrot.slane %v4206_v36, 2 }
 0x110   :  { %v3185_v63 = vpop.eup %3184  ;;  %v708_v0 = vadd.f32 1.0, %v3183_v61  ;;  %3204 = vpow2.f32 %v2971_v59  ;;  %v2994_v36 = vmul.f32 -1.442695, %v1070_v30 }
 0x111   :  { %v3187_v2 = vpop.eup %3186  ;;  %v709_v3 = vadd.f32 1.0, %v3185_v63  ;;  %3206 = vrcp.f32 %v707_v62  ;;  %v999_v62 = vrot.slane %v4202_v32, 2 }
 0x112   :  { %v3189_v9 = vpop.eup %3188  ;;  %v710_v10 = vadd.f32 1.0, %v3187_v2  ;;  %3208 = vrcp.f32 %v708_v0 }
 0x113   :  { %v3191_v12 = vpop.eup %3190  ;;  %v711_v15 = vadd.f32 1.0, %v3189_v9  ;;  %3210 = vrcp.f32 %v709_v3 }
 0x114   :  { %v3193_v23 = vpop.eup %3192  ;;  %v712_v24 = vadd.f32 1.0, %v3191_v12  ;;  %3212 = vrcp.f32 %v710_v10  ;;  %v1068_v12 = vrot.slane %v4200_v31, 3  ;;  %v1073_v31 = vrot.slane %v4210_v39, 3 }
 0x115   :  { %v3195_v25 = vpop.eup %3194  ;;  %v713_v26 = vadd.f32 1.0, %v3193_v23  ;;  %3214 = vrcp.f32 %v711_v15  ;;  %v1001_v23 = vrot.slane %v4210_v39, 2 }
 0x116   :  { %v3197_v28 = vpop.eup %3196  ;;  %v714_v29 = vadd.f32 1.0, %v3195_v25  ;;  %3216 = vrcp.f32 %v712_v24  ;;  %v1069_v24 = vrot.slane %v4204_v35, 3  ;;  %v2992_v35 = vmul.f32 -1.442695, %v1068_v12 }
 0x117   :  { %v3199_v34 = vpop.eup %3198  ;;  %3218 = vrcp.f32 %v713_v26  ;;  %v923_v44 = vadd.f32 1.0, %v3197_v28  ;;  %v1002_v26 = vrot.slane %v4214_v43, 2 }
 0x118   :  { %v3201_v42 = vpop.eup %3200  ;;  %3220 = vrcp.f32 %v714_v29  ;;  %v924_v46 = vadd.f32 1.0, %v3199_v34  ;;  %v1072_v29 = vrot.slane %v4208_v38, 3 }
 0x119   :  { %v3203_v45 = vpop.eup %3202  ;;  %3222 = vpow2.f32 %v2972_v27  ;;  %v925_v48 = vadd.f32 1.0, %v3201_v42  ;;  %v1071_v27 = vrot.slane %v4202_v32, 3  ;;  %v4266_v32 = vrot.slane %v483_v16, %v4136_v40 }
 0x11a   :  { %v3205_v47 = vpop.eup %3204  ;;  %3224 = vpow2.f32 %v2973_v33  ;;  %v926_v50 = vadd.f32 1.0, %v3203_v45  ;;  %v2991_v33 = vmul.f32 -1.442695, %v1067_v8  ;;  %v2996_v39 = vmul.f32 -1.442695, %v1072_v29 }
 0x11b   :  { %v4230_v49 = vpop.eup %3206  ;;  %3226 = vpow2.f32 %v2974_v41  ;;  %v927_v52 = vadd.f32 1.0, %v3205_v47  ;;  %v1074_v41 = vrot.slane %v4214_v43, 3  ;;  %v2997_v47 = vmul.f32 -1.442695, %v1073_v31 }
 0x11c   :  { %v4232_v51 = vpop.eup %3208  ;;  %3228 = vrcp.f32 %v923_v44  ;;  %v2993_v44 = vmul.f32 -1.442695, %v1069_v24 }
 0x11d   :  { %v4234_v53 = vpop.eup %3210  ;;  %3230 = vrcp.f32 %v924_v46  ;;  %v2995_v46 = vmul.f32 -1.442695, %v1071_v27 }
 0x11e   :  { %v4237_v55 = vpop.eup %3212  ;;  %3232 = vrcp.f32 %v925_v48 }
 0x11f   :  { %v4240_v57 = vpop.eup %3214  ;;  %3234 = vrcp.f32 %v926_v50  ;;  %v2998_v50 = vmul.f32 -1.442695, %v1074_v41 }
 0x120   :  { %v4243_v59 = vpop.eup %3216  ;;  %3236 = vrcp.f32 %v927_v52 }
 0x121   :  { %v4246_v61 = vpop.eup %3218  ;;  %3238 = vtanh.f32 %v995_v54 }
 0x122   :  { %v4249_v63 = vpop.eup %3220  ;;  %3240 = vtanh.f32 %v996_v56 }
 0x123   :  { %v3223_v0 = vpop.eup %3222  ;;  %3242 = vtanh.f32 %v997_v58 }
 0x124   :  { %v3225_v2 = vpop.eup %3224  ;;  %v928_v3 = vadd.f32 1.0, %v3223_v0  ;;  %3244 = vtanh.f32 %v998_v60 }
 0x125   :  { %v3227_v9 = vpop.eup %3226  ;;  %v929_v10 = vadd.f32 1.0, %v3225_v2  ;;  %3246 = vtanh.f32 %v999_v62 }
 0x126   :  { %v3229_v15 = vpop.eup %3228  ;;  %v930_v22 = vadd.f32 1.0, %v3227_v9  ;;  %3248 = vrcp.f32 %v928_v3  ;;  %v519_v3 = vcombine.low %v4173_v13, %v4188_v20 }
 0x127   :  { %v3231_v25 = vpop.eup %3230  ;;  %3250 = vrcp.f32 %v929_v10  ;;  %v1259_v48 = vmul.f32 0.0, %v3229_v15 }
 0x128   :  { %v3233_v28 = vpop.eup %3232  ;;  %3252 = vrcp.f32 %v930_v22  ;;  %v1260_v52 = vmul.f32 0.0, %v3231_v25 }
 0x129   :  { %v3235_v34 = vpop.eup %3234  ;;  %3254 = vtanh.f32 %v1000_v11  ;;  %v1261_v54 = vmul.f32 0.0, %v3233_v28  ;;  %v520_v11 = vcombine.high %v4173_v13, %v4188_v20 }
 0x12a   :  { %v3237_v42 = vpop.eup %3236  ;;  %3256 = vtanh.f32 %v1001_v23  ;;  %v1262_v58 = vmul.f32 0.0, %v3235_v34  ;;  %v521_v23 = vcombine.low %v4175_v14, %v4190_v21  ;;  %v4326_v14 = vrot.slane %v486_v19, %v4136_v40  ;;  %v2895_v19 = vld [vmem:[%s5260_s0 + $0x40] ss:$2 sm:$0xf] }
 0x12b   :  { %v3239_v45 = vpop.eup %3238  ;;  %3258 = vtanh.f32 %v1002_v26  ;;  %v1263_v60 = vmul.f32 0.0, %v3237_v42  ;;  %v4313_v24 = vrot.slane %v520_v11, %v4136_v40  ;;  %v4319_v26 = vrot.slane %v522_v4, %v4136_v40 }
 0x12c   :  { %v3241_v38 = vpop.eup %3240  ;;  %3260 = vpow2.f32 %v2991_v33  ;;  %v1283_v62 = vmul.f32 %v3239_v45, %v4230_v49  ;;  %v4316_v25 = vrot.slane %v521_v23, %v4136_v40  ;;  %v515_v21 = vcombine.high %v4266_v32, %v4266_v32 }
 0x12d   :  { %v3243_v43 = vpop.eup %3242  ;;  %3262 = vpow2.f32 %v2992_v35  ;;  %v1284_v16 = vmul.f32 %v3241_v38, %v4232_v51  ;;  %v4284_v51 = vrot.slane %v485_v18, %v4136_v40  ;;  %v4300_v18 = vrot.slane %v519_v3, %v4136_v40 }
 0x12e   :  { %v3245_v56 = vpop.eup %3244  ;;  %3264 = vpow2.f32 %v2993_v44  ;;  %v1285_v2 = vmul.f32 %v3243_v43, %v4234_v53  ;;  %v4274_v10 = vadd.f32 %v1283_v62, %v1259_v48  ;;  %v4290_v53 = vrot.slane %v484_v17, %v4136_v40  ;;  %v2896_v44 = vld [vmem:[%s5260_s0 + $0x48] ss:$2 sm:$0xf] }
 0x12f   :  { %v3247_v0 = vpop.eup %3246  ;;  %3266 = vpow2.f32 %v2994_v36  ;;  %v1286_v9 = vmul.f32 %v3245_v56, %v4237_v55  ;;  %v4278_v49 = vadd.f32 %v1284_v16, %v1260_v52  ;;  %v516_v27 = vcombine.high %v4284_v51, %v4284_v51 }
 0x130   :  { %v3249_v8 = vpop.eup %3248  ;;  %3268 = vpow2.f32 %v2995_v46  ;;  %v1287_v13 = vmul.f32 %v3247_v0, %v4240_v57  ;;  %v4295_v20 = vadd.f32 %v1285_v2, %v1261_v54  ;;  %v517_v31 = vcombine.high %v4290_v53, %v4290_v53  ;;  %v2898_v54 = vld [vmem:[%s5260_s0 + $0x58] ss:$2 sm:$0xf]  ;;  %v2899_v0 = vld [vmem:[%s5260_s0 + $0x60] ss:$2 sm:$0xf] }
 0x131   :  { %v3251_v12 = vpop.eup %3250  ;;  %3270 = vpow2.f32 %v2996_v39  ;;  %v4297_v15 = vadd.f32 %v1286_v9, %v1262_v58  ;;  %v551_v33 = vcombine.low %v4300_v18, %v4316_v25  ;;  %v1264_v7 = vmul.f32 0.0, %v3249_v8 }
 0x132   :  { %v4292_v55 = vpop.eup %3252  ;;  %3272 = vpow2.f32 %v2997_v47  ;;  %v4306_v17 = vadd.f32 %v1287_v13, %v1263_v60  ;;  %v552_v41 = vcombine.high %v4300_v18, %v4316_v25  ;;  %v1265_v39 = vmul.f32 0.0, %v3251_v12  ;;  %v2897_v47 = vld [vmem:[%s5260_s0 + $0x50] ss:$2 sm:$0xf] }
 0x133   :  { %v3255_v22 = vpop.eup %3254  ;;  %3274 = vpow2.f32 %v2998_v50  ;;  %v518_v48 = vcombine.high %v4326_v14, %v4326_v14  ;;  %v4360_v56 = vadd.f32 %v2895_v19, %v4266_v32  ;;  %v4367_v16 = vadd.f32 %v2896_v44, %v4290_v53  ;;  %v2900_v32 = vld [vmem:[%s5260_s0 + $0x68] ss:$2 sm:$0xf]  ;;  %v2901_v12 = vld [vmem:[%s5260_s0 + $0x70] ss:$2 sm:$0xf] }
 0x134   :  { %v3257_v6 = vpop.eup %3256  ;;  %3276 = vtanh.f32 %v4274_v10  ;;  %v1288_v52 = vmul.f32 %v3255_v22, %v4243_v59  ;;  %v4374_v8 = vadd.f32 %v2897_v47, %v515_v21  ;;  %v4383_v53 = vadd.f32 %v2898_v54, %v517_v31  ;;  %v2902_v22 = vld [vmem:[%s5260_s0 + $0x78] ss:$2 sm:$0xf]  ;;  %v2903_v25 = vld [vmem:[%s5260_s0 + $0x80] ss:$2 sm:$0xf] }
 0x135   :  { %v4309_v57 = vpop.eup %3258  ;;  %3278 = vtanh.f32 %v4278_v49  ;;  %v1289_v62 = vmul.f32 %v3257_v6, %v4246_v61  ;;  %v4391_v23 = vadd.f32 %v2899_v0, %v4284_v51  ;;  %v2951_v4 = vmul.f32 -1.442695, %v4360_v56 }
 0x136   :  { %v3261_v30 = vpop.eup %3260  ;;  %3280 = vtanh.f32 %v4295_v20  ;;  %v4369_v3 = vadd.f32 %v1288_v52, %v1264_v7  ;;  %v2952_v21 = vmul.f32 -1.442695, %v4367_v16  ;;  %v2953_v31 = vmul.f32 -1.442695, %v4374_v8 }
 0x137   :  { %v3263_v28 = vpop.eup %3262  ;;  %v1187_v29 = vadd.f32 1.0, %v3261_v30  ;;  %3282 = vtanh.f32 %v4297_v15  ;;  %v4378_v11 = vadd.f32 %v1289_v62, %v1265_v39  ;;  %v4397_v30 = vadd.f32 %v2900_v32, %v4326_v14 }
 0x138   :  { %v3265_v34 = vpop.eup %3264  ;;  %v1188_v5 = vadd.f32 1.0, %v3263_v28  ;;  %3284 = vtanh.f32 %v4306_v17  ;;  %v2955_v7 = vmul.f32 -1.442695, %v4391_v23  ;;  %v811_v19 = vrot.slane %v4360_v56, 1 }
 0x139   :  { %v3267_v35 = vpop.eup %3266  ;;  %v1189_v42 = vadd.f32 1.0, %v3265_v34  ;;  %3286 = vrcp.f32 %v1187_v29  ;;  %v4403_v29 = vadd.f32 %v2901_v12, %v516_v27  ;;  %v4409_v34 = vadd.f32 %v2902_v22, %v518_v48 }
 0x13a   :  { %v3269_v46 = vpop.eup %3268  ;;  %v1190_v38 = vadd.f32 1.0, %v3267_v35  ;;  %3288 = vrcp.f32 %v1188_v5  ;;  %v2954_v5 = vmul.f32 -1.442695, %v4383_v53  ;;  %v2956_v27 = vmul.f32 -1.442695, %v4397_v30 }
 0x13b   :  { %v3271_v43 = vpop.eup %3270  ;;  %v1191_v50 = vadd.f32 1.0, %v3269_v46  ;;  %3290 = vrcp.f32 %v1189_v42  ;;  %v812_v42 = vrot.slane %v4367_v16, 1  ;;  %v2957_v46 = vmul.f32 -1.442695, %v4403_v29 }
 0x13c   :  { %v3273_v58 = vpop.eup %3272  ;;  %v1192_v60 = vadd.f32 1.0, %v3271_v43  ;;  %3292 = vrcp.f32 %v1190_v38  ;;  %v813_v38 = vrot.slane %v4374_v8, 1  ;;  %v2958_v47 = vmul.f32 -1.442695, %v4409_v34 }
 0x13d   :  { %v3275_v59 = vpop.eup %3274  ;;  %v1193_v2 = vadd.f32 1.0, %v3273_v58  ;;  %3294 = vrcp.f32 %v1191_v50  ;;  %v814_v48 = vrot.slane %v4383_v53, 1  ;;  %v815_v50 = vrot.slane %v4391_v23, 1 }
 0x13e   :  { %v4376_v9 = vpop.eup %3276  ;;  %v1194_v61 = vadd.f32 1.0, %v3275_v59  ;;  %3296 = vrcp.f32 %v1192_v60  ;;  %v2975_v52 = vmul.f32 -1.442695, %v811_v19  ;;  %v2976_v58 = vmul.f32 -1.442695, %v812_v42 }
 0x13f   :  { %v4385_v13 = vpop.eup %3278  ;;  %3298 = vrcp.f32 %v1193_v2  ;;  %v2977_v62 = vmul.f32 -1.442695, %v813_v38  ;;  %v2978_v59 = vmul.f32 -1.442695, %v814_v48  ;;  %v816_v32 = vrot.slane %v4397_v30, 1 }
 0x140   :  { %v4394_v6 = vpop.eup %3280  ;;  %3300 = vrcp.f32 %v1194_v61  ;;  %v817_v61 = vrot.slane %v4403_v29, 1  ;;  %v2979_v12 = vmul.f32 -1.442695, %v815_v50  ;;  %v1003_v48 = vrot.slane %v4360_v56, 2 }
 0x141   :  { %v4400_v28 = vpop.eup %3282  ;;  %3302 = vtanh.f32 %v4369_v3 }
 0x142   :  { %v4406_v51 = vpop.eup %3284  ;;  %3304 = vtanh.f32 %v4378_v11  ;;  %v2981_v42 = vmul.f32 -1.442695, %v817_v61 }
 0x143   :  { %v3287_v14 = vpop.eup %3286  ;;  %3306 = vpow2.f32 %v2951_v4  ;;  %v818_v4 = vrot.slane %v4409_v34, 1 }
 0x144   :  { %v3289_v35 = vpop.eup %3288  ;;  %3308 = vpow2.f32 %v2952_v21 }
 0x145   :  { %v3291_v44 = vpop.eup %3290  ;;  %3310 = vpow2.f32 %v2953_v31 }
 0x146   :  { %v3293_v39 = vpop.eup %3292  ;;  %3312 = vpow2.f32 %v2954_v5 }
 0x147   :  { %v3295_v43 = vpop.eup %3294  ;;  %3314 = vpow2.f32 %v2955_v7 }
 0x148   :  { %v3297_v54 = vpop.eup %3296  ;;  %3316 = vpow2.f32 %v2956_v27  ;;  %v2980_v27 = vmul.f32 -1.442695, %v816_v32  ;;  %v1355_v32 = vmul.f32 %v3287_v14, %v4376_v9  ;;  %v1359_v1 = vmul.f32 %v3295_v43, %v4406_v51 }
 0x149   :  { %v3299_v60 = vpop.eup %3298  ;;  %3318 = vpow2.f32 %v2957_v46 }
 0x14a   :  { %v4421_v0 = vpop.eup %3300  ;;  %3320 = vpow2.f32 %v2958_v47  ;;  %v2982_v47 = vmul.f32 -1.442695, %v818_v4  ;;  %v1356_v4 = vmul.f32 %v3289_v35, %v4385_v13 }
 0x14b   :  { %v3303_v2 = vpop.eup %3302  ;;  %3322 = vpow2.f32 %v2975_v52 }
 0x14c   :  { %v3305_v22 = vpop.eup %3304  ;;  %3324 = vpow2.f32 %v2976_v58  ;;  %v1004_v58 = vrot.slane %v4367_v16, 2  ;;  %v1360_v36 = vmul.f32 %v3303_v2, %v3297_v54 }
 0x14d   :  { %v3307_v21 = vpop.eup %3306  ;;  %3326 = vpow2.f32 %v2977_v62  ;;  %v1005_v62 = vrot.slane %v4374_v8, 2  ;;  %v1361_v45 = vmul.f32 %v3305_v22, %v3299_v60 }
 0x14e   :  { %v3309_v31 = vpop.eup %3308  ;;  %v715_v5 = vadd.f32 1.0, %v3307_v21  ;;  %3328 = vpow2.f32 %v2978_v59  ;;  %v1432_v51 = vpack.c.bf16 %v1360_v36, %v1360_v36 }
 0x14f   :  { %v3311_v7 = vpop.eup %3310  ;;  %v716_v19 = vadd.f32 1.0, %v3309_v31  ;;  %3330 = vpow2.f32 %v2979_v12  ;;  %v1006_v12 = vrot.slane %v4383_v53, 2  ;;  %v1433_v54 = vpack.c.bf16 %v1361_v45, %v1361_v45 }
 0x150   :  { %v3313_v46 = vpop.eup %3312  ;;  %v717_v38 = vadd.f32 1.0, %v3311_v7  ;;  %3332 = vrcp.f32 %v715_v5  ;;  %v1357_v5 = vmul.f32 %v3291_v44, %v4394_v6 }
 0x151   :  { %v3315_v50 = vpop.eup %3314  ;;  %v718_v52 = vadd.f32 1.0, %v3313_v46  ;;  %3334 = vrcp.f32 %v716_v19  ;;  %v1358_v46 = vmul.f32 %v3293_v39, %v4400_v28  ;;  %v1431_v39 = vpack.c.bf16 %v1359_v1, %v1359_v1 }
 0x152   :  { %v3317_v21 = vpop.eup %3316  ;;  %v719_v59 = vadd.f32 1.0, %v3315_v50  ;;  %3336 = vrcp.f32 %v717_v38  ;;  %v1429_v35 = vpack.c.bf16 %v1357_v5, %v1357_v5  ;;  %v1481_v1 = vunpack.c.l.b16 %v1433_v54 }
 0x153   :  { %v3319_v61 = vpop.eup %3318  ;;  %v720_v31 = vadd.f32 1.0, %v3317_v21  ;;  %3338 = vrcp.f32 %v718_v52  ;;  %v1427_v52 = vpack.c.bf16 %v1355_v32, %v1355_v32  ;;  %v1428_v21 = vpack.c.bf16 %v1356_v4, %v1356_v4 }
 0x154   :  { %v3321_v7 = vpop.eup %3320  ;;  %v721_v19 = vadd.f32 1.0, %v3319_v61  ;;  %3340 = vrcp.f32 %v719_v59  ;;  %v1430_v44 = vpack.c.bf16 %v1358_v46, %v1358_v46 }
 0x155   :  { %v3323_v50 = vpop.eup %3322  ;;  %v722_v38 = vadd.f32 1.0, %v3321_v7  ;;  %3342 = vrcp.f32 %v720_v31  ;;  %v1475_v60 = vunpack.c.l.b16 %v1427_v52  ;;  %v1476_v32 = vunpack.c.l.b16 %v1428_v21 }
 0x156   :  { %v3325_v9 = vpop.eup %3324  ;;  %3344 = vrcp.f32 %v721_v19  ;;  %v931_v14 = vadd.f32 1.0, %v3323_v50  ;;  %v1477_v31 = vunpack.c.l.b16 %v1429_v35  ;;  %v1478_v5 = vunpack.c.l.b16 %v1430_v44 }
 0x157   :  { %v3327_v13 = vpop.eup %3326  ;;  %3346 = vrcp.f32 %v722_v38  ;;  %v932_v6 = vadd.f32 1.0, %v3325_v9  ;;  %v1479_v7 = vunpack.c.l.b16 %v1431_v39  ;;  %v1499_v36 = vrot.slane %v1476_v32, 7 }
 0x158   :  { %v3329_v59 = vpop.eup %3328  ;;  %3348 = vpow2.f32 %v2980_v27  ;;  %v933_v28 = vadd.f32 1.0, %v3327_v13  ;;  %v1480_v27 = vunpack.c.l.b16 %v1432_v51  ;;  %v1007_v50 = vrot.slane %v4391_v23, 2 }
 0x159   :  { %v3331_v43 = vpop.eup %3330  ;;  %3350 = vpow2.f32 %v2981_v42  ;;  %v934_v61 = vadd.f32 1.0, %v3329_v59  ;;  %v1502_v42 = vrot.slane %v1477_v31, 6  ;;  %v1501_v38 = vsel %vm1500_vm0, %v1499_v36, %v1475_v60 }
 0x15a   :  { %v4435_v2 = vpop.eup %3332  ;;  %3352 = vpow2.f32 %v2982_v47  ;;  %v935_v22 = vadd.f32 1.0, %v3331_v43  ;;  %v1505_v47 = vrot.slane %v1478_v5, 5  ;;  %v1508_v52 = vrot.slane %v1479_v7, 4 }
 0x15b   :  { %v4437_v4 = vpop.eup %3334  ;;  %3354 = vrcp.f32 %v931_v14  ;;  %v1504_v14 = vsel %vm1503_vm1, %v1502_v42, %v1501_v38  ;;  %v1514_v59 = vrot.slane %v1481_v1, 2  ;;  %v1075_v43 = vrot.slane %v4360_v56, 3 }
 0x15c   :  { %v4439_v19 = vpop.eup %3336  ;;  %3356 = vrcp.f32 %v932_v6  ;;  %v1507_v13 = vsel %vm1506_vm2, %v1505_v47, %v1504_v14  ;;  %v1511_v6 = vrot.slane %v1480_v27, 3  ;;  %v1008_v60 = vrot.slane %v4397_v30, 2 }
 0x15d   :  { %v4441_v45 = vpop.eup %3338  ;;  %3358 = vrcp.f32 %v933_v28  ;;  %v1510_v44 = vsel %vm1509_vm3, %v1508_v52, %v1507_v13  ;;  %v1009_v31 = vrot.slane %v4403_v29, 2  ;;  %v1077_v5 = vrot.slane %v4374_v8, 3 }
 0x15e   :  { %v4443_v46 = vpop.eup %3340  ;;  %3360 = vrcp.f32 %v934_v61  ;;  %v1513_v39 = vsel %vm1512_vm4, %v1511_v6, %v1510_v44  ;;  %v1010_v56 = vrot.slane %v4409_v34, 2  ;;  %v1078_v7 = vrot.slane %v4383_v53, 3 }
 0x15f   :  { %v4447_v9 = vpop.eup %3342  ;;  %3362 = vrcp.f32 %v935_v22  ;;  %v4467_v61 = vsel %vm1515_vm5, %v1514_v59, %v1513_v39  ;;  %v1076_v22 = vrot.slane %v4367_v16, 3  ;;  %v1079_v1 = vrot.slane %v4391_v23, 3 }
 0x160   :  { %v4450_v21 = vpop.eup %3344  ;;  %3364 = vtanh.f32 %v1003_v48  ;;  %v2999_v36 = vmul.f32 -1.442695, %v1075_v43  ;;  %v1080_v16 = vrot.slane %v4397_v30, 3  ;;  %v1081_v8 = vrot.slane %v4403_v29, 3 }
 0x161   :  { %v4455_v35 = vpop.eup %3346  ;;  %3366 = vtanh.f32 %v1004_v58  ;;  %v3000_v47 = vmul.f32 -1.442695, %v1076_v22  ;;  %v3001_v38 = vmul.f32 -1.442695, %v1077_v5  ;;  %v1082_v52 = vrot.slane %v4409_v34, 3 }
 0x162   :  { %v3349_v28 = vpop.eup %3348  ;;  %3368 = vtanh.f32 %v1005_v62  ;;  %v3002_v53 = vmul.f32 -1.442695, %v1078_v7  ;;  %v3003_v6 = vmul.f32 -1.442695, %v1079_v1  ;;  %v3004_v59 = vmul.f32 -1.442695, %v1080_v16 }
 0x163   :  { %v3351_v48 = vpop.eup %3350  ;;  %v936_v51 = vadd.f32 1.0, %v3349_v28  ;;  %3370 = vtanh.f32 %v1006_v12  ;;  %v3005_v39 = vmul.f32 -1.442695, %v1081_v8  ;;  %v3006_v43 = vmul.f32 -1.442695, %v1082_v52 }
 0x164   :  { %v3353_v58 = vpop.eup %3352  ;;  %v937_v54 = vadd.f32 1.0, %v3351_v48  ;;  %3372 = vtanh.f32 %v1007_v50  ;;  %v2907_v52 = vld [vmem:[%s5260_s0 + $0xa0] ss:$2 sm:$0xf] }
 0x165   :  { %v3355_v62 = vpop.eup %3354  ;;  %v938_v32 = vadd.f32 1.0, %v3353_v58  ;;  %3374 = vrcp.f32 %v936_v51 }
 0x166   :  { %v3357_v12 = vpop.eup %3356  ;;  %3376 = vrcp.f32 %v937_v54  ;;  %v1267_v23 = vmul.f32 0.0, %v3355_v62 }
 0x167   :  { %v3359_v27 = vpop.eup %3358  ;;  %3378 = vrcp.f32 %v938_v32  ;;  %v1268_v28 = vmul.f32 0.0, %v3357_v12 }
 0x168   :  { %v3361_v42 = vpop.eup %3360  ;;  %3380 = vtanh.f32 %v1008_v60  ;;  %v1269_v48 = vmul.f32 0.0, %v3359_v27 }
 0x169   :  { %v3363_v50 = vpop.eup %3362  ;;  %3382 = vtanh.f32 %v1009_v31  ;;  %v1270_v58 = vmul.f32 0.0, %v3361_v42  ;;  %v5281_v42 = vcombine.high %v4313_v24, %v4319_v26 }
 0x16a   :  { %v3365_v14 = vpop.eup %3364  ;;  %3384 = vtanh.f32 %v1010_v56  ;;  %v1271_v60 = vmul.f32 0.0, %v3363_v50 }
 0x16b   :  { %v3367_v13 = vpop.eup %3366  ;;  %3386 = vpow2.f32 %v2999_v36  ;;  %v1291_v29 = vmul.f32 %v3365_v14, %v4435_v2  ;;  %v2905_v14 = vld [vmem:[%s5260_s0 + $0x90] ss:$2 sm:$0xf] }
 0x16c   :  { %v3369_v44 = vpop.eup %3368  ;;  %3388 = vpow2.f32 %v3000_v47  ;;  %v1292_v34 = vmul.f32 %v3367_v13, %v4437_v4 }
 0x16d   :  { %v3371_v30 = vpop.eup %3370  ;;  %3390 = vpow2.f32 %v3001_v38  ;;  %v1293_v22 = vmul.f32 %v3369_v44, %v4439_v19  ;;  %v4482_v62 = vadd.f32 %v1291_v29, %v1267_v23  ;;  %v561_v19 = vrot.slane %v551_v33, %v4136_v40  ;;  %v2908_v29 = vld [vmem:[%s5260_s0 + $0xa8] ss:$2 sm:$0xf] }
 0x16e   :  { %v3373_v51 = vpop.eup %3372  ;;  %3392 = vpow2.f32 %v3002_v53  ;;  %v1294_v31 = vmul.f32 %v3371_v30, %v4441_v45  ;;  %v4485_v5 = vadd.f32 %v1292_v34, %v1268_v28  ;;  %v575_v45 = vrot.slane %v552_v41, %v4136_v40 }
 0x16f   :  { %v3375_v54 = vpop.eup %3374  ;;  %3394 = vpow2.f32 %v3003_v6  ;;  %v1295_v12 = vmul.f32 %v3373_v51, %v4443_v46  ;;  %v4490_v56 = vadd.f32 %v1293_v22, %v1269_v48  ;;  %v5280_v46 = vcombine.low %v4313_v24, %v4319_v26  ;;  %v2904_v24 = vld [vmem:[%s5260_s0 + $0x88] ss:$2 sm:$0xf] }
 0x170   :  { %v3377_v32 = vpop.eup %3376  ;;  %3396 = vpow2.f32 %v3004_v59  ;;  %v4492_v7 = vadd.f32 %v1294_v31, %v1270_v58  ;;  %v582_v33 = vrot.slane %v5281_v42, %v4136_v40  ;;  %v583_v26 = vcombine.high %v561_v19, %v561_v19  ;;  %v2906_v59 = vld [vmem:[%s5260_s0 + $0x98] ss:$2 sm:$0xf] }
 0x171   :  { %v4487_v2 = vpop.eup %3378  ;;  %3398 = vpow2.f32 %v3005_v39  ;;  %v4502_v1 = vadd.f32 %v1295_v12, %v1271_v60  ;;  %v568_v36 = vrot.slane %v5280_v46, %v4136_v40  ;;  %v585_v50 = vcombine.high %v575_v45, %v575_v45  ;;  %v2910_v12 = vld [vmem:[%s5260_s0 + $0xb8] ss:$2 sm:$0xf] }
 0x172   :  { %v3381_v4 = vpop.eup %3380  ;;  %3400 = vpow2.f32 %v3006_v43  ;;  %v586_v13 = vcombine.high %v582_v33, %v582_v33  ;;  %v1272_v44 = vmul.f32 0.0, %v3375_v54  ;;  %v4534_v28 = vadd.f32 %v2903_v25, %v561_v19  ;;  %v2909_v54 = vld [vmem:[%s5260_s0 + $0xb0] ss:$2 sm:$0xf] }
 0x173   :  { %v3383_v27 = vpop.eup %3382  ;;  %3402 = vtanh.f32 %v4482_v62  ;;  %v584_v53 = vcombine.high %v568_v36, %v568_v36  ;;  %v1273_v48 = vmul.f32 0.0, %v3377_v32  ;;  %v4539_v51 = vadd.f32 %v2904_v24, %v575_v45 }
 0x174   :  { %v4513_v16 = vpop.eup %3384  ;;  %3404 = vtanh.f32 %v4485_v5  ;;  %v1296_v34 = vmul.f32 %v3381_v4, %v4447_v9  ;;  %v4545_v60 = vadd.f32 %v2905_v14, %v583_v26  ;;  %v1297_v32 = vmul.f32 %v3383_v27, %v4450_v21 }
 0x175   :  { %v3387_v18 = vpop.eup %3386  ;;  %3406 = vtanh.f32 %v4490_v56  ;;  %v4551_v19 = vadd.f32 %v2906_v59, %v585_v50  ;;  %v4555_v4 = vadd.f32 %v2907_v52, %v568_v36  ;;  %v4561_v27 = vadd.f32 %v2909_v54, %v584_v53 }
 0x176   :  { %v3389_v41 = vpop.eup %3388  ;;  %v1195_v47 = vadd.f32 1.0, %v3387_v18  ;;  %3408 = vtanh.f32 %v4492_v7  ;;  %v4553_v9 = vadd.f32 %v1296_v34, %v1272_v44  ;;  %v4557_v25 = vadd.f32 %v1297_v32, %v1273_v48 }
 0x177   :  { %v3391_v8 = vpop.eup %3390  ;;  %v1196_v38 = vadd.f32 1.0, %v3389_v41  ;;  %3410 = vtanh.f32 %v4502_v1  ;;  %v4559_v41 = vadd.f32 %v2908_v29, %v582_v33  ;;  %v2959_v24 = vmul.f32 -1.442695, %v4534_v28 }
 0x178   :  { %v3393_v6 = vpop.eup %3392  ;;  %v1197_v23 = vadd.f32 1.0, %v3391_v8  ;;  %3412 = vrcp.f32 %v1195_v47  ;;  %5282 = vst [vmem:[#allocation4_spill] sm:$0xff] %v4557_v25  ;;  %v4563_v47 = vadd.f32 %v2910_v12, %v586_v13  ;;  %v2960_v36 = vmul.f32 -1.442695, %v4539_v51 }
 0x179   :  { %v3395_v30 = vpop.eup %3394  ;;  %v1198_v39 = vadd.f32 1.0, %v3393_v6  ;;  %3414 = vrcp.f32 %v1196_v38  ;;  %v2961_v8 = vmul.f32 -1.442695, %v4545_v60  ;;  %v2962_v33 = vmul.f32 -1.442695, %v4551_v19 }
 0x17a   :  { %v3397_v43 = vpop.eup %3396  ;;  %v1199_v58 = vadd.f32 1.0, %v3395_v30  ;;  %3416 = vrcp.f32 %v1197_v23  ;;  %v2963_v38 = vmul.f32 -1.442695, %v4555_v4  ;;  %v2964_v52 = vmul.f32 -1.442695, %v4559_v41 }
 0x17b   :  { %v3399_v22 = vpop.eup %3398  ;;  %v1200_v31 = vadd.f32 1.0, %v3397_v43  ;;  %3418 = vrcp.f32 %v1198_v39  ;;  %v819_v53 = vrot.slane %v4534_v28, 1  ;;  %v820_v13 = vrot.slane %v4539_v51, 1 }
 0x17c   :  { %v3401_v45 = vpop.eup %3400  ;;  %v1201_v46 = vadd.f32 1.0, %v3399_v22  ;;  %3420 = vrcp.f32 %v1199_v58  ;;  %v2965_v23 = vmul.f32 -1.442695, %v4561_v27  ;;  %v2966_v44 = vmul.f32 -1.442695, %v4563_v47 }
 0x17d   :  { %v3403_v42 = vpop.eup %3402  ;;  %v1202_v18 = vadd.f32 1.0, %v3401_v45  ;;  %3422 = vrcp.f32 %v1200_v31  ;;  %v821_v59 = vrot.slane %v4545_v60, 1  ;;  %v822_v39 = vrot.slane %v4551_v19, 1 }
 0x17e   :  { %v3405_v21 = vpop.eup %3404  ;;  %3424 = vrcp.f32 %v1201_v46  ;;  %v823_v48 = vrot.slane %v4555_v4, 1  ;;  %v2983_v31 = vmul.f32 -1.442695, %v819_v53  ;;  %v2984_v32 = vmul.f32 -1.442695, %v820_v13 }
 0x17f   :  { %v3407_v26 = vpop.eup %3406  ;;  %3426 = vrcp.f32 %v1202_v18  ;;  %v2986_v58 = vmul.f32 -1.442695, %v822_v39 }
 0x180   :  { %v3409_v50 = vpop.eup %3408  ;;  %3428 = vtanh.f32 %v4553_v9 }
 0x181   :  { %v3411_v14 = vpop.eup %3410  ;;  %3430 = vtanh.f32 %v4557_v25 }
 0x182   :  { %v3413_v6 = vpop.eup %3412  ;;  %3432 = vpow2.f32 %v2959_v24 }
 0x183   :  { %v3415_v30 = vpop.eup %3414  ;;  %3434 = vpow2.f32 %v2960_v36  ;;  %v1363_v29 = vmul.f32 %v3413_v6, %v3403_v42  ;;  %v2985_v42 = vmul.f32 -1.442695, %v821_v59 }
 0x184   :  { %v3417_v43 = vpop.eup %3416  ;;  %3436 = vpow2.f32 %v2961_v8  ;;  %v1364_v54 = vmul.f32 %v3415_v30, %v3405_v21 }
 0x185   :  { %v3419_v22 = vpop.eup %3418  ;;  %3438 = vpow2.f32 %v2962_v33  ;;  %v1365_v12 = vmul.f32 %v3417_v43, %v3407_v26  ;;  %v1435_v18 = vpack.c.bf16 %v1363_v29, %v1363_v29  ;;  %v2987_v33 = vmul.f32 -1.442695, %v823_v48 }
 0x186   :  { %v3421_v45 = vpop.eup %3420  ;;  %3440 = vpow2.f32 %v2963_v38  ;;  %v1366_v46 = vmul.f32 %v3419_v22, %v3409_v50  ;;  %v1436_v24 = vpack.c.bf16 %v1364_v54, %v1364_v54 }
 0x187   :  { %v3423_v36 = vpop.eup %3422  ;;  %3442 = vpow2.f32 %v2964_v52  ;;  %v1367_v6 = vmul.f32 %v3421_v45, %v3411_v14  ;;  %v1437_v8 = vpack.c.bf16 %v1365_v12, %v1365_v12  ;;  %v1483_v50 = vunpack.c.l.b16 %v1435_v18 }
 0x188   :  { %v3425_v37 = vpop.eup %3424  ;;  %3444 = vpow2.f32 %v2965_v23  ;;  %v1438_v34 = vpack.c.bf16 %v1366_v46, %v1366_v46  ;;  %v1484_v21 = vunpack.c.l.b16 %v1436_v24 }
 0x189   :  { %v4582_v30 = vpop.eup %3426  ;;  %3446 = vpow2.f32 %v2966_v44  ;;  %v1439_v26 = vpack.c.bf16 %v1367_v6, %v1367_v6  ;;  %v1485_v53 = vunpack.c.l.b16 %v1437_v8  ;;  %v826_v8 = vrot.slane %v4563_v47, 1 }
 0x18a   :  { %v3429_v38 = vpop.eup %3428  ;;  %3448 = vpow2.f32 %v2983_v31  ;;  %v1486_v13 = vunpack.c.l.b16 %v1438_v34  ;;  %v1520_v29 = vrot.slane %v1484_v21, 7 }
 0x18b   :  { %v3431_v52 = vpop.eup %3430  ;;  %3450 = vpow2.f32 %v2984_v32  ;;  %v1368_v14 = vmul.f32 %v3429_v38, %v3423_v36  ;;  %v1487_v59 = vunpack.c.l.b16 %v1439_v26  ;;  %v1522_v43 = vrot.slane %v1485_v53, 6 }
 0x18c   :  { %v3433_v23 = vpop.eup %3432  ;;  %3452 = vpow2.f32 %v2985_v42  ;;  %v1369_v39 = vmul.f32 %v3431_v52, %v3425_v37  ;;  %v1521_v54 = vsel %vm1500_vm0, %v1520_v29, %v1483_v50  ;;  %v1524_v22 = vrot.slane %v1486_v13, 5 }
 0x18d   :  { %v3435_v44 = vpop.eup %3434  ;;  %v723_v48 = vadd.f32 1.0, %v3433_v23  ;;  %3454 = vpow2.f32 %v2986_v58  ;;  %v1440_v12 = vpack.c.bf16 %v1368_v14, %v1368_v14  ;;  %v1523_v31 = vsel %vm1503_vm1, %v1522_v43, %v1521_v54 }
 0x18e   :  { %v3437_v45 = vpop.eup %3436  ;;  %v724_v34 = vadd.f32 1.0, %v3435_v44  ;;  %3456 = vpow2.f32 %v2987_v33  ;;  %v1441_v46 = vpack.c.bf16 %v1369_v39, %v1369_v39  ;;  %v1525_v32 = vsel %vm1506_vm2, %v1524_v22, %v1523_v31 }
 0x18f   :  { %v3439_v18 = vpop.eup %3438  ;;  %v725_v24 = vadd.f32 1.0, %v3437_v45  ;;  %3458 = vrcp.f32 %v723_v48  ;;  %v1488_v36 = vunpack.c.l.b16 %v1440_v12  ;;  %v1526_v37 = vrot.slane %v1487_v59, 4 }
 0x190   :  { %v3441_v42 = vpop.eup %3440  ;;  %v726_v6 = vadd.f32 1.0, %v3439_v18  ;;  %3460 = vrcp.f32 %v724_v34  ;;  %v1489_v58 = vunpack.c.l.b16 %v1441_v46  ;;  %v5283_v14 = vrot.slane %v4559_v41, 1 }
 0x191   :  { %v3443_v21 = vpop.eup %3442  ;;  %v727_v26 = vadd.f32 1.0, %v3441_v42  ;;  %3462 = vrcp.f32 %v725_v24  ;;  %v1527_v53 = vsel %vm1509_vm3, %v1526_v37, %v1525_v32  ;;  %v1528_v33 = vrot.slane %v1488_v36, 3 }
 0x192   :  { %v3445_v38 = vpop.eup %3444  ;;  %v728_v50 = vadd.f32 1.0, %v3443_v21  ;;  %3464 = vrcp.f32 %v726_v6  ;;  %v1530_v13 = vrot.slane %v1489_v58, 2  ;;  %v2988_v59 = vmul.f32 -1.442695, %v5283_v14 }
 0x193   :  { %v3447_v29 = vpop.eup %3446  ;;  %v729_v52 = vadd.f32 1.0, %v3445_v38  ;;  %3466 = vrcp.f32 %v727_v26  ;;  %v1529_v43 = vsel %vm1512_vm4, %v1528_v33, %v1527_v53  ;;  %v5284_v54 = vrot.slane %v4561_v27, 1 }
 0x194   :  { %v3449_v23 = vpop.eup %3448  ;;  %v730_v39 = vadd.f32 1.0, %v3447_v29  ;;  %3468 = vrcp.f32 %v728_v50  ;;  %v4595_v44 = vsel %vm1515_vm5, %v1530_v13, %v1529_v43  ;;  %v2990_v12 = vmul.f32 -1.442695, %v826_v8 }
 0x195   :  { %v2989_v22 = vmul.f32 -1.442695, %v5284_v54  ;;  %v3451_v48 = vpop.eup %3450  ;;  %3470 = vrcp.f32 %v729_v52  ;;  %v939_v45 = vadd.f32 1.0, %v3449_v23  ;;  %v1011_v8 = vrot.slane %v4534_v28, 2 }
 0x196   :  { %v3453_v31 = vpop.eup %3452  ;;  %3472 = vrcp.f32 %v730_v39  ;;  %v940_v46 = vadd.f32 1.0, %v3451_v48  ;;  %v1012_v21 = vrot.slane %v4539_v51, 2  ;;  %v1013_v53 = vrot.slane %v4545_v60, 2 }
 0x197   :  { %v3455_v34 = vpop.eup %3454  ;;  %3474 = vpow2.f32 %v2988_v59  ;;  %v941_v18 = vadd.f32 1.0, %v3453_v31  ;;  %v1014_v38 = vrot.slane %v4551_v19, 2  ;;  %v1015_v13 = vrot.slane %v4555_v4, 2 }
 0x198   :  { %v3457_v32 = vpop.eup %3456  ;;  %3476 = vpow2.f32 %v2989_v22  ;;  %v942_v36 = vadd.f32 1.0, %v3455_v34  ;;  %v1083_v43 = vrot.slane %v4534_v28, 3  ;;  %v1016_v54 = vrot.slane %v4559_v41, 2 }
 0x199   :  { %v4597_v24 = vpop.eup %3458  ;;  %3478 = vpow2.f32 %v2990_v12  ;;  %v943_v42 = vadd.f32 1.0, %v3457_v32  ;;  %v1084_v22 = vrot.slane %v4539_v51, 3  ;;  %v1017_v31 = vrot.slane %v4561_v27, 2 }
 0x19a   :  { %v4599_v37 = vpop.eup %3460  ;;  %3480 = vrcp.f32 %v939_v45  ;;  %v1085_v45 = vrot.slane %v4545_v60, 3  ;;  %v1086_v28 = vrot.slane %v4551_v19, 3  ;;  %v1088_v51 = vrot.slane %v4559_v41, 3 }
 0x19b   :  { %v4601_v6 = vpop.eup %3462  ;;  %3482 = vrcp.f32 %v940_v46  ;;  %v1018_v46 = vrot.slane %v4563_v47, 2  ;;  %v1089_v60 = vrot.slane %v4561_v27, 3 }
 0x19c   :  { %v4604_v58 = vpop.eup %3464  ;;  %3484 = vrcp.f32 %v941_v18  ;;  %v1087_v18 = vrot.slane %v4555_v4, 3  ;;  %v3010_v19 = vmul.f32 -1.442695, %v1086_v28 }
 0x19d   :  { %v4607_v26 = vpop.eup %3466  ;;  %3486 = vrcp.f32 %v942_v36  ;;  %v3007_v36 = vmul.f32 -1.442695, %v1083_v43  ;;  %v3012_v43 = vmul.f32 -1.442695, %v1088_v51 }
 0x19e   :  { %v4610_v33 = vpop.eup %3468  ;;  %3488 = vrcp.f32 %v943_v42 }
 0x19f   :  { %v4613_v50 = vpop.eup %3470  ;;  %3490 = vtanh.f32 %v1011_v8  ;;  %v3008_v8 = vmul.f32 -1.442695, %v1084_v22 }
 0x1a0   :  { %v4616_v29 = vpop.eup %3472  ;;  %3492 = vtanh.f32 %v1012_v21 }
 0x1a1   :  { %v3475_v52 = vpop.eup %3474  ;;  %3494 = vtanh.f32 %v1013_v53  ;;  %v3009_v53 = vmul.f32 -1.442695, %v1085_v45 }
 0x1a2   :  { %v3477_v14 = vpop.eup %3476  ;;  %v944_v59 = vadd.f32 1.0, %v3475_v52  ;;  %3496 = vtanh.f32 %v1014_v38 }
 0x1a3   :  { %v3479_v23 = vpop.eup %3478  ;;  %v945_v39 = vadd.f32 1.0, %v3477_v14  ;;  %3498 = vtanh.f32 %v1015_v13  ;;  %v1090_v13 = vrot.slane %v4563_v47, 3  ;;  %v3011_v14 = vmul.f32 -1.442695, %v1087_v18 }
 0x1a4   :  { %v3481_v48 = vpop.eup %3480  ;;  %v946_v12 = vadd.f32 1.0, %v3479_v23  ;;  %3500 = vrcp.f32 %v944_v59  ;;  %v1298_v18 = vmul.f32 %v4513_v16, %v4455_v35 }
 0x1a5   :  { %v3483_v34 = vpop.eup %3482  ;;  %3502 = vrcp.f32 %v945_v39  ;;  %v1275_v4 = vmul.f32 0.0, %v3481_v48  ;;  %v3013_v39 = vmul.f32 -1.442695, %v1089_v60  ;;  %v3014_v47 = vmul.f32 -1.442695, %v1090_v13 }
 0x1a6   :  { %v3485_v32 = vpop.eup %3484  ;;  %3504 = vrcp.f32 %v946_v12  ;;  %v1276_v23 = vmul.f32 0.0, %v3483_v34  ;;  %v1266_v12 = vmul.f32 0.0, %v4292_v55  ;;  %v1274_v48 = vmul.f32 0.0, %v4487_v2 }
 0x1a7   :  { %v3487_v42 = vpop.eup %3486  ;;  %3506 = vtanh.f32 %v1016_v54  ;;  %v1277_v54 = vmul.f32 0.0, %v3485_v32  ;;  %v1290_v32 = vmul.f32 %v4309_v57, %v4249_v63 }
 0x1a8   :  { %v3489_v21 = vpop.eup %3488  ;;  %3508 = vtanh.f32 %v1017_v31  ;;  %v4646_v51 = vadd.f32 %v1298_v18, %v1274_v48 }
 0x1a9   :  { %v3491_v38 = vpop.eup %3490  ;;  %3510 = vtanh.f32 %v1018_v46 }
 0x1aa   :  { %v3493_v52 = vpop.eup %3492  ;;  %3512 = vpow2.f32 %v3007_v36  ;;  %v1299_v27 = vmul.f32 %v3491_v38, %v4597_v24  ;;  %v4644_v36 = vadd.f32 %v1290_v32, %v1266_v12  ;;  %5285 = vst [vmem:[#allocation5_spill] sm:$0xff] %v4646_v51 }
 0x1ab   :  { %v3495_v59 = vpop.eup %3494  ;;  %3514 = vpow2.f32 %v3008_v8  ;;  %v1300_v31 = vmul.f32 %v3493_v52, %v4599_v37 }
 0x1ac   :  { %v3497_v41 = vpop.eup %3496  ;;  %3516 = vpow2.f32 %v3009_v53  ;;  %v1301_v46 = vmul.f32 %v3495_v59, %v4601_v6  ;;  %v4634_v34 = vadd.f32 %v1299_v27, %v1275_v4  ;;  %v1278_v53 = vmul.f32 0.0, %v3487_v42 }
 0x1ad   :  { %v3499_v22 = vpop.eup %3498  ;;  %3518 = vpow2.f32 %v3010_v19  ;;  %v4638_v24 = vadd.f32 %v1300_v31, %v1276_v23  ;;  %v1302_v4 = vmul.f32 %v3497_v41, %v4604_v58 }
 0x1ae   :  { %v3501_v45 = vpop.eup %3500  ;;  %3520 = vpow2.f32 %v3011_v14  ;;  %v4642_v37 = vadd.f32 %v1301_v46, %v1277_v54  ;;  %v1279_v14 = vmul.f32 0.0, %v3489_v21 }
 0x1af   :  { %v3503_v28 = vpop.eup %3502  ;;  %3522 = vpow2.f32 %v3012_v43  ;;  %v1280_v23 = vmul.f32 0.0, %v3501_v45  ;;  %v4655_v12 = vadd.f32 %v1302_v4, %v1278_v53 }
 0x1b0   :  { %v3505_v55 = vpop.eup %3504  ;;  %3524 = vpow2.f32 %v3013_v39  ;;  %v1303_v39 = vmul.f32 %v3499_v22, %v4607_v26  ;;  %v1281_v42 = vmul.f32 0.0, %v3503_v28 }
 0x1b1   :  { %v3507_v2 = vpop.eup %3506  ;;  %3526 = vpow2.f32 %v3014_v47  ;;  %5286 = vst [vmem:[#allocation6_spill] sm:$0xff] %v4655_v12  ;;  %v1282_v21 = vmul.f32 0.0, %v3505_v55 }
 0x1b2   :  { %v3509_v6 = vpop.eup %3508  ;;  %3528 = vtanh.f32 %v4634_v34  ;;  %v1304_v48 = vmul.f32 %v3507_v2, %v4610_v33  ;;  %v4658_v58 = vadd.f32 %v1303_v39, %v1279_v14 }
 0x1b3   :  { %v3511_v63 = vpop.eup %3510  ;;  %3530 = vtanh.f32 %v4638_v24  ;;  %v1305_v45 = vmul.f32 %v3509_v6, %v4613_v50 }
 0x1b4   :  { %v3513_v57 = vpop.eup %3512  ;;  %3532 = vtanh.f32 %v4642_v37  ;;  %5287 = vst [vmem:[#allocation7_spill] sm:$0xff] %v4658_v58  ;;  %v4661_v22 = vadd.f32 %v1304_v48, %v1280_v23  ;;  %v1306_v28 = vmul.f32 %v3511_v63, %v4616_v29 }
 0x1b5   :  { %v3515_v8 = vpop.eup %3514  ;;  %v1203_v35 = vadd.f32 1.0, %v3513_v57  ;;  %3534 = vtanh.f32 %v4644_v36  ;;  %v4664_v18 = vadd.f32 %v1305_v45, %v1281_v42 }
 0x1b6   :  { %v3517_v16 = vpop.eup %3516  ;;  %v1204_v60 = vadd.f32 1.0, %v3515_v8  ;;  %3536 = vtanh.f32 %v4646_v51  ;;  %5288 = vst [vmem:[#allocation8_spill] sm:$0xff] %v4661_v22  ;;  %v4666_v33 = vadd.f32 %v1306_v28, %v1282_v21 }
 0x1b7   :  { %v3519_v38 = vpop.eup %3518  ;;  %v1205_v13 = vadd.f32 1.0, %v3517_v16  ;;  %3538 = vrcp.f32 %v1203_v35  ;;  %5289 = vst [vmem:[#allocation9_spill] sm:$0xff] %v4664_v18 }
 0x1b8   :  { %v3521_v19 = vpop.eup %3520  ;;  %v1206_v52 = vadd.f32 1.0, %v3519_v38  ;;  %3540 = vrcp.f32 %v1204_v60  ;;  %5290 = vst [vmem:[#allocation10_spill] sm:$0xff] %v4666_v33 }
 0x1b9   :  { %v3523_v59 = vpop.eup %3522  ;;  %v1207_v43 = vadd.f32 1.0, %v3521_v19  ;;  %3542 = vrcp.f32 %v1205_v13 }
 0x1ba   :  { %v3525_v54 = vpop.eup %3524  ;;  %v1208_v27 = vadd.f32 1.0, %v3523_v59  ;;  %3544 = vrcp.f32 %v1206_v52 }
 0x1bb   :  { %v3527_v47 = vpop.eup %3526  ;;  %v1209_v31 = vadd.f32 1.0, %v3525_v54  ;;  %3546 = vrcp.f32 %v1207_v43 }
 0x1bc   :  { %v3529_v46 = vpop.eup %3528  ;;  %3548 = vrcp.f32 %v1208_v27  ;;  %v1210_v41 = vadd.f32 1.0, %v3527_v47 }
 0x1bd   :  { %v3531_v26 = vpop.eup %3530  ;;  %3550 = vrcp.f32 %v1209_v31 }
 0x1be   :  { %v3533_v32 = vpop.eup %3532  ;;  %3552 = vrcp.f32 %v1210_v41 }
 0x1bf   :  { %v3535_v57 = vpop.eup %3534  ;;  %3554 = vtanh.f32 %v4655_v12 }
 0x1c0   :  { %v3537_v55 = vpop.eup %3536  ;;  %v1362_v2 = vmul.f32 %v3535_v57, %v4421_v0  ;;  %3556 = vtanh.f32 %v4658_v58 }
 0x1c1   :  { %v3539_v50 = vpop.eup %3538  ;;  %v1370_v6 = vmul.f32 %v3537_v55, %v4582_v30  ;;  %3558 = vtanh.f32 %v4661_v22 }
 0x1c2   :  { %v3541_v29 = vpop.eup %3540  ;;  %v1434_v63 = vpack.c.bf16 %v1362_v2, %v1362_v2  ;;  %3560 = vtanh.f32 %v4664_v18  ;;  %v1371_v8 = vmul.f32 %v3539_v50, %v3529_v46 }
 0x1c3   :  { %v3543_v35 = vpop.eup %3542  ;;  %v1442_v16 = vpack.c.bf16 %v1370_v6, %v1370_v6  ;;  %3562 = vtanh.f32 %v4666_v33  ;;  %v1372_v60 = vmul.f32 %v3541_v29, %v3531_v26  ;;  %v5291_v29 = vmov 0  }
 0x1c4   :  { %v3545_v53 = vpop.eup %3544  ;;  %v1482_v38 = vunpack.c.l.b16 %v1434_v63  ;;  %v1373_v0 = vmul.f32 %v3543_v35, %v3533_v32  ;;  %v1443_v52 = vpack.c.bf16 %v1371_v8, %v1371_v8 }
 0x1c5   :  { %v3547_v13 = vpop.eup %3546  ;;  %v1490_v19 = vunpack.c.l.b16 %v1442_v16  ;;  %v1444_v30 = vpack.c.bf16 %v1372_v60, %v1372_v60 }
 0x1c6   :  { %v3549_v14 = vpop.eup %3548  ;;  %v1517_v4 = vrot.slane %v1482_v38, 1  ;;  %v1445_v59 = vpack.c.bf16 %v1373_v0, %v1373_v0  ;;  %v1491_v48 = vunpack.c.l.b16 %v1443_v52 }
 0x1c7   :  { %v3551_v43 = vpop.eup %3550  ;;  %v1532_v23 = vrot.slane %v1490_v19, 1  ;;  %v1492_v39 = vunpack.c.l.b16 %v1444_v30 }
 0x1c8   :  { %v3553_v54 = vpop.eup %3552  ;;  %v1519_v27 = vsel %vm1518_vm6, %v1517_v4, %v4467_v61  ;;  %v1493_v42 = vunpack.c.l.b16 %v1445_v59 }
 0x1c9   :  { %v3555_v47 = vpop.eup %3554  ;;  %v1533_v31 = vsel %vm1518_vm6, %v1532_v23, %v4595_v44  ;;  %v1534_v21 = vrot.slane %v1492_v39, 7 }
 0x1ca   :  { %v3557_v46 = vpop.eup %3556  ;;  %v1548_v41 = vpack.c.b16 %v1533_v31, %v1519_v27  ;;  %v1374_v45 = vmul.f32 %v3555_v47, %v3545_v53  ;;  %v1536_v26 = vrot.slane %v1493_v42, 6 }
 0x1cb   :  { %v3559_v28 = vpop.eup %3558  ;;  %v1375_v32 = vmul.f32 %v3557_v46, %v3547_v13  ;;  %v1535_v57 = vsel %vm1500_vm0, %v1534_v21, %v1491_v48 }
 0x1cc   :  { %v3561_v55 = vpop.eup %3560  ;;  %1585 = vmatmul.mubr.bf16.vlgmr.msra.gmra.mrb[8].mxu0 %v1548_v41  ;;  %1636 = vmatmul.mubr.bf16.vlgmr.msra.gmra.mrb[8].mxu1 %v1548_v41  ;;  %v1376_v2 = vmul.f32 %v3559_v28, %v3549_v14  ;;  %v1446_v61 = vpack.c.bf16 %v1374_v45, %v1374_v45  ;;  %v1537_v50 = vsel %vm1503_vm1, %v1536_v26, %v1535_v57 }
 0x1cd   :  { %v3563_v6 = vpop.eup %3562  ;;  %1594 = vmatprep.mubr.bf16.mxu0 %v5291_v29  ;;  %1645 = vmatprep.mubr.bf16.mxu1 %v5291_v29  ;;  %v1377_v44 = vmul.f32 %v3561_v55, %v3551_v43  ;;  %v1447_v63 = vpack.c.bf16 %v1375_v32, %v1375_v32 }
 0x1ce   :  { %v1378_v8 = vmul.f32 %v3563_v6, %v3553_v54  ;;  %v1448_v35 = vpack.c.bf16 %v1376_v2, %v1376_v2  ;;  %v1494_v16 = vunpack.c.l.b16 %v1446_v61 }
 0x1cf   :  { %v1449_v60 = vpack.c.bf16 %v1377_v44, %v1377_v44  ;;  %v1495_v53 = vunpack.c.l.b16 %v1447_v63 }
 0x1d0   :  { %v1450_v38 = vpack.c.bf16 %v1378_v8, %v1378_v8  ;;  %v1496_v0 = vunpack.c.l.b16 %v1448_v35  ;;  %v1538_v13 = vrot.slane %v1494_v16, 5 }
 0x1d1   :  { %v1497_v19 = vunpack.c.l.b16 %v1449_v60  ;;  %v1540_v52 = vrot.slane %v1495_v53, 4 }
 0x1d2   :  { %v1498_v30 = vunpack.c.l.b16 %v1450_v38  ;;  %v1539_v14 = vsel %vm1506_vm2, %v1538_v13, %v1537_v50  ;;  %v1542_v4 = vrot.slane %v1496_v0, 3  ;;  %v3015_v38 = vld [vmem:[%s5260_s0 + $0x1] ss:$2 sm:$0xf] }
 0x1d3   :  { %v1541_v59 = vsel %vm1509_vm3, %v1540_v52, %v1539_v14  ;;  %v1544_v23 = vrot.slane %v1497_v19, 2  ;;  %v3016_v0 = vld [vmem:[%s5260_s0 + $0x9] ss:$2 sm:$0xf] }
 0x1d4   :  { %v1543_v43 = vsel %vm1512_vm4, %v1542_v4, %v1541_v59  ;;  %v1546_v39 = vrot.slane %v1498_v30, 1  ;;  %v3017_v14 = vld [vmem:[%s5260_s0 + $0x11] ss:$2 sm:$0xf] }
 0x1d5   :  { %v1545_v54 = vsel %vm1515_vm5, %v1544_v23, %v1543_v43  ;;  %v3019_v4 = vld [vmem:[%s5260_s0 + $0x21] ss:$2 sm:$0xf] }
 0x1d6   :  { %v1547_v27 = vsel %vm1518_vm6, %v1546_v39, %v1545_v54  ;;  %v3018_v54 = vld [vmem:[%s5260_s0 + $0x19] ss:$2 sm:$0xf] }
 0x1d7   :  { %v1549_v42 = vpack.c.b16 %v1547_v27, %v1547_v27  ;;  %v3020_v27 = vld [vmem:[%s5260_s0 + $0x29] ss:$2 sm:$0xf] }
 0x1d9   :  { %1595 = vmatmul.mubr.bf16.gmra.mrb[12].mxu0 %v1549_v42  ;;  %1646 = vmatmul.mubr.bf16.gmra.mrb[12].mxu1 %v1549_v42 }
 0x29f   :  { %v1586_v47 = vpop.f32.mrb[8].mxu0  ;;  %v1637_v31 = vpop.f32.mrb[8].mxu1 }
 0x2a0   :  { %v1588_v48 = vpop.f32.mrb[9].mxu0  ;;  %v1639_v21 = vpop.f32.mrb[9].mxu1 }
 0x2a1   :  { %v1666_v46 = vcombine.low %v1586_v47, %v1588_v48  ;;  %v1667_v41 = vcombine.high %v1586_v47, %v1588_v48  ;;  %v1668_v45 = vcombine.low %v1637_v31, %v1639_v21  ;;  %v1669_v26 = vcombine.high %v1637_v31, %v1639_v21  ;;  %v1590_v28 = vpop.f32.mrb[10].mxu0  ;;  %v1641_v32 = vpop.f32.mrb[10].mxu1  ;;  %v3021_v21 = vld [vmem:[%s5260_s0 + $0x31] ss:$2 sm:$0xf] }
 0x2a2   :  { %v1592_v57 = vpop.f32.mrb[11].mxu0  ;;  %v1643_v55 = vpop.f32.mrb[11].mxu1 }
 0x2a3   :  { %v1676_v2 = vrot.slane %v1666_v46, %v4136_v40  ;;  %v1683_v61 = vrot.slane %v1667_v41, %v4136_v40  ;;  %v1690_v50 = vrot.slane %v1668_v45, %v4136_v40  ;;  %v1697_v6 = vrot.slane %v1669_v26, %v4136_v40 }
 0x2a4   :  { %v1734_v29 = vcombine.low %v1590_v28, %v1592_v57  ;;  %v1735_v44 = vcombine.high %v1590_v28, %v1592_v57  ;;  %v1736_v63 = vcombine.low %v1641_v32, %v1643_v55  ;;  %v1737_v8 = vcombine.high %v1641_v32, %v1643_v55  ;;  %v3022_v28 = vld [vmem:[%s5260_s0 + $0x39] ss:$2 sm:$0xf] }
 0x2a5   :  { %v1698_v35 = vcombine.low %v1676_v2, %v1690_v50  ;;  %v1699_v16 = vcombine.high %v1676_v2, %v1690_v50  ;;  %v1700_v60 = vcombine.low %v1683_v61, %v1697_v6  ;;  %v1701_v53 = vcombine.high %v1683_v61, %v1697_v6 }
 0x2a6   :  { %v4699_v13 = vrot.slane %v1734_v29, %v4136_v40  ;;  %v4702_v19 = vrot.slane %v1735_v44, %v4136_v40  ;;  %v4705_v52 = vrot.slane %v1736_v63, %v4136_v40  ;;  %v4708_v30 = vrot.slane %v1737_v8, %v4136_v40 }
 0x2a7   :  { %v1708_v59 = vrot.slane %v1698_v35, %v4136_v40  ;;  %v1715_v23 = vrot.slane %v1700_v60, %v4136_v40  ;;  %v1722_v43 = vrot.slane %v1699_v16, %v4136_v40  ;;  %v1729_v39 = vrot.slane %v1701_v53, %v4136_v40 }
 0x2a9   :  { %v1730_v46 = vcombine.high %v1708_v59, %v1708_v59  ;;  %v1731_v41 = vcombine.high %v1715_v23, %v1715_v23  ;;  %v1732_v45 = vcombine.high %v1722_v43, %v1722_v43  ;;  %v1733_v26 = vcombine.high %v1729_v39, %v1729_v39 }
 0x2aa   :  { %v4740_v32 = vadd.f32 %v3015_v38, %v1708_v59  ;;  %v4742_v57 = vadd.f32 %v3016_v0, %v1722_v43  ;;  %v4744_v55 = vadd.f32 %v3019_v4, %v1715_v23  ;;  %v4750_v50 = vadd.f32 %v3020_v27, %v1729_v39 }
 0x2ab   :  { %v4746_v2 = vadd.f32 %v3017_v14, %v1730_v46  ;;  %v4748_v61 = vadd.f32 %v3018_v54, %v1732_v45  ;;  %v4752_v6 = vadd.f32 %v3021_v21, %v1731_v41  ;;  %v4756_v63 = vadd.f32 %v3022_v28, %v1733_v26 }
 0x2ac   :  { %v3039_v29 = vmul.f32 -1.442695, %v4740_v32  ;;  %v3040_v44 = vmul.f32 -1.442695, %v4742_v57  ;;  %v3043_v16 = vmul.f32 -1.442695, %v4744_v55 }
 0x2ad   :  { %v3041_v8 = vmul.f32 -1.442695, %v4746_v2  ;;  %v3042_v35 = vmul.f32 -1.442695, %v4748_v61  ;;  %v2086_v60 = vrot.slane %v4740_v32, 1  ;;  %v4762_v53 = vpop.f32.mrb[12].mxu0 }
 0x2ae   :  { %3564 = vpow2.f32 %v3039_v29  ;;  %v3044_v38 = vmul.f32 -1.442695, %v4750_v50  ;;  %v2087_v0 = vrot.slane %v4742_v57, 1  ;;  %v4766_v14 = vpop.f32.mrb[12].mxu1  ;;  %v4768_v4 = vpop.f32.mrb[13].mxu0  ;;  %v2088_v23 = vrot.slane %v4746_v2, 1 }
 0x2af   :  { %3566 = vpow2.f32 %v3040_v44  ;;  %v3045_v59 = vmul.f32 -1.442695, %v4752_v6  ;;  %v4772_v43 = vpop.f32.mrb[13].mxu1  ;;  %v1600_v39 = vpop.f32.mrb[14].mxu0  ;;  %v3046_v54 = vmul.f32 -1.442695, %v4756_v63 }
 0x2b0   :  { %3568 = vpow2.f32 %v3041_v8  ;;  %v2089_v27 = vrot.slane %v4748_v61, 1  ;;  %v1651_v21 = vpop.f32.mrb[14].mxu1  ;;  %v2090_v46 = vrot.slane %v4744_v55, 1  ;;  %v3063_v41 = vmul.f32 -1.442695, %v2086_v60  ;;  %v1601_v28 = vpop.f32.mrb[15].mxu0 }
 0x2b1   :  { %3570 = vpow2.f32 %v3042_v35  ;;  %v3064_v45 = vmul.f32 -1.442695, %v2087_v0  ;;  %v3065_v26 = vmul.f32 -1.442695, %v2088_v23  ;;  %v1652_v29 = vpop.f32.mrb[15].mxu1  ;;  %v2091_v0 = vrot.slane %v4750_v50, 1 }
 0x2b2   :  { %3572 = vpow2.f32 %v3043_v16  ;;  %v3066_v44 = vmul.f32 -1.442695, %v2089_v27  ;;  %v3067_v8 = vmul.f32 -1.442695, %v2090_v46  ;;  %v2357_v33 = vrot.slane %v4756_v63, 3 }
 0x2b3   :  { %3574 = vpow2.f32 %v3044_v38 }
 0x2b4   :  { %3576 = vpow2.f32 %v3045_v59 }
 0x2b5   :  { %3578 = vpow2.f32 %v3046_v54  ;;  %v2092_v54 = vrot.slane %v4752_v6, 1 }
 0x2b6   :  { %3580 = vpow2.f32 %v3063_v41  ;;  %v2093_v41 = vrot.slane %v4756_v63, 1 }
 0x2b7   :  { %3582 = vpow2.f32 %v3064_v45 }
 0x2b8   :  { %v3565_v35 = vpop.eup %3564  ;;  %3584 = vpow2.f32 %v3065_v26 }
 0x2b9   :  { %v3567_v39 = vpop.eup %3566  ;;  %v1990_v48 = vadd.f32 1.0, %v3565_v35  ;;  %3586 = vpow2.f32 %v3066_v44  ;;  %v3068_v44 = vmul.f32 -1.442695, %v2091_v0  ;;  %v3069_v35 = vmul.f32 -1.442695, %v2092_v54 }
 0x2ba   :  { %v3569_v16 = vpop.eup %3568  ;;  %v1991_v21 = vadd.f32 1.0, %v3567_v39  ;;  %3588 = vpow2.f32 %v3067_v8 }
 0x2bb   :  { %v3571_v60 = vpop.eup %3570  ;;  %v1992_v38 = vadd.f32 1.0, %v3569_v16  ;;  %3590 = vrcp.f32 %v1990_v48  ;;  %v3070_v16 = vmul.f32 -1.442695, %v2093_v41  ;;  %v2278_v41 = vrot.slane %v4740_v32, 2 }
 0x2bc   :  { %v3573_v59 = vpop.eup %3572  ;;  %v1993_v23 = vadd.f32 1.0, %v3571_v60  ;;  %3592 = vrcp.f32 %v1991_v21 }
 0x2bd   :  { %v3575_v27 = vpop.eup %3574  ;;  %v1994_v46 = vadd.f32 1.0, %v3573_v59  ;;  %3594 = vrcp.f32 %v1992_v38 }
 0x2be   :  { %v3577_v45 = vpop.eup %3576  ;;  %v1995_v26 = vadd.f32 1.0, %v3575_v27  ;;  %3596 = vrcp.f32 %v1993_v23 }
 0x2bf   :  { %v3579_v28 = vpop.eup %3578  ;;  %v1996_v29 = vadd.f32 1.0, %v3577_v45  ;;  %3598 = vrcp.f32 %v1994_v46 }
 0x2c0   :  { %v3581_v48 = vpop.eup %3580  ;;  %v1997_v8 = vadd.f32 1.0, %v3579_v28  ;;  %3600 = vrcp.f32 %v1995_v26  ;;  %v2279_v28 = vrot.slane %v4742_v57, 2 }
 0x2c1   :  { %v3583_v39 = vpop.eup %3582  ;;  %3602 = vrcp.f32 %v1996_v29  ;;  %v2206_v60 = vadd.f32 1.0, %v3581_v48 }
 0x2c2   :  { %v3585_v21 = vpop.eup %3584  ;;  %3604 = vrcp.f32 %v1997_v8  ;;  %v2207_v59 = vadd.f32 1.0, %v3583_v39 }
 0x2c3   :  { %v3587_v38 = vpop.eup %3586  ;;  %3606 = vpow2.f32 %v3068_v44  ;;  %v2208_v23 = vadd.f32 1.0, %v3585_v21  ;;  %v2280_v44 = vrot.slane %v4746_v2, 2 }
 0x2c4   :  { %v3589_v31 = vpop.eup %3588  ;;  %3608 = vpow2.f32 %v3069_v35  ;;  %v2209_v0 = vadd.f32 1.0, %v3587_v38  ;;  %v2282_v35 = vrot.slane %v4744_v55, 2  ;;  %v2350_v38 = vrot.slane %v4740_v32, 3 }
 0x2c5   :  { %v4780_v27 = vpop.eup %3590  ;;  %3610 = vpow2.f32 %v3070_v16  ;;  %v2210_v45 = vadd.f32 1.0, %v3589_v31  ;;  %v2281_v31 = vrot.slane %v4748_v61, 2  ;;  %v2353_v32 = vrot.slane %v4748_v61, 3 }
 0x2c6   :  { %v4782_v46 = vpop.eup %3592  ;;  %3612 = vrcp.f32 %v2206_v60 }
 0x2c7   :  { %v4784_v54 = vpop.eup %3594  ;;  %3614 = vrcp.f32 %v2207_v59  ;;  %v3090_v61 = vmul.f32 -1.442695, %v2353_v32 }
 0x2c8   :  { %v4787_v26 = vpop.eup %3596  ;;  %3616 = vrcp.f32 %v2208_v23 }
 0x2c9   :  { %v4790_v29 = vpop.eup %3598  ;;  %3618 = vrcp.f32 %v2209_v0  ;;  %v2283_v0 = vrot.slane %v4750_v50, 2 }
 0x2ca   :  { %v4793_v48 = vpop.eup %3600  ;;  %3620 = vrcp.f32 %v2210_v45  ;;  %v2351_v45 = vrot.slane %v4742_v57, 3  ;;  %v2356_v57 = vrot.slane %v4752_v6, 3 }
 0x2cb   :  { %v4796_v8 = vpop.eup %3602  ;;  %3622 = vtanh.f32 %v2278_v41  ;;  %v2284_v41 = vrot.slane %v4752_v6, 2 }
 0x2cc   :  { %v4799_v39 = vpop.eup %3604  ;;  %3624 = vtanh.f32 %v2279_v28  ;;  %v2352_v28 = vrot.slane %v4746_v2, 3  ;;  %v3088_v2 = vmul.f32 -1.442695, %v2351_v45  ;;  %v3093_v12 = vmul.f32 -1.442695, %v2356_v57 }
 0x2cd   :  { %v3607_v16 = vpop.eup %3606  ;;  %3626 = vtanh.f32 %v2280_v44 }
 0x2ce   :  { %v3609_v21 = vpop.eup %3608  ;;  %v2211_v60 = vadd.f32 1.0, %v3607_v16  ;;  %3628 = vtanh.f32 %v2281_v31  ;;  %v2285_v31 = vrot.slane %v4756_v63, 2  ;;  %v2354_v16 = vrot.slane %v4744_v55, 3 }
 0x2cf   :  { %v3611_v59 = vpop.eup %3610  ;;  %v2212_v23 = vadd.f32 1.0, %v3609_v21  ;;  %3630 = vtanh.f32 %v2282_v35  ;;  %v2355_v35 = vrot.slane %v4750_v50, 3 }
 0x2d0   :  { %v3613_v47 = vpop.eup %3612  ;;  %v2213_v42 = vadd.f32 1.0, %v3611_v59  ;;  %3632 = vrcp.f32 %v2211_v60  ;;  %v3087_v59 = vmul.f32 -1.442695, %v2350_v38  ;;  %v3091_v58 = vmul.f32 -1.442695, %v2354_v16 }
 0x2d1   :  { %v3615_v44 = vpop.eup %3614  ;;  %3634 = vrcp.f32 %v2212_v23  ;;  %v3089_v23 = vmul.f32 -1.442695, %v2352_v28  ;;  %v2542_v55 = vmul.f32 %v3613_v47, %v4274_v10  ;;  %v3092_v50 = vmul.f32 -1.442695, %v2355_v35 }
 0x2d2   :  { %v3617_v21 = vpop.eup %3616  ;;  %3636 = vrcp.f32 %v2213_v42  ;;  %v2543_v6 = vmul.f32 %v3615_v44, %v4278_v49  ;;  %v5292_v16 = vcombine.low %v4699_v13, %v4705_v52 }
 0x2d3   :  { %v3619_v60 = vpop.eup %3618  ;;  %3638 = vtanh.f32 %v2283_v0  ;;  %v3094_v0 = vmul.f32 -1.442695, %v2357_v33  ;;  %v2544_v63 = vmul.f32 %v3617_v21, %v4295_v20  ;;  %v1802_v33 = vcombine.low %v4762_v53, %v4768_v4 }
 0x2d4   :  { %v3621_v18 = vpop.eup %3620  ;;  %3640 = vtanh.f32 %v2284_v41  ;;  %v2545_v28 = vmul.f32 %v3619_v60, %v4297_v15  ;;  %v1803_v15 = vcombine.high %v4762_v53, %v4768_v4  ;;  %v1805_v53 = vcombine.high %v4766_v14, %v4772_v43 }
 0x2d5   :  { %v3623_v22 = vpop.eup %3622  ;;  %3642 = vtanh.f32 %v2285_v31  ;;  %v2546_v31 = vmul.f32 %v3621_v18, %v4306_v17  ;;  %v1776_v21 = vrot.slane %v5292_v16, %v4136_v40 }
 0x2d6   :  { %v3625_v42 = vpop.eup %3624  ;;  %3644 = vpow2.f32 %v3087_v59  ;;  %v2566_v45 = vmul.f32 %v3623_v22, %v4780_v27  ;;  %v4831_v27 = vrot.slane %v1802_v33, %v4136_v40  ;;  %v4858_v59 = vrot.slane %v1805_v53, %v4136_v40  ;;  %v3026_v33 = vld [vmem:[%s5260_s0 + $0x59] ss:$2 sm:$0xf] }
 0x2d7   :  { %v3627_v38 = vpop.eup %3626  ;;  %3646 = vpow2.f32 %v3088_v2  ;;  %v2567_v10 = vmul.f32 %v3625_v42, %v4782_v46  ;;  %v1804_v46 = vcombine.low %v4766_v14, %v4772_v43  ;;  %v5293_v14 = vcombine.high %v4699_v13, %v4705_v52 }
 0x2d8   :  { %v3629_v41 = vpop.eup %3628  ;;  %3648 = vpow2.f32 %v3089_v23  ;;  %v2568_v32 = vmul.f32 %v3627_v38, %v4784_v54  ;;  %v2590_v49 = vadd.f32 %v2566_v45, %v2542_v55  ;;  %v3023_v55 = vld [vmem:[%s5260_s0 + $0x41] ss:$2 sm:$0xf]  ;;  %v5294_v38 = vcombine.low %v4702_v19, %v4708_v30 }
 0x2d9   :  { %v3631_v47 = vpop.eup %3630  ;;  %3650 = vpow2.f32 %v3090_v61  ;;  %v2569_v20 = vmul.f32 %v3629_v41, %v4787_v26  ;;  %v2591_v22 = vadd.f32 %v2567_v10, %v2543_v6  ;;  %v4838_v26 = vrot.slane %v1803_v15, %v4136_v40  ;;  %v3024_v6 = vld [vmem:[%s5260_s0 + $0x49] ss:$2 sm:$0xf] }
 0x2da   :  { %v4822_v44 = vpop.eup %3632  ;;  %3652 = vpow2.f32 %v3091_v58  ;;  %v2570_v18 = vmul.f32 %v3631_v47, %v4790_v29  ;;  %v2592_v58 = vadd.f32 %v2568_v32, %v2544_v63  ;;  %v4849_v35 = vrot.slane %v1804_v46, %v4136_v40 }
 0x2db   :  { %v4827_v17 = vpop.eup %3634  ;;  %3654 = vpow2.f32 %v3092_v50  ;;  %v2593_v29 = vadd.f32 %v2569_v20, %v2545_v28  ;;  %v1790_v43 = vrot.slane %v5293_v14, %v4136_v40  ;;  %v1798_v63 = vcombine.high %v1776_v21, %v1776_v21  ;;  %v3025_v28 = vld [vmem:[%s5260_s0 + $0x51] ss:$2 sm:$0xf] }
 0x2dc   :  { %v4835_v54 = vpop.eup %3636  ;;  %3656 = vpow2.f32 %v3093_v12  ;;  %v2594_v57 = vadd.f32 %v2570_v18, %v2546_v31  ;;  %v5295_v31 = vcombine.high %v4702_v19, %v4708_v30  ;;  %v4890_v20 = vadd.f32 %v3023_v55, %v1776_v21  ;;  %v3027_v18 = vld [vmem:[%s5260_s0 + $0x61] ss:$2 sm:$0xf] }
 0x2dd   :  { %v4842_v4 = vpop.eup %3638  ;;  %3658 = vpow2.f32 %v3094_v0  ;;  %v1783_v0 = vrot.slane %v5294_v38, %v4136_v40  ;;  %v1800_v47 = vcombine.high %v1790_v43, %v1790_v43  ;;  %v4895_v46 = vadd.f32 %v3024_v6, %v1790_v43 }
 0x2de   :  { %v4851_v12 = vpop.eup %3640  ;;  %3660 = vtanh.f32 %v2590_v49  ;;  %v1797_v10 = vrot.slane %v5295_v31, %v4136_v40  ;;  %v3047_v6 = vmul.f32 -1.442695, %v4890_v20 }
 0x2df   :  { %v4860_v60 = vpop.eup %3642  ;;  %3662 = vtanh.f32 %v2591_v22  ;;  %v1799_v53 = vcombine.high %v1783_v0, %v1783_v0  ;;  %v4905_v43 = vadd.f32 %v3026_v33, %v1800_v47 }
 0x2e0   :  { %v3645_v61 = vpop.eup %3644  ;;  %3664 = vtanh.f32 %v2592_v58  ;;  %v3028_v58 = vld [vmem:[%s5260_s0 + $0x69] ss:$2 sm:$0xf]  ;;  %v1801_v14 = vcombine.high %v1797_v10, %v1797_v10 }
 0x2e1   :  { %v3647_v42 = vpop.eup %3646  ;;  %v2470_v50 = vadd.f32 1.0, %v3645_v61  ;;  %3666 = vtanh.f32 %v2593_v29  ;;  %v4900_v29 = vadd.f32 %v3025_v28, %v1798_v63 }
 0x2e2   :  { %v3649_v45 = vpop.eup %3648  ;;  %v2471_v41 = vadd.f32 1.0, %v3647_v42  ;;  %3668 = vtanh.f32 %v2594_v57  ;;  %v3029_v57 = vld [vmem:[%s5260_s0 + $0x71] ss:$2 sm:$0xf] }
 0x2e3   :  { %v3651_v32 = vpop.eup %3650  ;;  %v2472_v49 = vadd.f32 1.0, %v3649_v45  ;;  %3670 = vrcp.f32 %v2470_v50  ;;  %v3030_v42 = vld [vmem:[%s5260_s0 + $0x79] ss:$2 sm:$0xf]  ;;  %v4910_v50 = vadd.f32 %v3027_v18, %v1783_v0  ;;  %v4915_v45 = vadd.f32 %v3028_v58, %v1797_v10 }
 0x2e4   :  { %v3653_v22 = vpop.eup %3652  ;;  %v2473_v15 = vadd.f32 1.0, %v3651_v32  ;;  %3672 = vrcp.f32 %v2471_v41  ;;  %v3048_v41 = vmul.f32 -1.442695, %v4895_v46  ;;  %v4920_v31 = vadd.f32 %v3029_v57, %v1799_v53 }
 0x2e5   :  { %v3655_v19 = vpop.eup %3654  ;;  %v2474_v30 = vadd.f32 1.0, %v3653_v22  ;;  %3674 = vrcp.f32 %v2472_v49  ;;  %v3049_v47 = vmul.f32 -1.442695, %v4900_v29  ;;  %v4925_v0 = vadd.f32 %v3030_v42, %v1801_v14 }
 0x2e6   :  { %v3657_v16 = vpop.eup %3656  ;;  %v2475_v21 = vadd.f32 1.0, %v3655_v19  ;;  %3676 = vrcp.f32 %v2473_v15  ;;  %v3050_v49 = vmul.f32 -1.442695, %v4905_v43  ;;  %v3051_v10 = vmul.f32 -1.442695, %v4910_v50 }
 0x2e7   :  { %v3659_v61 = vpop.eup %3658  ;;  %v2476_v55 = vadd.f32 1.0, %v3657_v16  ;;  %3678 = vrcp.f32 %v2474_v30  ;;  %v2094_v22 = vrot.slane %v4890_v20, 1  ;;  %v3052_v18 = vmul.f32 -1.442695, %v4915_v45 }
 0x2e8   :  { %v4913_v38 = vpop.eup %3660  ;;  %v2477_v63 = vadd.f32 1.0, %v3659_v61  ;;  %3680 = vrcp.f32 %v2475_v21  ;;  %v2095_v19 = vrot.slane %v4895_v46, 1  ;;  %v3053_v58 = vmul.f32 -1.442695, %v4920_v31 }
 0x2e9   :  { %v4918_v28 = vpop.eup %3662  ;;  %3682 = vrcp.f32 %v2476_v55  ;;  %v2096_v53 = vrot.slane %v4900_v29, 1  ;;  %v3054_v21 = vmul.f32 -1.442695, %v4925_v0  ;;  %v2097_v57 = vrot.slane %v4905_v43, 1 }
 0x2ea   :  { %v4923_v32 = vpop.eup %3664  ;;  %3684 = vrcp.f32 %v2477_v63  ;;  %v2098_v61 = vrot.slane %v4910_v50, 1  ;;  %v3071_v55 = vmul.f32 -1.442695, %v2094_v22 }
 0x2eb   :  { %v4928_v33 = vpop.eup %3666  ;;  %3686 = vpow2.f32 %v3047_v6  ;;  %v3072_v6 = vmul.f32 -1.442695, %v2095_v19 }
 0x2ec   :  { %v4932_v15 = vpop.eup %3668  ;;  %3688 = vpow2.f32 %v3048_v41  ;;  %v3073_v41 = vmul.f32 -1.442695, %v2096_v53  ;;  %v3075_v13 = vmul.f32 -1.442695, %v2098_v61  ;;  %v2100_v61 = vrot.slane %v4920_v31, 1 }
 0x2ed   :  { %v4936_v30 = vpop.eup %3670  ;;  %3690 = vpow2.f32 %v3049_v47 }
 0x2ee   :  { %v4940_v16 = vpop.eup %3672  ;;  %3692 = vpow2.f32 %v3050_v49  ;;  %v3074_v49 = vmul.f32 -1.442695, %v2097_v57 }
 0x2ef   :  { %v4944_v14 = vpop.eup %3674  ;;  %3694 = vpow2.f32 %v3051_v10 }
 0x2f0   :  { %v4947_v42 = vpop.eup %3676  ;;  %3696 = vpow2.f32 %v3052_v18 }
 0x2f1   :  { %v4949_v63 = vpop.eup %3678  ;;  %3698 = vpow2.f32 %v3053_v58 }
 0x2f2   :  { %v4951_v47 = vpop.eup %3680  ;;  %3700 = vpow2.f32 %v3054_v21  ;;  %v2099_v21 = vrot.slane %v4915_v45, 1 }
 0x2f3   :  { %5296 = vst [vmem:[#allocation11_spill] sm:$0xff] %v4951_v47  ;;  %v4953_v52 = vpop.eup %3682  ;;  %3702 = vpow2.f32 %v3071_v55 }
 0x2f4   :  { %5297 = vst [vmem:[#allocation12_spill] sm:$0xff] %v4953_v52  ;;  %v4955_v10 = vpop.eup %3684  ;;  %3704 = vpow2.f32 %v3072_v6 }
 0x2f5   :  { %5298 = vst [vmem:[#allocation13_spill] sm:$0xff] %v4955_v10  ;;  %v3687_v22 = vpop.eup %3686  ;;  %3706 = vpow2.f32 %v3073_v41  ;;  %v2101_v41 = vrot.slane %v4925_v0, 1 }
 0x2f6   :  { %v3689_v23 = vpop.eup %3688  ;;  %v1998_v18 = vadd.f32 1.0, %v3687_v22  ;;  %3708 = vpow2.f32 %v3074_v49 }
 0x2f7   :  { %v3691_v19 = vpop.eup %3690  ;;  %v1999_v2 = vadd.f32 1.0, %v3689_v23  ;;  %3710 = vpow2.f32 %v3075_v13 }
 0x2f8   :  { %v3693_v58 = vpop.eup %3692  ;;  %v2000_v53 = vadd.f32 1.0, %v3691_v19  ;;  %3712 = vrcp.f32 %v1998_v18  ;;  %v3076_v19 = vmul.f32 -1.442695, %v2099_v21  ;;  %v5277_v18 = vmov 0.0  }
 0x2f9   :  { %v3695_v57 = vpop.eup %3694  ;;  %v2001_v52 = vadd.f32 1.0, %v3693_v58  ;;  %3714 = vrcp.f32 %v1999_v2  ;;  %3120 = vmatprep.subr.bf16.mxu0 %v5277_v18  ;;  %v3077_v2 = vmul.f32 -1.442695, %v2100_v61  ;;  %3124 = vmatprep.mubr.msk.bf16.mxu0 %vm3951_vm7, %v5277_v18 }
 0x2fa   :  { %v3697_v55 = vpop.eup %3696  ;;  %v2002_v6 = vadd.f32 1.0, %v3695_v57  ;;  %3716 = vrcp.f32 %v2000_v53  ;;  %v3078_v57 = vmul.f32 -1.442695, %v2101_v41 }
 0x2fb   :  { %v3699_v22 = vpop.eup %3698  ;;  %v2003_v49 = vadd.f32 1.0, %v3697_v55  ;;  %3718 = vrcp.f32 %v2001_v52  ;;  %v2286_v55 = vrot.slane %v4890_v20, 2 }
 0x2fc   :  { %v3701_v23 = vpop.eup %3700  ;;  %v2004_v13 = vadd.f32 1.0, %v3699_v22  ;;  %3720 = vrcp.f32 %v2002_v6  ;;  %v2287_v22 = vrot.slane %v4895_v46, 2 }
 0x2fd   :  { %v3703_v10 = vpop.eup %3702  ;;  %v2005_v58 = vadd.f32 1.0, %v3701_v23  ;;  %3722 = vrcp.f32 %v2003_v49  ;;  %v2638_v49 = vmul.f32 %v4936_v30, %v4913_v38  ;;  %v2642_v38 = vmul.f32 %v4949_v63, %v4932_v15 }
 0x2fe   :  { %v3705_v47 = vpop.eup %3704  ;;  %3724 = vrcp.f32 %v2004_v13  ;;  %v2214_v51 = vadd.f32 1.0, %v3703_v10  ;;  %v2639_v10 = vmul.f32 %v4940_v16, %v4918_v28 }
 0x2ff   :  { %v3707_v53 = vpop.eup %3706  ;;  %3726 = vrcp.f32 %v2005_v58  ;;  %v2215_v52 = vadd.f32 1.0, %v3705_v47  ;;  %v2640_v47 = vmul.f32 %v4944_v14, %v4923_v32  ;;  %v2683_v58 = vpack.c.bf16 %v2638_v49, %v2638_v49 }
 0x300   :  { %v3709_v25 = vpop.eup %3708  ;;  %3728 = vpow2.f32 %v3076_v19  ;;  %v2216_v21 = vadd.f32 1.0, %v3707_v53  ;;  %v2641_v19 = vmul.f32 %v4947_v42, %v4928_v33  ;;  %v2289_v33 = vrot.slane %v4905_v43, 2 }
 0x301   :  { %v3711_v6 = vpop.eup %3710  ;;  %3730 = vpow2.f32 %v3077_v2  ;;  %v2217_v41 = vadd.f32 1.0, %v3709_v25  ;;  %v2288_v25 = vrot.slane %v4900_v29, 2  ;;  %v2684_v2 = vpack.c.bf16 %v2639_v10, %v2639_v10 }
 0x302   :  { %v4965_v61 = vpop.eup %3712  ;;  %3732 = vpow2.f32 %v3078_v57  ;;  %v2218_v23 = vadd.f32 1.0, %v3711_v6  ;;  %v2686_v16 = vpack.c.bf16 %v2641_v19, %v2641_v19  ;;  %v2687_v57 = vpack.c.bf16 %v2642_v38, %v2642_v38 }
 0x303   :  { %v4969_v13 = vpop.eup %3714  ;;  %3734 = vrcp.f32 %v2214_v51  ;;  %v2685_v51 = vpack.c.bf16 %v2640_v47, %v2640_v47  ;;  %v2732_v14 = vunpack.c.l.b16 %v2684_v2  ;;  %v2290_v6 = vrot.slane %v4910_v50, 2 }
 0x304   :  { %v4977_v30 = vpop.eup %3716  ;;  %3736 = vrcp.f32 %v2215_v52  ;;  %v2734_v63 = vunpack.c.l.b16 %v2686_v16  ;;  %v2735_v53 = vunpack.c.l.b16 %v2687_v57  ;;  %v2291_v10 = vrot.slane %v4915_v45, 2 }
 0x305   :  { %v4980_v28 = vpop.eup %3718  ;;  %3738 = vrcp.f32 %v2216_v21  ;;  %v2733_v42 = vunpack.c.l.b16 %v2685_v51  ;;  %v2731_v21 = vunpack.c.l.b16 %v2683_v58  ;;  %v2755_v49 = vrot.slane %v2732_v14, 7 }
 0x306   :  { %v4982_v32 = vpop.eup %3720  ;;  %3740 = vrcp.f32 %v2217_v41  ;;  %v2292_v38 = vrot.slane %v4920_v31, 2  ;;  %v2358_v2 = vrot.slane %v4890_v20, 3  ;;  %v2761_v58 = vrot.slane %v2735_v53, 4 }
 0x307   :  { %v4985_v15 = vpop.eup %3722  ;;  %3742 = vrcp.f32 %v2218_v23  ;;  %v2757_v47 = vrot.slane %v2733_v42, 6  ;;  %v2759_v23 = vrot.slane %v2734_v63, 5  ;;  %v2756_v51 = vsel %vm1500_vm0, %v2755_v49, %v2731_v21 }
 0x308   :  { %v4988_v52 = vpop.eup %3724  ;;  %3744 = vtanh.f32 %v2286_v55  ;;  %v2360_v20 = vrot.slane %v4900_v29, 3  ;;  %v2361_v53 = vrot.slane %v4905_v43, 3 }
 0x309   :  { %v4991_v41 = vpop.eup %3726  ;;  %3746 = vtanh.f32 %v2287_v22  ;;  %v2758_v55 = vsel %vm1503_vm1, %v2757_v47, %v2756_v51  ;;  %v2359_v22 = vrot.slane %v4895_v46, 3  ;;  %v2362_v46 = vrot.slane %v4910_v50, 3 }
 0x30a   :  { %5299 = vst [vmem:[#allocation14_spill] sm:$0xff] %v4991_v41  ;;  %v3729_v19 = vpop.eup %3728  ;;  %3748 = vtanh.f32 %v2288_v25  ;;  %v2760_v42 = vsel %vm1506_vm2, %v2759_v23, %v2758_v55  ;;  %v2363_v23 = vrot.slane %v4915_v45, 3  ;;  %v2364_v51 = vrot.slane %v4920_v31, 3 }
 0x30b   :  { %v3731_v16 = vpop.eup %3730  ;;  %v2219_v57 = vadd.f32 1.0, %v3729_v19  ;;  %3750 = vtanh.f32 %v2289_v33  ;;  %v5002_v25 = vsel %vm1509_vm3, %v2761_v58, %v2760_v42  ;;  %v2293_v33 = vrot.slane %v4925_v0, 2 }
 0x30c   :  { %v3733_v14 = vpop.eup %3732  ;;  %v2220_v18 = vadd.f32 1.0, %v3731_v16  ;;  %3752 = vtanh.f32 %v2290_v6  ;;  %v3095_v6 = vmul.f32 -1.442695, %v2358_v2  ;;  %v3096_v19 = vmul.f32 -1.442695, %v2359_v22 }
 0x30d   :  { %v3735_v63 = vpop.eup %3734  ;;  %v2221_v41 = vadd.f32 1.0, %v3733_v14  ;;  %3754 = vrcp.f32 %v2219_v57  ;;  %v3097_v16 = vmul.f32 -1.442695, %v2360_v20  ;;  %v2365_v57 = vrot.slane %v4925_v0, 3 }
 0x30e   :  { %v3737_v21 = vpop.eup %3736  ;;  %3756 = vrcp.f32 %v2220_v18  ;;  %v3098_v43 = vmul.f32 -1.442695, %v2361_v53  ;;  %v2550_v50 = vmul.f32 %v3735_v63, %v4482_v62 }
 0x30f   :  { %v3739_v49 = vpop.eup %3738  ;;  %3758 = vrcp.f32 %v2221_v41  ;;  %v3099_v41 = vmul.f32 -1.442695, %v2362_v46  ;;  %v2551_v45 = vmul.f32 %v3737_v21, %v4485_v5  ;;  %v3102_v0 = vmul.f32 -1.442695, %v2365_v57 }
 0x310   :  { %v3741_v47 = vpop.eup %3740  ;;  %3760 = vtanh.f32 %v2291_v10  ;;  %v3100_v10 = vmul.f32 -1.442695, %v2363_v23  ;;  %v2552_v31 = vmul.f32 %v3739_v49, %v4490_v56 }
 0x311   :  { %v3743_v29 = vpop.eup %3742  ;;  %3762 = vtanh.f32 %v2292_v38  ;;  %v3101_v38 = vmul.f32 -1.442695, %v2364_v51  ;;  %v2553_v42 = vmul.f32 %v3741_v47, %v4492_v7 }
 0x312   :  { %v3745_v18 = vpop.eup %3744  ;;  %3764 = vtanh.f32 %v2293_v33  ;;  %v2554_v63 = vmul.f32 %v3743_v29, %v4502_v1  ;;  %v5300_v1 = vcombine.low %v4831_v27, %v4849_v35  ;;  %v3031_v29 = vld [vmem:[%s5260_s0 + $0x81] ss:$2 sm:$0xf] }
 0x313   :  { %v3747_v55 = vpop.eup %3746  ;;  %3766 = vpow2.f32 %v3095_v6  ;;  %v2574_v14 = vmul.f32 %v3745_v18, %v4965_v61  ;;  %v3032_v18 = vld [vmem:[%s5260_s0 + $0x89] ss:$2 sm:$0xf] }
 0x314   :  { %v3749_v2 = vpop.eup %3748  ;;  %3768 = vpow2.f32 %v3096_v19  ;;  %v2575_v20 = vmul.f32 %v3747_v55, %v4969_v13 }
 0x315   :  { %v3751_v58 = vpop.eup %3750  ;;  %3770 = vpow2.f32 %v3097_v16  ;;  %v2576_v5 = vmul.f32 %v3749_v2, %v4977_v30  ;;  %v2598_v21 = vadd.f32 %v2574_v14, %v2550_v50  ;;  %v1844_v30 = vrot.slane %v5300_v1, %v4136_v40  ;;  %v3038_v1 = vld [vmem:[%s5260_s0 + $0xb9] ss:$2 sm:$0xf] }
 0x316   :  { %v3753_v22 = vpop.eup %3752  ;;  %3772 = vpow2.f32 %v3098_v43  ;;  %v2577_v56 = vmul.f32 %v3751_v58, %v4980_v28  ;;  %v2599_v61 = vadd.f32 %v2575_v20, %v2551_v45  ;;  %v5301_v28 = vcombine.high %v4831_v27, %v4849_v35 }
 0x317   :  { %v5016_v62 = vpop.eup %3754  ;;  %3774 = vpow2.f32 %v3099_v41  ;;  %v2578_v7 = vmul.f32 %v3753_v22, %v4982_v32  ;;  %v2600_v13 = vadd.f32 %v2576_v5, %v2552_v31  ;;  %v5302_v27 = vcombine.low %v4838_v26, %v4858_v59  ;;  %v3033_v41 = vld [vmem:[%s5260_s0 + $0x91] ss:$2 sm:$0xf] }
 0x318   :  { %v5020_v33 = vpop.eup %3756  ;;  %3776 = vpow2.f32 %v3100_v10  ;;  %v2601_v46 = vadd.f32 %v2577_v56, %v2553_v42  ;;  %v1858_v23 = vrot.slane %v5301_v28, %v4136_v40  ;;  %v1866_v57 = vcombine.high %v1844_v30, %v1844_v30  ;;  %v3037_v56 = vld [vmem:[%s5260_s0 + $0xb1] ss:$2 sm:$0xf] }
 0x319   :  { %v5023_v53 = vpop.eup %3758  ;;  %3778 = vpow2.f32 %v3101_v38  ;;  %v2602_v47 = vadd.f32 %v2578_v7, %v2554_v63  ;;  %v1851_v35 = vrot.slane %v5302_v27, %v4136_v40  ;;  %v5303_v50 = vcombine.high %v4838_v26, %v4858_v59  ;;  %v3034_v38 = vld [vmem:[%s5260_s0 + $0x99] ss:$2 sm:$0xf]  ;;  %v3036_v59 = vld [vmem:[%s5260_s0 + $0xa9] ss:$2 sm:$0xf] }
 0x31a   :  { %v5026_v49 = vpop.eup %3760  ;;  %3780 = vpow2.f32 %v3102_v0  ;;  %v1868_v10 = vcombine.high %v1858_v23, %v1858_v23  ;;  %v5060_v31 = vadd.f32 %v3031_v29, %v1844_v30  ;;  %v3035_v0 = vld [vmem:[%s5260_s0 + $0xa1] ss:$2 sm:$0xf]  ;;  %v5065_v42 = vadd.f32 %v3032_v18, %v1858_v23 }
 0x31b   :  { %v5032_v6 = vpop.eup %3762  ;;  %3782 = vtanh.f32 %v2598_v21  ;;  %v1865_v2 = vrot.slane %v5303_v50, %v4136_v40  ;;  %v1867_v20 = vcombine.high %v1851_v35, %v1851_v35  ;;  %v5070_v63 = vadd.f32 %v3033_v41, %v1866_v57 }
 0x31c   :  { %v5038_v32 = vpop.eup %3764  ;;  %3784 = vtanh.f32 %v2599_v61  ;;  %v5075_v7 = vadd.f32 %v3034_v38, %v1868_v10  ;;  %v5080_v30 = vadd.f32 %v3035_v0, %v1851_v35  ;;  %v3056_v29 = vmul.f32 -1.442695, %v5065_v42 }
 0x31d   :  { %v3767_v19 = vpop.eup %3766  ;;  %3786 = vtanh.f32 %v2600_v13  ;;  %v1869_v61 = vcombine.high %v1865_v2, %v1865_v2  ;;  %v3057_v18 = vmul.f32 -1.442695, %v5070_v63  ;;  %v2102_v41 = vrot.slane %v5060_v31, 1 }
 0x31e   :  { %v3769_v51 = vpop.eup %3768  ;;  %v2478_v16 = vadd.f32 1.0, %v3767_v19  ;;  %3788 = vtanh.f32 %v2601_v46  ;;  %v5083_v19 = vadd.f32 %v3036_v59, %v1865_v2  ;;  %v3058_v35 = vmul.f32 -1.442695, %v5075_v7 }
 0x31f   :  { %v3771_v43 = vpop.eup %3770  ;;  %v2479_v55 = vadd.f32 1.0, %v3769_v51  ;;  %3790 = vtanh.f32 %v2602_v47  ;;  %v3055_v47 = vmul.f32 -1.442695, %v5060_v31  ;;  %v5089_v57 = vadd.f32 %v3038_v1, %v1869_v61 }
 0x320   :  { %v3773_v45 = vpop.eup %3772  ;;  %v2480_v58 = vadd.f32 1.0, %v3771_v43  ;;  %3792 = vrcp.f32 %v2478_v16  ;;  %v5086_v16 = vadd.f32 %v3037_v56, %v1867_v20  ;;  %v3060_v2 = vmul.f32 -1.442695, %v5083_v19 }
 0x321   :  { %v3775_v14 = vpop.eup %3774  ;;  %v2481_v22 = vadd.f32 1.0, %v3773_v45  ;;  %3794 = vrcp.f32 %v2479_v55  ;;  %v3059_v55 = vmul.f32 -1.442695, %v5080_v30  ;;  %v2103_v10 = vrot.slane %v5065_v42, 1 }
 0x322   :  { %v3777_v40 = vpop.eup %3776  ;;  %v2482_v26 = vadd.f32 1.0, %v3775_v14  ;;  %3796 = vrcp.f32 %v2480_v58  ;;  %v2104_v45 = vrot.slane %v5070_v63, 1  ;;  %v3061_v38 = vmul.f32 -1.442695, %v5086_v16 }
 0x323   :  { %v3779_v5 = vpop.eup %3778  ;;  %v2483_v21 = vadd.f32 1.0, %v3777_v40  ;;  %3798 = vrcp.f32 %v2481_v22  ;;  %v3062_v22 = vmul.f32 -1.442695, %v5089_v57  ;;  %v2105_v0 = vrot.slane %v5075_v7, 1 }
 0x324   :  { %v3781_v13 = vpop.eup %3780  ;;  %v2484_v46 = vadd.f32 1.0, %v3779_v5  ;;  %3800 = vrcp.f32 %v2482_v26  ;;  %v2106_v59 = vrot.slane %v5080_v30, 1  ;;  %v3079_v20 = vmul.f32 -1.442695, %v2102_v41 }
 0x325   :  { %v3783_v28 = vpop.eup %3782  ;;  %v2485_v23 = vadd.f32 1.0, %v3781_v13  ;;  %3802 = vrcp.f32 %v2483_v21  ;;  %v3080_v56 = vmul.f32 -1.442695, %v2103_v10  ;;  %v3081_v61 = vmul.f32 -1.442695, %v2104_v45 }
 0x326   :  { %v3785_v51 = vpop.eup %3784  ;;  %3804 = vrcp.f32 %v2484_v46 }
 0x327   :  { %v3787_v27 = vpop.eup %3786  ;;  %3806 = vrcp.f32 %v2485_v23 }
 0x328   :  { %v3789_v43 = vpop.eup %3788  ;;  %3808 = vpow2.f32 %v3055_v47 }
 0x329   :  { %v3791_v50 = vpop.eup %3790  ;;  %3810 = vpow2.f32 %v3056_v29 }
 0x32a   :  { %v3793_v58 = vpop.eup %3792  ;;  %3812 = vpow2.f32 %v3057_v18 }
 0x32b   :  { %v3795_v14 = vpop.eup %3794  ;;  %3814 = vpow2.f32 %v3058_v35  ;;  %v2646_v40 = vmul.f32 %v3793_v58, %v3783_v28  ;;  %v3082_v28 = vmul.f32 -1.442695, %v2105_v0 }
 0x32c   :  { %v3797_v26 = vpop.eup %3796  ;;  %3816 = vpow2.f32 %v3059_v55  ;;  %v2647_v5 = vmul.f32 %v3795_v14, %v3785_v51  ;;  %v3083_v51 = vmul.f32 -1.442695, %v2106_v59 }
 0x32d   :  { %v3799_v21 = vpop.eup %3798  ;;  %3818 = vpow2.f32 %v3060_v2  ;;  %v2648_v13 = vmul.f32 %v3797_v26, %v3787_v27  ;;  %v2691_v47 = vpack.c.bf16 %v2646_v40, %v2646_v40  ;;  %v2107_v27 = vrot.slane %v5083_v19, 1 }
 0x32e   :  { %v3801_v46 = vpop.eup %3800  ;;  %3820 = vpow2.f32 %v3061_v38  ;;  %v2649_v1 = vmul.f32 %v3799_v21, %v3789_v43  ;;  %v2692_v23 = vpack.c.bf16 %v2647_v5, %v2647_v5 }
 0x32f   :  { %v5101_v29 = vpop.eup %3802  ;;  %3822 = vpow2.f32 %v3062_v22  ;;  %v2650_v18 = vmul.f32 %v3801_v46, %v3791_v50  ;;  %v2693_v35 = vpack.c.bf16 %v2648_v13, %v2648_v13  ;;  %v2739_v38 = vunpack.c.l.b16 %v2691_v47 }
 0x330   :  { %v5103_v55 = vpop.eup %3804  ;;  %3824 = vpow2.f32 %v3079_v20  ;;  %v2694_v41 = vpack.c.bf16 %v2649_v1, %v2649_v1  ;;  %v2740_v2 = vunpack.c.l.b16 %v2692_v23  ;;  %v2108_v23 = vrot.slane %v5086_v16, 1 }
 0x331   :  { %v5105_v10 = vpop.eup %3806  ;;  %3826 = vpow2.f32 %v3080_v56  ;;  %v2695_v43 = vpack.c.bf16 %v2650_v18, %v2650_v18  ;;  %v2741_v45 = vunpack.c.l.b16 %v2693_v35 }
 0x332   :  { %v3809_v58 = vpop.eup %3808  ;;  %3828 = vpow2.f32 %v3081_v61  ;;  %v2742_v14 = vunpack.c.l.b16 %v2694_v41  ;;  %v2769_v22 = vrot.slane %v2740_v2, 7 }
 0x333   :  { %v3811_v50 = vpop.eup %3810  ;;  %v2006_v0 = vadd.f32 1.0, %v3809_v58  ;;  %3830 = vpow2.f32 %v3082_v28  ;;  %v2743_v40 = vunpack.c.l.b16 %v2695_v43  ;;  %v2771_v26 = vrot.slane %v2741_v45, 6 }
 0x334   :  { %v3813_v59 = vpop.eup %3812  ;;  %v2007_v20 = vadd.f32 1.0, %v3811_v50  ;;  %3832 = vpow2.f32 %v3083_v51  ;;  %v2770_v5 = vsel %vm1500_vm0, %v2769_v22, %v2739_v38  ;;  %v2773_v21 = vrot.slane %v2742_v14, 5 }
 0x335   :  { %v3815_v13 = vpop.eup %3814  ;;  %v2008_v56 = vadd.f32 1.0, %v3813_v59  ;;  %3834 = vrcp.f32 %v2006_v0  ;;  %v2772_v46 = vsel %vm1503_vm1, %v2771_v26, %v2770_v5  ;;  %v2775_v61 = vrot.slane %v2743_v40, 4 }
 0x336   :  { %v3817_v1 = vpop.eup %3816  ;;  %v2009_v47 = vadd.f32 1.0, %v3815_v13  ;;  %3836 = vrcp.f32 %v2007_v20  ;;  %v2774_v28 = vsel %vm1506_vm2, %v2773_v21, %v2772_v46  ;;  %v2109_v51 = vrot.slane %v5089_v57, 1 }
 0x337   :  { %v3819_v18 = vpop.eup %3818  ;;  %v2010_v35 = vadd.f32 1.0, %v3817_v1  ;;  %3838 = vrcp.f32 %v2008_v56  ;;  %v5114_v41 = vsel %vm1509_vm3, %v2775_v61, %v2774_v28  ;;  %v3084_v38 = vmul.f32 -1.442695, %v2107_v27 }
 0x338   :  { %v3821_v2 = vpop.eup %3820  ;;  %v2011_v43 = vadd.f32 1.0, %v3819_v18  ;;  %3840 = vrcp.f32 %v2009_v47  ;;  %v3085_v50 = vmul.f32 -1.442695, %v2108_v23  ;;  %v3086_v40 = vmul.f32 -1.442695, %v2109_v51 }
 0x339   :  { %v3823_v45 = vpop.eup %3822  ;;  %v2012_v58 = vadd.f32 1.0, %v3821_v2  ;;  %3842 = vrcp.f32 %v2010_v35  ;;  %v2294_v47 = vrot.slane %v5060_v31, 2  ;;  %v2295_v28 = vrot.slane %v5065_v42, 2 }
 0x33a   :  { %v3825_v14 = vpop.eup %3824  ;;  %v2013_v22 = vadd.f32 1.0, %v3823_v45  ;;  %3844 = vrcp.f32 %v2011_v43  ;;  %v2296_v35 = vrot.slane %v5070_v63, 2  ;;  %v2297_v2 = vrot.slane %v5075_v7, 2 }
 0x33b   :  { %v3827_v0 = vpop.eup %3826  ;;  %3846 = vrcp.f32 %v2012_v58  ;;  %v2222_v59 = vadd.f32 1.0, %v3825_v14  ;;  %v2298_v45 = vrot.slane %v5080_v30, 2 }
 0x33c   :  { %v3829_v26 = vpop.eup %3828  ;;  %3848 = vrcp.f32 %v2013_v22  ;;  %v2223_v5 = vadd.f32 1.0, %v3827_v0 }
 0x33d   :  { %v3831_v20 = vpop.eup %3830  ;;  %3850 = vpow2.f32 %v3084_v38  ;;  %v2224_v13 = vadd.f32 1.0, %v3829_v26  ;;  %v2299_v26 = vrot.slane %v5083_v19, 2 }
 0x33e   :  { %v3833_v21 = vpop.eup %3832  ;;  %3852 = vpow2.f32 %v3085_v50  ;;  %v2225_v27 = vadd.f32 1.0, %v3831_v20  ;;  %v2366_v50 = vrot.slane %v5060_v31, 3  ;;  %v2369_v31 = vrot.slane %v5075_v7, 3 }
 0x33f   :  { %v5116_v56 = vpop.eup %3834  ;;  %3854 = vpow2.f32 %v3086_v40  ;;  %v2226_v61 = vadd.f32 1.0, %v3833_v21  ;;  %v2300_v21 = vrot.slane %v5086_v16, 2  ;;  %v2373_v7 = vrot.slane %v5089_v57, 3 }
 0x340   :  { %v5118_v46 = vpop.eup %3836  ;;  %3856 = vrcp.f32 %v2222_v59  ;;  %v2367_v59 = vrot.slane %v5065_v42, 3  ;;  %v2371_v42 = vrot.slane %v5083_v19, 3 }
 0x341   :  { %v5120_v1 = vpop.eup %3838  ;;  %3858 = vrcp.f32 %v2223_v5 }
 0x342   :  { %v5123_v23 = vpop.eup %3840  ;;  %3860 = vrcp.f32 %v2224_v13  ;;  %v2368_v13 = vrot.slane %v5070_v63, 3  ;;  %v2372_v63 = vrot.slane %v5086_v16, 3  ;;  %v3108_v19 = vmul.f32 -1.442695, %v2371_v42 }
 0x343   :  { %v5126_v18 = vpop.eup %3842  ;;  %3862 = vrcp.f32 %v2225_v27 }
 0x344   :  { %v5129_v51 = vpop.eup %3844  ;;  %3864 = vrcp.f32 %v2226_v61  ;;  %v2301_v61 = vrot.slane %v5089_v57, 2  ;;  %v3109_v16 = vmul.f32 -1.442695, %v2372_v63 }
 0x345   :  { %v5132_v43 = vpop.eup %3846  ;;  %3866 = vtanh.f32 %v2294_v47 }
 0x346   :  { %v5135_v58 = vpop.eup %3848  ;;  %3868 = vtanh.f32 %v2295_v28  ;;  %v2370_v28 = vrot.slane %v5080_v30, 3 }
 0x347   :  { %v3851_v38 = vpop.eup %3850  ;;  %3870 = vtanh.f32 %v2296_v35  ;;  %v3103_v35 = vmul.f32 -1.442695, %v2366_v50 }
 0x348   :  { %v3853_v14 = vpop.eup %3852  ;;  %v2227_v22 = vadd.f32 1.0, %v3851_v38  ;;  %3872 = vtanh.f32 %v2297_v2  ;;  %v3107_v30 = vmul.f32 -1.442695, %v2370_v28 }
 0x349   :  { %v3855_v0 = vpop.eup %3854  ;;  %v2228_v40 = vadd.f32 1.0, %v3853_v14  ;;  %3874 = vtanh.f32 %v2298_v45  ;;  %v3104_v45 = vmul.f32 -1.442695, %v2367_v59  ;;  %v3105_v14 = vmul.f32 -1.442695, %v2368_v13 }
 0x34a   :  { %v3857_v20 = vpop.eup %3856  ;;  %v2229_v5 = vadd.f32 1.0, %v3855_v0  ;;  %3876 = vrcp.f32 %v2227_v22  ;;  %v3106_v0 = vmul.f32 -1.442695, %v2369_v31 }
 0x34b   :  { %v3859_v27 = vpop.eup %3858  ;;  %3878 = vrcp.f32 %v2228_v40  ;;  %v2558_v50 = vmul.f32 %v3857_v20, %v4634_v34  ;;  %v2547_v34 = vmul.f32 %v4822_v44, %v4369_v3  ;;  %v2572_v44 = vmul.f32 %v4851_v12, %v4796_v8 }
 0x34c   :  { %v3861_v47 = vpop.eup %3860  ;;  %3880 = vrcp.f32 %v2229_v5  ;;  %v2559_v59 = vmul.f32 %v3859_v27, %v4638_v24  ;;  %v2573_v8 = vmul.f32 %v4860_v60, %v4799_v39  ;;  %v5305_v39 = vld [vmem:[#allocation5_spill] sm:$0xff] }
 0x34d   :  { %v5145_v2 = vpop.eup %3862  ;;  %3882 = vtanh.f32 %v2299_v26  ;;  %v2557_v60 = vmul.f32 %v5023_v53, %v5305_v39  ;;  %v5308_v53 = vld [vmem:[#allocation7_spill] sm:$0xff] }
 0x34e   :  { %v5148_v38 = vpop.eup %3864  ;;  %3884 = vtanh.f32 %v2300_v21  ;;  %v2560_v21 = vmul.f32 %v3861_v47, %v4642_v37  ;;  %v2548_v37 = vmul.f32 %v4827_v17, %v4378_v11 }
 0x34f   :  { %v3867_v22 = vpop.eup %3866  ;;  %3886 = vtanh.f32 %v2301_v61  ;;  %v3110_v61 = vmul.f32 -1.442695, %v2373_v7 }
 0x350   :  { %v3869_v40 = vpop.eup %3868  ;;  %3888 = vpow2.f32 %v3103_v35  ;;  %v2582_v13 = vmul.f32 %v3867_v22, %v5116_v56  ;;  %v2571_v56 = vmul.f32 %v4842_v4, %v4793_v48  ;;  %v2596_v11 = vadd.f32 %v2572_v44, %v2548_v37  ;;  %v5310_v44 = vld [vmem:[#allocation9_spill] sm:$0xff] }
 0x351   :  { %v3871_v26 = vpop.eup %3870  ;;  %3890 = vpow2.f32 %v3104_v45  ;;  %v2583_v31 = vmul.f32 %v3869_v40, %v5118_v46  ;;  %v2549_v48 = vmul.f32 %v4835_v54, %v4644_v36 }
 0x352   :  { %v5154_v5 = vpop.eup %3872  ;;  %3892 = vpow2.f32 %v3105_v14  ;;  %v2584_v24 = vmul.f32 %v3871_v26, %v5120_v1  ;;  %v2606_v27 = vadd.f32 %v2582_v13, %v2558_v50  ;;  %v2595_v1 = vadd.f32 %v2571_v56, %v2547_v34  ;;  %v5304_v50 = vld [vmem:[#allocation4_spill] sm:$0xff]  ;;  %v5307_v34 = vld [vmem:[#allocation6_spill] sm:$0xff] }
 0x353   :  { %v5158_v57 = vpop.eup %3874  ;;  %3894 = vpow2.f32 %v3106_v0  ;;  %v2607_v28 = vadd.f32 %v2583_v31, %v2559_v59  ;;  %v2555_v0 = vmul.f32 %v5016_v62, %v4553_v9  ;;  %v2556_v36 = vmul.f32 %v5020_v33, %v5304_v50  ;;  %v5306_v62 = vld [vmem:[#allocation14_spill] sm:$0xff] }
 0x354   :  { %v5163_v20 = vpop.eup %3876  ;;  %3896 = vpow2.f32 %v3107_v30  ;;  %v2608_v3 = vadd.f32 %v2584_v24, %v2560_v21  ;;  %v2597_v54 = vadd.f32 %v2573_v8, %v2549_v48  ;;  %v2580_v9 = vmul.f32 %v5032_v6, %v4988_v52 }
 0x355   :  { %v5168_v47 = vpop.eup %3878  ;;  %3898 = vpow2.f32 %v3108_v19  ;;  %v2579_v19 = vmul.f32 %v5026_v49, %v4985_v15  ;;  %v2581_v13 = vmul.f32 %v5038_v32, %v5306_v62  ;;  %v2561_v15 = vmul.f32 %v5145_v2, %v5307_v34  ;;  %v5309_v32 = vld [vmem:[#allocation8_spill] sm:$0xff] }
 0x356   :  { %v5172_v46 = vpop.eup %3880  ;;  %3900 = vpow2.f32 %v3109_v16  ;;  %v2604_v24 = vadd.f32 %v2580_v9, %v2556_v36  ;;  %v2585_v52 = vmul.f32 %v5154_v5, %v5123_v23  ;;  %v2563_v56 = vmul.f32 %v5163_v20, %v5309_v32  ;;  %v5312_v20 = vld [vmem:[#allocation11_spill] sm:$0xff] }
 0x357   :  { %v3883_v35 = vpop.eup %3882  ;;  %3902 = vpow2.f32 %v3110_v61  ;;  %v2603_v31 = vadd.f32 %v2579_v19, %v2555_v0  ;;  %v2605_v6 = vadd.f32 %v2581_v13, %v2557_v60 }
 0x358   :  { %v3885_v42 = vpop.eup %3884  ;;  %3904 = vtanh.f32 %v2606_v27  ;;  %v2562_v27 = vmul.f32 %v5148_v38, %v5308_v53  ;;  %v2587_v38 = vmul.f32 %v3883_v35, %v5129_v51  ;;  %v2609_v5 = vadd.f32 %v2585_v52, %v2561_v15 }
 0x359   :  { %v5176_v17 = vpop.eup %3886  ;;  %3906 = vtanh.f32 %v2607_v28 }
 0x35a   :  { %v3889_v45 = vpop.eup %3888  ;;  %3908 = vtanh.f32 %v2608_v3  ;;  %v2586_v3 = vmul.f32 %v5158_v57, %v5126_v18  ;;  %v2611_v51 = vadd.f32 %v2587_v38, %v2563_v56 }
 0x35b   :  { %v3891_v4 = vpop.eup %3890  ;;  %v2486_v63 = vadd.f32 1.0, %v3889_v45  ;;  %3910 = vtanh.f32 %v2595_v1  ;;  %v2564_v1 = vmul.f32 %v5168_v47, %v5310_v44  ;;  %v5311_v45 = vld [vmem:[#allocation10_spill] sm:$0xff]  ;;  %v2589_v47 = vmul.f32 %v5176_v17, %v5135_v58 }
 0x35c   :  { %v3893_v14 = vpop.eup %3892  ;;  %v2487_v22 = vadd.f32 1.0, %v3891_v4  ;;  %3912 = vtanh.f32 %v2596_v11  ;;  %v2565_v23 = vmul.f32 %v5172_v46, %v5311_v45  ;;  %v2610_v18 = vadd.f32 %v2586_v3, %v2562_v27 }
 0x35d   :  { %v3895_v12 = vpop.eup %3894  ;;  %v2488_v7 = vadd.f32 1.0, %v3893_v14  ;;  %3914 = vrcp.f32 %v2486_v63  ;;  %v2588_v63 = vmul.f32 %v3885_v42, %v5132_v43  ;;  %v5313_v14 = vld [vmem:[#allocation12_spill] sm:$0xff] }
 0x35e   :  { %v3897_v40 = vpop.eup %3896  ;;  %v2489_v30 = vadd.f32 1.0, %v3895_v12  ;;  %3916 = vrcp.f32 %v2487_v22 }
 0x35f   :  { %v3899_v26 = vpop.eup %3898  ;;  %v2490_v59 = vadd.f32 1.0, %v3897_v40  ;;  %3918 = vrcp.f32 %v2488_v7  ;;  %v2612_v46 = vadd.f32 %v2588_v63, %v2564_v1  ;;  %v2613_v40 = vadd.f32 %v2589_v47, %v2565_v23 }
 0x360   :  { %v3901_v16 = vpop.eup %3900  ;;  %v2491_v21 = vadd.f32 1.0, %v3899_v26  ;;  %3920 = vrcp.f32 %v2489_v30 }
 0x361   :  { %v3903_v33 = vpop.eup %3902  ;;  %v2492_v61 = vadd.f32 1.0, %v3901_v16  ;;  %3922 = vrcp.f32 %v2490_v59 }
 0x362   :  { %v3905_v49 = vpop.eup %3904  ;;  %3924 = vrcp.f32 %v2491_v21  ;;  %v2493_v2 = vadd.f32 1.0, %v3903_v33  ;;  %v5314_v33 = vld [vmem:[#allocation13_spill] sm:$0xff] }
 0x363   :  { %v3907_v37 = vpop.eup %3906  ;;  %3926 = vrcp.f32 %v2492_v61 }
 0x364   :  { %v3909_v28 = vpop.eup %3908  ;;  %3928 = vtanh.f32 %v2597_v54 }
 0x365   :  { %v3911_v11 = vpop.eup %3910  ;;  %3930 = vtanh.f32 %v2603_v31 }
 0x366   :  { %v3913_v48 = vpop.eup %3912  ;;  %3932 = vtanh.f32 %v2604_v24  ;;  %v2643_v4 = vmul.f32 %v3911_v11, %v5312_v20 }
 0x367   :  { %v3915_v57 = vpop.eup %3914  ;;  %3934 = vtanh.f32 %v2605_v6  ;;  %v2644_v22 = vmul.f32 %v3913_v48, %v5313_v14 }
 0x368   :  { %v3917_v35 = vpop.eup %3916  ;;  %v2688_v8 = vpack.c.bf16 %v2643_v4, %v2643_v4  ;;  %3936 = vrcp.f32 %v2493_v2  ;;  %v2654_v12 = vmul.f32 %v3915_v57, %v3905_v49 }
 0x369   :  { %v3919_v7 = vpop.eup %3918  ;;  %v2689_v0 = vpack.c.bf16 %v2644_v22, %v2644_v22  ;;  %3938 = vtanh.f32 %v2609_v5  ;;  %v2655_v30 = vmul.f32 %v3917_v35, %v3907_v37 }
 0x36a   :  { %v3921_v43 = vpop.eup %3920  ;;  %v2736_v42 = vunpack.c.l.b16 %v2688_v8  ;;  %3940 = vtanh.f32 %v2610_v18  ;;  %v2656_v50 = vmul.f32 %v3919_v7, %v3909_v28  ;;  %v2699_v26 = vpack.c.bf16 %v2654_v12, %v2654_v12 }
 0x36b   :  { %v3923_v36 = vpop.eup %3922  ;;  %v2737_v54 = vunpack.c.l.b16 %v2689_v0  ;;  %3942 = vtanh.f32 %v2611_v51  ;;  %v2700_v58 = vpack.c.bf16 %v2655_v30, %v2655_v30  ;;  %v5315_v30 = vld [vmem:[#allocation3_spill] sm:$0xff] }
 0x36c   :  { %v3925_v17 = vpop.eup %3924  ;;  %v2763_v19 = vrot.slane %v2736_v42, 3  ;;  %3944 = vtanh.f32 %v2612_v46  ;;  %v2701_v59 = vpack.c.bf16 %v2656_v50, %v2656_v50  ;;  %v2747_v34 = vunpack.c.l.b16 %v2699_v26 }
 0x36d   :  { %v3927_v39 = vpop.eup %3926  ;;  %v2765_v60 = vrot.slane %v2737_v54, 2  ;;  %3946 = vtanh.f32 %v2613_v40  ;;  %v2748_v16 = vunpack.c.l.b16 %v2700_v58  ;;  %v3111_v54 = vld [vmem:[%s5261_s2] ss:$0 sm:$0xff] }
 0x36e   :  { %v3929_v21 = vpop.eup %3928  ;;  %v2764_v9 = vsel %vm1512_vm4, %v2763_v19, %v5002_v25  ;;  %v2749_v62 = vunpack.c.l.b16 %v2701_v59  ;;  %vm2674_vm8 = vcmp.eq.s32.totalorder %v5315_v30, %v3111_v54 }
 0x36f   :  { %v3931_v13 = vpop.eup %3930  ;;  %v2645_v61 = vmul.f32 %v3929_v21, %v5314_v33  ;;  %v2766_v31 = vsel %vm1515_vm5, %v2765_v60, %v2764_v9  ;;  %v2783_v15 = vrot.slane %v2748_v16, 7  ;;  %v5316_v60 = vmov 0.0  }
 0x370   :  { %v3933_v49 = vpop.eup %3932  ;;  %v2651_v24 = vmul.f32 %v3931_v13, %v5101_v29  ;;  %v2785_v53 = vrot.slane %v2749_v62, 6  ;;  %v3112_v33 = vsel %vm2674_vm8, 1.0, %v5316_v60 }
 0x371   :  { %v3935_v27 = vpop.eup %3934  ;;  %v2652_v37 = vmul.f32 %v3933_v49, %v5103_v55  ;;  %v2690_v52 = vpack.c.bf16 %v2645_v61, %v2645_v61  ;;  %v2784_v6 = vsel %vm1500_vm0, %v2783_v15, %v2747_v34 }
 0x372   :  { %v3937_v32 = vpop.eup %3936  ;;  %v2653_v25 = vmul.f32 %v3935_v27, %v5105_v10  ;;  %v2696_v56 = vpack.c.bf16 %v2651_v24, %v2651_v24  ;;  %v2786_v28 = vsel %vm1503_vm1, %v2785_v53, %v2784_v6  ;;  %v2858_v24 = vld [vmem:[%s5262_s3] sm:$0xff] }
 0x373   :  { %v3939_v3 = vpop.eup %3938  ;;  %v2697_v2 = vpack.c.bf16 %v2652_v37, %v2652_v37  ;;  %v2738_v44 = vunpack.c.l.b16 %v2690_v52  ;;  %v3115_v27 = vld [vmem:[%s5263_s4] ss:$0 sm:$0xff]  ;;  %v2859_v37 = vld [vmem:[%s5262_s3 + $0x8] sm:$0xff] }
 0x374   :  { %v3941_v1 = vpop.eup %3940  ;;  %v2698_v11 = vpack.c.bf16 %v2653_v25, %v2653_v25  ;;  %v2744_v38 = vunpack.c.l.b16 %v2696_v56  ;;  %v2657_v29 = vmul.f32 %v3939_v3, %v3921_v43  ;;  %v2664_v43 = vadd.s32 8, %v5315_v30 }
 0x375   :  { %v3943_v45 = vpop.eup %3942  ;;  %v2745_v23 = vunpack.c.l.b16 %v2697_v2  ;;  %v2767_v5 = vrot.slane %v2738_v44, 1  ;;  %v2658_v55 = vmul.f32 %v3941_v1, %v3923_v36 }
 0x376   :  { %v3945_v48 = vpop.eup %3944  ;;  %v2746_v20 = vunpack.c.l.b16 %v2698_v11  ;;  %v2777_v4 = vrot.slane %v2744_v38, 3  ;;  %v2659_v63 = vmul.f32 %v3943_v45, %v3925_v17  ;;  %v2702_v18 = vpack.c.bf16 %v2657_v29, %v2657_v29 }
 0x377   :  { %v3947_v10 = vpop.eup %3946  ;;  %v2768_v57 = vsel %vm1518_vm6, %v2767_v5, %v2766_v31  ;;  %v2779_v14 = vrot.slane %v2745_v23, 2  ;;  %v2660_v22 = vmul.f32 %v3945_v48, %v3927_v39  ;;  %v2703_v47 = vpack.c.bf16 %v2658_v55, %v2658_v55 }
 0x378   :  { %v2778_v51 = vsel %vm1512_vm4, %v2777_v4, %v5114_v41  ;;  %v2781_v35 = vrot.slane %v2746_v20, 1  ;;  %v2661_v8 = vmul.f32 %v3947_v10, %v3937_v32  ;;  %v2704_v46 = vpack.c.bf16 %v2659_v63, %v2659_v63  ;;  %v3116_v32 = vld [vmem:[%s5264_s5] ss:$0 sm:$0xff] }
 0x379   :  { %v2780_v12 = vsel %vm1515_vm5, %v2779_v14, %v2778_v51  ;;  %v2705_v7 = vpack.c.bf16 %v2660_v22, %v2660_v22  ;;  %v2750_v0 = vunpack.c.l.b16 %v2702_v18  ;;  %v2751_v40 = vunpack.c.l.b16 %v2703_v47 }
 0x37a   :  { %v2782_v42 = vsel %vm1518_vm6, %v2781_v35, %v2780_v12  ;;  %v2706_v50 = vpack.c.bf16 %v2661_v8, %v2661_v8  ;;  %v2752_v36 = vunpack.c.l.b16 %v2704_v46  ;;  %vm2675_vm9 = vcmp.eq.s32.totalorder %v2664_v43, %v3111_v54 }
 0x37b   :  { %v2797_v26 = vpack.c.b16 %v2782_v42, %v2768_v57  ;;  %v2753_v41 = vunpack.c.l.b16 %v2705_v7  ;;  %v2787_v58 = vrot.slane %v2750_v0, 5  ;;  %v2789_v19 = vrot.slane %v2751_v40, 4 }
 0x37c   :  { %v2754_v17 = vunpack.c.l.b16 %v2706_v50  ;;  %v2791_v39 = vrot.slane %v2752_v36, 3  ;;  %v3113_v61 = vsel %vm2675_vm9, 1.0, %v5316_v60 }
 0x37d   :  { %3121 = vmatpush3.bf16.msra.mxu0 %v2797_v26  ;;  %v2788_v59 = vsel %vm1506_vm2, %v2787_v58, %v2786_v28  ;;  %v2793_v21 = vrot.slane %v2753_v41, 2  ;;  %v2680_v15 = vpack.c.bf16 %v3113_v61, %v3112_v33 }
 0x37e   :  { %3122 = vmatprep.subr.bf16.mxu0 %v5316_v60  ;;  %v2790_v16 = vsel %vm1509_vm3, %v2789_v19, %v2788_v59  ;;  %v2795_v62 = vrot.slane %v2754_v17, 1 }
 0x37f   :  { %v2792_v9 = vsel %vm1512_vm4, %v2791_v39, %v2790_v16 }
 0x380   :  { %v2794_v13 = vsel %vm1515_vm5, %v2793_v21, %v2792_v9 }
 0x381   :  { %v2796_v31 = vsel %vm1518_vm6, %v2795_v62, %v2794_v13 }
 0x382   :  { %v2798_v34 = vpack.c.b16 %v2796_v31, %v2796_v31 }
 0x384   :  { %v2806_v49 = vsel %vm2804_vm10, %v2798_v34, 0 }
 0x385   :  { %3123 = vmatpush3.bf16.msra.mxu0 %v2806_v49 }
 0x388   :  { %3125 = vmatmul.mubr.msk.bf16.vlgmr.msra.gmra.mrb[16].mxu0 %vm2800_vm11, %v2680_v15 }
 0x45b   :  { %v2842_v53 = vpop.f32.mrb[16].mxu0 }
 0x45c   :  { %v2860_v52 = vadd.f32 %v2858_v24, %v2842_v53  ;;  %v3126_v6 = vpop.f32.mrb[17].mxu0 }
 0x45d   :  { %v2845_v25 = vpop.f32.mrb[18].mxu0 }
 0x45e   :  { %v2869_v56 = vmul.f32 %v3115_v27, %v2860_v52  ;;  %v2861_v28 = vadd.f32 %v2859_v37, %v2845_v25  ;;  %v3127_v3 = vpop.f32.mrb[19].mxu0 }
 0x460   :  { %v2878_v2 = vadd.f32 %v3116_v32, %v2869_v56  ;;  %v2870_v44 = vmul.f32 %v3115_v27, %v2861_v28 }
 0x462   :  { %v2880_v1 = vmax.f32 %v2878_v2, 0.0  ;;  %v2879_v11 = vadd.f32 %v3116_v32, %v2870_v44 }
 0x464   :  { %2882 = vst [vmem:[%s5265_s6] sm:$0xff] %v2880_v1  ;;  %v2881_v38 = vmax.f32 %v2879_v11, 0.0 }
 0x466   :  { %2883 = vst [vmem:[%s5265_s6 + $0x8] sm:$0xff] %v2881_v38 }

// kernel: pathnn_forward.10
= control target key start
LH: loop header
LB: loop body
LE: loop exit
PB: predicated region body
PF: predicated region fallthrough
CT: control target
= control target key end

     0   :  { %v7722_v1 = vmov 0   ;;  %v5735_v33 = vmov 1966171168   ;;  %v390_v35 = vlaneseq  ;;  %vm1500_vm0 = vcmask 1041409   ;;  %s7715_s1 = inlined_call_operand.vmem [shape: bf16[128,512], index: 1, kind: input, shape index: {}]   ;;  %s7716_s0 = inlined_call_operand.vmem [shape: f32[24,3,512], index: 0, kind: input, shape index: {}]   ;;  %s7717_s2 = inlined_call_operand.vmem [shape: s32[1,24], index: 2, kind: input, shape index: {}]   ;;  %s7718_s3 = inlined_call_operand.vmem [shape: f32[16,128], index: 3, kind: input, shape index: {}, may-alias: {3,6}]   ;;  %s7719_s4 = inlined_call_operand.vmem [shape: f32[1,128], index: 4, kind: input, shape index: {}]   ;;  %s7720_s5 = inlined_call_operand.vmem [shape: f32[1,128], index: 5, kind: input, shape index: {}]   ;;  %s7721_s6 = inlined_call_operand.vmem [shape: f32[16,128], index: 6, kind: output, shape index: {}, may-alias: {3,6}]  }
   0x1   :  { %v5776_v0 = vld [vmem:[%s7715_s1 + $0x4] ss:$16 sps:$4 sm:$0xff]   ;;  %301 = vmatprep.mubr.bf16.mxu0 %v7722_v1  ;;  %352 = vmatprep.mubr.bf16.mxu1 %v7722_v1  ;;  %v5783_v2 = vld [vmem:[%s7715_s1 + $0xc] ss:$16 sps:$4 sm:$0xff]   ;;  %v5789_v3 = vld [vmem:[%s7715_s1] ss:$16 sps:$4 sm:$0xff]   ;;  %v388_v34 = vunpack.c.l.s4 %v5735_v33 }
   0x2   :  { %269 = vmatprep.subr.bf16.mxu0 %v5776_v0  ;;  %v5794_v4 = vld [vmem:[%s7715_s1 + $0x8] ss:$16 sps:$4 sm:$0xff]   ;;  %320 = vmatprep.subr.bf16.mxu1 %v5783_v2  ;;  %v5800_v5 = vld [vmem:[%s7715_s1 + $0x24] ss:$16 sps:$4 sm:$0xff]   ;;  %v5807_v6 = vld [vmem:[%s7715_s1 + $0x2c] ss:$16 sps:$4 sm:$0xff]  }
   0x3   :  { %270 = vmatpush1.bf16.msra.mxu0 %v5789_v3  ;;  %321 = vmatpush1.bf16.msra.mxu1 %v5794_v4  ;;  %v5812_v7 = vld [vmem:[%s7715_s1 + $0x20] ss:$16 sps:$4 sm:$0xff]   ;;  %v4515_v8 = vld [vmem:[%s7715_s1 + $0x28] ss:$16 sps:$4 sm:$0xff]   ;;  %v4516_v9 = vld [vmem:[%s7715_s1 + $0x44] ss:$16 sps:$4 sm:$0xff]   ;;  %v389_v36 = vunpack.c.0.s8 %v388_v34 }
   0x4   :  { %271 = vmatprep.subr.bf16.mxu0 %v5800_v5  ;;  %322 = vmatprep.subr.bf16.mxu1 %v5807_v6  ;;  %v4518_v10 = vld [vmem:[%s7715_s1 + $0x4c] ss:$16 sps:$4 sm:$0xff]   ;;  %v5828_v11 = vld [vmem:[%s7715_s1 + $0x40] ss:$16 sps:$4 sm:$0xff]   ;;  %v5833_v12 = vld [vmem:[%s7715_s1 + $0x48] ss:$16 sps:$4 sm:$0xff]  }
   0x5   :  { %v5839_v13 = vld [vmem:[%s7715_s1 + $0x64] ss:$16 sps:$4 sm:$0xff]   ;;  %v4524_v14 = vld [vmem:[%s7715_s1 + $0x6c] ss:$16 sps:$4 sm:$0xff]   ;;  %v4526_v15 = vld [vmem:[%s7715_s1 + $0x60] ss:$16 sps:$4 sm:$0xff]  }
   0x6   :  { %v4527_v16 = vld [vmem:[%s7715_s1 + $0x68] ss:$16 sps:$4 sm:$0xff]   ;;  %v4528_v17 = vld [vmem:[%s7715_s1 + $0x84] ss:$16 sps:$4 sm:$0xff]   ;;  %v4530_v18 = vld [vmem:[%s7715_s1 + $0x8c] ss:$16 sps:$4 sm:$0xff]  }
   0x7   :  { %272 = vmatpush1.bf16.msra.mxu0 %v5812_v7  ;;  %323 = vmatpush1.bf16.msra.mxu1 %v4515_v8  ;;  %v4532_v19 = vld [vmem:[%s7715_s1 + $0x80] ss:$16 sps:$4 sm:$0xff]   ;;  %v4533_v20 = vld [vmem:[%s7715_s1 + $0x88] ss:$16 sps:$4 sm:$0xff]   ;;  %v4534_v21 = vld [vmem:[%s7715_s1 + $0xa4] ss:$16 sps:$4 sm:$0xff]  }
   0x8   :  { %273 = vmatprep.subr.bf16.mxu0 %v4516_v9  ;;  %324 = vmatprep.subr.bf16.mxu1 %v4518_v10  ;;  %v4536_v22 = vld [vmem:[%s7715_s1 + $0xac] ss:$16 sps:$4 sm:$0xff]   ;;  %v4538_v23 = vld [vmem:[%s7715_s1 + $0xa0] ss:$16 sps:$4 sm:$0xff]   ;;  %v4539_v24 = vld [vmem:[%s7715_s1 + $0xa8] ss:$16 sps:$4 sm:$0xff]  }
   0x9   :  { %v4540_v25 = vld [vmem:[%s7715_s1 + $0xc4] ss:$16 sps:$4 sm:$0xff]   ;;  %v4542_v26 = vld [vmem:[%s7715_s1 + $0xcc] ss:$16 sps:$4 sm:$0xff]   ;;  %v4544_v27 = vld [vmem:[%s7715_s1 + $0xc0] ss:$16 sps:$4 sm:$0xff]  }
   0xa   :  { %v4545_v28 = vld [vmem:[%s7715_s1 + $0xc8] ss:$16 sps:$4 sm:$0xff]   ;;  %v4546_v29 = vld [vmem:[%s7715_s1 + $0xe4] ss:$16 sps:$4 sm:$0xff]   ;;  %v4548_v30 = vld [vmem:[%s7715_s1 + $0xec] ss:$16 sps:$4 sm:$0xff]  }
   0xb   :  { %274 = vmatpush1.bf16.msra.mxu0 %v5828_v11  ;;  %325 = vmatpush1.bf16.msra.mxu1 %v5833_v12  ;;  %v4550_v31 = vld [vmem:[%s7715_s1 + $0xe0] ss:$16 sps:$4 sm:$0xff]   ;;  %v4551_v32 = vld [vmem:[%s7715_s1 + $0xe8] ss:$16 sps:$4 sm:$0xff]   ;;  %v5921_v37 = vshrl.u32 %v390_v35, 7  ;;  %vm1503_vm1 = vcmask 1042434  }
   0xc   :  { %275 = vmatprep.subr.bf16.mxu0 %v5839_v13  ;;  %326 = vmatprep.subr.bf16.mxu1 %v4524_v14  ;;  %v62_v59 = vld [vmem:[%s7716_s0] ss:$4 sm:$0xf]  ;;  %v4164_v60 = vld [vmem:[%s7716_s0 + $0x10] ss:$4 sm:$0xf] }
   0xd   :  { %7747 = vst [vmem:[#allocation3_spill] sm:$0xff] %v5921_v37  ;;  %v5924_v40 = vsub.s32 %v389_v36, %v5921_v37  ;;  %vm1506_vm2 = vcmask 1043459   ;;  %vm1509_vm3 = vcmask 1044484   ;;  %vm1512_vm4 = vcmask 1045509  }
   0xe   :  { %vm1515_vm5 = vcmask 1046534   ;;  %vm1518_vm6 = vcmask 1047559   ;;  %vm5737_vm7 = vmmov 0   ;;  %vm4080_vm10 = vcmask 1043456  }
   0xf   :  { %276 = vmatpush1.bf16.msra.mxu0 %v4526_v15  ;;  %327 = vmatpush1.bf16.msra.mxu1 %v4527_v16  ;;  %vm4076_vm11 = vcmask 195584  }
  0x10   :  { %277 = vmatprep.subr.bf16.mxu0 %v4528_v17  ;;  %328 = vmatprep.subr.bf16.mxu1 %v4530_v18 }
  0x13   :  { %278 = vmatpush1.bf16.msra.mxu0 %v4532_v19  ;;  %329 = vmatpush1.bf16.msra.mxu1 %v4533_v20 }
  0x14   :  { %279 = vmatprep.subr.bf16.mxu0 %v4534_v21  ;;  %330 = vmatprep.subr.bf16.mxu1 %v4536_v22 }
  0x17   :  { %280 = vmatpush1.bf16.msra.mxu0 %v4538_v23  ;;  %331 = vmatpush1.bf16.msra.mxu1 %v4539_v24 }
  0x18   :  { %281 = vmatprep.subr.bf16.mxu0 %v4540_v25  ;;  %332 = vmatprep.subr.bf16.mxu1 %v4542_v26 }
  0x1b   :  { %282 = vmatpush1.bf16.msra.mxu0 %v4544_v27  ;;  %333 = vmatpush1.bf16.msra.mxu1 %v4545_v28 }
  0x1c   :  { %283 = vmatprep.subr.bf16.mxu0 %v4546_v29  ;;  %334 = vmatprep.subr.bf16.mxu1 %v4548_v30 }
  0x1f   :  { %284 = vmatpush1.bf16.msra.mxu0 %v4550_v31  ;;  %335 = vmatpush1.bf16.msra.mxu1 %v4551_v32 }
  0x20   :  { %1552 = vmatprep.subr.bf16.mxu0 %v5776_v0  ;;  %1603 = vmatprep.subr.bf16.mxu1 %v5783_v2 }
  0x22   :  { %302 = vmatmul.mubr.bf16.vlgmr.msra.gmra.mrb[0].mxu0 %v7722_v1  ;;  %353 = vmatmul.mubr.bf16.vlgmr.msra.gmra.mrb[0].mxu1 %v7722_v1 }
  0x23   :  { %311 = vmatprep.mubr.bf16.mxu0 %v7722_v1  ;;  %362 = vmatprep.mubr.bf16.mxu1 %v7722_v1 }
  0x24   :  { %1553 = vmatpush1.bf16.msra.mxu0 %v5789_v3  ;;  %1604 = vmatpush1.bf16.msra.mxu1 %v5794_v4  ;;  %v4166_v3 = vld [vmem:[%s7716_s0 + $0x30] ss:$4 sm:$0xf] }
  0x25   :  { %1554 = vmatprep.subr.bf16.mxu0 %v5800_v5  ;;  %1605 = vmatprep.subr.bf16.mxu1 %v5807_v6 }
  0x28   :  { %1555 = vmatpush1.bf16.msra.mxu0 %v5812_v7  ;;  %1606 = vmatpush1.bf16.msra.mxu1 %v4515_v8  ;;  %v4167_v8 = vld [vmem:[%s7716_s0 + $0x40] ss:$4 sm:$0xf] }
  0x29   :  { %1556 = vmatprep.subr.bf16.mxu0 %v4516_v9  ;;  %1607 = vmatprep.subr.bf16.mxu1 %v4518_v10 }
  0x2a   :  { %312 = vmatmul.mubr.bf16.gmra.mrb[4].mxu0 %v7722_v1  ;;  %363 = vmatmul.mubr.bf16.gmra.mrb[4].mxu1 %v7722_v1 }
  0x2b   :  { %1584 = vmatprep.mubr.bf16.mxu0 %v7722_v1  ;;  %1635 = vmatprep.mubr.bf16.mxu1 %v7722_v1 }
  0x2c   :  { %1557 = vmatpush1.bf16.msra.mxu0 %v5828_v11  ;;  %1608 = vmatpush1.bf16.msra.mxu1 %v5833_v12 }
  0x2d   :  { %1558 = vmatprep.subr.bf16.mxu0 %v5839_v13  ;;  %1609 = vmatprep.subr.bf16.mxu1 %v4524_v14 }
  0x30   :  { %1559 = vmatpush1.bf16.msra.mxu0 %v4526_v15  ;;  %1610 = vmatpush1.bf16.msra.mxu1 %v4527_v16  ;;  %v4168_v15 = vld [vmem:[%s7716_s0 + $0x50] ss:$4 sm:$0xf] }
  0x31   :  { %1560 = vmatprep.subr.bf16.mxu0 %v4528_v17  ;;  %1611 = vmatprep.subr.bf16.mxu1 %v4530_v18 }
  0x34   :  { %1561 = vmatpush1.bf16.msra.mxu0 %v4532_v19  ;;  %1612 = vmatpush1.bf16.msra.mxu1 %v4533_v20 }
  0x35   :  { %1562 = vmatprep.subr.bf16.mxu0 %v4534_v21  ;;  %1613 = vmatprep.subr.bf16.mxu1 %v4536_v22  ;;  %v4169_v22 = vld [vmem:[%s7716_s0 + $0x60] ss:$4 sm:$0xf] }
  0x38   :  { %1563 = vmatpush1.bf16.msra.mxu0 %v4538_v23  ;;  %1614 = vmatpush1.bf16.msra.mxu1 %v4539_v24 }
  0x39   :  { %1564 = vmatprep.subr.bf16.mxu0 %v4540_v25  ;;  %1615 = vmatprep.subr.bf16.mxu1 %v4542_v26 }
  0x3c   :  { %1565 = vmatpush1.bf16.msra.mxu0 %v4544_v27  ;;  %1616 = vmatpush1.bf16.msra.mxu1 %v4545_v28 }
  0x3d   :  { %1566 = vmatprep.subr.bf16.mxu0 %v4546_v29  ;;  %1617 = vmatprep.subr.bf16.mxu1 %v4548_v30  ;;  %v4170_v29 = vld [vmem:[%s7716_s0 + $0x70] ss:$4 sm:$0xf] }
  0x40   :  { %1567 = vmatpush1.bf16.msra.mxu0 %v4550_v31  ;;  %1618 = vmatpush1.bf16.msra.mxu1 %v4551_v32 }
  0x41   :  { %2828 = vmatprep.subr.bf16.mxu0 %v5776_v0  ;;  %2879 = vmatprep.subr.bf16.mxu1 %v5783_v2  ;;  %v4165_v2 = vld [vmem:[%s7716_s0 + $0x20] ss:$4 sm:$0xf] }
  0xf5   :  { %v303_v38 = vpop.f32.mrb[0].mxu0  ;;  %v354_v39 = vpop.f32.mrb[0].mxu1 }
  0xf6   :  { %v305_v41 = vpop.f32.mrb[1].mxu0  ;;  %v356_v42 = vpop.f32.mrb[1].mxu1 }
  0xf7   :  { %v383_v43 = vcombine.low %v303_v38, %v305_v41  ;;  %v384_v44 = vcombine.high %v303_v38, %v305_v41  ;;  %v385_v45 = vcombine.low %v354_v39, %v356_v42  ;;  %v386_v46 = vcombine.high %v354_v39, %v356_v42  ;;  %v307_v47 = vpop.f32.mrb[2].mxu0  ;;  %v358_v48 = vpop.f32.mrb[2].mxu1 }
  0xf8   :  { %v309_v49 = vpop.f32.mrb[3].mxu0  ;;  %v360_v50 = vpop.f32.mrb[3].mxu1 }
  0xf9   :  { %v393_v51 = vrot.slane %v383_v43, %v5924_v40  ;;  %v400_v52 = vrot.slane %v384_v44, %v5924_v40  ;;  %v407_v53 = vrot.slane %v385_v45, %v5924_v40  ;;  %v414_v54 = vrot.slane %v386_v46, %v5924_v40 }
  0xfa   :  { %v451_v55 = vcombine.low %v307_v47, %v309_v49  ;;  %v452_v56 = vcombine.high %v307_v47, %v309_v49  ;;  %v453_v57 = vcombine.low %v358_v48, %v360_v50  ;;  %v454_v58 = vcombine.high %v358_v48, %v360_v50 }
  0xfb   :  { %v415_v61 = vcombine.low %v393_v51, %v407_v53  ;;  %v416_v62 = vcombine.high %v393_v51, %v407_v53  ;;  %v417_v63 = vcombine.low %v400_v52, %v414_v54  ;;  %v418_v0 = vcombine.high %v400_v52, %v414_v54 }
  0xfc   :  { %v5943_v4 = vrot.slane %v451_v55, %v5924_v40  ;;  %v5946_v5 = vrot.slane %v452_v56, %v5924_v40  ;;  %v5949_v6 = vrot.slane %v453_v57, %v5924_v40  ;;  %v5952_v7 = vrot.slane %v454_v58, %v5924_v40 }
  0xfd   :  { %v425_v9 = vrot.slane %v415_v61, %v5924_v40  ;;  %v432_v10 = vrot.slane %v417_v63, %v5924_v40  ;;  %v439_v11 = vrot.slane %v416_v62, %v5924_v40  ;;  %v446_v12 = vrot.slane %v418_v0, %v5924_v40  ;;  %v5961_v13 = vpop.f32.mrb[4].mxu0  ;;  %v5963_v14 = vpop.f32.mrb[4].mxu1 }
  0xfe   :  { %v483_v16 = vcombine.low %v5943_v4, %v5949_v6  ;;  %v484_v17 = vcombine.high %v5943_v4, %v5949_v6  ;;  %v485_v18 = vcombine.low %v5946_v5, %v5952_v7  ;;  %v486_v19 = vcombine.high %v5946_v5, %v5952_v7  ;;  %v5976_v20 = vpop.f32.mrb[5].mxu0  ;;  %v5978_v21 = vpop.f32.mrb[5].mxu1 }
  0xff   :  { %v447_v23 = vcombine.high %v425_v9, %v425_v9  ;;  %v448_v24 = vcombine.high %v432_v10, %v432_v10  ;;  %v449_v25 = vcombine.high %v439_v11, %v439_v11  ;;  %v450_v26 = vcombine.high %v446_v12, %v446_v12  ;;  %v317_v27 = vpop.f32.mrb[6].mxu0  ;;  %v368_v28 = vpop.f32.mrb[6].mxu1 }
 0x100   :  { %v5986_v30 = vadd.f32 %v425_v9, %v62_v59  ;;  %v5988_v31 = vadd.f32 %v4164_v60, %v439_v11  ;;  %v5990_v32 = vadd.f32 %v4167_v8, %v432_v10  ;;  %v318_v33 = vpop.f32.mrb[7].mxu0  ;;  %v369_v34 = vpop.f32.mrb[7].mxu1  ;;  %v5996_v38 = vadd.f32 %v4168_v15, %v446_v12 }
 0x101   :  { %v5992_v35 = vadd.f32 %v4165_v2, %v447_v23  ;;  %v5994_v36 = vadd.f32 %v4166_v3, %v449_v25  ;;  %v5998_v39 = vadd.f32 %v4169_v22, %v448_v24  ;;  %v6002_v43 = vadd.f32 %v4170_v29, %v450_v26 }
 0x102   :  { %v4219_v41 = vmul.f32 -1.442695, %v5986_v30  ;;  %v4220_v42 = vmul.f32 -1.442695, %v5988_v31  ;;  %v4223_v46 = vmul.f32 -1.442695, %v5990_v32  ;;  %v522_v4 = vcombine.high %v5963_v14, %v5978_v21 }
 0x103   :  { %v4221_v44 = vmul.f32 -1.442695, %v5992_v35  ;;  %v4222_v45 = vmul.f32 -1.442695, %v5994_v36  ;;  %v803_v47 = vrot.slane %v5986_v30, 1  ;;  %v804_v49 = vrot.slane %v5988_v31, 1 }
 0x104   :  { %4552 = vpow2.f32 %v4219_v41  ;;  %v4224_v48 = vmul.f32 -1.442695, %v5996_v38  ;;  %v4225_v50 = vmul.f32 -1.442695, %v5998_v39  ;;  %v805_v51 = vrot.slane %v5992_v35, 1 }
 0x105   :  { %4554 = vpow2.f32 %v4220_v42  ;;  %v4226_v52 = vmul.f32 -1.442695, %v6002_v43  ;;  %v806_v53 = vrot.slane %v5994_v36, 1  ;;  %v807_v54 = vrot.slane %v5990_v32, 1 }
 0x106   :  { %4556 = vpow2.f32 %v4221_v44  ;;  %v4243_v55 = vmul.f32 -1.442695, %v803_v47  ;;  %v4244_v56 = vmul.f32 -1.442695, %v804_v49  ;;  %v4245_v57 = vmul.f32 -1.442695, %v805_v51 }
 0x107   :  { %4558 = vpow2.f32 %v4222_v45  ;;  %v4246_v58 = vmul.f32 -1.442695, %v806_v53  ;;  %v4247_v59 = vmul.f32 -1.442695, %v807_v54  ;;  %v808_v8 = vrot.slane %v5996_v38, 1 }
 0x108   :  { %4560 = vpow2.f32 %v4223_v46  ;;  %v809_v11 = vrot.slane %v5998_v39, 1  ;;  %v810_v22 = vrot.slane %v6002_v43, 1  ;;  %v995_v54 = vrot.slane %v5986_v30, 2 }
 0x109   :  { %4562 = vpow2.f32 %v4224_v48  ;;  %v4248_v27 = vmul.f32 -1.442695, %v808_v8  ;;  %v1067_v8 = vrot.slane %v5986_v30, 3  ;;  %v1070_v30 = vrot.slane %v5994_v36, 3 }
 0x10a   :  { %4564 = vpow2.f32 %v4225_v50  ;;  %v4249_v33 = vmul.f32 -1.442695, %v809_v11  ;;  %v4250_v41 = vmul.f32 -1.442695, %v810_v22  ;;  %v1000_v11 = vrot.slane %v5996_v38, 2 }
 0x10b   :  { %4566 = vpow2.f32 %v4226_v52 }
 0x10c   :  { %4568 = vpow2.f32 %v4243_v55 }
 0x10d   :  { %4570 = vpow2.f32 %v4244_v56  ;;  %v996_v56 = vrot.slane %v5988_v31, 2 }
 0x10e   :  { %v4553_v60 = vpop.eup %4552  ;;  %4572 = vpow2.f32 %v4245_v57 }
 0x10f   :  { %v4555_v61 = vpop.eup %4554  ;;  %v707_v62 = vadd.f32 1.0, %v4553_v60  ;;  %4574 = vpow2.f32 %v4246_v58  ;;  %v997_v58 = vrot.slane %v5992_v35, 2  ;;  %v998_v60 = vrot.slane %v5994_v36, 2 }
 0x110   :  { %v4557_v63 = vpop.eup %4556  ;;  %v708_v0 = vadd.f32 1.0, %v4555_v61  ;;  %4576 = vpow2.f32 %v4247_v59  ;;  %v4270_v36 = vmul.f32 -1.442695, %v1070_v30 }
 0x111   :  { %v4559_v2 = vpop.eup %4558  ;;  %v709_v3 = vadd.f32 1.0, %v4557_v63  ;;  %4578 = vrcp.f32 %v707_v62  ;;  %v999_v62 = vrot.slane %v5990_v32, 2 }
 0x112   :  { %v4561_v9 = vpop.eup %4560  ;;  %v710_v10 = vadd.f32 1.0, %v4559_v2  ;;  %4580 = vrcp.f32 %v708_v0 }
 0x113   :  { %v4563_v12 = vpop.eup %4562  ;;  %v711_v15 = vadd.f32 1.0, %v4561_v9  ;;  %4582 = vrcp.f32 %v709_v3 }
 0x114   :  { %v4565_v23 = vpop.eup %4564  ;;  %v712_v24 = vadd.f32 1.0, %v4563_v12  ;;  %4584 = vrcp.f32 %v710_v10  ;;  %v1068_v12 = vrot.slane %v5988_v31, 3  ;;  %v1073_v31 = vrot.slane %v5998_v39, 3 }
 0x115   :  { %v4567_v25 = vpop.eup %4566  ;;  %v713_v26 = vadd.f32 1.0, %v4565_v23  ;;  %4586 = vrcp.f32 %v711_v15  ;;  %v1001_v23 = vrot.slane %v5998_v39, 2 }
 0x116   :  { %v4569_v28 = vpop.eup %4568  ;;  %v714_v29 = vadd.f32 1.0, %v4567_v25  ;;  %4588 = vrcp.f32 %v712_v24  ;;  %v1069_v24 = vrot.slane %v5992_v35, 3  ;;  %v4268_v35 = vmul.f32 -1.442695, %v1068_v12 }
 0x117   :  { %v4571_v34 = vpop.eup %4570  ;;  %4590 = vrcp.f32 %v713_v26  ;;  %v923_v44 = vadd.f32 1.0, %v4569_v28  ;;  %v1002_v26 = vrot.slane %v6002_v43, 2 }
 0x118   :  { %v4573_v42 = vpop.eup %4572  ;;  %4592 = vrcp.f32 %v714_v29  ;;  %v924_v46 = vadd.f32 1.0, %v4571_v34  ;;  %v1072_v29 = vrot.slane %v5996_v38, 3 }
 0x119   :  { %v4575_v45 = vpop.eup %4574  ;;  %4594 = vpow2.f32 %v4248_v27  ;;  %v925_v48 = vadd.f32 1.0, %v4573_v42  ;;  %v1071_v27 = vrot.slane %v5990_v32, 3  ;;  %v6054_v32 = vrot.slane %v483_v16, %v5924_v40 }
 0x11a   :  { %v4577_v47 = vpop.eup %4576  ;;  %4596 = vpow2.f32 %v4249_v33  ;;  %v926_v50 = vadd.f32 1.0, %v4575_v45  ;;  %v4267_v33 = vmul.f32 -1.442695, %v1067_v8  ;;  %v4272_v39 = vmul.f32 -1.442695, %v1072_v29 }
 0x11b   :  { %v6018_v49 = vpop.eup %4578  ;;  %4598 = vpow2.f32 %v4250_v41  ;;  %v927_v52 = vadd.f32 1.0, %v4577_v47  ;;  %v1074_v41 = vrot.slane %v6002_v43, 3  ;;  %v4273_v47 = vmul.f32 -1.442695, %v1073_v31 }
 0x11c   :  { %v6020_v51 = vpop.eup %4580  ;;  %4600 = vrcp.f32 %v923_v44  ;;  %v4269_v44 = vmul.f32 -1.442695, %v1069_v24 }
 0x11d   :  { %v6022_v53 = vpop.eup %4582  ;;  %4602 = vrcp.f32 %v924_v46  ;;  %v4271_v46 = vmul.f32 -1.442695, %v1071_v27 }
 0x11e   :  { %v6025_v55 = vpop.eup %4584  ;;  %4604 = vrcp.f32 %v925_v48 }
 0x11f   :  { %v6028_v57 = vpop.eup %4586  ;;  %4606 = vrcp.f32 %v926_v50  ;;  %v4274_v50 = vmul.f32 -1.442695, %v1074_v41 }
 0x120   :  { %v6031_v59 = vpop.eup %4588  ;;  %4608 = vrcp.f32 %v927_v52 }
 0x121   :  { %v6034_v61 = vpop.eup %4590  ;;  %4610 = vtanh.f32 %v995_v54 }
 0x122   :  { %v6037_v63 = vpop.eup %4592  ;;  %4612 = vtanh.f32 %v996_v56 }
 0x123   :  { %v4595_v0 = vpop.eup %4594  ;;  %4614 = vtanh.f32 %v997_v58 }
 0x124   :  { %v4597_v2 = vpop.eup %4596  ;;  %v928_v3 = vadd.f32 1.0, %v4595_v0  ;;  %4616 = vtanh.f32 %v998_v60 }
 0x125   :  { %v4599_v9 = vpop.eup %4598  ;;  %v929_v10 = vadd.f32 1.0, %v4597_v2  ;;  %4618 = vtanh.f32 %v999_v62 }
 0x126   :  { %v4601_v15 = vpop.eup %4600  ;;  %v930_v22 = vadd.f32 1.0, %v4599_v9  ;;  %4620 = vrcp.f32 %v928_v3  ;;  %v519_v3 = vcombine.low %v5961_v13, %v5976_v20 }
 0x127   :  { %v4603_v25 = vpop.eup %4602  ;;  %4622 = vrcp.f32 %v929_v10  ;;  %v1259_v48 = vmul.f32 0.0, %v4601_v15 }
 0x128   :  { %v4605_v28 = vpop.eup %4604  ;;  %4624 = vrcp.f32 %v930_v22  ;;  %v1260_v52 = vmul.f32 0.0, %v4603_v25 }
 0x129   :  { %v4607_v34 = vpop.eup %4606  ;;  %4626 = vtanh.f32 %v1000_v11  ;;  %v1261_v54 = vmul.f32 0.0, %v4605_v28  ;;  %v520_v11 = vcombine.high %v5961_v13, %v5976_v20 }
 0x12a   :  { %v4609_v42 = vpop.eup %4608  ;;  %4628 = vtanh.f32 %v1001_v23  ;;  %v1262_v58 = vmul.f32 0.0, %v4607_v34  ;;  %v521_v23 = vcombine.low %v5963_v14, %v5978_v21  ;;  %v6114_v14 = vrot.slane %v486_v19, %v5924_v40  ;;  %v4171_v19 = vld [vmem:[%s7716_s0 + $0x80] ss:$4 sm:$0xf] }
 0x12b   :  { %v4611_v45 = vpop.eup %4610  ;;  %4630 = vtanh.f32 %v1002_v26  ;;  %v1263_v60 = vmul.f32 0.0, %v4609_v42  ;;  %v6101_v24 = vrot.slane %v520_v11, %v5924_v40  ;;  %v6107_v26 = vrot.slane %v522_v4, %v5924_v40 }
 0x12c   :  { %v4613_v38 = vpop.eup %4612  ;;  %4632 = vpow2.f32 %v4267_v33  ;;  %v1283_v62 = vmul.f32 %v4611_v45, %v6018_v49  ;;  %v6104_v25 = vrot.slane %v521_v23, %v5924_v40  ;;  %v515_v21 = vcombine.high %v6054_v32, %v6054_v32 }
 0x12d   :  { %v4615_v43 = vpop.eup %4614  ;;  %4634 = vpow2.f32 %v4268_v35  ;;  %v1284_v16 = vmul.f32 %v4613_v38, %v6020_v51  ;;  %v6072_v51 = vrot.slane %v485_v18, %v5924_v40  ;;  %v6088_v18 = vrot.slane %v519_v3, %v5924_v40 }
 0x12e   :  { %v4617_v56 = vpop.eup %4616  ;;  %4636 = vpow2.f32 %v4269_v44  ;;  %v1285_v2 = vmul.f32 %v4615_v43, %v6022_v53  ;;  %v6062_v10 = vadd.f32 %v1283_v62, %v1259_v48  ;;  %v6078_v53 = vrot.slane %v484_v17, %v5924_v40  ;;  %v4172_v44 = vld [vmem:[%s7716_s0 + $0x90] ss:$4 sm:$0xf] }
 0x12f   :  { %v4619_v0 = vpop.eup %4618  ;;  %4638 = vpow2.f32 %v4270_v36  ;;  %v1286_v9 = vmul.f32 %v4617_v56, %v6025_v55  ;;  %v6066_v49 = vadd.f32 %v1284_v16, %v1260_v52  ;;  %v516_v27 = vcombine.high %v6072_v51, %v6072_v51 }
 0x130   :  { %v4621_v8 = vpop.eup %4620  ;;  %4640 = vpow2.f32 %v4271_v46  ;;  %v1287_v13 = vmul.f32 %v4619_v0, %v6028_v57  ;;  %v6083_v20 = vadd.f32 %v1285_v2, %v1261_v54  ;;  %v517_v31 = vcombine.high %v6078_v53, %v6078_v53  ;;  %v4174_v54 = vld [vmem:[%s7716_s0 + $0xb0] ss:$4 sm:$0xf]  ;;  %v4175_v0 = vld [vmem:[%s7716_s0 + $0xc0] ss:$4 sm:$0xf] }
 0x131   :  { %v4623_v12 = vpop.eup %4622  ;;  %4642 = vpow2.f32 %v4272_v39  ;;  %v6085_v15 = vadd.f32 %v1286_v9, %v1262_v58  ;;  %v551_v33 = vcombine.low %v6088_v18, %v6104_v25  ;;  %v1264_v7 = vmul.f32 0.0, %v4621_v8 }
 0x132   :  { %v6080_v55 = vpop.eup %4624  ;;  %4644 = vpow2.f32 %v4273_v47  ;;  %v6094_v17 = vadd.f32 %v1287_v13, %v1263_v60  ;;  %v552_v41 = vcombine.high %v6088_v18, %v6104_v25  ;;  %v1265_v39 = vmul.f32 0.0, %v4623_v12  ;;  %v4173_v47 = vld [vmem:[%s7716_s0 + $0xa0] ss:$4 sm:$0xf] }
 0x133   :  { %v4627_v22 = vpop.eup %4626  ;;  %4646 = vpow2.f32 %v4274_v50  ;;  %v518_v48 = vcombine.high %v6114_v14, %v6114_v14  ;;  %v6148_v56 = vadd.f32 %v4171_v19, %v6054_v32  ;;  %v6155_v16 = vadd.f32 %v4172_v44, %v6078_v53  ;;  %v4176_v32 = vld [vmem:[%s7716_s0 + $0xd0] ss:$4 sm:$0xf]  ;;  %v4177_v12 = vld [vmem:[%s7716_s0 + $0xe0] ss:$4 sm:$0xf] }
 0x134   :  { %v4629_v6 = vpop.eup %4628  ;;  %4648 = vtanh.f32 %v6062_v10  ;;  %v1288_v52 = vmul.f32 %v4627_v22, %v6031_v59  ;;  %v6162_v8 = vadd.f32 %v4173_v47, %v515_v21  ;;  %v6171_v53 = vadd.f32 %v4174_v54, %v517_v31  ;;  %v4178_v22 = vld [vmem:[%s7716_s0 + $0xf0] ss:$4 sm:$0xf]  ;;  %v4179_v25 = vld [vmem:[%s7716_s0 + $0x100] ss:$4 sm:$0xf] }
 0x135   :  { %v6097_v57 = vpop.eup %4630  ;;  %4650 = vtanh.f32 %v6066_v49  ;;  %v1289_v62 = vmul.f32 %v4629_v6, %v6034_v61  ;;  %v6179_v23 = vadd.f32 %v4175_v0, %v6072_v51  ;;  %v4227_v4 = vmul.f32 -1.442695, %v6148_v56 }
 0x136   :  { %v4633_v30 = vpop.eup %4632  ;;  %4652 = vtanh.f32 %v6083_v20  ;;  %v6157_v3 = vadd.f32 %v1288_v52, %v1264_v7  ;;  %v4228_v21 = vmul.f32 -1.442695, %v6155_v16  ;;  %v4229_v31 = vmul.f32 -1.442695, %v6162_v8 }
 0x137   :  { %v4635_v28 = vpop.eup %4634  ;;  %v1187_v29 = vadd.f32 1.0, %v4633_v30  ;;  %4654 = vtanh.f32 %v6085_v15  ;;  %v6166_v11 = vadd.f32 %v1289_v62, %v1265_v39  ;;  %v6185_v30 = vadd.f32 %v4176_v32, %v6114_v14 }
 0x138   :  { %v4637_v34 = vpop.eup %4636  ;;  %v1188_v5 = vadd.f32 1.0, %v4635_v28  ;;  %4656 = vtanh.f32 %v6094_v17  ;;  %v4231_v7 = vmul.f32 -1.442695, %v6179_v23  ;;  %v811_v19 = vrot.slane %v6148_v56, 1 }
 0x139   :  { %v4639_v35 = vpop.eup %4638  ;;  %v1189_v42 = vadd.f32 1.0, %v4637_v34  ;;  %4658 = vrcp.f32 %v1187_v29  ;;  %v6191_v29 = vadd.f32 %v4177_v12, %v516_v27  ;;  %v6197_v34 = vadd.f32 %v4178_v22, %v518_v48 }
 0x13a   :  { %v4641_v46 = vpop.eup %4640  ;;  %v1190_v38 = vadd.f32 1.0, %v4639_v35  ;;  %4660 = vrcp.f32 %v1188_v5  ;;  %v4230_v5 = vmul.f32 -1.442695, %v6171_v53  ;;  %v4232_v27 = vmul.f32 -1.442695, %v6185_v30 }
 0x13b   :  { %v4643_v43 = vpop.eup %4642  ;;  %v1191_v50 = vadd.f32 1.0, %v4641_v46  ;;  %4662 = vrcp.f32 %v1189_v42  ;;  %v812_v42 = vrot.slane %v6155_v16, 1  ;;  %v4233_v46 = vmul.f32 -1.442695, %v6191_v29 }
 0x13c   :  { %v4645_v58 = vpop.eup %4644  ;;  %v1192_v60 = vadd.f32 1.0, %v4643_v43  ;;  %4664 = vrcp.f32 %v1190_v38  ;;  %v813_v38 = vrot.slane %v6162_v8, 1  ;;  %v4234_v47 = vmul.f32 -1.442695, %v6197_v34 }
 0x13d   :  { %v4647_v59 = vpop.eup %4646  ;;  %v1193_v2 = vadd.f32 1.0, %v4645_v58  ;;  %4666 = vrcp.f32 %v1191_v50  ;;  %v814_v48 = vrot.slane %v6171_v53, 1  ;;  %v815_v50 = vrot.slane %v6179_v23, 1 }
 0x13e   :  { %v6164_v9 = vpop.eup %4648  ;;  %v1194_v61 = vadd.f32 1.0, %v4647_v59  ;;  %4668 = vrcp.f32 %v1192_v60  ;;  %v4251_v52 = vmul.f32 -1.442695, %v811_v19  ;;  %v4252_v58 = vmul.f32 -1.442695, %v812_v42 }
 0x13f   :  { %v6173_v13 = vpop.eup %4650  ;;  %4670 = vrcp.f32 %v1193_v2  ;;  %v4253_v62 = vmul.f32 -1.442695, %v813_v38  ;;  %v4254_v59 = vmul.f32 -1.442695, %v814_v48  ;;  %v816_v32 = vrot.slane %v6185_v30, 1 }
 0x140   :  { %v6182_v6 = vpop.eup %4652  ;;  %4672 = vrcp.f32 %v1194_v61  ;;  %v817_v61 = vrot.slane %v6191_v29, 1  ;;  %v4255_v12 = vmul.f32 -1.442695, %v815_v50  ;;  %v1003_v48 = vrot.slane %v6148_v56, 2 }
 0x141   :  { %v6188_v28 = vpop.eup %4654  ;;  %4674 = vtanh.f32 %v6157_v3 }
 0x142   :  { %v6194_v51 = vpop.eup %4656  ;;  %4676 = vtanh.f32 %v6166_v11  ;;  %v4257_v42 = vmul.f32 -1.442695, %v817_v61 }
 0x143   :  { %v4659_v14 = vpop.eup %4658  ;;  %4678 = vpow2.f32 %v4227_v4  ;;  %v818_v4 = vrot.slane %v6197_v34, 1 }
 0x144   :  { %v4661_v35 = vpop.eup %4660  ;;  %4680 = vpow2.f32 %v4228_v21 }
 0x145   :  { %v4663_v44 = vpop.eup %4662  ;;  %4682 = vpow2.f32 %v4229_v31 }
 0x146   :  { %v4665_v39 = vpop.eup %4664  ;;  %4684 = vpow2.f32 %v4230_v5 }
 0x147   :  { %v4667_v43 = vpop.eup %4666  ;;  %4686 = vpow2.f32 %v4231_v7 }
 0x148   :  { %v4669_v54 = vpop.eup %4668  ;;  %4688 = vpow2.f32 %v4232_v27  ;;  %v4256_v27 = vmul.f32 -1.442695, %v816_v32  ;;  %v1355_v32 = vmul.f32 %v4659_v14, %v6164_v9  ;;  %v1359_v1 = vmul.f32 %v4667_v43, %v6194_v51 }
 0x149   :  { %v4671_v60 = vpop.eup %4670  ;;  %4690 = vpow2.f32 %v4233_v46 }
 0x14a   :  { %v6209_v0 = vpop.eup %4672  ;;  %4692 = vpow2.f32 %v4234_v47  ;;  %v4258_v47 = vmul.f32 -1.442695, %v818_v4  ;;  %v1356_v4 = vmul.f32 %v4661_v35, %v6173_v13 }
 0x14b   :  { %v4675_v2 = vpop.eup %4674  ;;  %4694 = vpow2.f32 %v4251_v52 }
 0x14c   :  { %v4677_v22 = vpop.eup %4676  ;;  %4696 = vpow2.f32 %v4252_v58  ;;  %v1004_v58 = vrot.slane %v6155_v16, 2  ;;  %v1360_v36 = vmul.f32 %v4675_v2, %v4669_v54 }
 0x14d   :  { %v4679_v21 = vpop.eup %4678  ;;  %4698 = vpow2.f32 %v4253_v62  ;;  %v1005_v62 = vrot.slane %v6162_v8, 2  ;;  %v1361_v45 = vmul.f32 %v4677_v22, %v4671_v60 }
 0x14e   :  { %v4681_v31 = vpop.eup %4680  ;;  %v715_v5 = vadd.f32 1.0, %v4679_v21  ;;  %4700 = vpow2.f32 %v4254_v59  ;;  %v1432_v51 = vpack.c.bf16 %v1360_v36, %v1360_v36 }
 0x14f   :  { %v4683_v7 = vpop.eup %4682  ;;  %v716_v19 = vadd.f32 1.0, %v4681_v31  ;;  %4702 = vpow2.f32 %v4255_v12  ;;  %v1006_v12 = vrot.slane %v6171_v53, 2  ;;  %v1433_v54 = vpack.c.bf16 %v1361_v45, %v1361_v45 }
 0x150   :  { %v4685_v46 = vpop.eup %4684  ;;  %v717_v38 = vadd.f32 1.0, %v4683_v7  ;;  %4704 = vrcp.f32 %v715_v5  ;;  %v1357_v5 = vmul.f32 %v4663_v44, %v6182_v6 }
 0x151   :  { %v4687_v50 = vpop.eup %4686  ;;  %v718_v52 = vadd.f32 1.0, %v4685_v46  ;;  %4706 = vrcp.f32 %v716_v19  ;;  %v1358_v46 = vmul.f32 %v4665_v39, %v6188_v28  ;;  %v1431_v39 = vpack.c.bf16 %v1359_v1, %v1359_v1 }
 0x152   :  { %v4689_v21 = vpop.eup %4688  ;;  %v719_v59 = vadd.f32 1.0, %v4687_v50  ;;  %4708 = vrcp.f32 %v717_v38  ;;  %v1429_v35 = vpack.c.bf16 %v1357_v5, %v1357_v5  ;;  %v1481_v1 = vunpack.c.l.b16 %v1433_v54 }
 0x153   :  { %v4691_v61 = vpop.eup %4690  ;;  %v720_v31 = vadd.f32 1.0, %v4689_v21  ;;  %4710 = vrcp.f32 %v718_v52  ;;  %v1427_v52 = vpack.c.bf16 %v1355_v32, %v1355_v32  ;;  %v1428_v21 = vpack.c.bf16 %v1356_v4, %v1356_v4 }
 0x154   :  { %v4693_v7 = vpop.eup %4692  ;;  %v721_v19 = vadd.f32 1.0, %v4691_v61  ;;  %4712 = vrcp.f32 %v719_v59  ;;  %v1430_v44 = vpack.c.bf16 %v1358_v46, %v1358_v46 }
 0x155   :  { %v4695_v50 = vpop.eup %4694  ;;  %v722_v38 = vadd.f32 1.0, %v4693_v7  ;;  %4714 = vrcp.f32 %v720_v31  ;;  %v1475_v60 = vunpack.c.l.b16 %v1427_v52  ;;  %v1476_v32 = vunpack.c.l.b16 %v1428_v21 }
 0x156   :  { %v4697_v9 = vpop.eup %4696  ;;  %4716 = vrcp.f32 %v721_v19  ;;  %v931_v14 = vadd.f32 1.0, %v4695_v50  ;;  %v1477_v31 = vunpack.c.l.b16 %v1429_v35  ;;  %v1478_v5 = vunpack.c.l.b16 %v1430_v44 }
 0x157   :  { %v4699_v13 = vpop.eup %4698  ;;  %4718 = vrcp.f32 %v722_v38  ;;  %v932_v6 = vadd.f32 1.0, %v4697_v9  ;;  %v1479_v7 = vunpack.c.l.b16 %v1431_v39  ;;  %v1499_v36 = vrot.slane %v1476_v32, 7 }
 0x158   :  { %v4701_v59 = vpop.eup %4700  ;;  %4720 = vpow2.f32 %v4256_v27  ;;  %v933_v28 = vadd.f32 1.0, %v4699_v13  ;;  %v1480_v27 = vunpack.c.l.b16 %v1432_v51  ;;  %v1007_v50 = vrot.slane %v6179_v23, 2 }
 0x159   :  { %v4703_v43 = vpop.eup %4702  ;;  %4722 = vpow2.f32 %v4257_v42  ;;  %v934_v61 = vadd.f32 1.0, %v4701_v59  ;;  %v1502_v42 = vrot.slane %v1477_v31, 6  ;;  %v1501_v38 = vsel %vm1500_vm0, %v1499_v36, %v1475_v60 }
 0x15a   :  { %v6223_v2 = vpop.eup %4704  ;;  %4724 = vpow2.f32 %v4258_v47  ;;  %v935_v22 = vadd.f32 1.0, %v4703_v43  ;;  %v1505_v47 = vrot.slane %v1478_v5, 5  ;;  %v1508_v52 = vrot.slane %v1479_v7, 4 }
 0x15b   :  { %v6225_v4 = vpop.eup %4706  ;;  %4726 = vrcp.f32 %v931_v14  ;;  %v1504_v14 = vsel %vm1503_vm1, %v1502_v42, %v1501_v38  ;;  %v1514_v59 = vrot.slane %v1481_v1, 2  ;;  %v1075_v43 = vrot.slane %v6148_v56, 3 }
 0x15c   :  { %v6227_v19 = vpop.eup %4708  ;;  %4728 = vrcp.f32 %v932_v6  ;;  %v1507_v13 = vsel %vm1506_vm2, %v1505_v47, %v1504_v14  ;;  %v1511_v6 = vrot.slane %v1480_v27, 3  ;;  %v1008_v60 = vrot.slane %v6185_v30, 2 }
 0x15d   :  { %v6229_v45 = vpop.eup %4710  ;;  %4730 = vrcp.f32 %v933_v28  ;;  %v1510_v44 = vsel %vm1509_vm3, %v1508_v52, %v1507_v13  ;;  %v1009_v31 = vrot.slane %v6191_v29, 2  ;;  %v1077_v5 = vrot.slane %v6162_v8, 3 }
 0x15e   :  { %v6231_v46 = vpop.eup %4712  ;;  %4732 = vrcp.f32 %v934_v61  ;;  %v1513_v39 = vsel %vm1512_vm4, %v1511_v6, %v1510_v44  ;;  %v1010_v56 = vrot.slane %v6197_v34, 2  ;;  %v1078_v7 = vrot.slane %v6171_v53, 3 }
 0x15f   :  { %v6235_v9 = vpop.eup %4714  ;;  %4734 = vrcp.f32 %v935_v22  ;;  %v6255_v61 = vsel %vm1515_vm5, %v1514_v59, %v1513_v39  ;;  %v1076_v22 = vrot.slane %v6155_v16, 3  ;;  %v1079_v1 = vrot.slane %v6179_v23, 3 }
 0x160   :  { %v6238_v21 = vpop.eup %4716  ;;  %4736 = vtanh.f32 %v1003_v48  ;;  %v4275_v36 = vmul.f32 -1.442695, %v1075_v43  ;;  %v1080_v16 = vrot.slane %v6185_v30, 3  ;;  %v1081_v8 = vrot.slane %v6191_v29, 3 }
 0x161   :  { %v6243_v35 = vpop.eup %4718  ;;  %4738 = vtanh.f32 %v1004_v58  ;;  %v4276_v47 = vmul.f32 -1.442695, %v1076_v22  ;;  %v4277_v38 = vmul.f32 -1.442695, %v1077_v5  ;;  %v1082_v52 = vrot.slane %v6197_v34, 3 }
 0x162   :  { %v4721_v28 = vpop.eup %4720  ;;  %4740 = vtanh.f32 %v1005_v62  ;;  %v4278_v53 = vmul.f32 -1.442695, %v1078_v7  ;;  %v4279_v6 = vmul.f32 -1.442695, %v1079_v1  ;;  %v4280_v59 = vmul.f32 -1.442695, %v1080_v16 }
 0x163   :  { %v4723_v48 = vpop.eup %4722  ;;  %v936_v51 = vadd.f32 1.0, %v4721_v28  ;;  %4742 = vtanh.f32 %v1006_v12  ;;  %v4281_v39 = vmul.f32 -1.442695, %v1081_v8  ;;  %v4282_v43 = vmul.f32 -1.442695, %v1082_v52 }
 0x164   :  { %v4725_v58 = vpop.eup %4724  ;;  %v937_v54 = vadd.f32 1.0, %v4723_v48  ;;  %4744 = vtanh.f32 %v1007_v50  ;;  %v4183_v52 = vld [vmem:[%s7716_s0 + $0x140] ss:$4 sm:$0xf] }
 0x165   :  { %v4727_v62 = vpop.eup %4726  ;;  %v938_v32 = vadd.f32 1.0, %v4725_v58  ;;  %4746 = vrcp.f32 %v936_v51 }
 0x166   :  { %v4729_v12 = vpop.eup %4728  ;;  %4748 = vrcp.f32 %v937_v54  ;;  %v1267_v23 = vmul.f32 0.0, %v4727_v62 }
 0x167   :  { %v4731_v27 = vpop.eup %4730  ;;  %4750 = vrcp.f32 %v938_v32  ;;  %v1268_v28 = vmul.f32 0.0, %v4729_v12 }
 0x168   :  { %v4733_v42 = vpop.eup %4732  ;;  %4752 = vtanh.f32 %v1008_v60  ;;  %v1269_v48 = vmul.f32 0.0, %v4731_v27 }
 0x169   :  { %v4735_v50 = vpop.eup %4734  ;;  %4754 = vtanh.f32 %v1009_v31  ;;  %v1270_v58 = vmul.f32 0.0, %v4733_v42  ;;  %v7749_v42 = vcombine.high %v6101_v24, %v6107_v26 }
 0x16a   :  { %v4737_v14 = vpop.eup %4736  ;;  %4756 = vtanh.f32 %v1010_v56  ;;  %v1271_v60 = vmul.f32 0.0, %v4735_v50 }
 0x16b   :  { %v4739_v13 = vpop.eup %4738  ;;  %4758 = vpow2.f32 %v4275_v36  ;;  %v1291_v29 = vmul.f32 %v4737_v14, %v6223_v2  ;;  %v4181_v14 = vld [vmem:[%s7716_s0 + $0x120] ss:$4 sm:$0xf] }
 0x16c   :  { %v4741_v44 = vpop.eup %4740  ;;  %4760 = vpow2.f32 %v4276_v47  ;;  %v1292_v34 = vmul.f32 %v4739_v13, %v6225_v4 }
 0x16d   :  { %v4743_v30 = vpop.eup %4742  ;;  %4762 = vpow2.f32 %v4277_v38  ;;  %v1293_v22 = vmul.f32 %v4741_v44, %v6227_v19  ;;  %v6270_v62 = vadd.f32 %v1291_v29, %v1267_v23  ;;  %v561_v19 = vrot.slane %v551_v33, %v5924_v40  ;;  %v4184_v29 = vld [vmem:[%s7716_s0 + $0x150] ss:$4 sm:$0xf] }
 0x16e   :  { %v4745_v51 = vpop.eup %4744  ;;  %4764 = vpow2.f32 %v4278_v53  ;;  %v1294_v31 = vmul.f32 %v4743_v30, %v6229_v45  ;;  %v6273_v5 = vadd.f32 %v1292_v34, %v1268_v28  ;;  %v575_v45 = vrot.slane %v552_v41, %v5924_v40 }
 0x16f   :  { %v4747_v54 = vpop.eup %4746  ;;  %4766 = vpow2.f32 %v4279_v6  ;;  %v1295_v12 = vmul.f32 %v4745_v51, %v6231_v46  ;;  %v6278_v56 = vadd.f32 %v1293_v22, %v1269_v48  ;;  %v7748_v46 = vcombine.low %v6101_v24, %v6107_v26  ;;  %v4180_v24 = vld [vmem:[%s7716_s0 + $0x110] ss:$4 sm:$0xf] }
 0x170   :  { %v4749_v32 = vpop.eup %4748  ;;  %4768 = vpow2.f32 %v4280_v59  ;;  %v6280_v7 = vadd.f32 %v1294_v31, %v1270_v58  ;;  %v582_v33 = vrot.slane %v7749_v42, %v5924_v40  ;;  %v583_v26 = vcombine.high %v561_v19, %v561_v19  ;;  %v4182_v59 = vld [vmem:[%s7716_s0 + $0x130] ss:$4 sm:$0xf] }
 0x171   :  { %v6275_v2 = vpop.eup %4750  ;;  %4770 = vpow2.f32 %v4281_v39  ;;  %v6290_v1 = vadd.f32 %v1295_v12, %v1271_v60  ;;  %v568_v36 = vrot.slane %v7748_v46, %v5924_v40  ;;  %v585_v50 = vcombine.high %v575_v45, %v575_v45  ;;  %v4186_v12 = vld [vmem:[%s7716_s0 + $0x170] ss:$4 sm:$0xf] }
 0x172   :  { %v4753_v4 = vpop.eup %4752  ;;  %4772 = vpow2.f32 %v4282_v43  ;;  %v586_v13 = vcombine.high %v582_v33, %v582_v33  ;;  %v1272_v44 = vmul.f32 0.0, %v4747_v54  ;;  %v6322_v28 = vadd.f32 %v4179_v25, %v561_v19  ;;  %v4185_v54 = vld [vmem:[%s7716_s0 + $0x160] ss:$4 sm:$0xf] }
 0x173   :  { %v4755_v27 = vpop.eup %4754  ;;  %4774 = vtanh.f32 %v6270_v62  ;;  %v584_v53 = vcombine.high %v568_v36, %v568_v36  ;;  %v1273_v48 = vmul.f32 0.0, %v4749_v32  ;;  %v6327_v51 = vadd.f32 %v4180_v24, %v575_v45 }
 0x174   :  { %v6301_v16 = vpop.eup %4756  ;;  %4776 = vtanh.f32 %v6273_v5  ;;  %v1296_v34 = vmul.f32 %v4753_v4, %v6235_v9  ;;  %v6333_v60 = vadd.f32 %v4181_v14, %v583_v26  ;;  %v1297_v32 = vmul.f32 %v4755_v27, %v6238_v21 }
 0x175   :  { %v4759_v18 = vpop.eup %4758  ;;  %4778 = vtanh.f32 %v6278_v56  ;;  %v6339_v19 = vadd.f32 %v4182_v59, %v585_v50  ;;  %v6343_v4 = vadd.f32 %v4183_v52, %v568_v36  ;;  %v6349_v27 = vadd.f32 %v4185_v54, %v584_v53 }
 0x176   :  { %v4761_v41 = vpop.eup %4760  ;;  %v1195_v47 = vadd.f32 1.0, %v4759_v18  ;;  %4780 = vtanh.f32 %v6280_v7  ;;  %v6341_v9 = vadd.f32 %v1296_v34, %v1272_v44  ;;  %v6345_v25 = vadd.f32 %v1297_v32, %v1273_v48 }
 0x177   :  { %v4763_v8 = vpop.eup %4762  ;;  %v1196_v38 = vadd.f32 1.0, %v4761_v41  ;;  %4782 = vtanh.f32 %v6290_v1  ;;  %v6347_v41 = vadd.f32 %v4184_v29, %v582_v33  ;;  %v4235_v24 = vmul.f32 -1.442695, %v6322_v28 }
 0x178   :  { %v4765_v6 = vpop.eup %4764  ;;  %v1197_v23 = vadd.f32 1.0, %v4763_v8  ;;  %4784 = vrcp.f32 %v1195_v47  ;;  %v6351_v47 = vadd.f32 %v4186_v12, %v586_v13  ;;  %v4236_v36 = vmul.f32 -1.442695, %v6327_v51 }
 0x179   :  { %v4767_v30 = vpop.eup %4766  ;;  %v1198_v39 = vadd.f32 1.0, %v4765_v6  ;;  %4786 = vrcp.f32 %v1196_v38  ;;  %v4237_v8 = vmul.f32 -1.442695, %v6333_v60  ;;  %v4238_v33 = vmul.f32 -1.442695, %v6339_v19 }
 0x17a   :  { %v4769_v43 = vpop.eup %4768  ;;  %v1199_v58 = vadd.f32 1.0, %v4767_v30  ;;  %4788 = vrcp.f32 %v1197_v23  ;;  %v4239_v38 = vmul.f32 -1.442695, %v6343_v4  ;;  %v4240_v52 = vmul.f32 -1.442695, %v6347_v41 }
 0x17b   :  { %v4771_v22 = vpop.eup %4770  ;;  %v1200_v31 = vadd.f32 1.0, %v4769_v43  ;;  %4790 = vrcp.f32 %v1198_v39  ;;  %v819_v53 = vrot.slane %v6322_v28, 1  ;;  %v820_v13 = vrot.slane %v6327_v51, 1 }
 0x17c   :  { %v4773_v45 = vpop.eup %4772  ;;  %v1201_v46 = vadd.f32 1.0, %v4771_v22  ;;  %4792 = vrcp.f32 %v1199_v58  ;;  %v4241_v23 = vmul.f32 -1.442695, %v6349_v27  ;;  %v4242_v44 = vmul.f32 -1.442695, %v6351_v47 }
 0x17d   :  { %v4775_v42 = vpop.eup %4774  ;;  %v1202_v18 = vadd.f32 1.0, %v4773_v45  ;;  %4794 = vrcp.f32 %v1200_v31  ;;  %v821_v59 = vrot.slane %v6333_v60, 1  ;;  %v822_v39 = vrot.slane %v6339_v19, 1 }
 0x17e   :  { %v4777_v21 = vpop.eup %4776  ;;  %4796 = vrcp.f32 %v1201_v46  ;;  %v823_v48 = vrot.slane %v6343_v4, 1  ;;  %v4259_v31 = vmul.f32 -1.442695, %v819_v53  ;;  %v4260_v32 = vmul.f32 -1.442695, %v820_v13 }
 0x17f   :  { %v4779_v26 = vpop.eup %4778  ;;  %4798 = vrcp.f32 %v1202_v18  ;;  %v4262_v58 = vmul.f32 -1.442695, %v822_v39 }
 0x180   :  { %v4781_v50 = vpop.eup %4780  ;;  %4800 = vtanh.f32 %v6341_v9 }
 0x181   :  { %v4783_v14 = vpop.eup %4782  ;;  %4802 = vtanh.f32 %v6345_v25 }
 0x182   :  { %v4785_v6 = vpop.eup %4784  ;;  %4804 = vpow2.f32 %v4235_v24 }
 0x183   :  { %v4787_v30 = vpop.eup %4786  ;;  %4806 = vpow2.f32 %v4236_v36  ;;  %v1363_v29 = vmul.f32 %v4785_v6, %v4775_v42  ;;  %v4261_v42 = vmul.f32 -1.442695, %v821_v59 }
 0x184   :  { %v4789_v43 = vpop.eup %4788  ;;  %4808 = vpow2.f32 %v4237_v8  ;;  %v1364_v54 = vmul.f32 %v4787_v30, %v4777_v21 }
 0x185   :  { %v4791_v22 = vpop.eup %4790  ;;  %4810 = vpow2.f32 %v4238_v33  ;;  %v1365_v12 = vmul.f32 %v4789_v43, %v4779_v26  ;;  %v1435_v18 = vpack.c.bf16 %v1363_v29, %v1363_v29  ;;  %v4263_v33 = vmul.f32 -1.442695, %v823_v48 }
 0x186   :  { %v4793_v45 = vpop.eup %4792  ;;  %4812 = vpow2.f32 %v4239_v38  ;;  %v1366_v46 = vmul.f32 %v4791_v22, %v4781_v50  ;;  %v1436_v24 = vpack.c.bf16 %v1364_v54, %v1364_v54 }
 0x187   :  { %v4795_v36 = vpop.eup %4794  ;;  %4814 = vpow2.f32 %v4240_v52  ;;  %v1367_v6 = vmul.f32 %v4793_v45, %v4783_v14  ;;  %v1437_v8 = vpack.c.bf16 %v1365_v12, %v1365_v12  ;;  %v1483_v50 = vunpack.c.l.b16 %v1435_v18 }
 0x188   :  { %v4797_v37 = vpop.eup %4796  ;;  %4816 = vpow2.f32 %v4241_v23  ;;  %v1438_v34 = vpack.c.bf16 %v1366_v46, %v1366_v46  ;;  %v1484_v21 = vunpack.c.l.b16 %v1436_v24 }
 0x189   :  { %v6370_v30 = vpop.eup %4798  ;;  %4818 = vpow2.f32 %v4242_v44  ;;  %v1439_v26 = vpack.c.bf16 %v1367_v6, %v1367_v6  ;;  %v1485_v53 = vunpack.c.l.b16 %v1437_v8  ;;  %v826_v8 = vrot.slane %v6351_v47, 1 }
 0x18a   :  { %v4801_v38 = vpop.eup %4800  ;;  %4820 = vpow2.f32 %v4259_v31  ;;  %v1486_v13 = vunpack.c.l.b16 %v1438_v34  ;;  %v1520_v29 = vrot.slane %v1484_v21, 7 }
 0x18b   :  { %v4803_v52 = vpop.eup %4802  ;;  %4822 = vpow2.f32 %v4260_v32  ;;  %v1368_v14 = vmul.f32 %v4801_v38, %v4795_v36  ;;  %v1487_v59 = vunpack.c.l.b16 %v1439_v26  ;;  %v1522_v43 = vrot.slane %v1485_v53, 6 }
 0x18c   :  { %v4805_v23 = vpop.eup %4804  ;;  %4824 = vpow2.f32 %v4261_v42  ;;  %v1369_v39 = vmul.f32 %v4803_v52, %v4797_v37  ;;  %v1521_v54 = vsel %vm1500_vm0, %v1520_v29, %v1483_v50  ;;  %v1524_v22 = vrot.slane %v1486_v13, 5 }
 0x18d   :  { %v4807_v44 = vpop.eup %4806  ;;  %v723_v48 = vadd.f32 1.0, %v4805_v23  ;;  %4826 = vpow2.f32 %v4262_v58  ;;  %v1440_v12 = vpack.c.bf16 %v1368_v14, %v1368_v14  ;;  %v1523_v31 = vsel %vm1503_vm1, %v1522_v43, %v1521_v54 }
 0x18e   :  { %v4809_v45 = vpop.eup %4808  ;;  %v724_v34 = vadd.f32 1.0, %v4807_v44  ;;  %4828 = vpow2.f32 %v4263_v33  ;;  %v1441_v46 = vpack.c.bf16 %v1369_v39, %v1369_v39  ;;  %v1525_v32 = vsel %vm1506_vm2, %v1524_v22, %v1523_v31 }
 0x18f   :  { %v4811_v18 = vpop.eup %4810  ;;  %v725_v24 = vadd.f32 1.0, %v4809_v45  ;;  %4830 = vrcp.f32 %v723_v48  ;;  %v1488_v36 = vunpack.c.l.b16 %v1440_v12  ;;  %v1526_v37 = vrot.slane %v1487_v59, 4 }
 0x190   :  { %v4813_v42 = vpop.eup %4812  ;;  %v726_v6 = vadd.f32 1.0, %v4811_v18  ;;  %4832 = vrcp.f32 %v724_v34  ;;  %v1489_v58 = vunpack.c.l.b16 %v1441_v46  ;;  %v7750_v14 = vrot.slane %v6347_v41, 1 }
 0x191   :  { %v4815_v21 = vpop.eup %4814  ;;  %v727_v26 = vadd.f32 1.0, %v4813_v42  ;;  %4834 = vrcp.f32 %v725_v24  ;;  %v1527_v53 = vsel %vm1509_vm3, %v1526_v37, %v1525_v32  ;;  %v1528_v33 = vrot.slane %v1488_v36, 3 }
 0x192   :  { %v4817_v38 = vpop.eup %4816  ;;  %v728_v50 = vadd.f32 1.0, %v4815_v21  ;;  %4836 = vrcp.f32 %v726_v6  ;;  %v1530_v13 = vrot.slane %v1489_v58, 2  ;;  %v4264_v59 = vmul.f32 -1.442695, %v7750_v14 }
 0x193   :  { %v4819_v29 = vpop.eup %4818  ;;  %v729_v52 = vadd.f32 1.0, %v4817_v38  ;;  %4838 = vrcp.f32 %v727_v26  ;;  %v1529_v43 = vsel %vm1512_vm4, %v1528_v33, %v1527_v53  ;;  %v7751_v54 = vrot.slane %v6349_v27, 1 }
 0x194   :  { %v4821_v23 = vpop.eup %4820  ;;  %v730_v39 = vadd.f32 1.0, %v4819_v29  ;;  %4840 = vrcp.f32 %v728_v50  ;;  %v6383_v44 = vsel %vm1515_vm5, %v1530_v13, %v1529_v43  ;;  %v4266_v12 = vmul.f32 -1.442695, %v826_v8 }
 0x195   :  { %v4265_v22 = vmul.f32 -1.442695, %v7751_v54  ;;  %v4823_v48 = vpop.eup %4822  ;;  %4842 = vrcp.f32 %v729_v52  ;;  %v939_v45 = vadd.f32 1.0, %v4821_v23  ;;  %v1011_v8 = vrot.slane %v6322_v28, 2 }
 0x196   :  { %v4825_v31 = vpop.eup %4824  ;;  %4844 = vrcp.f32 %v730_v39  ;;  %v940_v46 = vadd.f32 1.0, %v4823_v48  ;;  %v1012_v21 = vrot.slane %v6327_v51, 2  ;;  %v1013_v53 = vrot.slane %v6333_v60, 2 }
 0x197   :  { %v4827_v34 = vpop.eup %4826  ;;  %4846 = vpow2.f32 %v4264_v59  ;;  %v941_v18 = vadd.f32 1.0, %v4825_v31  ;;  %v1014_v38 = vrot.slane %v6339_v19, 2  ;;  %v1015_v13 = vrot.slane %v6343_v4, 2 }
 0x198   :  { %v4829_v32 = vpop.eup %4828  ;;  %4848 = vpow2.f32 %v4265_v22  ;;  %v942_v36 = vadd.f32 1.0, %v4827_v34  ;;  %v1083_v43 = vrot.slane %v6322_v28, 3  ;;  %v1016_v54 = vrot.slane %v6347_v41, 2 }
 0x199   :  { %v6385_v24 = vpop.eup %4830  ;;  %4850 = vpow2.f32 %v4266_v12  ;;  %v943_v42 = vadd.f32 1.0, %v4829_v32  ;;  %v1084_v22 = vrot.slane %v6327_v51, 3  ;;  %v1017_v31 = vrot.slane %v6349_v27, 2 }
 0x19a   :  { %v6387_v37 = vpop.eup %4832  ;;  %4852 = vrcp.f32 %v939_v45  ;;  %v1085_v45 = vrot.slane %v6333_v60, 3  ;;  %v1086_v28 = vrot.slane %v6339_v19, 3  ;;  %v1088_v51 = vrot.slane %v6347_v41, 3 }
 0x19b   :  { %v6389_v6 = vpop.eup %4834  ;;  %4854 = vrcp.f32 %v940_v46  ;;  %v1018_v46 = vrot.slane %v6351_v47, 2  ;;  %v1089_v60 = vrot.slane %v6349_v27, 3 }
 0x19c   :  { %v6392_v58 = vpop.eup %4836  ;;  %4856 = vrcp.f32 %v941_v18  ;;  %v1087_v18 = vrot.slane %v6343_v4, 3  ;;  %v4286_v19 = vmul.f32 -1.442695, %v1086_v28 }
 0x19d   :  { %v6395_v26 = vpop.eup %4838  ;;  %4858 = vrcp.f32 %v942_v36  ;;  %v4283_v36 = vmul.f32 -1.442695, %v1083_v43  ;;  %v4288_v43 = vmul.f32 -1.442695, %v1088_v51 }
 0x19e   :  { %v6398_v33 = vpop.eup %4840  ;;  %4860 = vrcp.f32 %v943_v42 }
 0x19f   :  { %v6401_v50 = vpop.eup %4842  ;;  %4862 = vtanh.f32 %v1011_v8  ;;  %v4284_v8 = vmul.f32 -1.442695, %v1084_v22 }
 0x1a0   :  { %v6404_v29 = vpop.eup %4844  ;;  %4864 = vtanh.f32 %v1012_v21 }
 0x1a1   :  { %v4847_v52 = vpop.eup %4846  ;;  %4866 = vtanh.f32 %v1013_v53  ;;  %v4285_v53 = vmul.f32 -1.442695, %v1085_v45 }
 0x1a2   :  { %v4849_v14 = vpop.eup %4848  ;;  %v944_v59 = vadd.f32 1.0, %v4847_v52  ;;  %4868 = vtanh.f32 %v1014_v38 }
 0x1a3   :  { %v4851_v23 = vpop.eup %4850  ;;  %v945_v39 = vadd.f32 1.0, %v4849_v14  ;;  %4870 = vtanh.f32 %v1015_v13  ;;  %v1090_v13 = vrot.slane %v6351_v47, 3  ;;  %v4287_v14 = vmul.f32 -1.442695, %v1087_v18 }
 0x1a4   :  { %v4853_v48 = vpop.eup %4852  ;;  %v946_v12 = vadd.f32 1.0, %v4851_v23  ;;  %4872 = vrcp.f32 %v944_v59  ;;  %v1298_v18 = vmul.f32 %v6301_v16, %v6243_v35 }
 0x1a5   :  { %v4855_v34 = vpop.eup %4854  ;;  %4874 = vrcp.f32 %v945_v39  ;;  %v1275_v4 = vmul.f32 0.0, %v4853_v48  ;;  %v4289_v39 = vmul.f32 -1.442695, %v1089_v60  ;;  %v4290_v47 = vmul.f32 -1.442695, %v1090_v13 }
 0x1a6   :  { %v4857_v32 = vpop.eup %4856  ;;  %4876 = vrcp.f32 %v946_v12  ;;  %v1276_v23 = vmul.f32 0.0, %v4855_v34  ;;  %v1266_v12 = vmul.f32 0.0, %v6080_v55  ;;  %v1274_v48 = vmul.f32 0.0, %v6275_v2 }
 0x1a7   :  { %v4859_v42 = vpop.eup %4858  ;;  %4878 = vtanh.f32 %v1016_v54  ;;  %v1277_v54 = vmul.f32 0.0, %v4857_v32  ;;  %v1290_v32 = vmul.f32 %v6097_v57, %v6037_v63 }
 0x1a8   :  { %v4861_v21 = vpop.eup %4860  ;;  %4880 = vtanh.f32 %v1017_v31  ;;  %v6434_v51 = vadd.f32 %v1298_v18, %v1274_v48 }
 0x1a9   :  { %v4863_v38 = vpop.eup %4862  ;;  %4882 = vtanh.f32 %v1018_v46 }
 0x1aa   :  { %v4865_v52 = vpop.eup %4864  ;;  %4884 = vpow2.f32 %v4283_v36  ;;  %v1299_v27 = vmul.f32 %v4863_v38, %v6385_v24  ;;  %v6432_v36 = vadd.f32 %v1290_v32, %v1266_v12 }
 0x1ab   :  { %v4867_v59 = vpop.eup %4866  ;;  %4886 = vpow2.f32 %v4284_v8  ;;  %v1300_v31 = vmul.f32 %v4865_v52, %v6387_v37 }
 0x1ac   :  { %v4869_v41 = vpop.eup %4868  ;;  %4888 = vpow2.f32 %v4285_v53  ;;  %v1301_v46 = vmul.f32 %v4867_v59, %v6389_v6  ;;  %v6422_v34 = vadd.f32 %v1299_v27, %v1275_v4  ;;  %v1278_v53 = vmul.f32 0.0, %v4859_v42 }
 0x1ad   :  { %v4871_v22 = vpop.eup %4870  ;;  %4890 = vpow2.f32 %v4286_v19  ;;  %v6426_v24 = vadd.f32 %v1300_v31, %v1276_v23  ;;  %v1302_v4 = vmul.f32 %v4869_v41, %v6392_v58 }
 0x1ae   :  { %v4873_v45 = vpop.eup %4872  ;;  %4892 = vpow2.f32 %v4287_v14  ;;  %v6430_v37 = vadd.f32 %v1301_v46, %v1277_v54  ;;  %v1279_v14 = vmul.f32 0.0, %v4861_v21 }
 0x1af   :  { %v4875_v28 = vpop.eup %4874  ;;  %4894 = vpow2.f32 %v4288_v43  ;;  %v1280_v23 = vmul.f32 0.0, %v4873_v45  ;;  %v6443_v12 = vadd.f32 %v1302_v4, %v1278_v53 }
 0x1b0   :  { %v4877_v55 = vpop.eup %4876  ;;  %4896 = vpow2.f32 %v4289_v39  ;;  %7752 = vst [vmem:[#allocation4_spill] sm:$0xff] %v6430_v37  ;;  %v1303_v39 = vmul.f32 %v4871_v22, %v6395_v26  ;;  %v1281_v42 = vmul.f32 0.0, %v4875_v28 }
 0x1b1   :  { %v4879_v2 = vpop.eup %4878  ;;  %4898 = vpow2.f32 %v4290_v47  ;;  %7753 = vst [vmem:[#allocation5_spill] sm:$0xff] %v6443_v12  ;;  %v1282_v21 = vmul.f32 0.0, %v4877_v55 }
 0x1b2   :  { %v4881_v6 = vpop.eup %4880  ;;  %4900 = vtanh.f32 %v6422_v34  ;;  %v1304_v48 = vmul.f32 %v4879_v2, %v6398_v33  ;;  %v6446_v58 = vadd.f32 %v1303_v39, %v1279_v14 }
 0x1b3   :  { %v4883_v63 = vpop.eup %4882  ;;  %4902 = vtanh.f32 %v6426_v24  ;;  %v1305_v45 = vmul.f32 %v4881_v6, %v6401_v50 }
 0x1b4   :  { %v4885_v57 = vpop.eup %4884  ;;  %4904 = vtanh.f32 %v6430_v37  ;;  %7754 = vst [vmem:[#allocation6_spill] sm:$0xff] %v6446_v58  ;;  %v6449_v22 = vadd.f32 %v1304_v48, %v1280_v23  ;;  %v1306_v28 = vmul.f32 %v4883_v63, %v6404_v29 }
 0x1b5   :  { %v4887_v8 = vpop.eup %4886  ;;  %v1203_v35 = vadd.f32 1.0, %v4885_v57  ;;  %4906 = vtanh.f32 %v6432_v36  ;;  %v6452_v18 = vadd.f32 %v1305_v45, %v1281_v42 }
 0x1b6   :  { %v4889_v16 = vpop.eup %4888  ;;  %v1204_v60 = vadd.f32 1.0, %v4887_v8  ;;  %4908 = vtanh.f32 %v6434_v51  ;;  %7755 = vst [vmem:[#allocation7_spill] sm:$0xff] %v6449_v22  ;;  %v6454_v33 = vadd.f32 %v1306_v28, %v1282_v21 }
 0x1b7   :  { %v4891_v38 = vpop.eup %4890  ;;  %v1205_v13 = vadd.f32 1.0, %v4889_v16  ;;  %4910 = vrcp.f32 %v1203_v35  ;;  %7756 = vst [vmem:[#allocation8_spill] sm:$0xff] %v6452_v18 }
 0x1b8   :  { %v4893_v19 = vpop.eup %4892  ;;  %v1206_v52 = vadd.f32 1.0, %v4891_v38  ;;  %4912 = vrcp.f32 %v1204_v60  ;;  %7757 = vst [vmem:[#allocation9_spill] sm:$0xff] %v6454_v33 }
 0x1b9   :  { %v4895_v59 = vpop.eup %4894  ;;  %v1207_v43 = vadd.f32 1.0, %v4893_v19  ;;  %4914 = vrcp.f32 %v1205_v13 }
 0x1ba   :  { %v4897_v54 = vpop.eup %4896  ;;  %v1208_v27 = vadd.f32 1.0, %v4895_v59  ;;  %4916 = vrcp.f32 %v1206_v52 }
 0x1bb   :  { %v4899_v47 = vpop.eup %4898  ;;  %v1209_v31 = vadd.f32 1.0, %v4897_v54  ;;  %4918 = vrcp.f32 %v1207_v43 }
 0x1bc   :  { %v4901_v46 = vpop.eup %4900  ;;  %4920 = vrcp.f32 %v1208_v27  ;;  %v1210_v41 = vadd.f32 1.0, %v4899_v47 }
 0x1bd   :  { %v4903_v26 = vpop.eup %4902  ;;  %4922 = vrcp.f32 %v1209_v31 }
 0x1be   :  { %v4905_v32 = vpop.eup %4904  ;;  %4924 = vrcp.f32 %v1210_v41 }
 0x1bf   :  { %v4907_v57 = vpop.eup %4906  ;;  %4926 = vtanh.f32 %v6443_v12 }
 0x1c0   :  { %v4909_v55 = vpop.eup %4908  ;;  %v1362_v2 = vmul.f32 %v4907_v57, %v6209_v0  ;;  %4928 = vtanh.f32 %v6446_v58 }
 0x1c1   :  { %v4911_v50 = vpop.eup %4910  ;;  %v1370_v6 = vmul.f32 %v4909_v55, %v6370_v30  ;;  %4930 = vtanh.f32 %v6449_v22 }
 0x1c2   :  { %v4913_v29 = vpop.eup %4912  ;;  %v1434_v63 = vpack.c.bf16 %v1362_v2, %v1362_v2  ;;  %4932 = vtanh.f32 %v6452_v18  ;;  %v1371_v8 = vmul.f32 %v4911_v50, %v4901_v46 }
 0x1c3   :  { %v4915_v35 = vpop.eup %4914  ;;  %v1442_v16 = vpack.c.bf16 %v1370_v6, %v1370_v6  ;;  %4934 = vtanh.f32 %v6454_v33  ;;  %v1372_v60 = vmul.f32 %v4913_v29, %v4903_v26  ;;  %v7758_v29 = vmov 0  }
 0x1c4   :  { %v4917_v53 = vpop.eup %4916  ;;  %v1482_v38 = vunpack.c.l.b16 %v1434_v63  ;;  %v1373_v0 = vmul.f32 %v4915_v35, %v4905_v32  ;;  %v1443_v52 = vpack.c.bf16 %v1371_v8, %v1371_v8 }
 0x1c5   :  { %v4919_v13 = vpop.eup %4918  ;;  %v1490_v19 = vunpack.c.l.b16 %v1442_v16  ;;  %v1444_v30 = vpack.c.bf16 %v1372_v60, %v1372_v60  ;;  %v5704_v60 = vld [vmem:[%s7715_s1] ss:$16 sps:$4 sm:$0xff]  }
 0x1c6   :  { %v4921_v14 = vpop.eup %4920  ;;  %v1517_v4 = vrot.slane %v1482_v38, 1  ;;  %v1445_v59 = vpack.c.bf16 %v1373_v0, %v1373_v0  ;;  %v1491_v48 = vunpack.c.l.b16 %v1443_v52 }
 0x1c7   :  { %v4923_v43 = vpop.eup %4922  ;;  %v1532_v23 = vrot.slane %v1490_v19, 1  ;;  %v1492_v39 = vunpack.c.l.b16 %v1444_v30  ;;  %v5707_v19 = vld [vmem:[%s7715_s1 + $0x2c] ss:$16 sps:$4 sm:$0xff]  }
 0x1c8   :  { %v4925_v54 = vpop.eup %4924  ;;  %v1519_v27 = vsel %vm1518_vm6, %v1517_v4, %v6255_v61  ;;  %v1493_v42 = vunpack.c.l.b16 %v1445_v59 }
 0x1c9   :  { %v4927_v47 = vpop.eup %4926  ;;  %v1533_v31 = vsel %vm1518_vm6, %v1532_v23, %v6383_v44  ;;  %v1534_v21 = vrot.slane %v1492_v39, 7 }
 0x1ca   :  { %v4929_v46 = vpop.eup %4928  ;;  %v1548_v41 = vpack.c.b16 %v1533_v31, %v1519_v27  ;;  %v1374_v45 = vmul.f32 %v4927_v47, %v4917_v53  ;;  %v1536_v26 = vrot.slane %v1493_v42, 6  ;;  %v5705_v53 = vld [vmem:[%s7715_s1 + $0x8] ss:$16 sps:$4 sm:$0xff]   ;;  %v5710_v31 = vld [vmem:[%s7715_s1 + $0x44] ss:$16 sps:$4 sm:$0xff]  }
 0x1cb   :  { %v4931_v28 = vpop.eup %4930  ;;  %v1375_v32 = vmul.f32 %v4929_v46, %v4919_v13  ;;  %v1535_v57 = vsel %vm1500_vm0, %v1534_v21, %v1491_v48  ;;  %v5706_v13 = vld [vmem:[%s7715_s1 + $0x24] ss:$16 sps:$4 sm:$0xff]   ;;  %v5709_v27 = vld [vmem:[%s7715_s1 + $0x28] ss:$16 sps:$4 sm:$0xff]   ;;  %v5711_v48 = vld [vmem:[%s7715_s1 + $0x4c] ss:$16 sps:$4 sm:$0xff]  }
 0x1cc   :  { %v4933_v55 = vpop.eup %4932  ;;  %1585 = vmatmul.mubr.bf16.vlgmr.msra.gmra.mrb[8].mxu0 %v1548_v41  ;;  %1636 = vmatmul.mubr.bf16.vlgmr.msra.gmra.mrb[8].mxu1 %v1548_v41  ;;  %v1376_v2 = vmul.f32 %v4931_v28, %v4921_v14  ;;  %v1446_v61 = vpack.c.bf16 %v1374_v45, %v1374_v45  ;;  %v1537_v50 = vsel %vm1503_vm1, %v1536_v26, %v1535_v57  ;;  %v5712_v26 = vld [vmem:[%s7715_s1 + $0x40] ss:$16 sps:$4 sm:$0xff]   ;;  %v5713_v28 = vld [vmem:[%s7715_s1 + $0x48] ss:$16 sps:$4 sm:$0xff]   ;;  %v5714_v57 = vld [vmem:[%s7715_s1 + $0x64] ss:$16 sps:$4 sm:$0xff]  }
 0x1cd   :  { %v4935_v6 = vpop.eup %4934  ;;  %1594 = vmatprep.mubr.bf16.mxu0 %v7758_v29  ;;  %1645 = vmatprep.mubr.bf16.mxu1 %v7758_v29  ;;  %v1377_v44 = vmul.f32 %v4933_v55, %v4923_v43  ;;  %v1447_v63 = vpack.c.bf16 %v1375_v32, %v1375_v32  ;;  %v5715_v55 = vld [vmem:[%s7715_s1 + $0x6c] ss:$16 sps:$4 sm:$0xff]  }
 0x1ce   :  { %v1378_v8 = vmul.f32 %v4935_v6, %v4925_v54  ;;  %v1448_v35 = vpack.c.bf16 %v1376_v2, %v1376_v2  ;;  %v1494_v16 = vunpack.c.l.b16 %v1446_v61  ;;  %2829 = vmatpush1.bf16.msra.mxu0 %v5704_v60  ;;  %2880 = vmatpush1.bf16.msra.mxu1 %v5705_v53  ;;  %v5708_v54 = vld [vmem:[%s7715_s1 + $0x20] ss:$16 sps:$4 sm:$0xff]   ;;  %v5717_v61 = vld [vmem:[%s7715_s1 + $0x68] ss:$16 sps:$4 sm:$0xff]   ;;  %v5719_v6 = vld [vmem:[%s7715_s1 + $0x8c] ss:$16 sps:$4 sm:$0xff]  }
 0x1cf   :  { %v1449_v38 = vpack.c.bf16 %v1377_v44, %v1377_v44  ;;  %v1495_v0 = vunpack.c.l.b16 %v1447_v63  ;;  %2830 = vmatprep.subr.bf16.mxu0 %v5706_v13  ;;  %2881 = vmatprep.subr.bf16.mxu1 %v5707_v19  ;;  %v5716_v2 = vld [vmem:[%s7715_s1 + $0x60] ss:$16 sps:$4 sm:$0xff]   ;;  %v5721_v63 = vld [vmem:[%s7715_s1 + $0x88] ss:$16 sps:$4 sm:$0xff]   ;;  %v5726_v53 = vld [vmem:[%s7715_s1 + $0xc4] ss:$16 sps:$4 sm:$0xff]  }
 0x1d0   :  { %v1450_v52 = vpack.c.bf16 %v1378_v8, %v1378_v8  ;;  %v1496_v30 = vunpack.c.l.b16 %v1448_v35  ;;  %v1538_v14 = vrot.slane %v1494_v16, 5  ;;  %v5720_v44 = vld [vmem:[%s7715_s1 + $0x80] ss:$16 sps:$4 sm:$0xff]   ;;  %v5722_v8 = vld [vmem:[%s7715_s1 + $0xa4] ss:$16 sps:$4 sm:$0xff]  }
 0x1d1   :  { %v1497_v4 = vunpack.c.l.b16 %v1449_v38  ;;  %v1540_v59 = vrot.slane %v1495_v0, 4  ;;  %v5723_v35 = vld [vmem:[%s7715_s1 + $0xac] ss:$16 sps:$4 sm:$0xff]   ;;  %v5724_v16 = vld [vmem:[%s7715_s1 + $0xa0] ss:$16 sps:$4 sm:$0xff]  }
 0x1d2   :  { %v1498_v43 = vunpack.c.l.b16 %v1450_v52  ;;  %v1539_v23 = vsel %vm1506_vm2, %v1538_v14, %v1537_v50  ;;  %v1542_v39 = vrot.slane %v1496_v30, 3  ;;  %2831 = vmatpush1.bf16.msra.mxu0 %v5708_v54  ;;  %2882 = vmatpush1.bf16.msra.mxu1 %v5709_v27  ;;  %v5718_v50 = vld [vmem:[%s7715_s1 + $0x84] ss:$16 sps:$4 sm:$0xff]   ;;  %v5725_v60 = vld [vmem:[%s7715_s1 + $0xa8] ss:$16 sps:$4 sm:$0xff]  }
 0x1d3   :  { %v1541_v42 = vsel %vm1509_vm3, %v1540_v59, %v1539_v23  ;;  %v1544_v47 = vrot.slane %v1497_v4, 2  ;;  %2832 = vmatprep.subr.bf16.mxu0 %v5710_v31  ;;  %2883 = vmatprep.subr.bf16.mxu1 %v5711_v48  ;;  %v5727_v38 = vld [vmem:[%s7715_s1 + $0xcc] ss:$16 sps:$4 sm:$0xff]   ;;  %v5728_v0 = vld [vmem:[%s7715_s1 + $0xc0] ss:$16 sps:$4 sm:$0xff]  }
 0x1d4   :  { %v1543_v21 = vsel %vm1512_vm4, %v1542_v39, %v1541_v42  ;;  %v1546_v46 = vrot.slane %v1498_v43, 1  ;;  %v5729_v13 = vld [vmem:[%s7715_s1 + $0xc8] ss:$16 sps:$4 sm:$0xff]   ;;  %v5730_v19 = vld [vmem:[%s7715_s1 + $0xe4] ss:$16 sps:$4 sm:$0xff]  }
 0x1d5   :  { %v1545_v41 = vsel %vm1515_vm5, %v1544_v47, %v1543_v21  ;;  %v5731_v52 = vld [vmem:[%s7715_s1 + $0xec] ss:$16 sps:$4 sm:$0xff]   ;;  %v5732_v30 = vld [vmem:[%s7715_s1 + $0xe0] ss:$16 sps:$4 sm:$0xff]   ;;  %v5733_v14 = vld [vmem:[%s7715_s1 + $0xe8] ss:$16 sps:$4 sm:$0xff]  }
 0x1d6   :  { %v1547_v45 = vsel %vm1518_vm6, %v1546_v46, %v1545_v41  ;;  %2833 = vmatpush1.bf16.msra.mxu0 %v5712_v26  ;;  %2884 = vmatpush1.bf16.msra.mxu1 %v5713_v28 }
 0x1d7   :  { %v1549_v32 = vpack.c.b16 %v1547_v45, %v1547_v45  ;;  %2834 = vmatprep.subr.bf16.mxu0 %v5714_v57  ;;  %2885 = vmatprep.subr.bf16.mxu1 %v5715_v55 }
 0x1d9   :  { %1595 = vmatmul.mubr.bf16.gmra.mrb[12].mxu0 %v1549_v32  ;;  %1646 = vmatmul.mubr.bf16.gmra.mrb[12].mxu1 %v1549_v32 }
 0x1da   :  { %2835 = vmatpush1.bf16.msra.mxu0 %v5716_v2  ;;  %2886 = vmatpush1.bf16.msra.mxu1 %v5717_v61 }
 0x1db   :  { %2836 = vmatprep.subr.bf16.mxu0 %v5718_v50  ;;  %2887 = vmatprep.subr.bf16.mxu1 %v5719_v6 }
 0x1dc   :  { %2860 = vmatprep.mubr.bf16.mxu0 %v7758_v29  ;;  %2911 = vmatprep.mubr.bf16.mxu1 %v7758_v29 }
 0x1de   :  { %2837 = vmatpush1.bf16.msra.mxu0 %v5720_v44  ;;  %2888 = vmatpush1.bf16.msra.mxu1 %v5721_v63  ;;  %v4291_v44 = vld [vmem:[%s7716_s0 + $0x1] ss:$4 sm:$0xf]  ;;  %v4292_v63 = vld [vmem:[%s7716_s0 + $0x11] ss:$4 sm:$0xf] }
 0x1df   :  { %2838 = vmatprep.subr.bf16.mxu0 %v5722_v8  ;;  %2889 = vmatprep.subr.bf16.mxu1 %v5723_v35 }
 0x1e2   :  { %2839 = vmatpush1.bf16.msra.mxu0 %v5724_v16  ;;  %2890 = vmatpush1.bf16.msra.mxu1 %v5725_v60 }
 0x1e3   :  { %2840 = vmatprep.subr.bf16.mxu0 %v5726_v53  ;;  %2891 = vmatprep.subr.bf16.mxu1 %v5727_v38  ;;  %v4293_v53 = vld [vmem:[%s7716_s0 + $0x21] ss:$4 sm:$0xf] }
 0x1e4   :  { %v4295_v38 = vld [vmem:[%s7716_s0 + $0x41] ss:$4 sm:$0xf] }
 0x1e6   :  { %2841 = vmatpush1.bf16.msra.mxu0 %v5728_v0  ;;  %2892 = vmatpush1.bf16.msra.mxu1 %v5729_v13 }
 0x1e7   :  { %2842 = vmatprep.subr.bf16.mxu0 %v5730_v19  ;;  %2893 = vmatprep.subr.bf16.mxu1 %v5731_v52 }
 0x1ea   :  { %2843 = vmatpush1.bf16.msra.mxu0 %v5732_v30  ;;  %2894 = vmatpush1.bf16.msra.mxu1 %v5733_v14  ;;  %v4294_v30 = vld [vmem:[%s7716_s0 + $0x31] ss:$4 sm:$0xf] }
 0x1eb   :  { %v4296_v14 = vld [vmem:[%s7716_s0 + $0x51] ss:$4 sm:$0xf] }
 0x29f   :  { %v1586_v4 = vpop.f32.mrb[8].mxu0  ;;  %v1637_v59 = vpop.f32.mrb[8].mxu1 }
 0x2a0   :  { %v1588_v43 = vpop.f32.mrb[9].mxu0  ;;  %v1639_v23 = vpop.f32.mrb[9].mxu1 }
 0x2a1   :  { %v1666_v39 = vcombine.low %v1586_v4, %v1588_v43  ;;  %v1667_v54 = vcombine.high %v1586_v4, %v1588_v43  ;;  %v1668_v27 = vcombine.low %v1637_v59, %v1639_v23  ;;  %v1669_v42 = vcombine.high %v1637_v59, %v1639_v23  ;;  %v1590_v47 = vpop.f32.mrb[10].mxu0  ;;  %v1641_v31 = vpop.f32.mrb[10].mxu1 }
 0x2a2   :  { %v1592_v48 = vpop.f32.mrb[11].mxu0  ;;  %v1643_v21 = vpop.f32.mrb[11].mxu1 }
 0x2a3   :  { %v1676_v46 = vrot.slane %v1666_v39, %v5924_v40  ;;  %v1683_v41 = vrot.slane %v1667_v54, %v5924_v40  ;;  %v1690_v45 = vrot.slane %v1668_v27, %v5924_v40  ;;  %v1697_v26 = vrot.slane %v1669_v42, %v5924_v40  ;;  %v4297_v39 = vld [vmem:[%s7716_s0 + $0x61] ss:$4 sm:$0xf] }
 0x2a4   :  { %v1734_v28 = vcombine.low %v1590_v47, %v1592_v48  ;;  %v1735_v32 = vcombine.high %v1590_v47, %v1592_v48  ;;  %v1736_v57 = vcombine.low %v1641_v31, %v1643_v21  ;;  %v1737_v55 = vcombine.high %v1641_v31, %v1643_v21  ;;  %v4298_v31 = vld [vmem:[%s7716_s0 + $0x71] ss:$4 sm:$0xf] }
 0x2a5   :  { %v1698_v2 = vcombine.low %v1676_v46, %v1690_v45  ;;  %v1699_v61 = vcombine.high %v1676_v46, %v1690_v45  ;;  %v1700_v50 = vcombine.low %v1683_v41, %v1697_v26  ;;  %v1701_v6 = vcombine.high %v1683_v41, %v1697_v26 }
 0x2a6   :  { %v6579_v8 = vrot.slane %v1734_v28, %v5924_v40  ;;  %v6582_v35 = vrot.slane %v1735_v32, %v5924_v40  ;;  %v6585_v16 = vrot.slane %v1736_v57, %v5924_v40  ;;  %v6588_v60 = vrot.slane %v1737_v55, %v5924_v40 }
 0x2a7   :  { %v1708_v0 = vrot.slane %v1698_v2, %v5924_v40  ;;  %v1715_v13 = vrot.slane %v1700_v50, %v5924_v40  ;;  %v1722_v19 = vrot.slane %v1699_v61, %v5924_v40  ;;  %v1729_v52 = vrot.slane %v1701_v6, %v5924_v40 }
 0x2a9   :  { %v1730_v54 = vcombine.high %v1708_v0, %v1708_v0  ;;  %v1731_v27 = vcombine.high %v1715_v13, %v1715_v13  ;;  %v1732_v42 = vcombine.high %v1722_v19, %v1722_v19  ;;  %v1733_v47 = vcombine.high %v1729_v52, %v1729_v52 }
 0x2aa   :  { %v6620_v48 = vadd.f32 %v4291_v44, %v1708_v0  ;;  %v6622_v21 = vadd.f32 %v4292_v63, %v1722_v19  ;;  %v6624_v46 = vadd.f32 %v4295_v38, %v1715_v13  ;;  %v6630_v26 = vadd.f32 %v4296_v14, %v1729_v52 }
 0x2ab   :  { %v6626_v41 = vadd.f32 %v4293_v53, %v1730_v54  ;;  %v6628_v45 = vadd.f32 %v4294_v30, %v1732_v42  ;;  %v6632_v28 = vadd.f32 %v4297_v39, %v1731_v27  ;;  %v6636_v55 = vadd.f32 %v4298_v31, %v1733_v47 }
 0x2ac   :  { %v4315_v32 = vmul.f32 -1.442695, %v6620_v48  ;;  %v4316_v57 = vmul.f32 -1.442695, %v6622_v21  ;;  %v4319_v50 = vmul.f32 -1.442695, %v6624_v46 }
 0x2ad   :  { %v4317_v2 = vmul.f32 -1.442695, %v6626_v41  ;;  %v4318_v61 = vmul.f32 -1.442695, %v6628_v45  ;;  %v2086_v6 = vrot.slane %v6620_v48, 1  ;;  %v6642_v44 = vpop.f32.mrb[12].mxu0 }
 0x2ae   :  { %4936 = vpow2.f32 %v4315_v32  ;;  %v4320_v63 = vmul.f32 -1.442695, %v6630_v26  ;;  %v2087_v53 = vrot.slane %v6622_v21, 1  ;;  %v6646_v38 = vpop.f32.mrb[12].mxu1  ;;  %v6648_v0 = vpop.f32.mrb[13].mxu0  ;;  %v2088_v19 = vrot.slane %v6626_v41, 1 }
 0x2af   :  { %4938 = vpow2.f32 %v4316_v57  ;;  %v4321_v13 = vmul.f32 -1.442695, %v6632_v28  ;;  %v6652_v52 = vpop.f32.mrb[13].mxu1  ;;  %v1600_v30 = vpop.f32.mrb[14].mxu0  ;;  %v4322_v14 = vmul.f32 -1.442695, %v6636_v55 }
 0x2b0   :  { %4940 = vpow2.f32 %v4317_v2  ;;  %v2089_v39 = vrot.slane %v6628_v45, 1  ;;  %v1651_v54 = vpop.f32.mrb[14].mxu1  ;;  %v2090_v27 = vrot.slane %v6624_v46, 1  ;;  %v4339_v42 = vmul.f32 -1.442695, %v2086_v6  ;;  %v1601_v32 = vpop.f32.mrb[15].mxu0 }
 0x2b1   :  { %4942 = vpow2.f32 %v4318_v61  ;;  %v4340_v47 = vmul.f32 -1.442695, %v2087_v53  ;;  %v4341_v31 = vmul.f32 -1.442695, %v2088_v19  ;;  %v1652_v57 = vpop.f32.mrb[15].mxu1  ;;  %v2091_v53 = vrot.slane %v6630_v26, 1 }
 0x2b2   :  { %4944 = vpow2.f32 %v4319_v50  ;;  %v4342_v2 = vmul.f32 -1.442695, %v2089_v39  ;;  %v4343_v30 = vmul.f32 -1.442695, %v2090_v27  ;;  %v2357_v33 = vrot.slane %v6636_v55, 3 }
 0x2b3   :  { %4946 = vpow2.f32 %v4320_v63  ;;  %v4344_v57 = vmul.f32 -1.442695, %v2091_v53 }
 0x2b4   :  { %4948 = vpow2.f32 %v4321_v13 }
 0x2b5   :  { %4950 = vpow2.f32 %v4322_v14  ;;  %v2092_v14 = vrot.slane %v6632_v28, 1 }
 0x2b6   :  { %4952 = vpow2.f32 %v4339_v42  ;;  %v2093_v42 = vrot.slane %v6636_v55, 1 }
 0x2b7   :  { %4954 = vpow2.f32 %v4340_v47 }
 0x2b8   :  { %v4937_v61 = vpop.eup %4936  ;;  %4956 = vpow2.f32 %v4341_v31 }
 0x2b9   :  { %v4939_v23 = vpop.eup %4938  ;;  %v1990_v43 = vadd.f32 1.0, %v4937_v61  ;;  %4958 = vpow2.f32 %v4342_v2 }
 0x2ba   :  { %v4941_v50 = vpop.eup %4940  ;;  %v1991_v54 = vadd.f32 1.0, %v4939_v23  ;;  %4960 = vpow2.f32 %v4343_v30  ;;  %v4345_v30 = vmul.f32 -1.442695, %v2092_v14 }
 0x2bb   :  { %v4943_v6 = vpop.eup %4942  ;;  %v1992_v63 = vadd.f32 1.0, %v4941_v50  ;;  %4962 = vrcp.f32 %v1990_v43  ;;  %v4346_v50 = vmul.f32 -1.442695, %v2093_v42  ;;  %v2278_v42 = vrot.slane %v6620_v48, 2 }
 0x2bc   :  { %v4945_v13 = vpop.eup %4944  ;;  %v1993_v19 = vadd.f32 1.0, %v4943_v6  ;;  %4964 = vrcp.f32 %v1991_v54 }
 0x2bd   :  { %v4947_v39 = vpop.eup %4946  ;;  %v1994_v27 = vadd.f32 1.0, %v4945_v13  ;;  %4966 = vrcp.f32 %v1992_v63 }
 0x2be   :  { %v4949_v47 = vpop.eup %4948  ;;  %v1995_v31 = vadd.f32 1.0, %v4947_v39  ;;  %4968 = vrcp.f32 %v1993_v19 }
 0x2bf   :  { %v4951_v23 = vpop.eup %4950  ;;  %v1996_v32 = vadd.f32 1.0, %v4949_v47  ;;  %4970 = vrcp.f32 %v1994_v27 }
 0x2c0   :  { %v4953_v43 = vpop.eup %4952  ;;  %v1997_v2 = vadd.f32 1.0, %v4951_v23  ;;  %4972 = vrcp.f32 %v1995_v31  ;;  %v2279_v23 = vrot.slane %v6622_v21, 2 }
 0x2c1   :  { %v4955_v61 = vpop.eup %4954  ;;  %4974 = vrcp.f32 %v1996_v32  ;;  %v2206_v6 = vadd.f32 1.0, %v4953_v43 }
 0x2c2   :  { %v4957_v54 = vpop.eup %4956  ;;  %4976 = vrcp.f32 %v1997_v2  ;;  %v2207_v13 = vadd.f32 1.0, %v4955_v61 }
 0x2c3   :  { %v4959_v63 = vpop.eup %4958  ;;  %4978 = vpow2.f32 %v4344_v57  ;;  %v2208_v19 = vadd.f32 1.0, %v4957_v54  ;;  %v2280_v57 = vrot.slane %v6626_v41, 2 }
 0x2c4   :  { %v4961_v59 = vpop.eup %4960  ;;  %4980 = vpow2.f32 %v4345_v30  ;;  %v2209_v53 = vadd.f32 1.0, %v4959_v63  ;;  %v2282_v30 = vrot.slane %v6624_v46, 2  ;;  %v2350_v63 = vrot.slane %v6620_v48, 3 }
 0x2c5   :  { %v6660_v39 = vpop.eup %4962  ;;  %4982 = vpow2.f32 %v4346_v50  ;;  %v2210_v47 = vadd.f32 1.0, %v4961_v59  ;;  %v2281_v59 = vrot.slane %v6628_v45, 2  ;;  %v2353_v48 = vrot.slane %v6628_v45, 3 }
 0x2c6   :  { %v6662_v27 = vpop.eup %4964  ;;  %4984 = vrcp.f32 %v2206_v6 }
 0x2c7   :  { %v6664_v14 = vpop.eup %4966  ;;  %4986 = vrcp.f32 %v2207_v13  ;;  %v4366_v45 = vmul.f32 -1.442695, %v2353_v48 }
 0x2c8   :  { %v6667_v31 = vpop.eup %4968  ;;  %4988 = vrcp.f32 %v2208_v19 }
 0x2c9   :  { %v6670_v32 = vpop.eup %4970  ;;  %4990 = vrcp.f32 %v2209_v53  ;;  %v2283_v53 = vrot.slane %v6630_v26, 2 }
 0x2ca   :  { %v6673_v43 = vpop.eup %4972  ;;  %4992 = vrcp.f32 %v2210_v47  ;;  %v2351_v47 = vrot.slane %v6622_v21, 3  ;;  %v2356_v21 = vrot.slane %v6632_v28, 3 }
 0x2cb   :  { %v6676_v2 = vpop.eup %4974  ;;  %4994 = vtanh.f32 %v2278_v42  ;;  %v2284_v42 = vrot.slane %v6632_v28, 2 }
 0x2cc   :  { %v6679_v61 = vpop.eup %4976  ;;  %4996 = vtanh.f32 %v2279_v23  ;;  %v2352_v23 = vrot.slane %v6626_v41, 3  ;;  %v4364_v41 = vmul.f32 -1.442695, %v2351_v47  ;;  %v4369_v12 = vmul.f32 -1.442695, %v2356_v21 }
 0x2cd   :  { %v4979_v50 = vpop.eup %4978  ;;  %4998 = vtanh.f32 %v2280_v57 }
 0x2ce   :  { %v4981_v54 = vpop.eup %4980  ;;  %v2211_v6 = vadd.f32 1.0, %v4979_v50  ;;  %5000 = vtanh.f32 %v2281_v59  ;;  %v2285_v59 = vrot.slane %v6636_v55, 2  ;;  %v2354_v50 = vrot.slane %v6624_v46, 3 }
 0x2cf   :  { %v4983_v13 = vpop.eup %4982  ;;  %v2212_v19 = vadd.f32 1.0, %v4981_v54  ;;  %5002 = vtanh.f32 %v2282_v30  ;;  %v2355_v30 = vrot.slane %v6630_v26, 3 }
 0x2d0   :  { %v4985_v4 = vpop.eup %4984  ;;  %v2213_v29 = vadd.f32 1.0, %v4983_v13  ;;  %5004 = vrcp.f32 %v2211_v6  ;;  %v4363_v13 = vmul.f32 -1.442695, %v2350_v63  ;;  %v4367_v58 = vmul.f32 -1.442695, %v2354_v50 }
 0x2d1   :  { %v4987_v57 = vpop.eup %4986  ;;  %5006 = vrcp.f32 %v2212_v19  ;;  %v4365_v19 = vmul.f32 -1.442695, %v2352_v23  ;;  %v2542_v26 = vmul.f32 %v4985_v4, %v6062_v10  ;;  %v4370_v63 = vmul.f32 -1.442695, %v2357_v33 }
 0x2d2   :  { %v4989_v54 = vpop.eup %4988  ;;  %5008 = vrcp.f32 %v2213_v29  ;;  %v4368_v29 = vmul.f32 -1.442695, %v2355_v30  ;;  %v1802_v33 = vcombine.low %v6642_v44, %v6648_v0  ;;  %v1804_v30 = vcombine.low %v6646_v38, %v6652_v52 }
 0x2d3   :  { %v4991_v6 = vpop.eup %4990  ;;  %5010 = vtanh.f32 %v2283_v53  ;;  %v2543_v53 = vmul.f32 %v4987_v57, %v6066_v49  ;;  %v2544_v55 = vmul.f32 %v4989_v54, %v6083_v20 }
 0x2d4   :  { %v4993_v18 = vpop.eup %4992  ;;  %5012 = vtanh.f32 %v2284_v42  ;;  %v2545_v42 = vmul.f32 %v4991_v6, %v6085_v15  ;;  %v1803_v15 = vcombine.high %v6642_v44, %v6648_v0  ;;  %v6729_v54 = vrot.slane %v1802_v33, %v5924_v40 }
 0x2d5   :  { %v4995_v22 = vpop.eup %4994  ;;  %5014 = vtanh.f32 %v2285_v59  ;;  %v2546_v23 = vmul.f32 %v4993_v18, %v6094_v17  ;;  %v7761_v18 = vcombine.low %v6579_v8, %v6585_v16 }
 0x2d6   :  { %v4997_v46 = vpop.eup %4996  ;;  %5016 = vpow2.f32 %v4363_v13  ;;  %v2566_v59 = vmul.f32 %v4995_v22, %v6660_v39  ;;  %v6747_v13 = vrot.slane %v1804_v30, %v5924_v40 }
 0x2d7   :  { %v4999_v28 = vpop.eup %4998  ;;  %5018 = vpow2.f32 %v4364_v41  ;;  %v2567_v50 = vmul.f32 %v4997_v46, %v6662_v27  ;;  %v1776_v39 = vrot.slane %v7761_v18, %v5924_v40 }
 0x2d8   :  { %v5001_v47 = vpop.eup %5000  ;;  %5020 = vpow2.f32 %v4365_v19  ;;  %v2568_v10 = vmul.f32 %v4999_v28, %v6664_v14  ;;  %v6703_v4 = vadd.f32 %v2566_v59, %v2542_v26  ;;  %v7767_v19 = vcombine.high %v6582_v35, %v6588_v60  ;;  %v4299_v28 = vld [vmem:[%s7716_s0 + $0x81] ss:$4 sm:$0xf] }
 0x2d9   :  { %v5003_v48 = vpop.eup %5002  ;;  %5022 = vpow2.f32 %v4366_v45  ;;  %v2569_v20 = vmul.f32 %v5001_v47, %v6667_v31  ;;  %v6709_v22 = vadd.f32 %v2567_v50, %v2543_v53  ;;  %v1798_v46 = vcombine.high %v1776_v39, %v1776_v39  ;;  %v4301_v50 = vld [vmem:[%s7716_s0 + $0xa1] ss:$4 sm:$0xf] }
 0x2da   :  { %v5005_v49 = vpop.eup %5004  ;;  %5024 = vpow2.f32 %v4367_v58  ;;  %7759 = vst [vmem:[#allocation10_spill] sm:$0xff] %v6703_v4  ;;  %v7762_v58 = vcombine.high %v6579_v8, %v6585_v16  ;;  %v2570_v44 = vmul.f32 %v5003_v48, %v6670_v32  ;;  %v6724_v0 = vadd.f32 %v2568_v10, %v2544_v55 }
 0x2db   :  { %v6707_v17 = vpop.eup %5006  ;;  %5026 = vpow2.f32 %v4368_v29  ;;  %7760 = vst [vmem:[#allocation11_spill] sm:$0xff] %v6709_v22  ;;  %v6726_v31 = vadd.f32 %v2569_v20, %v2545_v42  ;;  %v1805_v8 = vcombine.high %v6646_v38, %v6652_v52  ;;  %v6741_v32 = vrot.slane %v1803_v15, %v5924_v40  ;;  %v4302_v15 = vld [vmem:[%s7716_s0 + $0xb1] ss:$4 sm:$0xf] }
 0x2dc   :  { %v6719_v27 = vrot.slane %v7762_v58, %v5924_v40  ;;  %v6721_v14 = vpop.eup %5008  ;;  %5028 = vpow2.f32 %v4369_v12  ;;  %7763 = vst [vmem:[#allocation12_spill] sm:$0xff] %v6724_v0  ;;  %v6737_v12 = vadd.f32 %v2570_v44, %v2546_v23  ;;  %v7766_v52 = vcombine.low %v6582_v35, %v6588_v60  ;;  %v4300_v35 = vld [vmem:[%s7716_s0 + $0x91] ss:$4 sm:$0xf] }
 0x2dd   :  { %7764 = vst [vmem:[#allocation13_spill] sm:$0xff] %v6726_v31  ;;  %v5011_v57 = vpop.eup %5010  ;;  %5030 = vpow2.f32 %v4370_v63  ;;  %v6750_v6 = vrot.slane %v1805_v8, %v5924_v40  ;;  %v1797_v45 = vrot.slane %v7767_v19, %v5924_v40  ;;  %v2547_v48 = vmul.f32 %v5005_v49, %v6157_v3  ;;  %v4303_v49 = vld [vmem:[%s7716_s0 + $0xc1] ss:$4 sm:$0xf] }
 0x2de   :  { %v6735_v16 = vpop.eup %5012  ;;  %7765 = vst [vmem:[#allocation14_spill] sm:$0xff] %v6737_v12  ;;  %5032 = vtanh.f32 %v6703_v4  ;;  %v1783_v41 = vrot.slane %v7766_v52, %v5924_v40  ;;  %v1800_v63 = vcombine.high %v6719_v27, %v6719_v27  ;;  %v6786_v58 = vadd.f32 %v4299_v28, %v1776_v39  ;;  %v4304_v39 = vld [vmem:[%s7716_s0 + $0xd1] ss:$4 sm:$0xf] }
 0x2df   :  { %v6743_v21 = vpop.eup %5014  ;;  %5034 = vtanh.f32 %v6709_v22  ;;  %v2571_v3 = vmul.f32 %v5011_v57, %v6673_v43  ;;  %v6793_v8 = vadd.f32 %v4300_v35, %v6719_v27  ;;  %v1801_v19 = vcombine.high %v1797_v45, %v1797_v45  ;;  %v4305_v27 = vld [vmem:[%s7716_s0 + $0xe1] ss:$4 sm:$0xf] }
 0x2e0   :  { %v5017_v38 = vpop.eup %5016  ;;  %5036 = vtanh.f32 %v6724_v0  ;;  %v1799_v18 = vcombine.high %v1783_v41, %v1783_v41  ;;  %v6805_v57 = vadd.f32 %v4302_v15, %v1800_v63  ;;  %v6812_v35 = vadd.f32 %v4303_v49, %v1783_v41 }
 0x2e1   :  { %v5019_v29 = vpop.eup %5018  ;;  %v2470_v26 = vadd.f32 1.0, %v5017_v38  ;;  %5038 = vtanh.f32 %v6726_v31  ;;  %v6800_v43 = vadd.f32 %v2571_v3, %v2547_v48  ;;  %v6817_v48 = vadd.f32 %v4304_v39, %v1797_v45 }
 0x2e2   :  { %v5021_v55 = vpop.eup %5020  ;;  %v2471_v47 = vadd.f32 1.0, %v5019_v29  ;;  %5040 = vtanh.f32 %v6737_v12  ;;  %v6798_v29 = vadd.f32 %v4301_v50, %v1798_v46  ;;  %v4306_v46 = vld [vmem:[%s7716_s0 + $0xf1] ss:$4 sm:$0xf]  ;;  %v4324_v63 = vmul.f32 -1.442695, %v6793_v8 }
 0x2e3   :  { %v5023_v23 = vpop.eup %5022  ;;  %v2472_v59 = vadd.f32 1.0, %v5021_v55  ;;  %5042 = vrcp.f32 %v2470_v26  ;;  %7768 = vst [vmem:[#allocation15_spill] sm:$0xff] %v6800_v43  ;;  %v6828_v41 = vadd.f32 %v4306_v46, %v1801_v19  ;;  %v4327_v45 = vmul.f32 -1.442695, %v6812_v35 }
 0x2e4   :  { %v5025_v33 = vpop.eup %5024  ;;  %v2473_v20 = vadd.f32 1.0, %v5023_v23  ;;  %5044 = vrcp.f32 %v2471_v47  ;;  %v4323_v23 = vmul.f32 -1.442695, %v6786_v58  ;;  %v2094_v3 = vrot.slane %v6786_v58, 1 }
 0x2e5   :  { %v5027_v44 = vpop.eup %5026  ;;  %v2474_v30 = vadd.f32 1.0, %v5025_v33  ;;  %5046 = vrcp.f32 %v2472_v59  ;;  %v6822_v33 = vadd.f32 %v4305_v27, %v1799_v18  ;;  %v4328_v18 = vmul.f32 -1.442695, %v6817_v48 }
 0x2e6   :  { %v5029_v38 = vpop.eup %5028  ;;  %v2475_v52 = vadd.f32 1.0, %v5027_v44  ;;  %5048 = vrcp.f32 %v2473_v20  ;;  %v4325_v20 = vmul.f32 -1.442695, %v6798_v29  ;;  %v4326_v44 = vmul.f32 -1.442695, %v6805_v57 }
 0x2e7   :  { %v5031_v26 = vpop.eup %5030  ;;  %v2476_v28 = vadd.f32 1.0, %v5029_v38  ;;  %5050 = vrcp.f32 %v2474_v30  ;;  %v2095_v38 = vrot.slane %v6793_v8, 1  ;;  %v4329_v39 = vmul.f32 -1.442695, %v6822_v33 }
 0x2e8   :  { %v6807_v55 = vpop.eup %5032  ;;  %v2477_v47 = vadd.f32 1.0, %v5031_v26  ;;  %5052 = vrcp.f32 %v2475_v52  ;;  %v2096_v19 = vrot.slane %v6798_v29, 1  ;;  %v2097_v27 = vrot.slane %v6805_v57, 1 }
 0x2e9   :  { %v6815_v59 = vpop.eup %5034  ;;  %5054 = vrcp.f32 %v2476_v28  ;;  %v4330_v28 = vmul.f32 -1.442695, %v6828_v41  ;;  %v2098_v46 = vrot.slane %v6812_v35, 1  ;;  %v4348_v10 = vmul.f32 -1.442695, %v2095_v38 }
 0x2ea   :  { %v6820_v50 = vpop.eup %5036  ;;  %5056 = vrcp.f32 %v2477_v47  ;;  %v4350_v53 = vmul.f32 -1.442695, %v2097_v27 }
 0x2eb   :  { %v6825_v15 = vpop.eup %5038  ;;  %5058 = vtanh.f32 %v6800_v43  ;;  %v4351_v43 = vmul.f32 -1.442695, %v2098_v46 }
 0x2ec   :  { %v6831_v30 = vpop.eup %5040  ;;  %5060 = vpow2.f32 %v4323_v23  ;;  %v4347_v23 = vmul.f32 -1.442695, %v2094_v3 }
 0x2ed   :  { %v5043_v49 = vpop.eup %5042  ;;  %5062 = vpow2.f32 %v4324_v63 }
 0x2ee   :  { %v5045_v52 = vpop.eup %5044  ;;  %5064 = vpow2.f32 %v4325_v20  ;;  %v4349_v20 = vmul.f32 -1.442695, %v2096_v19  ;;  %v2100_v19 = vrot.slane %v6822_v33, 1 }
 0x2ef   :  { %v5047_v26 = vpop.eup %5046  ;;  %5066 = vpow2.f32 %v4326_v44 }
 0x2f0   :  { %v5049_v47 = vpop.eup %5048  ;;  %5068 = vpow2.f32 %v4327_v45 }
 0x2f1   :  { %v5051_v63 = vpop.eup %5050  ;;  %5070 = vpow2.f32 %v4328_v18  ;;  %v2099_v18 = vrot.slane %v6817_v48, 1 }
 0x2f2   :  { %v5053_v42 = vpop.eup %5052  ;;  %5072 = vpow2.f32 %v4329_v39 }
 0x2f3   :  { %v6842_v60 = vpop.eup %5054  ;;  %5074 = vpow2.f32 %v4330_v28  ;;  %v2101_v28 = vrot.slane %v6828_v41, 1 }
 0x2f4   :  { %7769 = vst [vmem:[#allocation16_spill] sm:$0xff] %v6842_v60  ;;  %v6844_v44 = vpop.eup %5056  ;;  %5076 = vpow2.f32 %v4347_v23 }
 0x2f5   :  { %7770 = vst [vmem:[#allocation17_spill] sm:$0xff] %v6844_v44  ;;  %v5059_v12 = vpop.eup %5058  ;;  %5078 = vpow2.f32 %v4348_v10 }
 0x2f6   :  { %v5061_v45 = vpop.eup %5060  ;;  %5080 = vpow2.f32 %v4349_v20 }
 0x2f7   :  { %v5063_v31 = vpop.eup %5062  ;;  %v1998_v3 = vadd.f32 1.0, %v5061_v45  ;;  %5082 = vpow2.f32 %v4350_v53  ;;  %v4352_v45 = vmul.f32 -1.442695, %v2099_v18  ;;  %v4353_v53 = vmul.f32 -1.442695, %v2100_v19 }
 0x2f8   :  { %v5065_v38 = vpop.eup %5064  ;;  %v1999_v39 = vadd.f32 1.0, %v5063_v31  ;;  %5084 = vpow2.f32 %v4351_v43  ;;  %v4354_v31 = vmul.f32 -1.442695, %v2101_v28  ;;  %v2638_v43 = vmul.f32 %v5043_v49, %v6807_v55 }
 0x2f9   :  { %v5067_v27 = vpop.eup %5066  ;;  %v2000_v0 = vadd.f32 1.0, %v5065_v38  ;;  %5086 = vrcp.f32 %v1998_v3  ;;  %v2639_v38 = vmul.f32 %v5045_v52, %v6815_v59  ;;  %v2641_v19 = vmul.f32 %v5049_v47, %v6825_v15 }
 0x2fa   :  { %v5069_v46 = vpop.eup %5068  ;;  %v2001_v23 = vadd.f32 1.0, %v5067_v27  ;;  %5088 = vrcp.f32 %v1999_v39  ;;  %v2286_v39 = vrot.slane %v6786_v58, 2  ;;  %v2287_v27 = vrot.slane %v6793_v8, 2 }
 0x2fb   :  { %v5071_v10 = vpop.eup %5070  ;;  %v2002_v20 = vadd.f32 1.0, %v5069_v46  ;;  %5090 = vrcp.f32 %v2000_v0  ;;  %v2640_v0 = vmul.f32 %v5047_v26, %v6820_v50  ;;  %v2643_v59 = vmul.f32 %v5059_v12, %v5053_v42 }
 0x2fc   :  { %v5073_v22 = vpop.eup %5072  ;;  %v2003_v4 = vadd.f32 1.0, %v5071_v10  ;;  %5092 = vrcp.f32 %v2001_v23 }
 0x2fd   :  { %v5075_v44 = vpop.eup %5074  ;;  %v2004_v60 = vadd.f32 1.0, %v5073_v22  ;;  %5094 = vrcp.f32 %v2002_v20  ;;  %v2642_v22 = vmul.f32 %v5051_v63, %v6831_v30  ;;  %v2712_v46 = vpack.c.bf16 %v2640_v0, %v2640_v0 }
 0x2fe   :  { %v5077_v3 = vpop.eup %5076  ;;  %v2005_v37 = vadd.f32 1.0, %v5075_v44  ;;  %5096 = vrcp.f32 %v2003_v4  ;;  %v2710_v4 = vpack.c.bf16 %v2638_v43, %v2638_v43  ;;  %v2711_v44 = vpack.c.bf16 %v2639_v38, %v2639_v38 }
 0x2ff   :  { %v5079_v18 = vpop.eup %5078  ;;  %5098 = vrcp.f32 %v2004_v60  ;;  %v2214_v55 = vadd.f32 1.0, %v5077_v3  ;;  %v2713_v60 = vpack.c.bf16 %v2641_v19, %v2641_v19  ;;  %v2714_v26 = vpack.c.bf16 %v2642_v22, %v2642_v22 }
 0x300   :  { %v5081_v28 = vpop.eup %5080  ;;  %5100 = vrcp.f32 %v2005_v37  ;;  %v2215_v49 = vadd.f32 1.0, %v5079_v18  ;;  %v2715_v47 = vpack.c.bf16 %v2643_v59, %v2643_v59  ;;  %v2759_v12 = vunpack.c.l.b16 %v2711_v44 }
 0x301   :  { %v5083_v52 = vpop.eup %5082  ;;  %5102 = vpow2.f32 %v4352_v45  ;;  %v2216_v50 = vadd.f32 1.0, %v5081_v28  ;;  %v2760_v42 = vunpack.c.l.b16 %v2712_v46  ;;  %v2761_v63 = vunpack.c.l.b16 %v2713_v60 }
 0x302   :  { %v5085_v23 = vpop.eup %5084  ;;  %5104 = vpow2.f32 %v4353_v53  ;;  %v2217_v15 = vadd.f32 1.0, %v5083_v52  ;;  %v2758_v45 = vunpack.c.l.b16 %v2710_v4  ;;  %v2762_v53 = vunpack.c.l.b16 %v2714_v26 }
 0x303   :  { %v6856_v10 = vpop.eup %5086  ;;  %5106 = vpow2.f32 %v4354_v31  ;;  %v2218_v30 = vadd.f32 1.0, %v5085_v23  ;;  %v2763_v43 = vunpack.c.l.b16 %v2715_v47  ;;  %v2782_v3 = vrot.slane %v2759_v12, 7 }
 0x304   :  { %v6858_v37 = vpop.eup %5088  ;;  %5108 = vrcp.f32 %v2214_v55  ;;  %v2784_v31 = vrot.slane %v2760_v42, 6  ;;  %v2786_v0 = vrot.slane %v2761_v63, 5  ;;  %v2288_v19 = vrot.slane %v6798_v29, 2 }
 0x305   :  { %v6860_v20 = vpop.eup %5090  ;;  %5110 = vrcp.f32 %v2215_v49  ;;  %v2289_v28 = vrot.slane %v6805_v57, 2  ;;  %v2783_v55 = vsel %vm1500_vm0, %v2782_v3, %v2758_v45  ;;  %v2290_v59 = vrot.slane %v6812_v35, 2 }
 0x306   :  { %v6862_v38 = vpop.eup %5092  ;;  %5112 = vrcp.f32 %v2216_v50  ;;  %v2785_v52 = vsel %vm1503_vm1, %v2784_v31, %v2783_v55  ;;  %v2788_v4 = vrot.slane %v2762_v53, 4  ;;  %v2790_v23 = vrot.slane %v2763_v43, 3 }
 0x307   :  { %v6864_v18 = vpop.eup %5094  ;;  %5114 = vrcp.f32 %v2217_v15  ;;  %v2787_v46 = vsel %vm1506_vm2, %v2786_v0, %v2785_v52  ;;  %v2291_v42 = vrot.slane %v6817_v48, 2  ;;  %v2292_v53 = vrot.slane %v6822_v33, 2 }
 0x308   :  { %v6867_v22 = vpop.eup %5096  ;;  %5116 = vrcp.f32 %v2218_v30  ;;  %v2789_v60 = vsel %vm1509_vm3, %v2788_v4, %v2787_v46  ;;  %v2358_v30 = vrot.slane %v6786_v58, 3  ;;  %v2360_v43 = vrot.slane %v6798_v29, 3 }
 0x309   :  { %v6871_v49 = vpop.eup %5098  ;;  %5118 = vtanh.f32 %v2286_v39  ;;  %v6881_v39 = vsel %vm1512_vm4, %v2790_v23, %v2789_v60  ;;  %v2293_v58 = vrot.slane %v6828_v41, 2  ;;  %v2361_v31 = vrot.slane %v6805_v57, 3 }
 0x30a   :  { %v6875_v44 = vpop.eup %5100  ;;  %5120 = vtanh.f32 %v2287_v27  ;;  %v2359_v27 = vrot.slane %v6793_v8, 3  ;;  %v2363_v8 = vrot.slane %v6817_v48, 3  ;;  %v2364_v29 = vrot.slane %v6822_v33, 3 }
 0x30b   :  { %v5103_v50 = vpop.eup %5102  ;;  %5122 = vtanh.f32 %v2288_v19  ;;  %v2362_v19 = vrot.slane %v6812_v35, 3  ;;  %v4373_v4 = vmul.f32 -1.442695, %v2360_v43  ;;  %v2365_v23 = vrot.slane %v6828_v41, 3 }
 0x30c   :  { %v5105_v26 = vpop.eup %5104  ;;  %v2219_v15 = vadd.f32 1.0, %v5103_v50  ;;  %5124 = vtanh.f32 %v2289_v28  ;;  %v4371_v28 = vmul.f32 -1.442695, %v2358_v30  ;;  %v4374_v57 = vmul.f32 -1.442695, %v2361_v31 }
 0x30d   :  { %v5107_v47 = vpop.eup %5106  ;;  %v2220_v12 = vadd.f32 1.0, %v5105_v26  ;;  %5126 = vtanh.f32 %v2290_v59  ;;  %v4372_v59 = vmul.f32 -1.442695, %v2359_v27  ;;  %v4375_v60 = vmul.f32 -1.442695, %v2362_v19 }
 0x30e   :  { %v5109_v63 = vpop.eup %5108  ;;  %v2221_v45 = vadd.f32 1.0, %v5107_v47  ;;  %5128 = vrcp.f32 %v2219_v15  ;;  %v4376_v15 = vmul.f32 -1.442695, %v2363_v8  ;;  %v4377_v47 = vmul.f32 -1.442695, %v2364_v29 }
 0x30f   :  { %v5111_v3 = vpop.eup %5110  ;;  %5130 = vrcp.f32 %v2220_v12  ;;  %v2550_v35 = vmul.f32 %v5109_v63, %v6270_v62  ;;  %v4378_v41 = vmul.f32 -1.442695, %v2365_v23 }
 0x310   :  { %v5113_v0 = vpop.eup %5112  ;;  %5132 = vrcp.f32 %v2221_v45  ;;  %v2551_v48 = vmul.f32 %v5111_v3, %v6273_v5 }
 0x311   :  { %v5115_v55 = vpop.eup %5114  ;;  %5134 = vtanh.f32 %v2291_v42  ;;  %v2552_v33 = vmul.f32 %v5113_v0, %v6278_v56 }
 0x312   :  { %v5117_v52 = vpop.eup %5116  ;;  %5136 = vtanh.f32 %v2292_v53  ;;  %v2553_v27 = vmul.f32 %v5115_v55, %v6280_v7  ;;  %v7773_v55 = vcombine.low %v6741_v32, %v6750_v6 }
 0x313   :  { %v5119_v46 = vpop.eup %5118  ;;  %5138 = vtanh.f32 %v2293_v58  ;;  %v2554_v63 = vmul.f32 %v5117_v52, %v6290_v1  ;;  %v4307_v52 = vld [vmem:[%s7716_s0 + $0x101] ss:$4 sm:$0xf] }
 0x314   :  { %v5121_v50 = vpop.eup %5120  ;;  %5140 = vpow2.f32 %v4371_v28  ;;  %v2574_v12 = vmul.f32 %v5119_v46, %v6856_v10  ;;  %v1851_v8 = vrot.slane %v7773_v55, %v5924_v40  ;;  %v4308_v46 = vld [vmem:[%s7716_s0 + $0x111] ss:$4 sm:$0xf] }
 0x315   :  { %v5123_v26 = vpop.eup %5122  ;;  %5142 = vpow2.f32 %v4372_v59  ;;  %v2575_v45 = vmul.f32 %v5121_v50, %v6858_v37  ;;  %v4309_v50 = vld [vmem:[%s7716_s0 + $0x121] ss:$4 sm:$0xf] }
 0x316   :  { %v5125_v30 = vpop.eup %5124  ;;  %5144 = vpow2.f32 %v4373_v4  ;;  %v2576_v5 = vmul.f32 %v5123_v26, %v6860_v20  ;;  %v6901_v53 = vadd.f32 %v2574_v12, %v2550_v35  ;;  %v4312_v12 = vld [vmem:[%s7716_s0 + $0x151] ss:$4 sm:$0xf] }
 0x317   :  { %v5127_v42 = vpop.eup %5126  ;;  %5146 = vpow2.f32 %v4374_v57  ;;  %v2577_v56 = vmul.f32 %v5125_v30, %v6862_v38  ;;  %v6906_v10 = vadd.f32 %v2575_v45, %v2551_v48  ;;  %v7771_v38 = vcombine.low %v6729_v54, %v6747_v13  ;;  %v4310_v48 = vld [vmem:[%s7716_s0 + $0x131] ss:$4 sm:$0xf] }
 0x318   :  { %v5129_v62 = vpop.eup %5128  ;;  %5148 = vpow2.f32 %v4375_v60  ;;  %v2578_v7 = vmul.f32 %v5127_v42, %v6864_v18  ;;  %v6911_v37 = vadd.f32 %v2576_v5, %v2552_v33  ;;  %v7772_v18 = vcombine.high %v6729_v54, %v6747_v13 }
 0x319   :  { %v6903_v43 = vpop.eup %5130  ;;  %5150 = vpow2.f32 %v4376_v15  ;;  %v6913_v1 = vadd.f32 %v2577_v56, %v2553_v27  ;;  %v1844_v0 = vrot.slane %v7771_v38, %v5924_v40  ;;  %v7774_v54 = vcombine.high %v6741_v32, %v6750_v6  ;;  %v4311_v32 = vld [vmem:[%s7716_s0 + $0x141] ss:$4 sm:$0xf] }
 0x31a   :  { %v6908_v3 = vpop.eup %5132  ;;  %5152 = vpow2.f32 %v4377_v47  ;;  %v6917_v31 = vadd.f32 %v2578_v7, %v2554_v63  ;;  %v1858_v19 = vrot.slane %v7772_v18, %v5924_v40  ;;  %v2555_v15 = vmul.f32 %v5129_v62, %v6341_v9  ;;  %v4313_v62 = vld [vmem:[%s7716_s0 + $0x161] ss:$4 sm:$0xf]  ;;  %v4314_v7 = vld [vmem:[%s7716_s0 + $0x171] ss:$4 sm:$0xf] }
 0x31b   :  { %v5135_v58 = vpop.eup %5134  ;;  %5154 = vpow2.f32 %v4378_v41  ;;  %v1865_v13 = vrot.slane %v7774_v54, %v5924_v40  ;;  %v1866_v6 = vcombine.high %v1844_v0, %v1844_v0  ;;  %v1867_v30 = vcombine.high %v1851_v8, %v1851_v8 }
 0x31c   :  { %v6915_v20 = vpop.eup %5136  ;;  %5156 = vtanh.f32 %v6901_v53  ;;  %v1868_v60 = vcombine.high %v1858_v19, %v1858_v19  ;;  %v6961_v41 = vadd.f32 %v4307_v52, %v1844_v0  ;;  %v2579_v9 = vmul.f32 %v5135_v58, %v6867_v22 }
 0x31d   :  { %v6928_v28 = vpop.eup %5138  ;;  %5158 = vtanh.f32 %v6906_v10  ;;  %v1869_v42 = vcombine.high %v1865_v13, %v1865_v13  ;;  %v6967_v63 = vadd.f32 %v4308_v46, %v1858_v19  ;;  %v6972_v38 = vadd.f32 %v4309_v50, %v1866_v6 }
 0x31e   :  { %v5141_v59 = vpop.eup %5140  ;;  %5160 = vtanh.f32 %v6911_v37  ;;  %v6974_v0 = vadd.f32 %v4310_v48, %v1868_v60  ;;  %v6976_v22 = vadd.f32 %v2579_v9, %v2555_v15  ;;  %v6978_v58 = vadd.f32 %v4311_v32, %v1851_v8 }
 0x31f   :  { %v5143_v29 = vpop.eup %5142  ;;  %v2478_v4 = vadd.f32 1.0, %v5141_v59  ;;  %5162 = vtanh.f32 %v6913_v1  ;;  %v6980_v52 = vadd.f32 %v4312_v12, %v1865_v13  ;;  %v4331_v54 = vmul.f32 -1.442695, %v6961_v41 }
 0x320   :  { %v5145_v23 = vpop.eup %5144  ;;  %v2479_v57 = vadd.f32 1.0, %v5143_v29  ;;  %5164 = vtanh.f32 %v6917_v31  ;;  %7775 = vst [vmem:[#allocation18_spill] sm:$0xff] %v6976_v22  ;;  %v6985_v46 = vadd.f32 %v4314_v7, %v1869_v42  ;;  %v4333_v8 = vmul.f32 -1.442695, %v6972_v38 }
 0x321   :  { %v5147_v35 = vpop.eup %5146  ;;  %v2480_v26 = vadd.f32 1.0, %v5145_v23  ;;  %5166 = vrcp.f32 %v2478_v4  ;;  %v6983_v4 = vadd.f32 %v4313_v62, %v1867_v30  ;;  %v4332_v23 = vmul.f32 -1.442695, %v6967_v63 }
 0x322   :  { %v5149_v47 = vpop.eup %5148  ;;  %v2481_v33 = vadd.f32 1.0, %v5147_v35  ;;  %5168 = vrcp.f32 %v2479_v57  ;;  %v4334_v13 = vmul.f32 -1.442695, %v6974_v0  ;;  %v4335_v6 = vmul.f32 -1.442695, %v6978_v58 }
 0x323   :  { %v5151_v27 = vpop.eup %5150  ;;  %v2482_v45 = vadd.f32 1.0, %v5149_v47  ;;  %5170 = vrcp.f32 %v2480_v26  ;;  %v2102_v60 = vrot.slane %v6961_v41, 1  ;;  %v2103_v35 = vrot.slane %v6967_v63, 1 }
 0x324   :  { %v5153_v5 = vpop.eup %5152  ;;  %v2483_v56 = vadd.f32 1.0, %v5151_v27  ;;  %5172 = vrcp.f32 %v2481_v33  ;;  %v4336_v15 = vmul.f32 -1.442695, %v6980_v52  ;;  %v4337_v48 = vmul.f32 -1.442695, %v6983_v4 }
 0x325   :  { %v5155_v18 = vpop.eup %5154  ;;  %v2484_v55 = vadd.f32 1.0, %v5153_v5  ;;  %5174 = vrcp.f32 %v2482_v45  ;;  %v4338_v30 = vmul.f32 -1.442695, %v6985_v46  ;;  %v2104_v33 = vrot.slane %v6972_v38, 1 }
 0x326   :  { %v5157_v19 = vpop.eup %5156  ;;  %v2485_v59 = vadd.f32 1.0, %v5155_v18  ;;  %5176 = vrcp.f32 %v2483_v56  ;;  %v2105_v12 = vrot.slane %v6974_v0, 1  ;;  %v2106_v45 = vrot.slane %v6978_v58, 1 }
 0x327   :  { %v5159_v29 = vpop.eup %5158  ;;  %5178 = vrcp.f32 %v2484_v55  ;;  %v4355_v56 = vmul.f32 -1.442695, %v2102_v60  ;;  %v4356_v7 = vmul.f32 -1.442695, %v2103_v35 }
 0x328   :  { %v5161_v57 = vpop.eup %5160  ;;  %5180 = vrcp.f32 %v2485_v59  ;;  %v4358_v9 = vmul.f32 -1.442695, %v2105_v12 }
 0x329   :  { %v5163_v50 = vpop.eup %5162  ;;  %5182 = vtanh.f32 %v6976_v22 }
 0x32a   :  { %v5165_v32 = vpop.eup %5164  ;;  %5184 = vpow2.f32 %v4331_v54 }
 0x32b   :  { %v5167_v26 = vpop.eup %5166  ;;  %5186 = vpow2.f32 %v4332_v23 }
 0x32c   :  { %v5169_v47 = vpop.eup %5168  ;;  %5188 = vpow2.f32 %v4333_v8  ;;  %v2646_v42 = vmul.f32 %v5167_v26, %v5157_v19  ;;  %v4357_v19 = vmul.f32 -1.442695, %v2104_v33 }
 0x32d   :  { %v5171_v27 = vpop.eup %5170  ;;  %5190 = vpow2.f32 %v4334_v13  ;;  %v2647_v62 = vmul.f32 %v5169_v47, %v5159_v29 }
 0x32e   :  { %v5173_v5 = vpop.eup %5172  ;;  %5192 = vpow2.f32 %v4335_v6  ;;  %v2648_v18 = vmul.f32 %v5171_v27, %v5161_v57  ;;  %v2718_v54 = vpack.c.bf16 %v2646_v42, %v2646_v42  ;;  %v4359_v57 = vmul.f32 -1.442695, %v2106_v45 }
 0x32f   :  { %v5175_v55 = vpop.eup %5174  ;;  %5194 = vpow2.f32 %v4336_v15  ;;  %v2649_v59 = vmul.f32 %v5173_v5, %v5163_v50  ;;  %v2719_v23 = vpack.c.bf16 %v2647_v62, %v2647_v62 }
 0x330   :  { %v5177_v8 = vpop.eup %5176  ;;  %5196 = vpow2.f32 %v4337_v48  ;;  %v2650_v26 = vmul.f32 %v5175_v55, %v5165_v32  ;;  %v2720_v13 = vpack.c.bf16 %v2648_v18, %v2648_v18  ;;  %v2766_v15 = vunpack.c.l.b16 %v2718_v54 }
 0x331   :  { %v7001_v22 = vpop.eup %5178  ;;  %5198 = vpow2.f32 %v4338_v30  ;;  %v2721_v29 = vpack.c.bf16 %v2649_v59, %v2649_v59  ;;  %v2767_v47 = vunpack.c.l.b16 %v2719_v23 }
 0x332   :  { %v7003_v6 = vpop.eup %5180  ;;  %5200 = vpow2.f32 %v4355_v56  ;;  %v2722_v60 = vpack.c.bf16 %v2650_v26, %v2650_v26  ;;  %v2768_v35 = vunpack.c.l.b16 %v2720_v13 }
 0x333   :  { %v5183_v50 = vpop.eup %5182  ;;  %5202 = vpow2.f32 %v4356_v7  ;;  %v2769_v42 = vunpack.c.l.b16 %v2721_v29  ;;  %v2796_v48 = vrot.slane %v2767_v47, 7 }
 0x334   :  { %v5185_v33 = vpop.eup %5184  ;;  %5204 = vpow2.f32 %v4357_v19  ;;  %v2651_v32 = vmul.f32 %v5183_v50, %v5177_v8  ;;  %v2770_v27 = vunpack.c.l.b16 %v2722_v60  ;;  %v2798_v62 = vrot.slane %v2768_v35, 6 }
 0x335   :  { %v5187_v30 = vpop.eup %5186  ;;  %v2006_v12 = vadd.f32 1.0, %v5185_v33  ;;  %5206 = vpow2.f32 %v4358_v9  ;;  %v2797_v5 = vsel %vm1500_vm0, %v2796_v48, %v2766_v15  ;;  %v2800_v18 = vrot.slane %v2769_v42, 5 }
 0x336   :  { %v5189_v56 = vpop.eup %5188  ;;  %v2007_v45 = vadd.f32 1.0, %v5187_v30  ;;  %5208 = vpow2.f32 %v4359_v57  ;;  %v2723_v55 = vpack.c.bf16 %v2651_v32, %v2651_v32  ;;  %v2799_v7 = vsel %vm1503_vm1, %v2798_v62, %v2797_v5 }
 0x337   :  { %v5191_v59 = vpop.eup %5190  ;;  %v2008_v54 = vadd.f32 1.0, %v5189_v56  ;;  %5210 = vrcp.f32 %v2006_v12  ;;  %v2801_v23 = vsel %vm1506_vm2, %v2800_v18, %v2799_v7  ;;  %v2802_v8 = vrot.slane %v2770_v27, 4 }
 0x338   :  { %v5193_v19 = vpop.eup %5192  ;;  %v2009_v26 = vadd.f32 1.0, %v5191_v59  ;;  %5212 = vrcp.f32 %v2007_v45  ;;  %v2108_v9 = vrot.slane %v6983_v4, 1  ;;  %v2771_v13 = vunpack.c.l.b16 %v2723_v55 }
 0x339   :  { %v5195_v29 = vpop.eup %5194  ;;  %v2010_v47 = vadd.f32 1.0, %v5193_v19  ;;  %5214 = vrcp.f32 %v2008_v54  ;;  %v2109_v57 = vrot.slane %v6985_v46, 1  ;;  %v2803_v60 = vsel %vm1509_vm3, %v2802_v8, %v2801_v23 }
 0x33a   :  { %v5197_v35 = vpop.eup %5196  ;;  %v2011_v50 = vadd.f32 1.0, %v5195_v29  ;;  %5216 = vrcp.f32 %v2009_v26  ;;  %v2804_v15 = vrot.slane %v2771_v13, 3  ;;  %v7776_v33 = vrot.slane %v6980_v52, 1 }
 0x33b   :  { %v5199_v42 = vpop.eup %5198  ;;  %v2012_v48 = vadd.f32 1.0, %v5197_v35  ;;  %5218 = vrcp.f32 %v2010_v47  ;;  %v4361_v30 = vmul.f32 -1.442695, %v2108_v9  ;;  %v4362_v18 = vmul.f32 -1.442695, %v2109_v57 }
 0x33c   :  { %v4360_v32 = vmul.f32 -1.442695, %v7776_v33  ;;  %v5201_v27 = vpop.eup %5200  ;;  %v2013_v62 = vadd.f32 1.0, %v5199_v42  ;;  %5220 = vrcp.f32 %v2011_v50  ;;  %v7014_v12 = vsel %vm1512_vm4, %v2804_v15, %v2803_v60 }
 0x33d   :  { %v5203_v5 = vpop.eup %5202  ;;  %5222 = vrcp.f32 %v2012_v48  ;;  %v2222_v45 = vadd.f32 1.0, %v5201_v27  ;;  %v2294_v13 = vrot.slane %v6961_v41, 2  ;;  %v2295_v47 = vrot.slane %v6967_v63, 2 }
 0x33e   :  { %v5205_v56 = vpop.eup %5204  ;;  %5224 = vrcp.f32 %v2013_v62  ;;  %v2223_v7 = vadd.f32 1.0, %v5203_v5  ;;  %v2296_v60 = vrot.slane %v6972_v38, 2  ;;  %v2297_v50 = vrot.slane %v6974_v0, 2 }
 0x33f   :  { %v5207_v55 = vpop.eup %5206  ;;  %5226 = vpow2.f32 %v4360_v32  ;;  %v2224_v54 = vadd.f32 1.0, %v5205_v56  ;;  %v2298_v42 = vrot.slane %v6978_v58, 2  ;;  %v2366_v62 = vrot.slane %v6961_v41, 3 }
 0x340   :  { %v5209_v59 = vpop.eup %5208  ;;  %5228 = vpow2.f32 %v4361_v30  ;;  %v2225_v8 = vadd.f32 1.0, %v5207_v55  ;;  %v2367_v56 = vrot.slane %v6967_v63, 3  ;;  %v2369_v41 = vrot.slane %v6974_v0, 3 }
 0x341   :  { %v7016_v23 = vpop.eup %5210  ;;  %5230 = vpow2.f32 %v4362_v18  ;;  %v2226_v26 = vadd.f32 1.0, %v5209_v59  ;;  %v2299_v18 = vrot.slane %v6980_v52, 2  ;;  %v2368_v59 = vrot.slane %v6972_v38, 3 }
 0x342   :  { %v7018_v19 = vpop.eup %5212  ;;  %5232 = vrcp.f32 %v2222_v45  ;;  %v2372_v38 = vrot.slane %v6983_v4, 3  ;;  %v2373_v0 = vrot.slane %v6985_v46, 3 }
 0x343   :  { %v7020_v9 = vpop.eup %5214  ;;  %5234 = vrcp.f32 %v2223_v7  ;;  %v2300_v7 = vrot.slane %v6983_v4, 2  ;;  %v2548_v4 = vmul.f32 %v6707_v17, %v6166_v11 }
 0x344   :  { %v7023_v29 = vpop.eup %5216  ;;  %5236 = vrcp.f32 %v2224_v54 }
 0x345   :  { %v7026_v57 = vpop.eup %5218  ;;  %5238 = vrcp.f32 %v2225_v8  ;;  %v2301_v8 = vrot.slane %v6985_v46, 2 }
 0x346   :  { %v7029_v35 = vpop.eup %5220  ;;  %5240 = vrcp.f32 %v2226_v26 }
 0x347   :  { %v7032_v15 = vpop.eup %5222  ;;  %5242 = vtanh.f32 %v2294_v13  ;;  %v2370_v13 = vrot.slane %v6978_v58, 3 }
 0x348   :  { %v7035_v48 = vpop.eup %5224  ;;  %5244 = vtanh.f32 %v2295_v47  ;;  %v4379_v47 = vmul.f32 -1.442695, %v2366_v62 }
 0x349   :  { %v5227_v33 = vpop.eup %5226  ;;  %5246 = vtanh.f32 %v2296_v60  ;;  %v2371_v60 = vrot.slane %v6980_v52, 3  ;;  %v4383_v58 = vmul.f32 -1.442695, %v2370_v13 }
 0x34a   :  { %v5229_v32 = vpop.eup %5228  ;;  %v2227_v27 = vadd.f32 1.0, %v5227_v33  ;;  %5248 = vtanh.f32 %v2297_v50  ;;  %v4380_v50 = vmul.f32 -1.442695, %v2367_v56  ;;  %v4381_v33 = vmul.f32 -1.442695, %v2368_v59 }
 0x34b   :  { %v5231_v30 = vpop.eup %5230  ;;  %v2228_v5 = vadd.f32 1.0, %v5229_v32  ;;  %5250 = vtanh.f32 %v2298_v42  ;;  %v4384_v52 = vmul.f32 -1.442695, %v2371_v60  ;;  %v4386_v59 = vmul.f32 -1.442695, %v2373_v0 }
 0x34c   :  { %v5233_v45 = vpop.eup %5232  ;;  %v2229_v55 = vadd.f32 1.0, %v5231_v30  ;;  %5252 = vrcp.f32 %v2227_v27  ;;  %v4382_v27 = vmul.f32 -1.442695, %v2369_v41  ;;  %v2581_v60 = vmul.f32 %v6928_v28, %v6875_v44  ;;  %v7779_v28 = vld [vmem:[#allocation6_spill] sm:$0xff] }
 0x34d   :  { %v5235_v54 = vpop.eup %5234  ;;  %5254 = vrcp.f32 %v2228_v5  ;;  %v2558_v62 = vmul.f32 %v5233_v45, %v6422_v34  ;;  %v2549_v34 = vmul.f32 %v6721_v14, %v6432_v36  ;;  %v2580_v36 = vmul.f32 %v6915_v20, %v6871_v49 }
 0x34e   :  { %v7044_v26 = vpop.eup %5236  ;;  %5256 = vrcp.f32 %v2229_v55  ;;  %v4385_v55 = vmul.f32 -1.442695, %v2372_v38 }
 0x34f   :  { %v7047_v63 = vpop.eup %5238  ;;  %5258 = vtanh.f32 %v2299_v18  ;;  %v2559_v18 = vmul.f32 %v5235_v54, %v6426_v24  ;;  %v2572_v24 = vmul.f32 %v6735_v16, %v6676_v2  ;;  %v2556_v54 = vmul.f32 %v6903_v43, %v6345_v25 }
 0x350   :  { %v7050_v42 = vpop.eup %5240  ;;  %5260 = vtanh.f32 %v2300_v7  ;;  %v2557_v43 = vmul.f32 %v6908_v3, %v6434_v51  ;;  %v7777_v51 = vld [vmem:[#allocation4_spill] sm:$0xff] }
 0x351   :  { %v5243_v32 = vpop.eup %5242  ;;  %5262 = vtanh.f32 %v2301_v8  ;;  %v7072_v13 = vadd.f32 %v2572_v24, %v2548_v4  ;;  %v7078_v16 = vadd.f32 %v2580_v36, %v2556_v54  ;;  %v2560_v3 = vmul.f32 %v7044_v26, %v7777_v51 }
 0x352   :  { %v5245_v30 = vpop.eup %5244  ;;  %5264 = vpow2.f32 %v4379_v47  ;;  %v2582_v7 = vmul.f32 %v5243_v32, %v7016_v23  ;;  %v2573_v23 = vmul.f32 %v6743_v21, %v6679_v61 }
 0x353   :  { %v5247_v5 = vpop.eup %5246  ;;  %5266 = vpow2.f32 %v4380_v50  ;;  %v2583_v8 = vmul.f32 %v5245_v30, %v7018_v19 }
 0x354   :  { %v5249_v56 = vpop.eup %5248  ;;  %5268 = vpow2.f32 %v4381_v33  ;;  %v7066_v11 = vadd.f32 %v2582_v7, %v2558_v62  ;;  %v7076_v25 = vadd.f32 %v2573_v23, %v2549_v34  ;;  %v7778_v62 = vld [vmem:[#allocation5_spill] sm:$0xff]  ;;  %v7780_v34 = vld [vmem:[#allocation7_spill] sm:$0xff] }
 0x355   :  { %v5251_v46 = vpop.eup %5250  ;;  %5270 = vpow2.f32 %v4382_v27  ;;  %v7070_v41 = vadd.f32 %v2583_v8, %v2559_v18  ;;  %v7091_v27 = vadd.f32 %v2581_v60, %v2557_v43  ;;  %v2561_v44 = vmul.f32 %v7047_v63, %v7778_v62 }
 0x356   :  { %v5253_v45 = vpop.eup %5252  ;;  %5272 = vpow2.f32 %v4383_v58  ;;  %v2585_v7 = vmul.f32 %v5249_v56, %v7023_v29  ;;  %v2586_v8 = vmul.f32 %v5251_v46, %v7026_v57 }
 0x357   :  { %v5255_v17 = vpop.eup %5254  ;;  %5274 = vpow2.f32 %v4384_v52  ;;  %v2562_v52 = vmul.f32 %v7050_v42, %v7779_v28  ;;  %v2563_v24 = vmul.f32 %v5253_v45, %v7780_v34  ;;  %v7781_v42 = vld [vmem:[#allocation8_spill] sm:$0xff] }
 0x358   :  { %v5257_v19 = vpop.eup %5256  ;;  %5276 = vpow2.f32 %v4385_v55  ;;  %v2584_v55 = vmul.f32 %v5247_v5, %v7020_v9  ;;  %v2564_v36 = vmul.f32 %v5255_v17, %v7781_v42  ;;  %v7782_v9 = vld [vmem:[#allocation9_spill] sm:$0xff]  ;;  %v7107_v5 = vadd.f32 %v2585_v7, %v2561_v44 }
 0x359   :  { %v5259_v2 = vpop.eup %5258  ;;  %5278 = vpow2.f32 %v4386_v59  ;;  %v2565_v29 = vmul.f32 %v5257_v19, %v7782_v9  ;;  %v7110_v46 = vadd.f32 %v2586_v8, %v2562_v52 }
 0x35a   :  { %v5261_v14 = vpop.eup %5260  ;;  %5280 = vtanh.f32 %v7066_v11  ;;  %v7101_v63 = vadd.f32 %v2584_v55, %v2560_v3  ;;  %v2587_v43 = vmul.f32 %v5259_v2, %v7029_v35  ;;  %7783 = vst [vmem:[#allocation4_spill] sm:$0xff] %v7107_v5  ;;  %v7787_v2 = vld [vmem:[#allocation17_spill] sm:$0xff] }
 0x35b   :  { %v5263_v61 = vpop.eup %5262  ;;  %5282 = vtanh.f32 %v7070_v41  ;;  %v2588_v57 = vmul.f32 %v5261_v14, %v7032_v15  ;;  %7784 = vst [vmem:[#allocation5_spill] sm:$0xff] %v7110_v46 }
 0x35c   :  { %v5265_v21 = vpop.eup %5264  ;;  %5284 = vtanh.f32 %v7072_v13  ;;  %v2589_v17 = vmul.f32 %v5263_v61, %v7035_v48 }
 0x35d   :  { %v5267_v49 = vpop.eup %5266  ;;  %v2486_v20 = vadd.f32 1.0, %v5265_v21  ;;  %5286 = vtanh.f32 %v7076_v25  ;;  %v7117_v19 = vadd.f32 %v2588_v57, %v2564_v36 }
 0x35e   :  { %v5269_v47 = vpop.eup %5268  ;;  %v2487_v50 = vadd.f32 1.0, %v5267_v49  ;;  %5288 = vtanh.f32 %v7078_v16  ;;  %v7785_v49 = vld [vmem:[#allocation16_spill] sm:$0xff] }
 0x35f   :  { %v5271_v38 = vpop.eup %5270  ;;  %v2488_v33 = vadd.f32 1.0, %v5269_v47  ;;  %5290 = vrcp.f32 %v2486_v20  ;;  %v7114_v47 = vadd.f32 %v2587_v43, %v2563_v24  ;;  %7788 = vst [vmem:[#allocation7_spill] sm:$0xff] %v7117_v19 }
 0x360   :  { %v5273_v32 = vpop.eup %5272  ;;  %v2489_v0 = vadd.f32 1.0, %v5271_v38  ;;  %5292 = vrcp.f32 %v2487_v50  ;;  %v7121_v38 = vadd.f32 %v2589_v17, %v2565_v29 }
 0x361   :  { %v5275_v30 = vpop.eup %5274  ;;  %v2490_v58 = vadd.f32 1.0, %v5273_v32  ;;  %5294 = vrcp.f32 %v2488_v33  ;;  %7786 = vst [vmem:[#allocation6_spill] sm:$0xff] %v7114_v47 }
 0x362   :  { %v5277_v18 = vpop.eup %5276  ;;  %v2491_v4 = vadd.f32 1.0, %v5275_v30  ;;  %5296 = vrcp.f32 %v2489_v0  ;;  %7789 = vst [vmem:[#allocation8_spill] sm:$0xff] %v7121_v38 }
 0x363   :  { %v5279_v59 = vpop.eup %5278  ;;  %v2492_v26 = vadd.f32 1.0, %v5277_v18  ;;  %5298 = vrcp.f32 %v2490_v58 }
 0x364   :  { %v5281_v54 = vpop.eup %5280  ;;  %5300 = vrcp.f32 %v2491_v4  ;;  %v2493_v23 = vadd.f32 1.0, %v5279_v59 }
 0x365   :  { %v5283_v21 = vpop.eup %5282  ;;  %5302 = vtanh.f32 %v7091_v27 }
 0x366   :  { %v5285_v56 = vpop.eup %5284  ;;  %5304 = vrcp.f32 %v2492_v26 }
 0x367   :  { %v5287_v45 = vpop.eup %5286  ;;  %v2644_v20 = vmul.f32 %v5285_v56, %v7785_v49  ;;  %5306 = vrcp.f32 %v2493_v23 }
 0x368   :  { %v5289_v35 = vpop.eup %5288  ;;  %v2645_v60 = vmul.f32 %v5287_v45, %v7787_v2  ;;  %5308 = vtanh.f32 %v7101_v63 }
 0x369   :  { %v5291_v50 = vpop.eup %5290  ;;  %v2652_v15 = vmul.f32 %v5289_v35, %v7001_v22  ;;  %v2716_v14 = vpack.c.bf16 %v2644_v20, %v2644_v20  ;;  %5310 = vtanh.f32 %v7107_v5 }
 0x36a   :  { %v5293_v33 = vpop.eup %5292  ;;  %v2717_v32 = vpack.c.bf16 %v2645_v60, %v2645_v60  ;;  %5312 = vtanh.f32 %v7110_v46  ;;  %v2654_v48 = vmul.f32 %v5291_v50, %v5281_v54 }
 0x36b   :  { %v5295_v61 = vpop.eup %5294  ;;  %v2724_v0 = vpack.c.bf16 %v2652_v15, %v2652_v15  ;;  %v2764_v51 = vunpack.c.l.b16 %v2716_v14  ;;  %5314 = vtanh.f32 %v7114_v47  ;;  %v2655_v3 = vmul.f32 %v5293_v33, %v5283_v21 }
 0x36c   :  { %v5297_v30 = vpop.eup %5296  ;;  %v2765_v58 = vunpack.c.l.b16 %v2717_v32  ;;  %5316 = vtanh.f32 %v7117_v19  ;;  %v2726_v22 = vpack.c.bf16 %v2654_v48, %v2654_v48 }
 0x36d   :  { %v5299_v62 = vpop.eup %5298  ;;  %v2772_v44 = vunpack.c.l.b16 %v2724_v0  ;;  %v2792_v28 = vrot.slane %v2764_v51, 2  ;;  %5318 = vtanh.f32 %v7121_v38  ;;  %v2727_v52 = vpack.c.bf16 %v2655_v3, %v2655_v3 }
 0x36e   :  { %v5301_v18 = vpop.eup %5300  ;;  %v2794_v4 = vrot.slane %v2765_v58, 1  ;;  %v2774_v42 = vunpack.c.l.b16 %v2726_v22 }
 0x36f   :  { %v5303_v55 = vpop.eup %5302  ;;  %v2793_v7 = vsel %vm1515_vm5, %v2792_v28, %v6881_v39  ;;  %v2806_v59 = vrot.slane %v2772_v44, 2  ;;  %v2775_v26 = vunpack.c.l.b16 %v2727_v52 }
 0x370   :  { %v5305_v8 = vpop.eup %5304  ;;  %v2653_v34 = vmul.f32 %v5303_v55, %v7003_v6  ;;  %v2795_v24 = vsel %vm1518_vm6, %v2794_v4, %v2793_v7 }
 0x371   :  { %v5307_v54 = vpop.eup %5306  ;;  %v2807_v23 = vsel %vm1515_vm5, %v2806_v59, %v7014_v12  ;;  %v2810_v36 = vrot.slane %v2775_v26, 7 }
 0x372   :  { %v5309_v21 = vpop.eup %5308  ;;  %v2725_v43 = vpack.c.bf16 %v2653_v34, %v2653_v34 }
 0x373   :  { %v5311_v9 = vpop.eup %5310  ;;  %v2656_v29 = vmul.f32 %v5309_v21, %v5295_v61  ;;  %v2811_v56 = vsel %vm1500_vm0, %v2810_v36, %v2774_v42 }
 0x374   :  { %v5313_v39 = vpop.eup %5312  ;;  %v2773_v57 = vunpack.c.l.b16 %v2725_v43  ;;  %v2657_v45 = vmul.f32 %v5311_v9, %v5297_v30 }
 0x375   :  { %v5315_v49 = vpop.eup %5314  ;;  %v2658_v20 = vmul.f32 %v5313_v39, %v5299_v62  ;;  %v2728_v6 = vpack.c.bf16 %v2656_v29, %v2656_v29 }
 0x376   :  { %v5317_v17 = vpop.eup %5316  ;;  %v2808_v35 = vrot.slane %v2773_v57, 1  ;;  %v2659_v2 = vmul.f32 %v5315_v49, %v5301_v18  ;;  %v2729_v60 = vpack.c.bf16 %v2657_v45, %v2657_v45  ;;  %v7790_v18 = vmov 0  }
 0x377   :  { %v5319_v50 = vpop.eup %5318  ;;  %v2660_v12 = vmul.f32 %v5317_v17, %v5305_v8  ;;  %v2730_v15 = vpack.c.bf16 %v2658_v20, %v2658_v20  ;;  %v2776_v14 = vunpack.c.l.b16 %v2728_v6 }
 0x378   :  { %v2809_v33 = vsel %vm1518_vm6, %v2808_v35, %v2807_v23  ;;  %v2661_v32 = vmul.f32 %v5319_v50, %v5307_v54  ;;  %v2731_v48 = vpack.c.bf16 %v2659_v2, %v2659_v2  ;;  %v2777_v61 = vunpack.c.l.b16 %v2729_v60 }
 0x379   :  { %v2824_v0 = vpack.c.b16 %v2809_v33, %v2795_v24  ;;  %v2732_v51 = vpack.c.bf16 %v2660_v12, %v2660_v12  ;;  %v2778_v3 = vunpack.c.l.b16 %v2730_v15  ;;  %v2812_v30 = vrot.slane %v2776_v14, 6  ;;  %v4387_v14 = vld [vmem:[%s7716_s0 + $0x2] ss:$4 sm:$0xf] }
 0x37a   :  { %v2733_v58 = vpack.c.bf16 %v2661_v32, %v2661_v32  ;;  %v2779_v22 = vunpack.c.l.b16 %v2731_v48  ;;  %v2814_v62 = vrot.slane %v2777_v61, 5  ;;  %v4388_v33 = vld [vmem:[%s7716_s0 + $0x12] ss:$4 sm:$0xf] }
 0x37b   :  { %2861 = vmatmul.mubr.bf16.vlgmr.msra.gmra.mrb[16].mxu0 %v2824_v0  ;;  %2912 = vmatmul.mubr.bf16.vlgmr.msra.gmra.mrb[16].mxu1 %v2824_v0  ;;  %v2780_v44 = vunpack.c.l.b16 %v2732_v51  ;;  %v2813_v28 = vsel %vm1503_vm1, %v2812_v30, %v2811_v56  ;;  %v2816_v52 = vrot.slane %v2778_v3, 4  ;;  %v4389_v51 = vld [vmem:[%s7716_s0 + $0x22] ss:$4 sm:$0xf] }
 0x37c   :  { %2870 = vmatprep.mubr.bf16.mxu0 %v7790_v18  ;;  %2921 = vmatprep.mubr.bf16.mxu1 %v7790_v18  ;;  %v2781_v4 = vunpack.c.l.b16 %v2733_v58  ;;  %v2815_v55 = vsel %vm1506_vm2, %v2814_v62, %v2813_v28  ;;  %v2818_v7 = vrot.slane %v2779_v22, 3  ;;  %v4390_v3 = vld [vmem:[%s7716_s0 + $0x32] ss:$4 sm:$0xf] }
 0x37d   :  { %v2817_v59 = vsel %vm1509_vm3, %v2816_v52, %v2815_v55  ;;  %v2820_v26 = vrot.slane %v2780_v44, 2  ;;  %v4391_v44 = vld [vmem:[%s7716_s0 + $0x42] ss:$4 sm:$0xf] }
 0x37e   :  { %v2819_v8 = vsel %vm1512_vm4, %v2818_v7, %v2817_v59  ;;  %v2822_v34 = vrot.slane %v2781_v4, 1  ;;  %v4392_v59 = vld [vmem:[%s7716_s0 + $0x52] ss:$4 sm:$0xf] }
 0x37f   :  { %v2821_v24 = vsel %vm1515_vm5, %v2820_v26, %v2819_v8 }
 0x380   :  { %v2823_v54 = vsel %vm1518_vm6, %v2822_v34, %v2821_v24 }
 0x381   :  { %v2825_v23 = vpack.c.b16 %v2823_v54, %v2823_v54 }
 0x383   :  { %2871 = vmatmul.mubr.bf16.gmra.mrb[20].mxu0 %v2825_v23  ;;  %2922 = vmatmul.mubr.bf16.gmra.mrb[20].mxu1 %v2825_v23 }
 0x44e   :  { %v2862_v42 = vpop.f32.mrb[16].mxu0  ;;  %v2913_v36 = vpop.f32.mrb[16].mxu1 }
 0x44f   :  { %v2864_v21 = vpop.f32.mrb[17].mxu0  ;;  %v2915_v43 = vpop.f32.mrb[17].mxu1 }
 0x450   :  { %v2942_v9 = vcombine.low %v2862_v42, %v2864_v21  ;;  %v2943_v29 = vcombine.high %v2862_v42, %v2864_v21  ;;  %v2944_v56 = vcombine.low %v2913_v36, %v2915_v43  ;;  %v2945_v39 = vcombine.high %v2913_v36, %v2915_v43  ;;  %v2866_v57 = vpop.f32.mrb[18].mxu0  ;;  %v2917_v45 = vpop.f32.mrb[18].mxu1  ;;  %v4393_v42 = vld [vmem:[%s7716_s0 + $0x62] ss:$4 sm:$0xf] }
 0x451   :  { %v2868_v49 = vpop.f32.mrb[19].mxu0  ;;  %v2919_v20 = vpop.f32.mrb[19].mxu1 }
 0x452   :  { %v2952_v6 = vrot.slane %v2942_v9, %v5924_v40  ;;  %v2959_v17 = vrot.slane %v2943_v29, %v5924_v40  ;;  %v2966_v35 = vrot.slane %v2944_v56, %v5924_v40  ;;  %v2973_v2 = vrot.slane %v2945_v39, %v5924_v40  ;;  %v4394_v39 = vld [vmem:[%s7716_s0 + $0x72] ss:$4 sm:$0xf] }
 0x453   :  { %v3010_v60 = vcombine.low %v2866_v57, %v2868_v49  ;;  %v3011_v50 = vcombine.high %v2866_v57, %v2868_v49  ;;  %v3012_v12 = vcombine.low %v2917_v45, %v2919_v20  ;;  %v3013_v15 = vcombine.high %v2917_v45, %v2919_v20 }
 0x454   :  { %v2974_v32 = vcombine.low %v2952_v6, %v2966_v35  ;;  %v2975_v48 = vcombine.high %v2952_v6, %v2966_v35  ;;  %v2976_v61 = vcombine.low %v2959_v17, %v2973_v2  ;;  %v2977_v0 = vcombine.high %v2959_v17, %v2973_v2 }
 0x455   :  { %v7161_v30 = vrot.slane %v3010_v60, %v5924_v40  ;;  %v7164_v58 = vrot.slane %v3011_v50, %v5924_v40  ;;  %v7167_v22 = vrot.slane %v3012_v12, %v5924_v40  ;;  %v7170_v62 = vrot.slane %v3013_v15, %v5924_v40 }
 0x456   :  { %v2984_v28 = vrot.slane %v2974_v32, %v5924_v40  ;;  %v2991_v52 = vrot.slane %v2976_v61, %v5924_v40  ;;  %v2998_v18 = vrot.slane %v2975_v48, %v5924_v40  ;;  %v3005_v4 = vrot.slane %v2977_v0, %v5924_v40  ;;  %v7179_v55 = vpop.f32.mrb[20].mxu0  ;;  %v7181_v7 = vpop.f32.mrb[20].mxu1 }
 0x457   :  { %v7194_v54 = vpop.f32.mrb[21].mxu0  ;;  %v7196_v23 = vpop.f32.mrb[21].mxu1 }
 0x458   :  { %v3006_v36 = vcombine.high %v2984_v28, %v2984_v28  ;;  %v3007_v21 = vcombine.high %v2991_v52, %v2991_v52  ;;  %v3008_v43 = vcombine.high %v2998_v18, %v2998_v18  ;;  %v3009_v9 = vcombine.high %v3005_v4, %v3005_v4  ;;  %v2876_v29 = vpop.f32.mrb[22].mxu0  ;;  %v2927_v56 = vpop.f32.mrb[22].mxu1 }
 0x459   :  { %v7204_v57 = vadd.f32 %v4387_v14, %v2984_v28  ;;  %v7206_v45 = vadd.f32 %v4388_v33, %v2998_v18  ;;  %v7208_v49 = vadd.f32 %v4391_v44, %v2991_v52  ;;  %v2877_v20 = vpop.f32.mrb[23].mxu0  ;;  %v2928_v6 = vpop.f32.mrb[23].mxu1  ;;  %v7214_v2 = vadd.f32 %v4392_v59, %v3005_v4 }
 0x45a   :  { %v7210_v17 = vadd.f32 %v4389_v51, %v3006_v36  ;;  %v7212_v35 = vadd.f32 %v4390_v3, %v3008_v43  ;;  %v7216_v60 = vadd.f32 %v4393_v42, %v3007_v21  ;;  %v7220_v15 = vadd.f32 %v4394_v39, %v3009_v9 }
 0x45b   :  { %v4411_v50 = vmul.f32 -1.442695, %v7204_v57  ;;  %v4412_v12 = vmul.f32 -1.442695, %v7206_v45  ;;  %v4415_v32 = vmul.f32 -1.442695, %v7208_v49 }
 0x45c   :  { %v4413_v14 = vmul.f32 -1.442695, %v7210_v17  ;;  %v4414_v33 = vmul.f32 -1.442695, %v7212_v35  ;;  %v3362_v48 = vrot.slane %v7204_v57, 1  ;;  %v3363_v0 = vrot.slane %v7206_v45, 1 }
 0x45d   :  { %5320 = vpow2.f32 %v4411_v50  ;;  %v4416_v61 = vmul.f32 -1.442695, %v7214_v2  ;;  %v4417_v51 = vmul.f32 -1.442695, %v7216_v60  ;;  %v3364_v3 = vrot.slane %v7210_v17, 1 }
 0x45e   :  { %5322 = vpow2.f32 %v4412_v12  ;;  %v4418_v44 = vmul.f32 -1.442695, %v7220_v15  ;;  %v3365_v28 = vrot.slane %v7212_v35, 1  ;;  %v3366_v52 = vrot.slane %v7208_v49, 1 }
 0x45f   :  { %5324 = vpow2.f32 %v4413_v14  ;;  %v4435_v18 = vmul.f32 -1.442695, %v3362_v48  ;;  %v4436_v4 = vmul.f32 -1.442695, %v3363_v0  ;;  %v4437_v59 = vmul.f32 -1.442695, %v3364_v3 }
 0x460   :  { %5326 = vpow2.f32 %v4414_v33  ;;  %v4438_v42 = vmul.f32 -1.442695, %v3365_v28  ;;  %v4439_v36 = vmul.f32 -1.442695, %v3366_v52  ;;  %v3367_v6 = vrot.slane %v7214_v2, 1 }
 0x461   :  { %5328 = vpow2.f32 %v4415_v32  ;;  %v3368_v14 = vrot.slane %v7216_v60, 1  ;;  %v3369_v48 = vrot.slane %v7220_v15, 1 }
 0x462   :  { %5330 = vpow2.f32 %v4416_v61 }
 0x463   :  { %5332 = vpow2.f32 %v4417_v51 }
 0x464   :  { %5334 = vpow2.f32 %v4418_v44  ;;  %v4440_v44 = vmul.f32 -1.442695, %v3367_v6 }
 0x465   :  { %5336 = vpow2.f32 %v4435_v18  ;;  %v4441_v18 = vmul.f32 -1.442695, %v3368_v14 }
 0x466   :  { %5338 = vpow2.f32 %v4436_v4 }
 0x467   :  { %v5321_v21 = vpop.eup %5320  ;;  %5340 = vpow2.f32 %v4437_v59  ;;  %v4442_v59 = vmul.f32 -1.442695, %v3369_v48  ;;  %v3556_v48 = vrot.slane %v7210_v17, 2 }
 0x468   :  { %v5323_v43 = vpop.eup %5322  ;;  %v3266_v9 = vadd.f32 1.0, %v5321_v21  ;;  %5342 = vpow2.f32 %v4438_v42 }
 0x469   :  { %v5325_v29 = vpop.eup %5324  ;;  %v3267_v56 = vadd.f32 1.0, %v5323_v43  ;;  %5344 = vpow2.f32 %v4439_v36 }
 0x46a   :  { %v5327_v39 = vpop.eup %5326  ;;  %v3268_v20 = vadd.f32 1.0, %v5325_v29  ;;  %5346 = vrcp.f32 %v3266_v9 }
 0x46b   :  { %v5329_v50 = vpop.eup %5328  ;;  %v3269_v12 = vadd.f32 1.0, %v5327_v39  ;;  %5348 = vrcp.f32 %v3267_v56 }
 0x46c   :  { %v5331_v33 = vpop.eup %5330  ;;  %v3270_v32 = vadd.f32 1.0, %v5329_v50  ;;  %5350 = vrcp.f32 %v3268_v20 }
 0x46d   :  { %v5333_v61 = vpop.eup %5332  ;;  %v3271_v0 = vadd.f32 1.0, %v5331_v33  ;;  %5352 = vrcp.f32 %v3269_v12  ;;  %v3554_v12 = vrot.slane %v7204_v57, 2  ;;  %v3555_v33 = vrot.slane %v7206_v45, 2 }
 0x46e   :  { %v5335_v51 = vpop.eup %5334  ;;  %v3272_v3 = vadd.f32 1.0, %v5333_v61  ;;  %5354 = vrcp.f32 %v3270_v32 }
 0x46f   :  { %v5337_v28 = vpop.eup %5336  ;;  %v3273_v52 = vadd.f32 1.0, %v5335_v51  ;;  %5356 = vrcp.f32 %v3271_v0  ;;  %v3557_v0 = vrot.slane %v7212_v35, 2 }
 0x470   :  { %v5339_v4 = vpop.eup %5338  ;;  %5358 = vrcp.f32 %v3272_v3  ;;  %v3482_v36 = vadd.f32 1.0, %v5337_v28  ;;  %v3558_v3 = vrot.slane %v7208_v49, 2 }
 0x471   :  { %v5341_v42 = vpop.eup %5340  ;;  %5360 = vrcp.f32 %v3273_v52  ;;  %v3483_v43 = vadd.f32 1.0, %v5339_v4  ;;  %v3626_v4 = vrot.slane %v7204_v57, 3  ;;  %v3629_v57 = vrot.slane %v7212_v35, 3 }
 0x472   :  { %v5343_v21 = vpop.eup %5342  ;;  %5362 = vpow2.f32 %v4440_v44  ;;  %v3484_v29 = vadd.f32 1.0, %v5341_v42 }
 0x473   :  { %v5345_v9 = vpop.eup %5344  ;;  %5364 = vpow2.f32 %v4441_v18  ;;  %v3485_v39 = vadd.f32 1.0, %v5343_v21  ;;  %v3627_v21 = vrot.slane %v7206_v45, 3  ;;  %v3632_v45 = vrot.slane %v7216_v60, 3 }
 0x474   :  { %v7236_v56 = vpop.eup %5346  ;;  %5366 = vpow2.f32 %v4442_v59  ;;  %v3486_v6 = vadd.f32 1.0, %v5345_v9  ;;  %v4462_v35 = vmul.f32 -1.442695, %v3629_v57 }
 0x475   :  { %v7238_v20 = vpop.eup %5348  ;;  %5368 = vrcp.f32 %v3482_v36  ;;  %v3559_v36 = vrot.slane %v7214_v2, 2  ;;  %v4465_v8 = vmul.f32 -1.442695, %v3632_v45  ;;  %v3078_v45 = vcombine.low %v7179_v55, %v7194_v54 }
 0x476   :  { %v7240_v50 = vpop.eup %5350  ;;  %5370 = vrcp.f32 %v3483_v43 }
 0x477   :  { %v7243_v14 = vpop.eup %5352  ;;  %5372 = vrcp.f32 %v3484_v29  ;;  %v3560_v29 = vrot.slane %v7216_v60, 2  ;;  %v7792_v60 = vld [vmem:[#allocation11_spill] sm:$0xff] }
 0x478   :  { %v7246_v32 = vpop.eup %5354  ;;  %5374 = vrcp.f32 %v3485_v39  ;;  %v3628_v39 = vrot.slane %v7210_v17, 3  ;;  %v4460_v17 = vmul.f32 -1.442695, %v3627_v21 }
 0x479   :  { %v7249_v61 = vpop.eup %5356  ;;  %5376 = vrcp.f32 %v3486_v6 }
 0x47a   :  { %v7252_v51 = vpop.eup %5358  ;;  %5378 = vtanh.f32 %v3554_v12  ;;  %v3561_v12 = vrot.slane %v7220_v15, 2 }
 0x47b   :  { %v7255_v44 = vpop.eup %5360  ;;  %5380 = vtanh.f32 %v3555_v33  ;;  %v3630_v33 = vrot.slane %v7208_v49, 3  ;;  %v7791_v49 = vld [vmem:[#allocation10_spill] sm:$0xff] }
 0x47c   :  { %v5363_v28 = vpop.eup %5362  ;;  %5382 = vtanh.f32 %v3556_v48 }
 0x47d   :  { %v5365_v52 = vpop.eup %5364  ;;  %v3487_v18 = vadd.f32 1.0, %v5363_v28  ;;  %5384 = vtanh.f32 %v3557_v0  ;;  %v3631_v0 = vrot.slane %v7214_v2, 3  ;;  %v4463_v24 = vmul.f32 -1.442695, %v3630_v33  ;;  %v7795_v33 = vld [vmem:[#allocation14_spill] sm:$0xff] }
 0x47e   :  { %v5367_v59 = vpop.eup %5366  ;;  %v3488_v42 = vadd.f32 1.0, %v5365_v52  ;;  %5386 = vtanh.f32 %v3558_v3  ;;  %v4459_v3 = vmul.f32 -1.442695, %v3626_v4  ;;  %v3633_v52 = vrot.slane %v7220_v15, 3  ;;  %v7793_v15 = vld [vmem:[#allocation12_spill] sm:$0xff] }
 0x47f   :  { %v5369_v43 = vpop.eup %5368  ;;  %v3489_v9 = vadd.f32 1.0, %v5367_v59  ;;  %5388 = vrcp.f32 %v3487_v18  ;;  %v4461_v59 = vmul.f32 -1.442695, %v3628_v39  ;;  %v4464_v2 = vmul.f32 -1.442695, %v3631_v0 }
 0x480   :  { %v5371_v6 = vpop.eup %5370  ;;  %5390 = vrcp.f32 %v3488_v42  ;;  %v3818_v34 = vmul.f32 %v5369_v43, %v7791_v49 }
 0x481   :  { %v5373_v48 = vpop.eup %5372  ;;  %5392 = vrcp.f32 %v3489_v9  ;;  %v3819_v4 = vmul.f32 %v5371_v6, %v7792_v60 }
 0x482   :  { %v5375_v28 = vpop.eup %5374  ;;  %5394 = vtanh.f32 %v3559_v36  ;;  %v4466_v36 = vmul.f32 -1.442695, %v3633_v52  ;;  %v3820_v21 = vmul.f32 %v5373_v48, %v7793_v15 }
 0x483   :  { %v5377_v18 = vpop.eup %5376  ;;  %5396 = vtanh.f32 %v3560_v29 }
 0x484   :  { %v5379_v42 = vpop.eup %5378  ;;  %5398 = vtanh.f32 %v3561_v12  ;;  %v7794_v12 = vld [vmem:[#allocation13_spill] sm:$0xff]  ;;  %v3822_v38 = vmul.f32 %v5377_v18, %v7795_v33  ;;  %v7796_v18 = vcombine.low %v7161_v30, %v7167_v22 }
 0x485   :  { %v5381_v9 = vpop.eup %5380  ;;  %5400 = vpow2.f32 %v4459_v3  ;;  %v3842_v29 = vmul.f32 %v5379_v42, %v7236_v56  ;;  %v3821_v57 = vmul.f32 %v5375_v28, %v7794_v12  ;;  %v3079_v28 = vcombine.high %v7179_v55, %v7194_v54 }
 0x486   :  { %v5383_v26 = vpop.eup %5382  ;;  %5402 = vpow2.f32 %v4460_v17  ;;  %v3843_v43 = vmul.f32 %v5381_v9, %v7238_v20  ;;  %v3081_v55 = vcombine.high %v7181_v7, %v7196_v23 }
 0x487   :  { %v5385_v39 = vpop.eup %5384  ;;  %5404 = vpow2.f32 %v4461_v59  ;;  %v3844_v0 = vmul.f32 %v5383_v26, %v7240_v50  ;;  %v3866_v6 = vadd.f32 %v3842_v29, %v3818_v34  ;;  %v7287_v26 = vrot.slane %v3078_v45, %v5924_v40 }
 0x488   :  { %v5387_v3 = vpop.eup %5386  ;;  %5406 = vpow2.f32 %v4462_v35  ;;  %v3845_v56 = vmul.f32 %v5385_v39, %v7243_v14  ;;  %v3867_v48 = vadd.f32 %v3843_v43, %v3819_v4  ;;  %v3080_v34 = vcombine.low %v7181_v7, %v7196_v23  ;;  %v4397_v43 = vld [vmem:[%s7716_s0 + $0xa2] ss:$4 sm:$0xf] }
 0x489   :  { %v7278_v52 = vpop.eup %5388  ;;  %5408 = vpow2.f32 %v4463_v24  ;;  %v3846_v20 = vmul.f32 %v5387_v3, %v7246_v32  ;;  %v3868_v24 = vadd.f32 %v3844_v0, %v3820_v21  ;;  %v7294_v14 = vrot.slane %v3079_v28, %v5924_v40  ;;  %v4396_v21 = vld [vmem:[%s7716_s0 + $0x92] ss:$4 sm:$0xf] }
 0x48a   :  { %v7283_v17 = vpop.eup %5390  ;;  %5410 = vpow2.f32 %v4464_v2  ;;  %v3869_v32 = vadd.f32 %v3845_v56, %v3821_v57  ;;  %v3052_v59 = vrot.slane %v7796_v18, %v5924_v40  ;;  %v7305_v42 = vrot.slane %v3080_v34, %v5924_v40 }
 0x48b   :  { %v7291_v50 = vpop.eup %5392  ;;  %5412 = vpow2.f32 %v4465_v8  ;;  %v3870_v35 = vadd.f32 %v3846_v20, %v3822_v38  ;;  %v7797_v7 = vcombine.high %v7161_v30, %v7167_v22  ;;  %v7314_v49 = vrot.slane %v3081_v55, %v5924_v40  ;;  %v4395_v38 = vld [vmem:[%s7716_s0 + $0x82] ss:$4 sm:$0xf] }
 0x48c   :  { %v7298_v54 = vpop.eup %5394  ;;  %5414 = vpow2.f32 %v4466_v36  ;;  %v7798_v29 = vcombine.low %v7164_v58, %v7170_v62  ;;  %v3074_v12 = vcombine.high %v3052_v59, %v3052_v59  ;;  %v7799_v3 = vcombine.high %v7164_v58, %v7170_v62 }
 0x48d   :  { %v7307_v8 = vpop.eup %5396  ;;  %5416 = vtanh.f32 %v3866_v6  ;;  %v3066_v23 = vrot.slane %v7797_v7, %v5924_v40  ;;  %v7346_v28 = vadd.f32 %v4395_v38, %v3052_v59 }
 0x48e   :  { %v7316_v9 = vpop.eup %5398  ;;  %5418 = vtanh.f32 %v3867_v48  ;;  %v3059_v39 = vrot.slane %v7798_v29, %v5924_v40  ;;  %v3073_v0 = vrot.slane %v7799_v3, %v5924_v40  ;;  %v4398_v48 = vld [vmem:[%s7716_s0 + $0xb2] ss:$4 sm:$0xf] }
 0x48f   :  { %v5401_v4 = vpop.eup %5400  ;;  %5420 = vtanh.f32 %v3868_v24  ;;  %v3076_v6 = vcombine.high %v3066_v23, %v3066_v23  ;;  %v4399_v24 = vld [vmem:[%s7716_s0 + $0xc2] ss:$4 sm:$0xf]  ;;  %v7351_v55 = vadd.f32 %v4396_v21, %v3066_v23  ;;  %v4402_v21 = vld [vmem:[%s7716_s0 + $0xf2] ss:$4 sm:$0xf] }
 0x490   :  { %v5403_v36 = vpop.eup %5402  ;;  %v3746_v15 = vadd.f32 1.0, %v5401_v4  ;;  %5422 = vtanh.f32 %v3869_v32  ;;  %v4400_v32 = vld [vmem:[%s7716_s0 + $0xd2] ss:$4 sm:$0xf]  ;;  %v3075_v18 = vcombine.high %v3059_v39, %v3059_v39  ;;  %v3077_v38 = vcombine.high %v3073_v0, %v3073_v0 }
 0x491   :  { %v5405_v57 = vpop.eup %5404  ;;  %v3747_v33 = vadd.f32 1.0, %v5403_v36  ;;  %5424 = vtanh.f32 %v3870_v35  ;;  %v7356_v35 = vadd.f32 %v4397_v43, %v3074_v12  ;;  %v4401_v4 = vld [vmem:[%s7716_s0 + $0xe2] ss:$4 sm:$0xf]  ;;  %v7361_v23 = vadd.f32 %v4398_v48, %v3076_v6 }
 0x492   :  { %v5407_v45 = vpop.eup %5406  ;;  %v3748_v56 = vadd.f32 1.0, %v5405_v57  ;;  %5426 = vrcp.f32 %v3746_v15  ;;  %v7366_v29 = vadd.f32 %v4399_v24, %v3059_v39  ;;  %v4419_v12 = vmul.f32 -1.442695, %v7346_v28 }
 0x493   :  { %v5409_v20 = vpop.eup %5408  ;;  %v3749_v34 = vadd.f32 1.0, %v5407_v45  ;;  %5428 = vrcp.f32 %v3747_v33  ;;  %v7371_v43 = vadd.f32 %v4400_v32, %v3073_v0  ;;  %v4420_v3 = vmul.f32 -1.442695, %v7351_v55 }
 0x494   :  { %v5411_v58 = vpop.eup %5410  ;;  %v3750_v62 = vadd.f32 1.0, %v5409_v20  ;;  %5430 = vrcp.f32 %v3748_v56  ;;  %v7376_v45 = vadd.f32 %v4401_v4, %v3075_v18  ;;  %v4421_v56 = vmul.f32 -1.442695, %v7356_v35 }
 0x495   :  { %v5413_v59 = vpop.eup %5412  ;;  %v3751_v7 = vadd.f32 1.0, %v5411_v58  ;;  %5432 = vrcp.f32 %v3749_v34  ;;  %v7381_v39 = vadd.f32 %v4402_v21, %v3077_v38  ;;  %v4422_v20 = vmul.f32 -1.442695, %v7361_v23 }
 0x496   :  { %v5415_v36 = vpop.eup %5414  ;;  %v3752_v15 = vadd.f32 1.0, %v5413_v59  ;;  %5434 = vrcp.f32 %v3750_v62  ;;  %v4423_v0 = vmul.f32 -1.442695, %v7366_v29  ;;  %v3370_v24 = vrot.slane %v7346_v28, 1 }
 0x497   :  { %v7369_v57 = vpop.eup %5416  ;;  %v3753_v33 = vadd.f32 1.0, %v5415_v36  ;;  %5436 = vrcp.f32 %v3751_v7  ;;  %v4424_v62 = vmul.f32 -1.442695, %v7371_v43  ;;  %v3371_v32 = vrot.slane %v7351_v55, 1 }
 0x498   :  { %v7374_v6 = vpop.eup %5418  ;;  %5438 = vrcp.f32 %v3752_v15  ;;  %v4425_v59 = vmul.f32 -1.442695, %v7376_v45  ;;  %v3372_v7 = vrot.slane %v7356_v35, 1  ;;  %v4426_v38 = vmul.f32 -1.442695, %v7381_v39 }
 0x499   :  { %v7379_v48 = vpop.eup %5420  ;;  %5440 = vrcp.f32 %v3753_v33  ;;  %v3373_v36 = vrot.slane %v7361_v23, 1  ;;  %v3374_v21 = vrot.slane %v7366_v29, 1 }
 0x49a   :  { %v7384_v34 = vpop.eup %5422  ;;  %5442 = vpow2.f32 %v4419_v12  ;;  %v4443_v12 = vmul.f32 -1.442695, %v3370_v24  ;;  %v4445_v22 = vmul.f32 -1.442695, %v3372_v7 }
 0x49b   :  { %v7388_v58 = vpop.eup %5424  ;;  %5444 = vpow2.f32 %v4420_v3  ;;  %v4444_v3 = vmul.f32 -1.442695, %v3371_v32  ;;  %v4447_v2 = vmul.f32 -1.442695, %v3374_v21  ;;  %v3376_v21 = vrot.slane %v7376_v45, 1 }
 0x49c   :  { %v7392_v18 = vpop.eup %5426  ;;  %5446 = vpow2.f32 %v4421_v56 }
 0x49d   :  { %v7396_v4 = vpop.eup %5428  ;;  %5448 = vpow2.f32 %v4422_v20  ;;  %v4446_v20 = vmul.f32 -1.442695, %v3373_v36 }
 0x49e   :  { %v7400_v15 = vpop.eup %5430  ;;  %5450 = vpow2.f32 %v4423_v0 }
 0x49f   :  { %v7403_v33 = vpop.eup %5432  ;;  %5452 = vpow2.f32 %v4424_v62 }
 0x4a0   :  { %v7405_v56 = vpop.eup %5434  ;;  %5454 = vpow2.f32 %v4425_v59 }
 0x4a1   :  { %v7407_v30 = vpop.eup %5436  ;;  %5456 = vpow2.f32 %v4426_v38  ;;  %v3375_v38 = vrot.slane %v7371_v43, 1 }
 0x4a2   :  { %7800 = vst [vmem:[#allocation9_spill] sm:$0xff] %v7407_v30  ;;  %v7409_v60 = vpop.eup %5438  ;;  %5458 = vpow2.f32 %v4443_v12 }
 0x4a3   :  { %7801 = vst [vmem:[#allocation16_spill] sm:$0xff] %v7409_v60  ;;  %v7411_v0 = vpop.eup %5440  ;;  %5460 = vpow2.f32 %v4444_v3 }
 0x4a4   :  { %7802 = vst [vmem:[#allocation17_spill] sm:$0xff] %v7411_v0  ;;  %v5443_v24 = vpop.eup %5442  ;;  %5462 = vpow2.f32 %v4445_v22  ;;  %v3377_v22 = vrot.slane %v7381_v39, 1 }
 0x4a5   :  { %v5445_v19 = vpop.eup %5444  ;;  %v3274_v62 = vadd.f32 1.0, %v5443_v24  ;;  %5464 = vpow2.f32 %v4446_v20 }
 0x4a6   :  { %v5447_v32 = vpop.eup %5446  ;;  %v3275_v47 = vadd.f32 1.0, %v5445_v19  ;;  %5466 = vpow2.f32 %v4447_v2 }
 0x4a7   :  { %v5449_v59 = vpop.eup %5448  ;;  %v3276_v7 = vadd.f32 1.0, %v5447_v32  ;;  %5468 = vrcp.f32 %v3274_v62  ;;  %v4448_v32 = vmul.f32 -1.442695, %v3375_v38  ;;  %v7745_v62 = vmov 0.0  }
 0x4a8   :  { %v5451_v36 = vpop.eup %5450  ;;  %v3277_v60 = vadd.f32 1.0, %v5449_v59  ;;  %5470 = vrcp.f32 %v3275_v47  ;;  %4492 = vmatprep.subr.bf16.mxu0 %v7745_v62  ;;  %v4449_v47 = vmul.f32 -1.442695, %v3376_v21  ;;  %4496 = vmatprep.mubr.msk.bf16.mxu0 %vm5737_vm7, %v7745_v62 }
 0x4a9   :  { %v5453_v12 = vpop.eup %5452  ;;  %v3278_v3 = vadd.f32 1.0, %v5451_v36  ;;  %5472 = vrcp.f32 %v3276_v7  ;;  %v4450_v36 = vmul.f32 -1.442695, %v3377_v22 }
 0x4aa   :  { %v5455_v24 = vpop.eup %5454  ;;  %v3279_v20 = vadd.f32 1.0, %v5453_v12  ;;  %5474 = vrcp.f32 %v3277_v60  ;;  %v3562_v12 = vrot.slane %v7346_v28, 2 }
 0x4ab   :  { %v5457_v19 = vpop.eup %5456  ;;  %v3280_v2 = vadd.f32 1.0, %v5455_v24  ;;  %5476 = vrcp.f32 %v3278_v3  ;;  %v3563_v24 = vrot.slane %v7351_v55, 2 }
 0x4ac   :  { %v5459_v0 = vpop.eup %5458  ;;  %v3281_v59 = vadd.f32 1.0, %v5457_v19  ;;  %5478 = vrcp.f32 %v3279_v20  ;;  %v3914_v20 = vmul.f32 %v7392_v18, %v7369_v57  ;;  %v3918_v57 = vmul.f32 %v7405_v56, %v7388_v58 }
 0x4ad   :  { %v5461_v30 = vpop.eup %5460  ;;  %5480 = vrcp.f32 %v3280_v2  ;;  %v3490_v46 = vadd.f32 1.0, %v5459_v0  ;;  %v3915_v0 = vmul.f32 %v7396_v4, %v7374_v6 }
 0x4ae   :  { %v5463_v7 = vpop.eup %5462  ;;  %5482 = vrcp.f32 %v3281_v59  ;;  %v3491_v60 = vadd.f32 1.0, %v5461_v30  ;;  %v3916_v30 = vmul.f32 %v7400_v15, %v7379_v48  ;;  %v3959_v59 = vpack.c.bf16 %v3914_v20, %v3914_v20 }
 0x4af   :  { %v5465_v5 = vpop.eup %5464  ;;  %5484 = vpow2.f32 %v4448_v32  ;;  %v3492_v38 = vadd.f32 1.0, %v5463_v7  ;;  %v3917_v32 = vmul.f32 %v7403_v33, %v7384_v34  ;;  %v3565_v34 = vrot.slane %v7361_v23, 2 }
 0x4b0   :  { %v5467_v3 = vpop.eup %5466  ;;  %5486 = vpow2.f32 %v4449_v47  ;;  %v3493_v22 = vadd.f32 1.0, %v5465_v5  ;;  %v3564_v5 = vrot.slane %v7356_v35, 2  ;;  %v3960_v47 = vpack.c.bf16 %v3915_v0, %v3915_v0 }
 0x4b1   :  { %v7421_v21 = vpop.eup %5468  ;;  %5488 = vpow2.f32 %v4450_v36  ;;  %v3494_v19 = vadd.f32 1.0, %v5467_v3  ;;  %v3962_v4 = vpack.c.bf16 %v3917_v32, %v3917_v32  ;;  %v3963_v36 = vpack.c.bf16 %v3918_v57, %v3918_v57 }
 0x4b2   :  { %v7425_v2 = vpop.eup %5470  ;;  %5490 = vrcp.f32 %v3490_v46  ;;  %v3961_v46 = vpack.c.bf16 %v3916_v30, %v3916_v30  ;;  %v4008_v15 = vunpack.c.l.b16 %v3960_v47  ;;  %v3566_v3 = vrot.slane %v7366_v29, 2 }
 0x4b3   :  { %v7433_v18 = vpop.eup %5472  ;;  %5492 = vrcp.f32 %v3491_v60  ;;  %v4010_v56 = vunpack.c.l.b16 %v3962_v4  ;;  %v4011_v7 = vunpack.c.l.b16 %v3963_v36  ;;  %v3567_v0 = vrot.slane %v7371_v43, 2 }
 0x4b4   :  { %v7436_v6 = vpop.eup %5474  ;;  %5494 = vrcp.f32 %v3492_v38  ;;  %v4009_v33 = vunpack.c.l.b16 %v3961_v46  ;;  %v4007_v38 = vunpack.c.l.b16 %v3959_v59  ;;  %v4031_v20 = vrot.slane %v4008_v15, 7 }
 0x4b5   :  { %v7438_v48 = vpop.eup %5476  ;;  %5496 = vrcp.f32 %v3493_v22  ;;  %v3568_v57 = vrot.slane %v7376_v45, 2  ;;  %v3634_v47 = vrot.slane %v7346_v28, 3  ;;  %v4037_v59 = vrot.slane %v4011_v7, 4 }
 0x4b6   :  { %v7441_v58 = vpop.eup %5478  ;;  %5498 = vrcp.f32 %v3494_v19  ;;  %v4033_v30 = vrot.slane %v4009_v33, 6  ;;  %v4035_v19 = vrot.slane %v4010_v56, 5  ;;  %v4032_v46 = vsel %vm1500_vm0, %v4031_v20, %v4007_v38 }
 0x4b7   :  { %v7444_v60 = vpop.eup %5480  ;;  %5500 = vtanh.f32 %v3562_v12  ;;  %v3636_v28 = vrot.slane %v7356_v35, 3  ;;  %v3637_v7 = vrot.slane %v7361_v23, 3 }
 0x4b8   :  { %v7447_v22 = vpop.eup %5482  ;;  %5502 = vtanh.f32 %v3563_v24  ;;  %v4034_v12 = vsel %vm1503_vm1, %v4033_v30, %v4032_v46  ;;  %v3635_v24 = vrot.slane %v7351_v55, 3  ;;  %v3638_v55 = vrot.slane %v7366_v29, 3 }
 0x4b9   :  { %7803 = vst [vmem:[#allocation10_spill] sm:$0xff] %v7447_v22  ;;  %v5485_v32 = vpop.eup %5484  ;;  %5504 = vtanh.f32 %v3564_v5  ;;  %v4036_v33 = vsel %vm1506_vm2, %v4035_v19, %v4034_v12  ;;  %v3639_v19 = vrot.slane %v7371_v43, 3  ;;  %v3640_v46 = vrot.slane %v7376_v45, 3 }
 0x4ba   :  { %v5487_v4 = vpop.eup %5486  ;;  %v3495_v36 = vadd.f32 1.0, %v5485_v32  ;;  %5506 = vtanh.f32 %v3565_v34  ;;  %v7458_v5 = vsel %vm1509_vm3, %v4037_v59, %v4036_v33  ;;  %v3569_v34 = vrot.slane %v7381_v39, 2 }
 0x4bb   :  { %v5489_v15 = vpop.eup %5488  ;;  %v3496_v62 = vadd.f32 1.0, %v5487_v4  ;;  %5508 = vtanh.f32 %v3566_v3  ;;  %v4467_v3 = vmul.f32 -1.442695, %v3634_v47  ;;  %v4468_v32 = vmul.f32 -1.442695, %v3635_v24 }
 0x4bc   :  { %v5491_v56 = vpop.eup %5490  ;;  %v3497_v22 = vadd.f32 1.0, %v5489_v15  ;;  %5510 = vrcp.f32 %v3495_v36  ;;  %v4469_v4 = vmul.f32 -1.442695, %v3636_v28  ;;  %v3641_v36 = vrot.slane %v7381_v39, 3 }
 0x4bd   :  { %v5493_v38 = vpop.eup %5492  ;;  %5512 = vrcp.f32 %v3496_v62  ;;  %v4470_v23 = vmul.f32 -1.442695, %v3637_v7  ;;  %v3826_v29 = vmul.f32 %v5491_v56, %v6901_v53 }
 0x4be   :  { %v5495_v20 = vpop.eup %5494  ;;  %5514 = vrcp.f32 %v3497_v22  ;;  %v4471_v22 = vmul.f32 -1.442695, %v3638_v55  ;;  %v3827_v43 = vmul.f32 %v5493_v38, %v6906_v10  ;;  %v4474_v39 = vmul.f32 -1.442695, %v3641_v36 }
 0x4bf   :  { %v5497_v30 = vpop.eup %5496  ;;  %5516 = vtanh.f32 %v3567_v0  ;;  %v4472_v0 = vmul.f32 -1.442695, %v3639_v19  ;;  %v3828_v45 = vmul.f32 %v5495_v20, %v6911_v37 }
 0x4c0   :  { %v5499_v35 = vpop.eup %5498  ;;  %5518 = vtanh.f32 %v3568_v57  ;;  %v4473_v57 = vmul.f32 -1.442695, %v3640_v46  ;;  %v3829_v33 = vmul.f32 %v5497_v30, %v6913_v1 }
 0x4c1   :  { %v5501_v62 = vpop.eup %5500  ;;  %5520 = vtanh.f32 %v3569_v34  ;;  %v3830_v56 = vmul.f32 %v5499_v35, %v6917_v31  ;;  %v7804_v31 = vcombine.low %v7287_v26, %v7305_v42  ;;  %v4403_v35 = vld [vmem:[%s7716_s0 + $0x102] ss:$4 sm:$0xf] }
 0x4c2   :  { %v5503_v12 = vpop.eup %5502  ;;  %5522 = vpow2.f32 %v4467_v3  ;;  %v3850_v15 = vmul.f32 %v5501_v62, %v7421_v21  ;;  %v4404_v62 = vld [vmem:[%s7716_s0 + $0x112] ss:$4 sm:$0xf] }
 0x4c3   :  { %v5505_v47 = vpop.eup %5504  ;;  %5524 = vpow2.f32 %v4468_v32  ;;  %v3851_v28 = vmul.f32 %v5503_v12, %v7425_v2 }
 0x4c4   :  { %v5507_v59 = vpop.eup %5506  ;;  %5526 = vpow2.f32 %v4469_v4  ;;  %v3852_v10 = vmul.f32 %v5505_v47, %v7433_v18  ;;  %v3874_v38 = vadd.f32 %v3850_v15, %v3826_v29  ;;  %v3120_v18 = vrot.slane %v7804_v31, %v5924_v40  ;;  %v4410_v31 = vld [vmem:[%s7716_s0 + $0x172] ss:$4 sm:$0xf] }
 0x4c5   :  { %v5509_v24 = vpop.eup %5508  ;;  %5528 = vpow2.f32 %v4470_v23  ;;  %v3853_v37 = vmul.f32 %v5507_v59, %v7436_v6  ;;  %v3875_v21 = vadd.f32 %v3851_v28, %v3827_v43  ;;  %v7805_v6 = vcombine.high %v7287_v26, %v7305_v42 }
 0x4c6   :  { %v7472_v53 = vpop.eup %5510  ;;  %5530 = vpow2.f32 %v4471_v22  ;;  %v3854_v1 = vmul.f32 %v5509_v24, %v7438_v48  ;;  %v3876_v2 = vadd.f32 %v3852_v10, %v3828_v45  ;;  %v7806_v26 = vcombine.low %v7294_v14, %v7314_v49  ;;  %v4405_v22 = vld [vmem:[%s7716_s0 + $0x122] ss:$4 sm:$0xf] }
 0x4c7   :  { %v7476_v34 = vpop.eup %5512  ;;  %5532 = vpow2.f32 %v4472_v0  ;;  %v3877_v55 = vadd.f32 %v3853_v37, %v3829_v33  ;;  %v3134_v19 = vrot.slane %v7805_v6, %v5924_v40  ;;  %v3142_v36 = vcombine.high %v3120_v18, %v3120_v18  ;;  %v4409_v37 = vld [vmem:[%s7716_s0 + $0x162] ss:$4 sm:$0xf] }
 0x4c8   :  { %v7479_v7 = vpop.eup %5514  ;;  %5534 = vpow2.f32 %v4473_v57  ;;  %v3878_v30 = vadd.f32 %v3854_v1, %v3830_v56  ;;  %v3127_v42 = vrot.slane %v7806_v26, %v5924_v40  ;;  %v7807_v29 = vcombine.high %v7294_v14, %v7314_v49  ;;  %v4406_v57 = vld [vmem:[%s7716_s0 + $0x132] ss:$4 sm:$0xf] }
 0x4c9   :  { %v7482_v20 = vpop.eup %5516  ;;  %5536 = vpow2.f32 %v4474_v39  ;;  %v3144_v0 = vcombine.high %v3134_v19, %v3134_v19  ;;  %v7516_v45 = vadd.f32 %v4403_v35, %v3120_v18  ;;  %v4407_v39 = vld [vmem:[%s7716_s0 + $0x142] ss:$4 sm:$0xf]  ;;  %v7521_v33 = vadd.f32 %v4404_v62, %v3134_v19  ;;  %v4408_v49 = vld [vmem:[%s7716_s0 + $0x152] ss:$4 sm:$0xf] }
 0x4ca   :  { %v7488_v3 = vpop.eup %5518  ;;  %5538 = vtanh.f32 %v3874_v38  ;;  %v3141_v47 = vrot.slane %v7807_v29, %v5924_v40  ;;  %v3143_v28 = vcombine.high %v3127_v42, %v3127_v42  ;;  %v7526_v56 = vadd.f32 %v4405_v22, %v3142_v36 }
 0x4cb   :  { %v7494_v48 = vpop.eup %5520  ;;  %5540 = vtanh.f32 %v3875_v21  ;;  %v7531_v1 = vadd.f32 %v4406_v57, %v3144_v0  ;;  %v7536_v18 = vadd.f32 %v4407_v39, %v3127_v42  ;;  %v4428_v35 = vmul.f32 -1.442695, %v7521_v33 }
 0x4cc   :  { %v5523_v32 = vpop.eup %5522  ;;  %5542 = vtanh.f32 %v3876_v2  ;;  %v3145_v21 = vcombine.high %v3141_v47, %v3141_v47  ;;  %v4429_v62 = vmul.f32 -1.442695, %v7526_v56  ;;  %v3378_v22 = vrot.slane %v7516_v45, 1 }
 0x4cd   :  { %v5525_v46 = vpop.eup %5524  ;;  %v3754_v4 = vadd.f32 1.0, %v5523_v32  ;;  %5544 = vtanh.f32 %v3877_v55  ;;  %v7539_v32 = vadd.f32 %v4408_v49, %v3141_v47  ;;  %v4430_v42 = vmul.f32 -1.442695, %v7531_v1 }
 0x4ce   :  { %v5527_v23 = vpop.eup %5526  ;;  %v3755_v12 = vadd.f32 1.0, %v5525_v46  ;;  %5546 = vtanh.f32 %v3878_v30  ;;  %v4427_v30 = vmul.f32 -1.442695, %v7516_v45  ;;  %v7545_v36 = vadd.f32 %v4410_v31, %v3145_v21 }
 0x4cf   :  { %v5529_v43 = vpop.eup %5528  ;;  %v3756_v59 = vadd.f32 1.0, %v5527_v23  ;;  %5548 = vrcp.f32 %v3754_v4  ;;  %v7542_v4 = vadd.f32 %v4409_v37, %v3143_v28  ;;  %v4432_v47 = vmul.f32 -1.442695, %v7539_v32 }
 0x4d0   :  { %v5531_v15 = vpop.eup %5530  ;;  %v3757_v24 = vadd.f32 1.0, %v5529_v43  ;;  %5550 = vrcp.f32 %v3755_v12  ;;  %v4431_v12 = vmul.f32 -1.442695, %v7536_v18  ;;  %v3379_v0 = vrot.slane %v7521_v33, 1 }
 0x4d1   :  { %v5533_v40 = vpop.eup %5532  ;;  %v3758_v14 = vadd.f32 1.0, %v5531_v15  ;;  %5552 = vrcp.f32 %v3756_v59  ;;  %v3380_v43 = vrot.slane %v7526_v56, 1  ;;  %v4433_v57 = vmul.f32 -1.442695, %v7542_v4 }
 0x4d2   :  { %v5535_v10 = vpop.eup %5534  ;;  %v3759_v38 = vadd.f32 1.0, %v5533_v40  ;;  %5554 = vrcp.f32 %v3757_v24  ;;  %v4434_v24 = vmul.f32 -1.442695, %v7545_v36  ;;  %v3381_v39 = vrot.slane %v7531_v1, 1 }
 0x4d3   :  { %v5537_v2 = vpop.eup %5536  ;;  %v3760_v55 = vadd.f32 1.0, %v5535_v10  ;;  %5556 = vrcp.f32 %v3758_v14  ;;  %v3382_v49 = vrot.slane %v7536_v18, 1  ;;  %v4451_v28 = vmul.f32 -1.442695, %v3378_v22 }
 0x4d4   :  { %v5539_v6 = vpop.eup %5538  ;;  %v3761_v19 = vadd.f32 1.0, %v5537_v2  ;;  %5558 = vrcp.f32 %v3759_v38  ;;  %v4452_v37 = vmul.f32 -1.442695, %v3379_v0  ;;  %v4453_v21 = vmul.f32 -1.442695, %v3380_v43 }
 0x4d5   :  { %v5541_v46 = vpop.eup %5540  ;;  %5560 = vrcp.f32 %v3760_v55 }
 0x4d6   :  { %v5543_v26 = vpop.eup %5542  ;;  %5562 = vrcp.f32 %v3761_v19 }
 0x4d7   :  { %v5545_v23 = vpop.eup %5544  ;;  %5564 = vpow2.f32 %v4427_v30 }
 0x4d8   :  { %v5547_v29 = vpop.eup %5546  ;;  %5566 = vpow2.f32 %v4428_v35 }
 0x4d9   :  { %v5549_v59 = vpop.eup %5548  ;;  %5568 = vpow2.f32 %v4429_v62 }
 0x4da   :  { %v5551_v15 = vpop.eup %5550  ;;  %5570 = vpow2.f32 %v4430_v42  ;;  %v3922_v40 = vmul.f32 %v5549_v59, %v5539_v6  ;;  %v4454_v6 = vmul.f32 -1.442695, %v3381_v39 }
 0x4db   :  { %v5553_v14 = vpop.eup %5552  ;;  %5572 = vpow2.f32 %v4431_v12  ;;  %v3923_v10 = vmul.f32 %v5551_v15, %v5541_v46  ;;  %v4455_v46 = vmul.f32 -1.442695, %v3382_v49 }
 0x4dc   :  { %v5555_v38 = vpop.eup %5554  ;;  %5574 = vpow2.f32 %v4432_v47  ;;  %v3924_v2 = vmul.f32 %v5553_v14, %v5543_v26  ;;  %v3967_v30 = vpack.c.bf16 %v3922_v40, %v3922_v40  ;;  %v3383_v26 = vrot.slane %v7539_v32, 1 }
 0x4dd   :  { %v5557_v55 = vpop.eup %5556  ;;  %5576 = vpow2.f32 %v4433_v57  ;;  %v3925_v31 = vmul.f32 %v5555_v38, %v5545_v23  ;;  %v3968_v19 = vpack.c.bf16 %v3923_v10, %v3923_v10 }
 0x4de   :  { %v7557_v35 = vpop.eup %5558  ;;  %5578 = vpow2.f32 %v4434_v24  ;;  %v3926_v62 = vmul.f32 %v5557_v55, %v5547_v29  ;;  %v3969_v42 = vpack.c.bf16 %v3924_v2, %v3924_v2  ;;  %v4015_v57 = vunpack.c.l.b16 %v3967_v30 }
 0x4df   :  { %v7559_v12 = vpop.eup %5560  ;;  %5580 = vpow2.f32 %v4451_v28  ;;  %v3970_v22 = vpack.c.bf16 %v3925_v31, %v3925_v31  ;;  %v4016_v47 = vunpack.c.l.b16 %v3968_v19  ;;  %v3384_v19 = vrot.slane %v7542_v4, 1 }
 0x4e0   :  { %v7561_v0 = vpop.eup %5562  ;;  %5582 = vpow2.f32 %v4452_v37  ;;  %v3971_v23 = vpack.c.bf16 %v3926_v62, %v3926_v62  ;;  %v4017_v43 = vunpack.c.l.b16 %v3969_v42 }
 0x4e1   :  { %v5565_v59 = vpop.eup %5564  ;;  %5584 = vpow2.f32 %v4453_v21  ;;  %v4018_v15 = vunpack.c.l.b16 %v3970_v22  ;;  %v4045_v24 = vrot.slane %v4016_v47, 7 }
 0x4e2   :  { %v5567_v29 = vpop.eup %5566  ;;  %v3282_v39 = vadd.f32 1.0, %v5565_v59  ;;  %5586 = vpow2.f32 %v4454_v6  ;;  %v4019_v40 = vunpack.c.l.b16 %v3971_v23  ;;  %v4047_v14 = vrot.slane %v4017_v43, 6 }
 0x4e3   :  { %v5569_v49 = vpop.eup %5568  ;;  %v3283_v28 = vadd.f32 1.0, %v5567_v29  ;;  %5588 = vpow2.f32 %v4455_v46  ;;  %v4046_v10 = vsel %vm1500_vm0, %v4045_v24, %v4015_v57  ;;  %v4049_v38 = vrot.slane %v4018_v15, 5 }
 0x4e4   :  { %v5571_v2 = vpop.eup %5570  ;;  %v3284_v37 = vadd.f32 1.0, %v5569_v49  ;;  %5590 = vrcp.f32 %v3282_v39  ;;  %v4048_v55 = vsel %vm1503_vm1, %v4047_v14, %v4046_v10  ;;  %v4051_v21 = vrot.slane %v4019_v40, 4 }
 0x4e5   :  { %v5573_v31 = vpop.eup %5572  ;;  %v3285_v30 = vadd.f32 1.0, %v5571_v2  ;;  %5592 = vrcp.f32 %v3283_v28  ;;  %v4050_v6 = vsel %vm1506_vm2, %v4049_v38, %v4048_v55  ;;  %v3385_v46 = vrot.slane %v7545_v36, 1 }
 0x4e6   :  { %v5575_v62 = vpop.eup %5574  ;;  %v3286_v42 = vadd.f32 1.0, %v5573_v31  ;;  %5594 = vrcp.f32 %v3284_v37  ;;  %v7570_v22 = vsel %vm1509_vm3, %v4051_v21, %v4050_v6  ;;  %v4456_v57 = vmul.f32 -1.442695, %v3383_v26 }
 0x4e7   :  { %v5577_v47 = vpop.eup %5576  ;;  %v3287_v23 = vadd.f32 1.0, %v5575_v62  ;;  %5596 = vrcp.f32 %v3285_v30  ;;  %v4457_v29 = vmul.f32 -1.442695, %v3384_v19  ;;  %v4458_v40 = vmul.f32 -1.442695, %v3385_v46 }
 0x4e8   :  { %v5579_v43 = vpop.eup %5578  ;;  %v3288_v59 = vadd.f32 1.0, %v5577_v47  ;;  %5598 = vrcp.f32 %v3286_v42  ;;  %v3570_v30 = vrot.slane %v7516_v45, 2  ;;  %v3571_v6 = vrot.slane %v7521_v33, 2 }
 0x4e9   :  { %v5581_v15 = vpop.eup %5580  ;;  %v3289_v24 = vadd.f32 1.0, %v5579_v43  ;;  %5600 = vrcp.f32 %v3287_v23  ;;  %v3572_v42 = vrot.slane %v7526_v56, 2  ;;  %v3573_v47 = vrot.slane %v7531_v1, 2 }
 0x4ea   :  { %v5583_v39 = vpop.eup %5582  ;;  %5602 = vrcp.f32 %v3288_v59  ;;  %v3498_v49 = vadd.f32 1.0, %v5581_v15  ;;  %v3574_v43 = vrot.slane %v7536_v18, 2 }
 0x4eb   :  { %v5585_v14 = vpop.eup %5584  ;;  %5604 = vrcp.f32 %v3289_v24  ;;  %v3499_v10 = vadd.f32 1.0, %v5583_v39 }
 0x4ec   :  { %v5587_v28 = vpop.eup %5586  ;;  %5606 = vpow2.f32 %v4456_v57  ;;  %v3500_v2 = vadd.f32 1.0, %v5585_v14  ;;  %v3575_v14 = vrot.slane %v7539_v32, 2 }
 0x4ed   :  { %v5589_v38 = vpop.eup %5588  ;;  %5608 = vpow2.f32 %v4457_v29  ;;  %v3501_v26 = vadd.f32 1.0, %v5587_v28  ;;  %v3642_v29 = vrot.slane %v7516_v45, 3  ;;  %v3645_v45 = vrot.slane %v7531_v1, 3 }
 0x4ee   :  { %v7572_v37 = vpop.eup %5590  ;;  %5610 = vpow2.f32 %v4458_v40  ;;  %v3502_v21 = vadd.f32 1.0, %v5589_v38  ;;  %v3576_v38 = vrot.slane %v7542_v4, 2  ;;  %v3649_v1 = vrot.slane %v7545_v36, 3 }
 0x4ef   :  { %v7574_v55 = vpop.eup %5592  ;;  %5612 = vrcp.f32 %v3498_v49  ;;  %v3643_v49 = vrot.slane %v7521_v33, 3  ;;  %v3647_v33 = vrot.slane %v7539_v32, 3 }
 0x4f0   :  { %v7576_v31 = vpop.eup %5594  ;;  %5614 = vrcp.f32 %v3499_v10 }
 0x4f1   :  { %v7579_v19 = vpop.eup %5596  ;;  %5616 = vrcp.f32 %v3500_v2  ;;  %v3644_v2 = vrot.slane %v7526_v56, 3  ;;  %v3648_v56 = vrot.slane %v7542_v4, 3  ;;  %v4480_v32 = vmul.f32 -1.442695, %v3647_v33 }
 0x4f2   :  { %v7582_v62 = vpop.eup %5598  ;;  %5618 = vrcp.f32 %v3501_v26  ;;  %v3848_v33 = vmul.f32 %v7307_v8, %v7252_v51  ;;  %v3849_v51 = vmul.f32 %v7316_v9, %v7255_v44  ;;  %v3833_v44 = vmul.f32 %v7479_v7, %v7091_v27  ;;  %v7812_v27 = vld [vmem:[#allocation5_spill] sm:$0xff] }
 0x4f3   :  { %v7585_v46 = vpop.eup %5600  ;;  %5620 = vrcp.f32 %v3502_v21  ;;  %v3577_v21 = vrot.slane %v7545_v36, 2  ;;  %v4481_v4 = vmul.f32 -1.442695, %v3648_v56 }
 0x4f4   :  { %v7588_v23 = vpop.eup %5602  ;;  %5622 = vtanh.f32 %v3570_v30 }
 0x4f5   :  { %v7591_v59 = vpop.eup %5604  ;;  %5624 = vtanh.f32 %v3571_v6  ;;  %v3646_v6 = vrot.slane %v7536_v18, 3 }
 0x4f6   :  { %v5607_v57 = vpop.eup %5606  ;;  %5626 = vtanh.f32 %v3572_v42  ;;  %v4475_v42 = vmul.f32 -1.442695, %v3642_v29 }
 0x4f7   :  { %v5609_v15 = vpop.eup %5608  ;;  %v3503_v24 = vadd.f32 1.0, %v5607_v57  ;;  %5628 = vtanh.f32 %v3573_v47  ;;  %v4479_v18 = vmul.f32 -1.442695, %v3646_v6 }
 0x4f8   :  { %v5611_v39 = vpop.eup %5610  ;;  %v3504_v40 = vadd.f32 1.0, %v5609_v15  ;;  %5630 = vtanh.f32 %v3574_v43  ;;  %v4476_v43 = vmul.f32 -1.442695, %v3643_v49  ;;  %v4477_v15 = vmul.f32 -1.442695, %v3644_v2 }
 0x4f9   :  { %v5613_v28 = vpop.eup %5612  ;;  %v3505_v10 = vadd.f32 1.0, %v5611_v39  ;;  %5632 = vrcp.f32 %v3503_v24  ;;  %v4478_v39 = vmul.f32 -1.442695, %v3645_v45 }
 0x4fa   :  { %v5615_v26 = vpop.eup %5614  ;;  %5634 = vrcp.f32 %v3504_v40  ;;  %v3834_v29 = vmul.f32 %v5613_v28, %v7066_v11  ;;  %v7808_v11 = vld [vmem:[#allocation15_spill] sm:$0xff] }
 0x4fb   :  { %v5617_v30 = vpop.eup %5616  ;;  %5636 = vrcp.f32 %v3505_v10  ;;  %v3835_v49 = vmul.f32 %v5615_v26, %v7070_v41  ;;  %v3823_v28 = vmul.f32 %v7278_v52, %v7808_v11 }
 0x4fc   :  { %v7601_v47 = vpop.eup %5618  ;;  %5638 = vtanh.f32 %v3575_v14 }
 0x4fd   :  { %v7604_v57 = vpop.eup %5620  ;;  %5640 = vtanh.f32 %v3576_v38  ;;  %v3836_v38 = vmul.f32 %v5617_v30, %v7101_v63  ;;  %v3824_v63 = vmul.f32 %v7283_v17, %v7072_v13 }
 0x4fe   :  { %v5623_v24 = vpop.eup %5622  ;;  %5642 = vtanh.f32 %v3577_v21  ;;  %v4482_v21 = vmul.f32 -1.442695, %v3649_v1  ;;  %v3838_v7 = vmul.f32 %v7604_v57, %v7812_v27 }
 0x4ff   :  { %v5625_v40 = vpop.eup %5624  ;;  %5644 = vpow2.f32 %v4475_v42  ;;  %v3858_v2 = vmul.f32 %v5623_v24, %v7572_v37  ;;  %v3847_v37 = vmul.f32 %v7298_v54, %v7249_v61  ;;  %v3872_v13 = vadd.f32 %v3848_v33, %v3824_v63 }
 0x500   :  { %v5627_v14 = vpop.eup %5626  ;;  %5646 = vpow2.f32 %v4476_v43  ;;  %v3859_v45 = vmul.f32 %v5625_v40, %v7574_v55  ;;  %v3825_v61 = vmul.f32 %v7291_v50, %v7076_v25  ;;  %v3832_v25 = vmul.f32 %v7476_v34, %v7078_v16 }
 0x501   :  { %v7610_v10 = vpop.eup %5628  ;;  %5648 = vpow2.f32 %v4477_v15  ;;  %v3860_v41 = vmul.f32 %v5627_v14, %v7576_v31  ;;  %v3882_v26 = vadd.f32 %v3858_v2, %v3834_v29  ;;  %v3871_v31 = vadd.f32 %v3847_v37, %v3823_v28  ;;  %v7811_v28 = vld [vmem:[#allocation4_spill] sm:$0xff] }
 0x502   :  { %v7614_v36 = vpop.eup %5630  ;;  %5650 = vpow2.f32 %v4478_v39  ;;  %v3883_v42 = vadd.f32 %v3859_v45, %v3835_v49  ;;  %v3873_v50 = vadd.f32 %v3849_v51, %v3825_v61 }
 0x503   :  { %v7619_v6 = vpop.eup %5632  ;;  %5652 = vpow2.f32 %v4479_v18  ;;  %v3884_v52 = vadd.f32 %v3860_v41, %v3836_v38  ;;  %v7809_v18 = vld [vmem:[#allocation18_spill] sm:$0xff] }
 0x504   :  { %v7624_v30 = vpop.eup %5634  ;;  %5654 = vpow2.f32 %v4480_v32  ;;  %v3831_v29 = vmul.f32 %v7472_v53, %v7809_v18  ;;  %v3856_v53 = vmul.f32 %v7488_v3, %v7444_v60  ;;  %v3861_v60 = vmul.f32 %v7610_v10, %v7579_v19 }
 0x505   :  { %v7628_v55 = vpop.eup %5636  ;;  %5656 = vpow2.f32 %v4481_v4  ;;  %v3855_v4 = vmul.f32 %v7482_v20, %v7441_v58  ;;  %v3837_v58 = vmul.f32 %v7601_v47, %v7811_v28 }
 0x506   :  { %v5639_v43 = vpop.eup %5638  ;;  %5658 = vpow2.f32 %v4482_v21  ;;  %v7810_v21 = vld [vmem:[#allocation10_spill] sm:$0xff]  ;;  %v3880_v41 = vadd.f32 %v3856_v53, %v3832_v25 }
 0x507   :  { %v5641_v56 = vpop.eup %5640  ;;  %5660 = vtanh.f32 %v3882_v26  ;;  %v3857_v45 = vmul.f32 %v7494_v48, %v7810_v21  ;;  %v3879_v11 = vadd.f32 %v3855_v4, %v3831_v29  ;;  %v7813_v48 = vld [vmem:[#allocation6_spill] sm:$0xff]  ;;  %v3863_v57 = vmul.f32 %v5639_v43, %v7585_v46 }
 0x508   :  { %v7632_v17 = vpop.eup %5642  ;;  %5662 = vtanh.f32 %v3883_v42  ;;  %v3839_v63 = vmul.f32 %v7619_v6, %v7813_v48  ;;  %v3862_v42 = vmul.f32 %v7614_v36, %v7582_v62  ;;  %v3885_v10 = vadd.f32 %v3861_v60, %v3837_v58  ;;  %v7816_v6 = vld [vmem:[#allocation9_spill] sm:$0xff] }
 0x509   :  { %v5645_v15 = vpop.eup %5644  ;;  %5664 = vtanh.f32 %v3884_v52  ;;  %v3881_v3 = vadd.f32 %v3857_v45, %v3833_v44  ;;  %v7814_v52 = vld [vmem:[#allocation7_spill] sm:$0xff] }
 0x50a   :  { %v5647_v54 = vpop.eup %5646  ;;  %v3762_v24 = vadd.f32 1.0, %v5645_v15  ;;  %5666 = vtanh.f32 %v3871_v31  ;;  %v3840_v33 = vmul.f32 %v7624_v30, %v7814_v52  ;;  %v3886_v62 = vadd.f32 %v3862_v42, %v3838_v7 }
 0x50b   :  { %v5649_v1 = vpop.eup %5648  ;;  %v3763_v39 = vadd.f32 1.0, %v5647_v54  ;;  %5668 = vtanh.f32 %v3872_v13  ;;  %v7815_v13 = vld [vmem:[#allocation8_spill] sm:$0xff]  ;;  %v3864_v54 = vmul.f32 %v5641_v56, %v7588_v23  ;;  %v3865_v30 = vmul.f32 %v7632_v17, %v7591_v59 }
 0x50c   :  { %v5651_v8 = vpop.eup %5650  ;;  %v3764_v40 = vadd.f32 1.0, %v5649_v1  ;;  %5670 = vrcp.f32 %v3762_v24  ;;  %v3841_v19 = vmul.f32 %v7628_v55, %v7815_v13  ;;  %v7817_v24 = vld [vmem:[#allocation16_spill] sm:$0xff]  ;;  %v3887_v46 = vadd.f32 %v3863_v57, %v3839_v63 }
 0x50d   :  { %v5653_v14 = vpop.eup %5652  ;;  %v3765_v32 = vadd.f32 1.0, %v5651_v8  ;;  %5672 = vrcp.f32 %v3763_v39  ;;  %v3888_v55 = vadd.f32 %v3864_v54, %v3840_v33 }
 0x50e   :  { %v5655_v49 = vpop.eup %5654  ;;  %v3766_v38 = vadd.f32 1.0, %v5653_v14  ;;  %5674 = vrcp.f32 %v3764_v40  ;;  %v3889_v18 = vadd.f32 %v3865_v30, %v3841_v19 }
 0x50f   :  { %v5657_v9 = vpop.eup %5656  ;;  %v3767_v2 = vadd.f32 1.0, %v5655_v49  ;;  %5676 = vrcp.f32 %v3765_v32 }
 0x510   :  { %v5659_v16 = vpop.eup %5658  ;;  %v3768_v34 = vadd.f32 1.0, %v5657_v9  ;;  %5678 = vrcp.f32 %v3766_v38 }
 0x511   :  { %v5661_v20 = vpop.eup %5660  ;;  %5680 = vrcp.f32 %v3767_v2  ;;  %v3769_v47 = vadd.f32 1.0, %v5659_v16  ;;  %v7818_v16 = vld [vmem:[#allocation17_spill] sm:$0xff] }
 0x512   :  { %v5663_v26 = vpop.eup %5662  ;;  %5682 = vrcp.f32 %v3768_v34 }
 0x513   :  { %v5665_v37 = vpop.eup %5664  ;;  %5684 = vtanh.f32 %v3873_v50 }
 0x514   :  { %v5667_v31 = vpop.eup %5666  ;;  %5686 = vtanh.f32 %v3879_v11 }
 0x515   :  { %v5669_v15 = vpop.eup %5668  ;;  %5688 = vtanh.f32 %v3880_v41  ;;  %v3919_v61 = vmul.f32 %v5667_v31, %v7816_v6 }
 0x516   :  { %v5671_v36 = vpop.eup %5670  ;;  %5690 = vtanh.f32 %v3881_v3  ;;  %v3920_v1 = vmul.f32 %v5669_v15, %v7817_v24 }
 0x517   :  { %v5673_v43 = vpop.eup %5672  ;;  %v3964_v39 = vpack.c.bf16 %v3919_v61, %v3919_v61  ;;  %5692 = vrcp.f32 %v3769_v47  ;;  %v3930_v51 = vmul.f32 %v5671_v36, %v5661_v20 }
 0x518   :  { %v5675_v8 = vpop.eup %5674  ;;  %v3965_v40 = vpack.c.bf16 %v3920_v1, %v3920_v1  ;;  %5694 = vtanh.f32 %v3885_v10  ;;  %v3931_v29 = vmul.f32 %v5673_v43, %v5663_v26 }
 0x519   :  { %v5677_v23 = vpop.eup %5676  ;;  %v4012_v56 = vunpack.c.l.b16 %v3964_v39  ;;  %5696 = vtanh.f32 %v3886_v62  ;;  %v3932_v14 = vmul.f32 %v5675_v8, %v5665_v37  ;;  %v3975_v50 = vpack.c.bf16 %v3930_v51, %v3930_v51 }
 0x51a   :  { %v5679_v32 = vpop.eup %5678  ;;  %v4013_v25 = vunpack.c.l.b16 %v3965_v40  ;;  %5698 = vtanh.f32 %v3887_v46  ;;  %v3976_v59 = vpack.c.bf16 %v3931_v29, %v3931_v29  ;;  %v7819_v29 = vld [vmem:[#allocation3_spill] sm:$0xff] }
 0x51b   :  { %v5681_v17 = vpop.eup %5680  ;;  %v4039_v49 = vrot.slane %v4012_v56, 3  ;;  %5700 = vtanh.f32 %v3888_v55  ;;  %v3977_v4 = vpack.c.bf16 %v3932_v14, %v3932_v14  ;;  %v4023_v28 = vunpack.c.l.b16 %v3975_v50 }
 0x51c   :  { %v5683_v38 = vpop.eup %5682  ;;  %v4041_v44 = vrot.slane %v4013_v25, 2  ;;  %5702 = vtanh.f32 %v3889_v18  ;;  %v4024_v9 = vunpack.c.l.b16 %v3976_v59  ;;  %v4483_v25 = vld [vmem:[%s7717_s2] ss:$0 sm:$0xff] }
 0x51d   :  { %v5685_v2 = vpop.eup %5684  ;;  %v4040_v53 = vsel %vm1512_vm4, %v4039_v49, %v7458_v5  ;;  %v4025_v21 = vunpack.c.l.b16 %v3977_v4  ;;  %vm3950_vm8 = vcmp.eq.s32.totalorder %v7819_v29, %v4483_v25 }
 0x51e   :  { %v5687_v45 = vpop.eup %5686  ;;  %v3921_v34 = vmul.f32 %v5685_v2, %v7818_v16  ;;  %v4042_v11 = vsel %vm1515_vm5, %v4041_v44, %v4040_v53  ;;  %v4059_v58 = vrot.slane %v4024_v9, 7  ;;  %v7820_v44 = vmov 0.0  }
 0x51f   :  { %v5689_v20 = vpop.eup %5688  ;;  %v3927_v41 = vmul.f32 %v5687_v45, %v7557_v35  ;;  %v4061_v27 = vrot.slane %v4025_v21, 6  ;;  %v4484_v16 = vsel %vm3950_vm8, 1.0, %v7820_v44 }
 0x520   :  { %v5691_v7 = vpop.eup %5690  ;;  %v3928_v26 = vmul.f32 %v5689_v20, %v7559_v12  ;;  %v3966_v60 = vpack.c.bf16 %v3921_v34, %v3921_v34  ;;  %v4060_v3 = vsel %vm1500_vm0, %v4059_v58, %v4023_v28 }
 0x521   :  { %v5693_v48 = vpop.eup %5692  ;;  %v3929_v5 = vmul.f32 %v5691_v7, %v7561_v0  ;;  %v3972_v63 = vpack.c.bf16 %v3927_v41, %v3927_v41  ;;  %v4062_v37 = vsel %vm1503_vm1, %v4061_v27, %v4060_v3  ;;  %v4134_v41 = vld [vmem:[%s7718_s3] sm:$0xff] }
 0x522   :  { %v5695_v42 = vpop.eup %5694  ;;  %v3973_v47 = vpack.c.bf16 %v3928_v26, %v3928_v26  ;;  %v4014_v52 = vunpack.c.l.b16 %v3966_v60  ;;  %v4487_v7 = vld [vmem:[%s7719_s4] ss:$0 sm:$0xff]  ;;  %v4135_v26 = vld [vmem:[%s7718_s3 + $0x8] sm:$0xff] }
 0x523   :  { %v5697_v33 = vpop.eup %5696  ;;  %v3974_v31 = vpack.c.bf16 %v3929_v5, %v3929_v5  ;;  %v4020_v57 = vunpack.c.l.b16 %v3972_v63  ;;  %v3933_v35 = vmul.f32 %v5695_v42, %v5677_v23  ;;  %v3940_v23 = vadd.s32 8, %v7819_v29 }
 0x524   :  { %v5699_v13 = vpop.eup %5698  ;;  %v4021_v19 = vunpack.c.l.b16 %v3973_v47  ;;  %v4043_v10 = vrot.slane %v4014_v52, 1  ;;  %v3934_v12 = vmul.f32 %v5697_v33, %v5679_v32 }
 0x525   :  { %v5701_v15 = vpop.eup %5700  ;;  %v4022_v6 = vunpack.c.l.b16 %v3974_v31  ;;  %v4053_v61 = vrot.slane %v4020_v57, 3  ;;  %v3935_v54 = vmul.f32 %v5699_v13, %v5681_v17  ;;  %v3978_v62 = vpack.c.bf16 %v3933_v35, %v3933_v35 }
 0x526   :  { %v5703_v0 = vpop.eup %5702  ;;  %v4044_v36 = vsel %vm1518_vm6, %v4043_v10, %v4042_v11  ;;  %v4055_v24 = vrot.slane %v4021_v19, 2  ;;  %v3936_v1 = vmul.f32 %v5701_v15, %v5683_v38  ;;  %v3979_v30 = vpack.c.bf16 %v3934_v12, %v3934_v12 }
 0x527   :  { %v4054_v46 = vsel %vm1512_vm4, %v4053_v61, %v7570_v22  ;;  %v4057_v43 = vrot.slane %v4022_v6, 1  ;;  %v3937_v39 = vmul.f32 %v5703_v0, %v5693_v48  ;;  %v3980_v55 = vpack.c.bf16 %v3935_v54, %v3935_v54  ;;  %v4488_v48 = vld [vmem:[%s7720_s5] ss:$0 sm:$0xff] }
 0x528   :  { %v4056_v51 = vsel %vm1515_vm5, %v4055_v24, %v4054_v46  ;;  %v3981_v8 = vpack.c.bf16 %v3936_v1, %v3936_v1  ;;  %v4026_v40 = vunpack.c.l.b16 %v3978_v62  ;;  %v4027_v18 = vunpack.c.l.b16 %v3979_v30 }
 0x529   :  { %v4058_v56 = vsel %vm1518_vm6, %v4057_v43, %v4056_v51  ;;  %v3982_v14 = vpack.c.bf16 %v3937_v39, %v3937_v39  ;;  %v4028_v32 = vunpack.c.l.b16 %v3980_v55  ;;  %vm3951_vm9 = vcmp.eq.s32.totalorder %v3940_v23, %v4483_v25 }
 0x52a   :  { %v4073_v50 = vpack.c.b16 %v4058_v56, %v4044_v36  ;;  %v4029_v22 = vunpack.c.l.b16 %v3981_v8  ;;  %v4063_v59 = vrot.slane %v4026_v40, 5  ;;  %v4065_v49 = vrot.slane %v4027_v18, 4 }
 0x52b   :  { %v4030_v17 = vunpack.c.l.b16 %v3982_v14  ;;  %v4067_v38 = vrot.slane %v4028_v32, 3  ;;  %v4485_v34 = vsel %vm3951_vm9, 1.0, %v7820_v44 }
 0x52c   :  { %4493 = vmatpush3.bf16.msra.mxu0 %v4073_v50  ;;  %v4064_v4 = vsel %vm1506_vm2, %v4063_v59, %v4062_v37  ;;  %v4069_v2 = vrot.slane %v4029_v22, 2  ;;  %v3956_v58 = vpack.c.bf16 %v4485_v34, %v4484_v16 }
 0x52d   :  { %4494 = vmatprep.subr.bf16.mxu0 %v7820_v44  ;;  %v4066_v9 = vsel %vm1509_vm3, %v4065_v49, %v4064_v4  ;;  %v4071_v21 = vrot.slane %v4030_v17, 1 }
 0x52e   :  { %v4068_v53 = vsel %vm1512_vm4, %v4067_v38, %v4066_v9 }
 0x52f   :  { %v4070_v45 = vsel %vm1515_vm5, %v4069_v2, %v4068_v53 }
 0x530   :  { %v4072_v11 = vsel %vm1518_vm6, %v4071_v21, %v4070_v45 }
 0x531   :  { %v4074_v28 = vpack.c.b16 %v4072_v11, %v4072_v11 }
 0x533   :  { %v4082_v20 = vsel %vm4080_vm10, %v4074_v28, 0 }
 0x534   :  { %4495 = vmatpush3.bf16.msra.mxu0 %v4082_v20 }
 0x537   :  { %4497 = vmatmul.mubr.msk.bf16.vlgmr.msra.gmra.mrb[24].mxu0 %vm4076_vm11, %v3956_v58 }
 0x60a   :  { %v4118_v27 = vpop.f32.mrb[24].mxu0 }
 0x60b   :  { %v4136_v60 = vadd.f32 %v4134_v41, %v4118_v27  ;;  %v4498_v3 = vpop.f32.mrb[25].mxu0 }
 0x60c   :  { %v4121_v5 = vpop.f32.mrb[26].mxu0 }
 0x60d   :  { %v4145_v63 = vmul.f32 %v4487_v7, %v4136_v60  ;;  %v4137_v37 = vadd.f32 %v4135_v26, %v4121_v5  ;;  %v4499_v42 = vpop.f32.mrb[27].mxu0 }
 0x60f   :  { %v4154_v47 = vadd.f32 %v4488_v48, %v4145_v63  ;;  %v4146_v52 = vmul.f32 %v4487_v7, %v4137_v37 }
 0x611   :  { %v4156_v33 = vmax.f32 %v4154_v47, 0.0  ;;  %v4155_v31 = vadd.f32 %v4488_v48, %v4146_v52 }
 0x613   :  { %4158 = vst [vmem:[%s7721_s6] sm:$0xff] %v4156_v33  ;;  %v4157_v57 = vmax.f32 %v4155_v31, 0.0 }
 0x615   :  { %4159 = vst [vmem:[%s7721_s6 + $0x8] sm:$0xff] %v4157_v57 }

</bundles_post_ra>
